<compile_context>
chip_gen: v6e
topology: v6e:2x2x1
jax: 0.10.0
libtpu: 0.0.40
codegen_flags: <defaults>
</compile_context>

<pallas_src>
import functools
import math

import jax
import jax.numpy as jnp
from jax import lax
from jax.experimental import pallas as pl
from jax.experimental.pallas import tpu as pltpu


_GELU_C = 0.7978845608028654  # sqrt(2/pi), gelu_new tanh approximation

# stacked per-layer / final-LN weights consumed by every transformer kernel (fixed order)
_STACK_KEYS = ("ln1_g", "ln1_b", "attn_w", "attn_b", "cproj_w", "cproj_b",
               "ln2_g", "ln2_b", "fc_w", "fc_b", "mproj_w", "mproj_b",
               "lnf_g", "lnf_b")


# ----------------------------------------------------------------------------------
# small math helpers (used inside kernels)
# ----------------------------------------------------------------------------------

def _layernorm(x, g, b):
    mu = jnp.mean(x, axis=-1, keepdims=True)
    var = jnp.mean(jnp.square(x - mu), axis=-1, keepdims=True)
    return (x - mu) * lax.rsqrt(var + 1e-5) * g + b


def _gelu_new(x):
    return 0.5 * x * (1.0 + jnp.tanh(_GELU_C * (x + 0.044715 * x * x * x)))


# ----------------------------------------------------------------------------------
# per-sequence 2-D GPT-2 stack (context pass): x (S, H), bias (S, S)
# ----------------------------------------------------------------------------------

def _stack_core_seq(x, bias, w, *, n_layer, n_head):
    S, H = x.shape
    dh = H // n_head
    scale = 1.0 / math.sqrt(dh)
    h = x
    for l in range(n_layer):
        # ---- attention ----
        xn = _layernorm(h, w["ln1_g"][l], w["ln1_b"][l])
        qkv = jnp.dot(xn.astype(jnp.bfloat16), w["attn_w"][l],
                      preferred_element_type=jnp.float32) + w["attn_b"][l]
        qkv = qkv.astype(jnp.bfloat16)                    # one cast feeds all heads
        heads = []
        for hd in range(n_head):
            q = qkv[:, hd * dh:(hd + 1) * dh]
            k = qkv[:, H + hd * dh:H + (hd + 1) * dh]
            v = qkv[:, 2 * H + hd * dh:2 * H + (hd + 1) * dh]
            s = lax.dot_general(q, k, (((1,), (1,)), ((), ())),
                                preferred_element_type=jnp.float32) * scale + bias
            s = s - jnp.max(s, axis=-1, keepdims=True)
            p = jnp.exp(s)
            p = p / jnp.sum(p, axis=-1, keepdims=True)    # exact division (no approx recip)
            heads.append(jnp.dot(p.astype(jnp.bfloat16), v,
                                 preferred_element_type=jnp.float32))
        o = jnp.concatenate(heads, axis=-1).astype(jnp.bfloat16)        # (S, H)
        h = h + (jnp.dot(o, w["cproj_w"][l],
                         preferred_element_type=jnp.float32) + w["cproj_b"][l])
        # ---- MLP ----
        xn = _layernorm(h, w["ln2_g"][l], w["ln2_b"][l])
        ff = jnp.dot(xn.astype(jnp.bfloat16), w["fc_w"][l],
                     preferred_element_type=jnp.float32) + w["fc_b"][l]
        ff = _gelu_new(ff)
        h = h + (jnp.dot(ff.astype(jnp.bfloat16), w["mproj_w"][l],
                         preferred_element_type=jnp.float32) + w["mproj_b"][l])
    return h


# ----------------------------------------------------------------------------------
# rows-batched short-sequence GPT-2 stack (decode passes): xs = [ (rows, H) ] * Sd
# Scores use lane reductions over <=Sd keys (no (rows*Sd)^2 score matrix).
# ----------------------------------------------------------------------------------

def _stack_core_rows(xs, w, *, n_layer, n_head):
    Sd = len(xs)
    rows, H = xs[0].shape
    dh = H // n_head
    scale = 1.0 / math.sqrt(dh)
    h = list(xs)
    for l in range(n_layer):
        qkv = []
        for p in range(Sd):
            xn = _layernorm(h[p], w["ln1_g"][l], w["ln1_b"][l])
            qkv.append(jnp.dot(xn.astype(jnp.bfloat16), w["attn_w"][l],
                               preferred_element_type=jnp.float32) + w["attn_b"][l])
        for p in range(Sd):
            head_outs = []
            for hd in range(n_head):
                q = qkv[p][:, hd * dh:(hd + 1) * dh]
                ks = [qkv[kk][:, H + hd * dh:H + (hd + 1) * dh] for kk in range(p + 1)]
                vs = [qkv[kk][:, 2 * H + hd * dh:2 * H + (hd + 1) * dh]
                      for kk in range(p + 1)]
                s = jnp.concatenate(
                    [jnp.sum(q * ks[kk], axis=-1, keepdims=True) * scale
                     for kk in range(p + 1)], axis=-1)                   # (rows, p+1)
                s = s - jnp.max(s, axis=-1, keepdims=True)
                pr = jnp.exp(s)
                pr = pr / jnp.sum(pr, axis=-1, keepdims=True)
                o = pr[:, 0:1] * vs[0]
                for kk in range(1, p + 1):
                    o = o + pr[:, kk:kk + 1] * vs[kk]
                head_outs.append(o)
            o_cat = jnp.concatenate(head_outs, axis=-1).astype(jnp.bfloat16)  # (rows, H)
            h[p] = h[p] + (jnp.dot(o_cat, w["cproj_w"][l],
                                   preferred_element_type=jnp.float32)
                           + w["cproj_b"][l])
        for p in range(Sd):
            xn = _layernorm(h[p], w["ln2_g"][l], w["ln2_b"][l])
            ff = jnp.dot(xn.astype(jnp.bfloat16), w["fc_w"][l],
                         preferred_element_type=jnp.float32) + w["fc_b"][l]
            ff = _gelu_new(ff)
            h[p] = h[p] + (jnp.dot(ff.astype(jnp.bfloat16), w["mproj_w"][l],
                                   preferred_element_type=jnp.float32)
                           + w["mproj_b"][l])
    return h


# ----------------------------------------------------------------------------------
# kernels
# ----------------------------------------------------------------------------------

def _context_kernel(*refs, n_layer, n_head, ctx_lo, ctx_hi):
    """One grid step = one sequence.  Outputs post-ln_f hidden + fused mixing-head sum."""
    nw = len(_STACK_KEYS)
    x_ref, mask_ref = refs[0], refs[1]                    # (1, Sc, H), (1, 1, Sc)
    w = dict(zip(_STACK_KEYS, refs[2:2 + nw]))
    mix_w1, mix_b1, mix_w2, mix_b2 = refs[2 + nw:6 + nw]
    hid_ref, mix_ref = refs[6 + nw], refs[7 + nw]

    x = x_ref[0]                                          # (Sc, H)
    S = x.shape[0]
    iq = lax.broadcasted_iota(jnp.int32, (S, S), 0)
    ik = lax.broadcasted_iota(jnp.int32, (S, S), 1)
    key_ok = mask_ref[0] > 0                              # (1, Sc) key-padding mask
    # TODO(synk): a query row whose keys are all masked degenerates to uniform attention
    # (same as HF's additive-mask softmax); the test uses an all-ones attention_mask.
    allowed = jnp.logical_and(ik <= iq, key_ok)
    bias = jnp.where(allowed, 0.0, -1e9).astype(jnp.float32)

    h = _stack_core_seq(x, bias, w, n_layer=n_layer, n_head=n_head)
    hidden = _layernorm(h, w["lnf_g"][...], w["lnf_b"][...])
    hid_ref[0] = hidden

    # fused mixing head (Linear -> ReLU -> Linear -> Sigmoid) on the context rows, summed
    ctx = hidden[ctx_lo:ctx_hi, :]
    h1 = jnp.dot(ctx.astype(jnp.bfloat16), mix_w1[...],
                 preferred_element_type=jnp.float32) + mix_b1[...]
    h1 = jnp.maximum(h1, 0.0)
    z = jnp.dot(h1.astype(jnp.bfloat16), mix_w2[...],
                preferred_element_type=jnp.float32) + mix_b2[...]
    sig = 1.0 / (1.0 + jnp.exp(-z))                       # exact sigmoid
    mix_ref[0] = jnp.sum(sig, axis=0, keepdims=True)      # (1, 1)


def _last_logits_kernel(*refs, n_layer, n_head, seq_len):
    """Rows-batched decode: logits of the last position of every length-`seq_len` seq."""
    nw = len(_STACK_KEYS)
    x_ref = refs[0]                                       # (seq_len, rows, H)
    w = dict(zip(_STACK_KEYS, refs[1:1 + nw]))
    lm_w = refs[1 + nw]
    o_ref = refs[2 + nw]                                  # (rows, V)
    xs = [x_ref[p] for p in range(seq_len)]
    h = _stack_core_rows(xs, w, n_layer=n_layer, n_head=n_head)
    hl = _layernorm(h[seq_len - 1], w["lnf_g"][...], w["lnf_b"][...])
    o_ref[...] = jnp.dot(hl.astype(jnp.bfloat16), lm_w[...],
                         preferred_element_type=jnp.float32)


def _last_logprob_kernel(*refs, n_layer, n_head, seq_len):
    """Teacher-forced reward path: lm_head + log_softmax at the label, fused so the
    (rows, V) logits never leave VMEM."""
    nw = len(_STACK_KEYS)
    x_ref, lbl_ref = refs[0], refs[1]                     # (seq_len, rows, H), (rows, 1)
    w = dict(zip(_STACK_KEYS, refs[2:2 + nw]))
    lm_w = refs[2 + nw]
    lp_ref = refs[3 + nw]                                 # (rows, 1)
    xs = [x_ref[p] for p in range(seq_len)]
    h = _stack_core_rows(xs, w, n_layer=n_layer, n_head=n_head)
    hl = _layernorm(h[seq_len - 1], w["lnf_g"][...], w["lnf_b"][...])
    logits = jnp.dot(hl.astype(jnp.bfloat16), lm_w[...],
                     preferred_element_type=jnp.float32)  # (rows, V)
    m = jnp.max(logits, axis=-1, keepdims=True)
    lse = m + jnp.log(jnp.sum(jnp.exp(logits - m), axis=-1, keepdims=True))
    lbl = lbl_ref[...]                                    # (rows, 1) i32
    iota = lax.broadcasted_iota(jnp.int32, logits.shape, 1)
    tgt = jnp.sum(jnp.where(iota == lbl, logits, 0.0), axis=-1, keepdims=True)
    lp_ref[...] = tgt - lse


def _true_logprob_kernel(logits_ref, labels_ref, o_ref):
    """log_softmax(logits)[label] per row (used for the sampled thought tokens)."""
    x = logits_ref[...]
    lbl = labels_ref[...]
    m = jnp.max(x, axis=-1, keepdims=True)
    lse = m + jnp.log(jnp.sum(jnp.exp(x - m), axis=-1, keepdims=True))
    iota = lax.broadcasted_iota(jnp.int32, x.shape, 1)
    tgt = jnp.sum(jnp.where(iota == lbl, x, 0.0), axis=-1, keepdims=True)
    o_ref[...] = tgt - lse


# ----------------------------------------------------------------------------------
# pallas_call wrappers
# ----------------------------------------------------------------------------------

def _whole_spec(a):
    nd = a.ndim
    return pl.BlockSpec(a.shape, lambda i, _nd=nd: (0,) * _nd)


def _weight_args(params, extra=()):
    return tuple(params[k] for k in _STACK_KEYS) + tuple(extra)


def _pick_groups(n, max_groups=4):
    """Grid groups along the row axis: keep each block sublane-aligned (multiple of 8)
    unless the whole axis fits one block.  >1 groups feeds both TensorCores on v7x."""
    for g in range(max_groups, 1, -1):
        if n % g == 0 and (n // g) % 8 == 0:
            return g
    return 1


def gpt2_context(params, emb, mask, *, n_head, ctx_lo, ctx_hi):
    """emb: (B, Sc, H) f32 (wte+wpe); mask: (B, 1, Sc) i32 key validity.
    Returns (post-ln_f hidden (B, Sc, H), per-sequence mixing-head sums (B, 1, 1))."""
    B, Sc, H = emb.shape
    n_layer = params["attn_w"].shape[0]
    weights = _weight_args(params, extra=(params["mix_w1"], params["mix_b1"],
                                          params["mix_w2"], params["mix_b2"]))
    kern = functools.partial(_context_kernel, n_layer=n_layer, n_head=n_head,
                             ctx_lo=ctx_lo, ctx_hi=ctx_hi)
    # TODO(synk): at real GPT-2 scale (H=768, V~50K) the resident whole-weight blocks
    # need a layer grid + vocab tiling to fit v7x's 64 MiB VMEM; unnecessary at H=32.
    return pl.pallas_call(
        kern,
        out_shape=(jax.ShapeDtypeStruct((B, Sc, H), jnp.float32),
                   jax.ShapeDtypeStruct((B, 1, 1), jnp.float32)),
        grid=(B,),
        in_specs=([pl.BlockSpec((1, Sc, H), lambda i: (i, 0, 0)),
                   pl.BlockSpec((1, 1, Sc), lambda i: (i, 0, 0))]
                  + [_whole_spec(a) for a in weights]),
        out_specs=(pl.BlockSpec((1, Sc, H), lambda i: (i, 0, 0)),
                   pl.BlockSpec((1, 1, 1), lambda i: (i, 0, 0))),
        compiler_params=pltpu.CompilerParams(dimension_semantics=("parallel",)),
    )(emb, mask, *weights)


def gpt2_last_logits(params, x_pm, *, n_head):
    """x_pm: (Sd, N, H) position-major embeddings (wpe added), causal, all valid.
    Returns last-position tied-lm_head logits (N, V)."""
    Sd, N, H = x_pm.shape
    V = params["lm_w"].shape[1]
    n_layer = params["attn_w"].shape[0]
    G = _pick_groups(N)
    nb = N // G
    weights = _weight_args(params, extra=(params["lm_w"],))
    kern = functools.partial(_last_logits_kernel, n_layer=n_layer, n_head=n_head,
                             seq_len=Sd)
    return pl.pallas_call(
        kern,
        out_shape=jax.ShapeDtypeStruct((N, V), jnp.float32),
        grid=(G,),
        in_specs=([pl.BlockSpec((Sd, nb, H), lambda i: (0, i, 0))]
                  + [_whole_spec(a) for a in weights]),
        out_specs=pl.BlockSpec((nb, V), lambda i: (i, 0)),
        compiler_params=pltpu.CompilerParams(dimension_semantics=("parallel",)),
    )(x_pm, *weights)


def gpt2_last_logprob(params, x_pm, labels, *, n_head):
    """Teacher-forced path: full stack + lm_head + log_softmax at `labels`, fused.
    x_pm: (Sd, N, H); labels: (N, 1) i32. Returns (N, 1) log-probs."""
    Sd, N, H = x_pm.shape
    n_layer = params["attn_w"].shape[0]
    G = _pick_groups(N)
    nb = N // G
    weights = _weight_args(params, extra=(params["lm_w"],))
    kern = functools.partial(_last_logprob_kernel, n_layer=n_layer, n_head=n_head,
                             seq_len=Sd)
    return pl.pallas_call(
        kern,
        out_shape=jax.ShapeDtypeStruct((N, 1), jnp.float32),
        grid=(G,),
        in_specs=([pl.BlockSpec((Sd, nb, H), lambda i: (0, i, 0)),
                   pl.BlockSpec((nb, 1), lambda i: (i, 0))]
                  + [_whole_spec(a) for a in weights]),
        out_specs=pl.BlockSpec((nb, 1), lambda i: (i, 0)),
        compiler_params=pltpu.CompilerParams(dimension_semantics=("parallel",)),
    )(x_pm, labels, *weights)


def pallas_true_logprob(logits, labels):
    N, V = logits.shape
    return pl.pallas_call(
        _true_logprob_kernel,
        out_shape=jax.ShapeDtypeStruct((N, 1), jnp.float32),
        grid=(1,),
        in_specs=[_whole_spec(logits), _whole_spec(labels)],
        out_specs=pl.BlockSpec((N, 1), lambda i: (0, 0)),
    )(logits, labels)


# ----------------------------------------------------------------------------------
# synthetic GPT-2 parameters (deterministic)
# ----------------------------------------------------------------------------------

def init_params(key, V, H, n_layer, n_head, max_pos):
    def nrm(k, shape, scale=0.02):
        return (scale * jax.random.normal(k, shape)).astype(jnp.float32)

    ks = list(jax.random.split(key, 12))
    it = iter(ks)
    p = {}
    p["wte"] = nrm(next(it), (V, H))
    p["wpe"] = nrm(next(it), (max_pos, H), 0.01)
    # per-layer weights stacked on a leading layer axis; matmul weights bf16 (MXU),
    # LN params / biases f32.
    p["ln1_g"] = jnp.ones((n_layer, 1, H), jnp.float32)
    p["ln1_b"] = jnp.zeros((n_layer, 1, H), jnp.float32)
    p["ln2_g"] = jnp.ones((n_layer, 1, H), jnp.float32)
    p["ln2_b"] = jnp.zeros((n_layer, 1, H), jnp.float32)
    p["attn_w"] = nrm(next(it), (n_layer, H, 3 * H)).astype(jnp.bfloat16)
    p["attn_b"] = jnp.zeros((n_layer, 1, 3 * H), jnp.float32)
    p["cproj_w"] = nrm(next(it), (n_layer, H, H)).astype(jnp.bfloat16)
    p["cproj_b"] = jnp.zeros((n_layer, 1, H), jnp.float32)
    p["fc_w"] = nrm(next(it), (n_layer, H, 4 * H)).astype(jnp.bfloat16)
    p["fc_b"] = jnp.zeros((n_layer, 1, 4 * H), jnp.float32)
    p["mproj_w"] = nrm(next(it), (n_layer, 4 * H, H)).astype(jnp.bfloat16)
    p["mproj_b"] = jnp.zeros((n_layer, 1, H), jnp.float32)
    p["lnf_g"] = jnp.ones((1, H), jnp.float32)
    p["lnf_b"] = jnp.zeros((1, H), jnp.float32)
    # module-level parameters from __init__
    p["start_thought"] = jax.random.normal(next(it), (1, H)).astype(jnp.float32)
    p["end_thought"] = jax.random.normal(next(it), (1, H)).astype(jnp.float32)  # unused in forward (as in torch)
    p["mix_w1"] = nrm(next(it), (H, H // 2), 0.1).astype(jnp.bfloat16)
    p["mix_b1"] = jnp.zeros((1, H // 2), jnp.float32)
    p["mix_w2"] = nrm(next(it), (H // 2, 1), 0.1).astype(jnp.bfloat16)
    p["mix_b2"] = jnp.zeros((1, 1), jnp.float32)
    # tied lm_head (GPT2LMHeadModel ties lm_head to wte).  Kept bf16 for the MXU;
    # deviates from an all-f32 torch reference at the last mantissa bits.
    p["lm_w"] = p["wte"].T.astype(jnp.bfloat16)
    return p


# ----------------------------------------------------------------------------------
# forward pass (JAX glue around the fused kernels)
# ----------------------------------------------------------------------------------

def forward(params, key, input_ids, attention_mask, labels, *,
            num_independent_thoughts, num_tokens_ahead, thought_length=2,
            max_seq_chunk=64, n_head=2):
    B, S = input_ids.shape
    H = params["wte"].shape[1]
    T = num_independent_thoughts
    F = num_tokens_ahead
    L = thought_length
    wte, wpe = params["wte"], params["wpe"]

    total_reinforce = jnp.float32(0.0)
    mixing_sum = jnp.float32(0.0)
    mixing_cnt = 0
    rewards_chunks = []

    for chunk_start in range(0, S - F, max_seq_chunk):
        chunk_end = min(chunk_start + max_seq_chunk, S - F)
        Sc = chunk_end + 1
        P = chunk_end - chunk_start
        chunk_ids = input_ids[:, :Sc]
        chunk_mask = attention_mask[:, :Sc]
        chunk_labels = labels[:, chunk_start + 1: chunk_end + 1 + F]

        # ---- context encoding: one fused whole-stack kernel (per-sequence attention,
        #      mixing-head sum fused as a second output) ----
        emb = wte[chunk_ids] + wpe[:Sc][None, :, :]                     # (B, Sc, H)
        mask3 = chunk_mask.reshape(B, 1, Sc).astype(jnp.int32)
        hidden, mix_part = gpt2_context(params, emb, mask3, n_head=n_head,
                                        ctx_lo=chunk_start, ctx_hi=chunk_end)
        context_hidden = hidden[:, chunk_start:chunk_end]               # (B, P, H)
        mixing_sum = mixing_sum + jnp.sum(mix_part)
        mixing_cnt += B * P

        # ---- batched thought rollout over all (batch, position, thought) ----
        Bq = B * P * T
        ctx_slab = jnp.broadcast_to(context_hidden[:, :, None, :],
                                    (B, P, T, H)).reshape(Bq, H)
        start_slab = jnp.broadcast_to(params["start_thought"], (Bq, H))
        tf = jnp.stack([labels[:, chunk_start + p: chunk_start + p + F]
                        for p in range(P)], axis=1)                     # (B, P, F)
        tf_flat = jnp.broadcast_to(tf[:, :, None, :],
                                   (B, P, T, F)).reshape(Bq, F)
        pos_labels = jnp.stack([chunk_labels[:, p: p + F]
                                for p in range(P)], axis=1)             # (B, P, F)

        slabs = [ctx_slab, start_slab]
        step_logits, step_tokens = [], []
        for _ in range(L):                       # genuinely sequential (sampling dep.)
            Sd = len(slabs)
            x_pm = jnp.stack(slabs, axis=0) + wpe[:Sd][:, None, :]      # (Sd, Bq, H)
            logits = gpt2_last_logits(params, x_pm, n_head=n_head)      # (Bq, V)
            # TODO(synk): torch.distributions.Categorical reproduced with
            # jax.random.categorical (different RNG stream, deterministic under PRNGKey).
            key, sk = jax.random.split(key)
            nxt = jax.random.categorical(sk, logits, axis=-1).astype(jnp.int32)
            step_logits.append(logits)
            step_tokens.append(nxt)
            slabs.append(wte[nxt])

        # log-prob of every sampled thought token: one batched kernel call per chunk
        lp = pallas_true_logprob(jnp.concatenate(step_logits, axis=0),
                                 jnp.concatenate(step_tokens, axis=0)[:, None])
        log_probs = lp.reshape(L, B, P, T).transpose(1, 2, 3, 0)        # (B, P, T, L)

        # ---- teacher-forced future predictions: all n_future length-1 passes in ONE
        #      launch, with the reward log-prob fused in-kernel ----
        tf_slabs = [slabs[-1]] + [wte[tf_flat[:, i]] for i in range(F - 1)]
        x_tf = (jnp.concatenate(tf_slabs, axis=0) + wpe[0][None, :])[None]  # (1, F*Bq, H)
        lbl_bq = jnp.broadcast_to(pos_labels[:, :, None, :],
                                  (B, P, T, F)).reshape(Bq, F)
        lbl_tf = lbl_bq.T.reshape(F * Bq, 1).astype(jnp.int32)              # i-major rows
        true_lp = gpt2_last_logprob(params, x_tf, lbl_tf, n_head=n_head)    # (F*Bq, 1)
        true_lp = true_lp.reshape(F, Bq).T.reshape(B, P, T, F)
        rewards = jnp.maximum(jnp.sum(true_lp, axis=-1) * 10.0, 0.1)        # (B, P, T)
        rewards_chunks.append(rewards)

        # REINFORCE: sum over positions of -(mean over B,T,L) == P * mean over all
        total_reinforce = total_reinforce + P * (-jnp.mean(log_probs * rewards[..., None]))

    num_positions = S - F
    avg_reinforce = total_reinforce / num_positions
    avg_mixing = (mixing_sum / mixing_cnt) if mixing_cnt else jnp.float32(0.0)
    rewards_out = (jnp.concatenate(rewards_chunks, axis=1)
                   if rewards_chunks else jnp.float32(0.0))
    return {"loss": avg_reinforce, "reinforce_loss": avg_reinforce,
            "rewards": rewards_out, "mixing_weight": avg_mixing}


# ----------------------------------------------------------------------------------

if __name__ == "__main__":
    # small synthetic config consistent with the module's forward
    B, S = 2, 8
    H = 32                       # hidden_dim (n_embd)
    n_head, n_layer = 2, 2
    base_vocab = 126
    V = base_vocab + 2           # 128 (+ <|startofthought|>, <|endofthought|>) -> lane-dense logits
    max_pos = 32
    num_independent_thoughts = 2
    num_tokens_ahead = 2
    thought_length = 2

    root = jax.random.PRNGKey(0)
    k_params, k_data, k_sample = jax.random.split(root, 3)

    params = init_params(k_params, V, H, n_layer, n_head, max_pos)
    input_ids = jax.random.randint(k_data, (B, S), 0, base_vocab, dtype=jnp.int32)
    attention_mask = jnp.ones((B, S), dtype=jnp.int32)
    labels = input_ids   # standard LM setup: labels == input_ids

    fwd = jax.jit(functools.partial(
        forward,
        num_independent_thoughts=num_independent_thoughts,
        num_tokens_ahead=num_tokens_ahead,
        thought_length=thought_length,
        n_head=n_head))

    out = fwd(params, k_sample, input_ids, attention_mask, labels)

    jax.block_until_ready(out["loss"])
    jax.block_until_ready(out["rewards"])
    jax.block_until_ready(out["mixing_weight"])
    assert out["rewards"].shape == (B, S - num_tokens_ahead, num_independent_thoughts)
    print("KERNEL_OK")
</pallas_src>

<mosaic_0001>
module attributes {stable_mosaic.version = 11 : i64} {
  func.func @_context_kernel(%arg0: i32, %arg1: memref<1x7x32xf32, #tpu.memory_space<vmem>>, %arg2: memref<1x1x7xi32, #tpu.memory_space<vmem>>, %arg3: memref<2x1x32xf32, #tpu.memory_space<vmem>>, %arg4: memref<2x1x32xf32, #tpu.memory_space<vmem>>, %arg5: memref<2x32x96xbf16, #tpu.memory_space<vmem>>, %arg6: memref<2x1x96xf32, #tpu.memory_space<vmem>>, %arg7: memref<2x32x32xbf16, #tpu.memory_space<vmem>>, %arg8: memref<2x1x32xf32, #tpu.memory_space<vmem>>, %arg9: memref<2x1x32xf32, #tpu.memory_space<vmem>>, %arg10: memref<2x1x32xf32, #tpu.memory_space<vmem>>, %arg11: memref<2x32x128xbf16, #tpu.memory_space<vmem>>, %arg12: memref<2x1x128xf32, #tpu.memory_space<vmem>>, %arg13: memref<2x128x32xbf16, #tpu.memory_space<vmem>>, %arg14: memref<2x1x32xf32, #tpu.memory_space<vmem>>, %arg15: memref<1x32xf32, #tpu.memory_space<vmem>>, %arg16: memref<1x32xf32, #tpu.memory_space<vmem>>, %arg17: memref<32x16xbf16, #tpu.memory_space<vmem>>, %arg18: memref<1x16xf32, #tpu.memory_space<vmem>>, %arg19: memref<16x1xbf16, #tpu.memory_space<vmem>>, %arg20: memref<1x1xf32, #tpu.memory_space<vmem>>, %arg21: memref<1x7x32xf32, #tpu.memory_space<vmem>>, %arg22: memref<1x1x1xf32, #tpu.memory_space<vmem>>) attributes {dimension_semantics = [#tpu.dimension_semantics<parallel>], iteration_bounds = array<i64: 2>, scalar_prefetch = 0 : i64, scratch_operands = 0 : i64, tpu.core_type = #tpu.core_type<tc>, window_params = [{transform_indices = @transform_0, window_bounds = array<i64: 1, 7, 32>}, {transform_indices = @transform_1, window_bounds = array<i64: 1, 1, 7>}, {pipeline_mode = #tpu.pipeline_mode<synchronous>, transform_indices = @transform_2, window_bounds = array<i64: 2, 1, 32>}, {pipeline_mode = #tpu.pipeline_mode<synchronous>, transform_indices = @transform_3, window_bounds = array<i64: 2, 1, 32>}, {pipeline_mode = #tpu.pipeline_mode<synchronous>, transform_indices = @transform_4, window_bounds = array<i64: 2, 32, 96>}, {pipeline_mode = #tpu.pipeline_mode<synchronous>, transform_indices = @transform_5, window_bounds = array<i64: 2, 1, 96>}, {pipeline_mode = #tpu.pipeline_mode<synchronous>, transform_indices = @transform_6, window_bounds = array<i64: 2, 32, 32>}, {pipeline_mode = #tpu.pipeline_mode<synchronous>, transform_indices = @transform_7, window_bounds = array<i64: 2, 1, 32>}, {pipeline_mode = #tpu.pipeline_mode<synchronous>, transform_indices = @transform_8, window_bounds = array<i64: 2, 1, 32>}, {pipeline_mode = #tpu.pipeline_mode<synchronous>, transform_indices = @transform_9, window_bounds = array<i64: 2, 1, 32>}, {pipeline_mode = #tpu.pipeline_mode<synchronous>, transform_indices = @transform_10, window_bounds = array<i64: 2, 32, 128>}, {pipeline_mode = #tpu.pipeline_mode<synchronous>, transform_indices = @transform_11, window_bounds = array<i64: 2, 1, 128>}, {pipeline_mode = #tpu.pipeline_mode<synchronous>, transform_indices = @transform_12, window_bounds = array<i64: 2, 128, 32>}, {pipeline_mode = #tpu.pipeline_mode<synchronous>, transform_indices = @transform_13, window_bounds = array<i64: 2, 1, 32>}, {pipeline_mode = #tpu.pipeline_mode<synchronous>, transform_indices = @transform_14, window_bounds = array<i64: 1, 32>}, {pipeline_mode = #tpu.pipeline_mode<synchronous>, transform_indices = @transform_15, window_bounds = array<i64: 1, 32>}, {pipeline_mode = #tpu.pipeline_mode<synchronous>, transform_indices = @transform_16, window_bounds = array<i64: 32, 16>}, {pipeline_mode = #tpu.pipeline_mode<synchronous>, transform_indices = @transform_17, window_bounds = array<i64: 1, 16>}, {pipeline_mode = #tpu.pipeline_mode<synchronous>, transform_indices = @transform_18, window_bounds = array<i64: 16, 1>}, {pipeline_mode = #tpu.pipeline_mode<synchronous>, transform_indices = @transform_19, window_bounds = array<i64: 1, 1>}, {transform_indices = @transform_20, window_bounds = array<i64: 1, 7, 32>}, {transform_indices = @transform_21, window_bounds = array<i64: 1, 1, 1>}]} {
    %c0 = arith.constant 0 : index
    %c0_0 = arith.constant 0 : index
    %c0_1 = arith.constant 0 : index
    %0 = vector.load %arg1[%c0, %c0_0, %c0_1] : memref<1x7x32xf32, #tpu.memory_space<vmem>>, vector<1x7x32xf32>
    %1 = vector.shape_cast %0 : vector<1x7x32xf32> to vector<7x32xf32>
    %2 = tpu.iota {dimensions = array<i32: 0>} : vector<7x7xi32>
    %3 = tpu.iota {dimensions = array<i32: 1>} : vector<7x7xi32>
    %c0_2 = arith.constant 0 : index
    %c0_3 = arith.constant 0 : index
    %c0_4 = arith.constant 0 : index
    %4 = vector.load %arg2[%c0_2, %c0_3, %c0_4] : memref<1x1x7xi32, #tpu.memory_space<vmem>>, vector<1x1x7xi32>
    %5 = vector.shape_cast %4 : vector<1x1x7xi32> to vector<1x7xi32>
    %c0_i32 = arith.constant 0 : i32
    %6 = vector.broadcast %c0_i32 : i32 to vector<1x7xi32>
    %7 = arith.cmpi sgt, %5, %6 : vector<1x7xi32>
    %8 = arith.cmpi sle, %3, %2 : vector<7x7xi32>
    %9 = vector.broadcast %7 : vector<1x7xi1> to vector<7x7xi1>
    %10 = arith.andi %8, %9 : vector<7x7xi1>
    %cst = arith.constant 0.000000e+00 : f32
    %cst_5 = arith.constant -1.000000e+09 : f32
    %11 = vector.broadcast %cst : f32 to vector<7x7xf32>
    %12 = vector.broadcast %cst_5 : f32 to vector<7x7xf32>
    %13 = arith.select %10, %11, %12 : vector<7x7xi1>, vector<7x7xf32>
    %c0_6 = arith.constant 0 : index
    %c0_7 = arith.constant 0 : index
    %c0_8 = arith.constant 0 : index
    %14 = vector.load %arg3[%c0_6, %c0_7, %c0_8] : memref<2x1x32xf32, #tpu.memory_space<vmem>>, vector<1x1x32xf32>
    %15 = vector.shape_cast %14 : vector<1x1x32xf32> to vector<1x32xf32>
    %c0_9 = arith.constant 0 : index
    %c0_10 = arith.constant 0 : index
    %c0_11 = arith.constant 0 : index
    %16 = vector.load %arg4[%c0_9, %c0_10, %c0_11] : memref<2x1x32xf32, #tpu.memory_space<vmem>>, vector<1x1x32xf32>
    %17 = vector.shape_cast %16 : vector<1x1x32xf32> to vector<1x32xf32>
    %cst_12 = arith.constant dense<0.000000e+00> : vector<7xf32>
    %18 = vector.multi_reduction <add>, %1, %cst_12 [1] : vector<7x32xf32> to vector<7xf32>
    %19 = vector.shape_cast %18 : vector<7xf32> to vector<7x1xf32>
    %cst_13 = arith.constant 3.200000e+01 : f32
    %20 = vector.broadcast %cst_13 : f32 to vector<7x1xf32>
    %21 = arith.divf %19, %20 : vector<7x1xf32>
    %22 = vector.broadcast %21 : vector<7x1xf32> to vector<7x32xf32>
    %23 = arith.subf %1, %22 : vector<7x32xf32>
    %24 = arith.mulf %23, %23 : vector<7x32xf32>
    %cst_14 = arith.constant dense<0.000000e+00> : vector<7xf32>
    %25 = vector.multi_reduction <add>, %24, %cst_14 [1] : vector<7x32xf32> to vector<7xf32>
    %26 = vector.shape_cast %25 : vector<7xf32> to vector<7x1xf32>
    %cst_15 = arith.constant 3.200000e+01 : f32
    %27 = vector.broadcast %cst_15 : f32 to vector<7x1xf32>
    %28 = arith.divf %26, %27 : vector<7x1xf32>
    %29 = vector.broadcast %21 : vector<7x1xf32> to vector<7x32xf32>
    %30 = arith.subf %1, %29 : vector<7x32xf32>
    %cst_16 = arith.constant 9.99999974E-6 : f32
    %31 = vector.broadcast %cst_16 : f32 to vector<7x1xf32>
    %32 = arith.addf %28, %31 : vector<7x1xf32>
    %33 = math.rsqrt %32 : vector<7x1xf32>
    %34 = vector.broadcast %33 : vector<7x1xf32> to vector<7x32xf32>
    %35 = arith.mulf %30, %34 : vector<7x32xf32>
    %36 = vector.broadcast %15 : vector<1x32xf32> to vector<7x32xf32>
    %37 = arith.mulf %35, %36 : vector<7x32xf32>
    %38 = vector.broadcast %17 : vector<1x32xf32> to vector<7x32xf32>
    %39 = arith.addf %37, %38 : vector<7x32xf32>
    %40 = arith.truncf %39 : vector<7x32xf32> to vector<7x32xbf16>
    %c0_17 = arith.constant 0 : index
    %c0_18 = arith.constant 0 : index
    %c0_19 = arith.constant 0 : index
    %41 = vector.load %arg5[%c0_17, %c0_18, %c0_19] : memref<2x32x96xbf16, #tpu.memory_space<vmem>>, vector<1x32x96xbf16>
    %42 = vector.shape_cast %41 : vector<1x32x96xbf16> to vector<32x96xbf16>
    %cst_20 = arith.constant dense<0.000000e+00> : vector<7x96xf32>
    %43 = tpu.matmul %40, %42, %cst_20 {dimension_numbers = #tpu.dot_dimension_numbers<[1], [0], [0], [1], [0, 0, 1, 1], [], []>} : vector<7x32xbf16>, vector<32x96xbf16>, vector<7x96xf32> -> vector<7x96xf32>
    %c0_21 = arith.constant 0 : index
    %c0_22 = arith.constant 0 : index
    %c0_23 = arith.constant 0 : index
    %44 = vector.load %arg6[%c0_21, %c0_22, %c0_23] : memref<2x1x96xf32, #tpu.memory_space<vmem>>, vector<1x1x96xf32>
    %45 = vector.shape_cast %44 : vector<1x1x96xf32> to vector<1x96xf32>
    %46 = vector.broadcast %45 : vector<1x96xf32> to vector<7x96xf32>
    %47 = arith.addf %43, %46 : vector<7x96xf32>
    %48 = arith.truncf %47 : vector<7x96xf32> to vector<7x96xbf16>
    %49 = vector.extract_strided_slice %48 {offsets = [0, 0], sizes = [7, 16], strides = [1, 1]} : vector<7x96xbf16> to vector<7x16xbf16>
    %50 = vector.extract_strided_slice %48 {offsets = [0, 32], sizes = [7, 16], strides = [1, 1]} : vector<7x96xbf16> to vector<7x16xbf16>
    %51 = vector.extract_strided_slice %48 {offsets = [0, 64], sizes = [7, 16], strides = [1, 1]} : vector<7x96xbf16> to vector<7x16xbf16>
    %cst_24 = arith.constant dense<0.000000e+00> : vector<7x7xf32>
    %52 = tpu.matmul %49, %50, %cst_24 {dimension_numbers = #tpu.dot_dimension_numbers<[1], [1], [0], [0], [0, 0, 1, 0], [], []>} : vector<7x16xbf16>, vector<7x16xbf16>, vector<7x7xf32> -> vector<7x7xf32>
    %cst_25 = arith.constant 2.500000e-01 : f32
    %53 = vector.broadcast %cst_25 : f32 to vector<7x7xf32>
    %54 = arith.mulf %52, %53 : vector<7x7xf32>
    %55 = arith.addf %54, %13 : vector<7x7xf32>
    %cst_26 = arith.constant dense<0xFF800000> : vector<7xf32>
    %56 = vector.multi_reduction <maximumf>, %55, %cst_26 [1] : vector<7x7xf32> to vector<7xf32>
    %57 = vector.shape_cast %56 : vector<7xf32> to vector<7x1xf32>
    %58 = vector.broadcast %57 : vector<7x1xf32> to vector<7x7xf32>
    %59 = arith.subf %55, %58 : vector<7x7xf32>
    %60 = math.exp %59 : vector<7x7xf32>
    %cst_27 = arith.constant dense<0.000000e+00> : vector<7xf32>
    %61 = vector.multi_reduction <add>, %60, %cst_27 [1] : vector<7x7xf32> to vector<7xf32>
    %62 = vector.shape_cast %61 : vector<7xf32> to vector<7x1xf32>
    %63 = vector.broadcast %62 : vector<7x1xf32> to vector<7x7xf32>
    %64 = arith.divf %60, %63 : vector<7x7xf32>
    %65 = arith.truncf %64 : vector<7x7xf32> to vector<7x7xbf16>
    %cst_28 = arith.constant dense<0.000000e+00> : vector<7x16xf32>
    %66 = tpu.matmul %65, %51, %cst_28 {dimension_numbers = #tpu.dot_dimension_numbers<[1], [0], [0], [1], [0, 0, 1, 1], [], []>} : vector<7x7xbf16>, vector<7x16xbf16>, vector<7x16xf32> -> vector<7x16xf32>
    %67 = vector.extract_strided_slice %48 {offsets = [0, 16], sizes = [7, 16], strides = [1, 1]} : vector<7x96xbf16> to vector<7x16xbf16>
    %68 = vector.extract_strided_slice %48 {offsets = [0, 48], sizes = [7, 16], strides = [1, 1]} : vector<7x96xbf16> to vector<7x16xbf16>
    %69 = vector.extract_strided_slice %48 {offsets = [0, 80], sizes = [7, 16], strides = [1, 1]} : vector<7x96xbf16> to vector<7x16xbf16>
    %cst_29 = arith.constant dense<0.000000e+00> : vector<7x7xf32>
    %70 = tpu.matmul %67, %68, %cst_29 {dimension_numbers = #tpu.dot_dimension_numbers<[1], [1], [0], [0], [0, 0, 1, 0], [], []>} : vector<7x16xbf16>, vector<7x16xbf16>, vector<7x7xf32> -> vector<7x7xf32>
    %cst_30 = arith.constant 2.500000e-01 : f32
    %71 = vector.broadcast %cst_30 : f32 to vector<7x7xf32>
    %72 = arith.mulf %70, %71 : vector<7x7xf32>
    %73 = arith.addf %72, %13 : vector<7x7xf32>
    %cst_31 = arith.constant dense<0xFF800000> : vector<7xf32>
    %74 = vector.multi_reduction <maximumf>, %73, %cst_31 [1] : vector<7x7xf32> to vector<7xf32>
    %75 = vector.shape_cast %74 : vector<7xf32> to vector<7x1xf32>
    %76 = vector.broadcast %75 : vector<7x1xf32> to vector<7x7xf32>
    %77 = arith.subf %73, %76 : vector<7x7xf32>
    %78 = math.exp %77 : vector<7x7xf32>
    %cst_32 = arith.constant dense<0.000000e+00> : vector<7xf32>
    %79 = vector.multi_reduction <add>, %78, %cst_32 [1] : vector<7x7xf32> to vector<7xf32>
    %80 = vector.shape_cast %79 : vector<7xf32> to vector<7x1xf32>
    %81 = vector.broadcast %80 : vector<7x1xf32> to vector<7x7xf32>
    %82 = arith.divf %78, %81 : vector<7x7xf32>
    %83 = arith.truncf %82 : vector<7x7xf32> to vector<7x7xbf16>
    %cst_33 = arith.constant dense<0.000000e+00> : vector<7x16xf32>
    %84 = tpu.matmul %83, %69, %cst_33 {dimension_numbers = #tpu.dot_dimension_numbers<[1], [0], [0], [1], [0, 0, 1, 1], [], []>} : vector<7x7xbf16>, vector<7x16xbf16>, vector<7x16xf32> -> vector<7x16xf32>
    %85 = tpu.concatenate %66, %84 in 1 : vector<7x16xf32>, vector<7x16xf32> -> vector<7x32xf32>
    %86 = arith.truncf %85 : vector<7x32xf32> to vector<7x32xbf16>
    %c0_34 = arith.constant 0 : index
    %c0_35 = arith.constant 0 : index
    %c0_36 = arith.constant 0 : index
    %87 = vector.load %arg7[%c0_34, %c0_35, %c0_36] : memref<2x32x32xbf16, #tpu.memory_space<vmem>>, vector<1x32x32xbf16>
    %88 = vector.shape_cast %87 : vector<1x32x32xbf16> to vector<32x32xbf16>
    %cst_37 = arith.constant dense<0.000000e+00> : vector<7x32xf32>
    %89 = tpu.matmul %86, %88, %cst_37 {dimension_numbers = #tpu.dot_dimension_numbers<[1], [0], [0], [1], [0, 0, 1, 1], [], []>} : vector<7x32xbf16>, vector<32x32xbf16>, vector<7x32xf32> -> vector<7x32xf32>
    %c0_38 = arith.constant 0 : index
    %c0_39 = arith.constant 0 : index
    %c0_40 = arith.constant 0 : index
    %90 = vector.load %arg8[%c0_38, %c0_39, %c0_40] : memref<2x1x32xf32, #tpu.memory_space<vmem>>, vector<1x1x32xf32>
    %91 = vector.shape_cast %90 : vector<1x1x32xf32> to vector<1x32xf32>
    %92 = vector.broadcast %91 : vector<1x32xf32> to vector<7x32xf32>
    %93 = arith.addf %89, %92 : vector<7x32xf32>
    %94 = arith.addf %1, %93 : vector<7x32xf32>
    %c0_41 = arith.constant 0 : index
    %c0_42 = arith.constant 0 : index
    %c0_43 = arith.constant 0 : index
    %95 = vector.load %arg9[%c0_41, %c0_42, %c0_43] : memref<2x1x32xf32, #tpu.memory_space<vmem>>, vector<1x1x32xf32>
    %96 = vector.shape_cast %95 : vector<1x1x32xf32> to vector<1x32xf32>
    %c0_44 = arith.constant 0 : index
    %c0_45 = arith.constant 0 : index
    %c0_46 = arith.constant 0 : index
    %97 = vector.load %arg10[%c0_44, %c0_45, %c0_46] : memref<2x1x32xf32, #tpu.memory_space<vmem>>, vector<1x1x32xf32>
    %98 = vector.shape_cast %97 : vector<1x1x32xf32> to vector<1x32xf32>
    %cst_47 = arith.constant dense<0.000000e+00> : vector<7xf32>
    %99 = vector.multi_reduction <add>, %94, %cst_47 [1] : vector<7x32xf32> to vector<7xf32>
    %100 = vector.shape_cast %99 : vector<7xf32> to vector<7x1xf32>
    %cst_48 = arith.constant 3.200000e+01 : f32
    %101 = vector.broadcast %cst_48 : f32 to vector<7x1xf32>
    %102 = arith.divf %100, %101 : vector<7x1xf32>
    %103 = vector.broadcast %102 : vector<7x1xf32> to vector<7x32xf32>
    %104 = arith.subf %94, %103 : vector<7x32xf32>
    %105 = arith.mulf %104, %104 : vector<7x32xf32>
    %cst_49 = arith.constant dense<0.000000e+00> : vector<7xf32>
    %106 = vector.multi_reduction <add>, %105, %cst_49 [1] : vector<7x32xf32> to vector<7xf32>
    %107 = vector.shape_cast %106 : vector<7xf32> to vector<7x1xf32>
    %cst_50 = arith.constant 3.200000e+01 : f32
    %108 = vector.broadcast %cst_50 : f32 to vector<7x1xf32>
    %109 = arith.divf %107, %108 : vector<7x1xf32>
    %110 = vector.broadcast %102 : vector<7x1xf32> to vector<7x32xf32>
    %111 = arith.subf %94, %110 : vector<7x32xf32>
    %cst_51 = arith.constant 9.99999974E-6 : f32
    %112 = vector.broadcast %cst_51 : f32 to vector<7x1xf32>
    %113 = arith.addf %109, %112 : vector<7x1xf32>
    %114 = math.rsqrt %113 : vector<7x1xf32>
    %115 = vector.broadcast %114 : vector<7x1xf32> to vector<7x32xf32>
    %116 = arith.mulf %111, %115 : vector<7x32xf32>
    %117 = vector.broadcast %96 : vector<1x32xf32> to vector<7x32xf32>
    %118 = arith.mulf %116, %117 : vector<7x32xf32>
    %119 = vector.broadcast %98 : vector<1x32xf32> to vector<7x32xf32>
    %120 = arith.addf %118, %119 : vector<7x32xf32>
    %121 = arith.truncf %120 : vector<7x32xf32> to vector<7x32xbf16>
    %c0_52 = arith.constant 0 : index
    %c0_53 = arith.constant 0 : index
    %c0_54 = arith.constant 0 : index
    %122 = vector.load %arg11[%c0_52, %c0_53, %c0_54] : memref<2x32x128xbf16, #tpu.memory_space<vmem>>, vector<1x32x128xbf16>
    %123 = vector.shape_cast %122 : vector<1x32x128xbf16> to vector<32x128xbf16>
    %cst_55 = arith.constant dense<0.000000e+00> : vector<7x128xf32>
    %124 = tpu.matmul %121, %123, %cst_55 {dimension_numbers = #tpu.dot_dimension_numbers<[1], [0], [0], [1], [0, 0, 1, 1], [], []>} : vector<7x32xbf16>, vector<32x128xbf16>, vector<7x128xf32> -> vector<7x128xf32>
    %c0_56 = arith.constant 0 : index
    %c0_57 = arith.constant 0 : index
    %c0_58 = arith.constant 0 : index
    %125 = vector.load %arg12[%c0_56, %c0_57, %c0_58] : memref<2x1x128xf32, #tpu.memory_space<vmem>>, vector<1x1x128xf32>
    %126 = vector.shape_cast %125 : vector<1x1x128xf32> to vector<1x128xf32>
    %127 = vector.broadcast %126 : vector<1x128xf32> to vector<7x128xf32>
    %128 = arith.addf %124, %127 : vector<7x128xf32>
    %cst_59 = arith.constant 5.000000e-01 : f32
    %129 = vector.broadcast %cst_59 : f32 to vector<7x128xf32>
    %130 = arith.mulf %129, %128 : vector<7x128xf32>
    %cst_60 = arith.constant 4.471500e-02 : f32
    %131 = vector.broadcast %cst_60 : f32 to vector<7x128xf32>
    %132 = arith.mulf %131, %128 : vector<7x128xf32>
    %133 = arith.mulf %132, %128 : vector<7x128xf32>
    %134 = arith.mulf %133, %128 : vector<7x128xf32>
    %135 = arith.addf %128, %134 : vector<7x128xf32>
    %cst_61 = arith.constant 0.797884583 : f32
    %136 = vector.broadcast %cst_61 : f32 to vector<7x128xf32>
    %137 = arith.mulf %136, %135 : vector<7x128xf32>
    %138 = math.tanh %137 : vector<7x128xf32>
    %cst_62 = arith.constant 1.000000e+00 : f32
    %139 = vector.broadcast %cst_62 : f32 to vector<7x128xf32>
    %140 = arith.addf %139, %138 : vector<7x128xf32>
    %141 = arith.mulf %130, %140 : vector<7x128xf32>
    %142 = arith.truncf %141 : vector<7x128xf32> to vector<7x128xbf16>
    %c0_63 = arith.constant 0 : index
    %c0_64 = arith.constant 0 : index
    %c0_65 = arith.constant 0 : index
    %143 = vector.load %arg13[%c0_63, %c0_64, %c0_65] : memref<2x128x32xbf16, #tpu.memory_space<vmem>>, vector<1x128x32xbf16>
    %144 = vector.shape_cast %143 : vector<1x128x32xbf16> to vector<128x32xbf16>
    %cst_66 = arith.constant dense<0.000000e+00> : vector<7x32xf32>
    %145 = tpu.matmul %142, %144, %cst_66 {dimension_numbers = #tpu.dot_dimension_numbers<[1], [0], [0], [1], [0, 0, 1, 1], [], []>} : vector<7x128xbf16>, vector<128x32xbf16>, vector<7x32xf32> -> vector<7x32xf32>
    %c0_67 = arith.constant 0 : index
    %c0_68 = arith.constant 0 : index
    %c0_69 = arith.constant 0 : index
    %146 = vector.load %arg14[%c0_67, %c0_68, %c0_69] : memref<2x1x32xf32, #tpu.memory_space<vmem>>, vector<1x1x32xf32>
    %147 = vector.shape_cast %146 : vector<1x1x32xf32> to vector<1x32xf32>
    %148 = vector.broadcast %147 : vector<1x32xf32> to vector<7x32xf32>
    %149 = arith.addf %145, %148 : vector<7x32xf32>
    %150 = arith.addf %94, %149 : vector<7x32xf32>
    %c1 = arith.constant 1 : index
    %c0_70 = arith.constant 0 : index
    %c0_71 = arith.constant 0 : index
    %151 = vector.load %arg3[%c1, %c0_70, %c0_71] : memref<2x1x32xf32, #tpu.memory_space<vmem>>, vector<1x1x32xf32>
    %152 = vector.shape_cast %151 : vector<1x1x32xf32> to vector<1x32xf32>
    %c1_72 = arith.constant 1 : index
    %c0_73 = arith.constant 0 : index
    %c0_74 = arith.constant 0 : index
    %153 = vector.load %arg4[%c1_72, %c0_73, %c0_74] : memref<2x1x32xf32, #tpu.memory_space<vmem>>, vector<1x1x32xf32>
    %154 = vector.shape_cast %153 : vector<1x1x32xf32> to vector<1x32xf32>
    %cst_75 = arith.constant dense<0.000000e+00> : vector<7xf32>
    %155 = vector.multi_reduction <add>, %150, %cst_75 [1] : vector<7x32xf32> to vector<7xf32>
    %156 = vector.shape_cast %155 : vector<7xf32> to vector<7x1xf32>
    %cst_76 = arith.constant 3.200000e+01 : f32
    %157 = vector.broadcast %cst_76 : f32 to vector<7x1xf32>
    %158 = arith.divf %156, %157 : vector<7x1xf32>
    %159 = vector.broadcast %158 : vector<7x1xf32> to vector<7x32xf32>
    %160 = arith.subf %150, %159 : vector<7x32xf32>
    %161 = arith.mulf %160, %160 : vector<7x32xf32>
    %cst_77 = arith.constant dense<0.000000e+00> : vector<7xf32>
    %162 = vector.multi_reduction <add>, %161, %cst_77 [1] : vector<7x32xf32> to vector<7xf32>
    %163 = vector.shape_cast %162 : vector<7xf32> to vector<7x1xf32>
    %cst_78 = arith.constant 3.200000e+01 : f32
    %164 = vector.broadcast %cst_78 : f32 to vector<7x1xf32>
    %165 = arith.divf %163, %164 : vector<7x1xf32>
    %166 = vector.broadcast %158 : vector<7x1xf32> to vector<7x32xf32>
    %167 = arith.subf %150, %166 : vector<7x32xf32>
    %cst_79 = arith.constant 9.99999974E-6 : f32
    %168 = vector.broadcast %cst_79 : f32 to vector<7x1xf32>
    %169 = arith.addf %165, %168 : vector<7x1xf32>
    %170 = math.rsqrt %169 : vector<7x1xf32>
    %171 = vector.broadcast %170 : vector<7x1xf32> to vector<7x32xf32>
    %172 = arith.mulf %167, %171 : vector<7x32xf32>
    %173 = vector.broadcast %152 : vector<1x32xf32> to vector<7x32xf32>
    %174 = arith.mulf %172, %173 : vector<7x32xf32>
    %175 = vector.broadcast %154 : vector<1x32xf32> to vector<7x32xf32>
    %176 = arith.addf %174, %175 : vector<7x32xf32>
    %177 = arith.truncf %176 : vector<7x32xf32> to vector<7x32xbf16>
    %c1_80 = arith.constant 1 : index
    %c0_81 = arith.constant 0 : index
    %c0_82 = arith.constant 0 : index
    %178 = vector.load %arg5[%c1_80, %c0_81, %c0_82] : memref<2x32x96xbf16, #tpu.memory_space<vmem>>, vector<1x32x96xbf16>
    %179 = vector.shape_cast %178 : vector<1x32x96xbf16> to vector<32x96xbf16>
    %cst_83 = arith.constant dense<0.000000e+00> : vector<7x96xf32>
    %180 = tpu.matmul %177, %179, %cst_83 {dimension_numbers = #tpu.dot_dimension_numbers<[1], [0], [0], [1], [0, 0, 1, 1], [], []>} : vector<7x32xbf16>, vector<32x96xbf16>, vector<7x96xf32> -> vector<7x96xf32>
    %c1_84 = arith.constant 1 : index
    %c0_85 = arith.constant 0 : index
    %c0_86 = arith.constant 0 : index
    %181 = vector.load %arg6[%c1_84, %c0_85, %c0_86] : memref<2x1x96xf32, #tpu.memory_space<vmem>>, vector<1x1x96xf32>
    %182 = vector.shape_cast %181 : vector<1x1x96xf32> to vector<1x96xf32>
    %183 = vector.broadcast %182 : vector<1x96xf32> to vector<7x96xf32>
    %184 = arith.addf %180, %183 : vector<7x96xf32>
    %185 = arith.truncf %184 : vector<7x96xf32> to vector<7x96xbf16>
    %186 = vector.extract_strided_slice %185 {offsets = [0, 0], sizes = [7, 16], strides = [1, 1]} : vector<7x96xbf16> to vector<7x16xbf16>
    %187 = vector.extract_strided_slice %185 {offsets = [0, 32], sizes = [7, 16], strides = [1, 1]} : vector<7x96xbf16> to vector<7x16xbf16>
    %188 = vector.extract_strided_slice %185 {offsets = [0, 64], sizes = [7, 16], strides = [1, 1]} : vector<7x96xbf16> to vector<7x16xbf16>
    %cst_87 = arith.constant dense<0.000000e+00> : vector<7x7xf32>
    %189 = tpu.matmul %186, %187, %cst_87 {dimension_numbers = #tpu.dot_dimension_numbers<[1], [1], [0], [0], [0, 0, 1, 0], [], []>} : vector<7x16xbf16>, vector<7x16xbf16>, vector<7x7xf32> -> vector<7x7xf32>
    %cst_88 = arith.constant 2.500000e-01 : f32
    %190 = vector.broadcast %cst_88 : f32 to vector<7x7xf32>
    %191 = arith.mulf %189, %190 : vector<7x7xf32>
    %192 = arith.addf %191, %13 : vector<7x7xf32>
    %cst_89 = arith.constant dense<0xFF800000> : vector<7xf32>
    %193 = vector.multi_reduction <maximumf>, %192, %cst_89 [1] : vector<7x7xf32> to vector<7xf32>
    %194 = vector.shape_cast %193 : vector<7xf32> to vector<7x1xf32>
    %195 = vector.broadcast %194 : vector<7x1xf32> to vector<7x7xf32>
    %196 = arith.subf %192, %195 : vector<7x7xf32>
    %197 = math.exp %196 : vector<7x7xf32>
    %cst_90 = arith.constant dense<0.000000e+00> : vector<7xf32>
    %198 = vector.multi_reduction <add>, %197, %cst_90 [1] : vector<7x7xf32> to vector<7xf32>
    %199 = vector.shape_cast %198 : vector<7xf32> to vector<7x1xf32>
    %200 = vector.broadcast %199 : vector<7x1xf32> to vector<7x7xf32>
    %201 = arith.divf %197, %200 : vector<7x7xf32>
    %202 = arith.truncf %201 : vector<7x7xf32> to vector<7x7xbf16>
    %cst_91 = arith.constant dense<0.000000e+00> : vector<7x16xf32>
    %203 = tpu.matmul %202, %188, %cst_91 {dimension_numbers = #tpu.dot_dimension_numbers<[1], [0], [0], [1], [0, 0, 1, 1], [], []>} : vector<7x7xbf16>, vector<7x16xbf16>, vector<7x16xf32> -> vector<7x16xf32>
    %204 = vector.extract_strided_slice %185 {offsets = [0, 16], sizes = [7, 16], strides = [1, 1]} : vector<7x96xbf16> to vector<7x16xbf16>
    %205 = vector.extract_strided_slice %185 {offsets = [0, 48], sizes = [7, 16], strides = [1, 1]} : vector<7x96xbf16> to vector<7x16xbf16>
    %206 = vector.extract_strided_slice %185 {offsets = [0, 80], sizes = [7, 16], strides = [1, 1]} : vector<7x96xbf16> to vector<7x16xbf16>
    %cst_92 = arith.constant dense<0.000000e+00> : vector<7x7xf32>
    %207 = tpu.matmul %204, %205, %cst_92 {dimension_numbers = #tpu.dot_dimension_numbers<[1], [1], [0], [0], [0, 0, 1, 0], [], []>} : vector<7x16xbf16>, vector<7x16xbf16>, vector<7x7xf32> -> vector<7x7xf32>
    %cst_93 = arith.constant 2.500000e-01 : f32
    %208 = vector.broadcast %cst_93 : f32 to vector<7x7xf32>
    %209 = arith.mulf %207, %208 : vector<7x7xf32>
    %210 = arith.addf %209, %13 : vector<7x7xf32>
    %cst_94 = arith.constant dense<0xFF800000> : vector<7xf32>
    %211 = vector.multi_reduction <maximumf>, %210, %cst_94 [1] : vector<7x7xf32> to vector<7xf32>
    %212 = vector.shape_cast %211 : vector<7xf32> to vector<7x1xf32>
    %213 = vector.broadcast %212 : vector<7x1xf32> to vector<7x7xf32>
    %214 = arith.subf %210, %213 : vector<7x7xf32>
    %215 = math.exp %214 : vector<7x7xf32>
    %cst_95 = arith.constant dense<0.000000e+00> : vector<7xf32>
    %216 = vector.multi_reduction <add>, %215, %cst_95 [1] : vector<7x7xf32> to vector<7xf32>
    %217 = vector.shape_cast %216 : vector<7xf32> to vector<7x1xf32>
    %218 = vector.broadcast %217 : vector<7x1xf32> to vector<7x7xf32>
    %219 = arith.divf %215, %218 : vector<7x7xf32>
    %220 = arith.truncf %219 : vector<7x7xf32> to vector<7x7xbf16>
    %cst_96 = arith.constant dense<0.000000e+00> : vector<7x16xf32>
    %221 = tpu.matmul %220, %206, %cst_96 {dimension_numbers = #tpu.dot_dimension_numbers<[1], [0], [0], [1], [0, 0, 1, 1], [], []>} : vector<7x7xbf16>, vector<7x16xbf16>, vector<7x16xf32> -> vector<7x16xf32>
    %222 = tpu.concatenate %203, %221 in 1 : vector<7x16xf32>, vector<7x16xf32> -> vector<7x32xf32>
    %223 = arith.truncf %222 : vector<7x32xf32> to vector<7x32xbf16>
    %c1_97 = arith.constant 1 : index
    %c0_98 = arith.constant 0 : index
    %c0_99 = arith.constant 0 : index
    %224 = vector.load %arg7[%c1_97, %c0_98, %c0_99] : memref<2x32x32xbf16, #tpu.memory_space<vmem>>, vector<1x32x32xbf16>
    %225 = vector.shape_cast %224 : vector<1x32x32xbf16> to vector<32x32xbf16>
    %cst_100 = arith.constant dense<0.000000e+00> : vector<7x32xf32>
    %226 = tpu.matmul %223, %225, %cst_100 {dimension_numbers = #tpu.dot_dimension_numbers<[1], [0], [0], [1], [0, 0, 1, 1], [], []>} : vector<7x32xbf16>, vector<32x32xbf16>, vector<7x32xf32> -> vector<7x32xf32>
    %c1_101 = arith.constant 1 : index
    %c0_102 = arith.constant 0 : index
    %c0_103 = arith.constant 0 : index
    %227 = vector.load %arg8[%c1_101, %c0_102, %c0_103] : memref<2x1x32xf32, #tpu.memory_space<vmem>>, vector<1x1x32xf32>
    %228 = vector.shape_cast %227 : vector<1x1x32xf32> to vector<1x32xf32>
    %229 = vector.broadcast %228 : vector<1x32xf32> to vector<7x32xf32>
    %230 = arith.addf %226, %229 : vector<7x32xf32>
    %231 = arith.addf %150, %230 : vector<7x32xf32>
    %c1_104 = arith.constant 1 : index
    %c0_105 = arith.constant 0 : index
    %c0_106 = arith.constant 0 : index
    %232 = vector.load %arg9[%c1_104, %c0_105, %c0_106] : memref<2x1x32xf32, #tpu.memory_space<vmem>>, vector<1x1x32xf32>
    %233 = vector.shape_cast %232 : vector<1x1x32xf32> to vector<1x32xf32>
    %c1_107 = arith.constant 1 : index
    %c0_108 = arith.constant 0 : index
    %c0_109 = arith.constant 0 : index
    %234 = vector.load %arg10[%c1_107, %c0_108, %c0_109] : memref<2x1x32xf32, #tpu.memory_space<vmem>>, vector<1x1x32xf32>
    %235 = vector.shape_cast %234 : vector<1x1x32xf32> to vector<1x32xf32>
    %cst_110 = arith.constant dense<0.000000e+00> : vector<7xf32>
    %236 = vector.multi_reduction <add>, %231, %cst_110 [1] : vector<7x32xf32> to vector<7xf32>
    %237 = vector.shape_cast %236 : vector<7xf32> to vector<7x1xf32>
    %cst_111 = arith.constant 3.200000e+01 : f32
    %238 = vector.broadcast %cst_111 : f32 to vector<7x1xf32>
    %239 = arith.divf %237, %238 : vector<7x1xf32>
    %240 = vector.broadcast %239 : vector<7x1xf32> to vector<7x32xf32>
    %241 = arith.subf %231, %240 : vector<7x32xf32>
    %242 = arith.mulf %241, %241 : vector<7x32xf32>
    %cst_112 = arith.constant dense<0.000000e+00> : vector<7xf32>
    %243 = vector.multi_reduction <add>, %242, %cst_112 [1] : vector<7x32xf32> to vector<7xf32>
    %244 = vector.shape_cast %243 : vector<7xf32> to vector<7x1xf32>
    %cst_113 = arith.constant 3.200000e+01 : f32
    %245 = vector.broadcast %cst_113 : f32 to vector<7x1xf32>
    %246 = arith.divf %244, %245 : vector<7x1xf32>
    %247 = vector.broadcast %239 : vector<7x1xf32> to vector<7x32xf32>
    %248 = arith.subf %231, %247 : vector<7x32xf32>
    %cst_114 = arith.constant 9.99999974E-6 : f32
    %249 = vector.broadcast %cst_114 : f32 to vector<7x1xf32>
    %250 = arith.addf %246, %249 : vector<7x1xf32>
    %251 = math.rsqrt %250 : vector<7x1xf32>
    %252 = vector.broadcast %251 : vector<7x1xf32> to vector<7x32xf32>
    %253 = arith.mulf %248, %252 : vector<7x32xf32>
    %254 = vector.broadcast %233 : vector<1x32xf32> to vector<7x32xf32>
    %255 = arith.mulf %253, %254 : vector<7x32xf32>
    %256 = vector.broadcast %235 : vector<1x32xf32> to vector<7x32xf32>
    %257 = arith.addf %255, %256 : vector<7x32xf32>
    %258 = arith.truncf %257 : vector<7x32xf32> to vector<7x32xbf16>
    %c1_115 = arith.constant 1 : index
    %c0_116 = arith.constant 0 : index
    %c0_117 = arith.constant 0 : index
    %259 = vector.load %arg11[%c1_115, %c0_116, %c0_117] : memref<2x32x128xbf16, #tpu.memory_space<vmem>>, vector<1x32x128xbf16>
    %260 = vector.shape_cast %259 : vector<1x32x128xbf16> to vector<32x128xbf16>
    %cst_118 = arith.constant dense<0.000000e+00> : vector<7x128xf32>
    %261 = tpu.matmul %258, %260, %cst_118 {dimension_numbers = #tpu.dot_dimension_numbers<[1], [0], [0], [1], [0, 0, 1, 1], [], []>} : vector<7x32xbf16>, vector<32x128xbf16>, vector<7x128xf32> -> vector<7x128xf32>
    %c1_119 = arith.constant 1 : index
    %c0_120 = arith.constant 0 : index
    %c0_121 = arith.constant 0 : index
    %262 = vector.load %arg12[%c1_119, %c0_120, %c0_121] : memref<2x1x128xf32, #tpu.memory_space<vmem>>, vector<1x1x128xf32>
    %263 = vector.shape_cast %262 : vector<1x1x128xf32> to vector<1x128xf32>
    %264 = vector.broadcast %263 : vector<1x128xf32> to vector<7x128xf32>
    %265 = arith.addf %261, %264 : vector<7x128xf32>
    %cst_122 = arith.constant 5.000000e-01 : f32
    %266 = vector.broadcast %cst_122 : f32 to vector<7x128xf32>
    %267 = arith.mulf %266, %265 : vector<7x128xf32>
    %cst_123 = arith.constant 4.471500e-02 : f32
    %268 = vector.broadcast %cst_123 : f32 to vector<7x128xf32>
    %269 = arith.mulf %268, %265 : vector<7x128xf32>
    %270 = arith.mulf %269, %265 : vector<7x128xf32>
    %271 = arith.mulf %270, %265 : vector<7x128xf32>
    %272 = arith.addf %265, %271 : vector<7x128xf32>
    %cst_124 = arith.constant 0.797884583 : f32
    %273 = vector.broadcast %cst_124 : f32 to vector<7x128xf32>
    %274 = arith.mulf %273, %272 : vector<7x128xf32>
    %275 = math.tanh %274 : vector<7x128xf32>
    %cst_125 = arith.constant 1.000000e+00 : f32
    %276 = vector.broadcast %cst_125 : f32 to vector<7x128xf32>
    %277 = arith.addf %276, %275 : vector<7x128xf32>
    %278 = arith.mulf %267, %277 : vector<7x128xf32>
    %279 = arith.truncf %278 : vector<7x128xf32> to vector<7x128xbf16>
    %c1_126 = arith.constant 1 : index
    %c0_127 = arith.constant 0 : index
    %c0_128 = arith.constant 0 : index
    %280 = vector.load %arg13[%c1_126, %c0_127, %c0_128] : memref<2x128x32xbf16, #tpu.memory_space<vmem>>, vector<1x128x32xbf16>
    %281 = vector.shape_cast %280 : vector<1x128x32xbf16> to vector<128x32xbf16>
    %cst_129 = arith.constant dense<0.000000e+00> : vector<7x32xf32>
    %282 = tpu.matmul %279, %281, %cst_129 {dimension_numbers = #tpu.dot_dimension_numbers<[1], [0], [0], [1], [0, 0, 1, 1], [], []>} : vector<7x128xbf16>, vector<128x32xbf16>, vector<7x32xf32> -> vector<7x32xf32>
    %c1_130 = arith.constant 1 : index
    %c0_131 = arith.constant 0 : index
    %c0_132 = arith.constant 0 : index
    %283 = vector.load %arg14[%c1_130, %c0_131, %c0_132] : memref<2x1x32xf32, #tpu.memory_space<vmem>>, vector<1x1x32xf32>
    %284 = vector.shape_cast %283 : vector<1x1x32xf32> to vector<1x32xf32>
    %285 = vector.broadcast %284 : vector<1x32xf32> to vector<7x32xf32>
    %286 = arith.addf %282, %285 : vector<7x32xf32>
    %287 = arith.addf %231, %286 : vector<7x32xf32>
    %c0_133 = arith.constant 0 : index
    %c0_134 = arith.constant 0 : index
    %288 = vector.load %arg15[%c0_133, %c0_134] : memref<1x32xf32, #tpu.memory_space<vmem>>, vector<1x32xf32>
    %c0_135 = arith.constant 0 : index
    %c0_136 = arith.constant 0 : index
    %289 = vector.load %arg16[%c0_135, %c0_136] : memref<1x32xf32, #tpu.memory_space<vmem>>, vector<1x32xf32>
    %cst_137 = arith.constant dense<0.000000e+00> : vector<7xf32>
    %290 = vector.multi_reduction <add>, %287, %cst_137 [1] : vector<7x32xf32> to vector<7xf32>
    %291 = vector.shape_cast %290 : vector<7xf32> to vector<7x1xf32>
    %cst_138 = arith.constant 3.200000e+01 : f32
    %292 = vector.broadcast %cst_138 : f32 to vector<7x1xf32>
    %293 = arith.divf %291, %292 : vector<7x1xf32>
    %294 = vector.broadcast %293 : vector<7x1xf32> to vector<7x32xf32>
    %295 = arith.subf %287, %294 : vector<7x32xf32>
    %296 = arith.mulf %295, %295 : vector<7x32xf32>
    %cst_139 = arith.constant dense<0.000000e+00> : vector<7xf32>
    %297 = vector.multi_reduction <add>, %296, %cst_139 [1] : vector<7x32xf32> to vector<7xf32>
    %298 = vector.shape_cast %297 : vector<7xf32> to vector<7x1xf32>
    %cst_140 = arith.constant 3.200000e+01 : f32
    %299 = vector.broadcast %cst_140 : f32 to vector<7x1xf32>
    %300 = arith.divf %298, %299 : vector<7x1xf32>
    %301 = vector.broadcast %293 : vector<7x1xf32> to vector<7x32xf32>
    %302 = arith.subf %287, %301 : vector<7x32xf32>
    %cst_141 = arith.constant 9.99999974E-6 : f32
    %303 = vector.broadcast %cst_141 : f32 to vector<7x1xf32>
    %304 = arith.addf %300, %303 : vector<7x1xf32>
    %305 = math.rsqrt %304 : vector<7x1xf32>
    %306 = vector.broadcast %305 : vector<7x1xf32> to vector<7x32xf32>
    %307 = arith.mulf %302, %306 : vector<7x32xf32>
    %308 = vector.broadcast %288 : vector<1x32xf32> to vector<7x32xf32>
    %309 = arith.mulf %307, %308 : vector<7x32xf32>
    %310 = vector.broadcast %289 : vector<1x32xf32> to vector<7x32xf32>
    %311 = arith.addf %309, %310 : vector<7x32xf32>
    %c0_142 = arith.constant 0 : index
    %c0_143 = arith.constant 0 : index
    %c0_144 = arith.constant 0 : index
    %312 = vector.load %arg21[%c0_142, %c0_143, %c0_144] : memref<1x7x32xf32, #tpu.memory_space<vmem>>, vector<1x7x32xf32>
    %313 = vector.shape_cast %312 : vector<1x7x32xf32> to vector<7x32xf32>
    %314 = vector.shape_cast %311 : vector<7x32xf32> to vector<1x7x32xf32>
    tpu.vector_store %arg21[%c0_142, %c0_143, %c0_144], %314 {strides = array<i32>} : memref<1x7x32xf32, #tpu.memory_space<vmem>>, vector<1x7x32xf32>,
    %315 = vector.extract_strided_slice %311 {offsets = [0, 0], sizes = [6, 32], strides = [1, 1]} : vector<7x32xf32> to vector<6x32xf32>
    %316 = arith.truncf %315 : vector<6x32xf32> to vector<6x32xbf16>
    %c0_145 = arith.constant 0 : index
    %c0_146 = arith.constant 0 : index
    %317 = vector.load %arg17[%c0_145, %c0_146] : memref<32x16xbf16, #tpu.memory_space<vmem>>, vector<32x16xbf16>
    %cst_147 = arith.constant dense<0.000000e+00> : vector<6x16xf32>
    %318 = tpu.matmul %316, %317, %cst_147 {dimension_numbers = #tpu.dot_dimension_numbers<[1], [0], [0], [1], [0, 0, 1, 1], [], []>} : vector<6x32xbf16>, vector<32x16xbf16>, vector<6x16xf32> -> vector<6x16xf32>
    %c0_148 = arith.constant 0 : index
    %c0_149 = arith.constant 0 : index
    %319 = vector.load %arg18[%c0_148, %c0_149] : memref<1x16xf32, #tpu.memory_space<vmem>>, vector<1x16xf32>
    %320 = vector.broadcast %319 : vector<1x16xf32> to vector<6x16xf32>
    %321 = arith.addf %318, %320 : vector<6x16xf32>
    %cst_150 = arith.constant 0.000000e+00 : f32
    %322 = vector.broadcast %cst_150 : f32 to vector<6x16xf32>
    %323 = arith.maximumf %321, %322 : vector<6x16xf32>
    %324 = arith.truncf %323 : vector<6x16xf32> to vector<6x16xbf16>
    %c0_151 = arith.constant 0 : index
    %c0_152 = arith.constant 0 : index
    %325 = vector.load %arg19[%c0_151, %c0_152] : memref<16x1xbf16, #tpu.memory_space<vmem>>, vector<16x1xbf16>
    %cst_153 = arith.constant dense<0.000000e+00> : vector<6x1xf32>
    %326 = tpu.matmul %324, %325, %cst_153 {dimension_numbers = #tpu.dot_dimension_numbers<[1], [0], [0], [1], [0, 0, 1, 1], [], []>} : vector<6x16xbf16>, vector<16x1xbf16>, vector<6x1xf32> -> vector<6x1xf32>
    %c0_154 = arith.constant 0 : index
    %c0_155 = arith.constant 0 : index
    %327 = vector.load %arg20[%c0_154, %c0_155] : memref<1x1xf32, #tpu.memory_space<vmem>>, vector<1x1xf32>
    %328 = vector.broadcast %327 : vector<1x1xf32> to vector<6x1xf32>
    %329 = arith.addf %326, %328 : vector<6x1xf32>
    %cst_156 = arith.constant 0.000000e+00 : f32
    %330 = vector.broadcast %cst_156 : f32 to vector<6x1xf32>
    %331 = arith.subf %330, %329 : vector<6x1xf32>
    %332 = math.exp %331 : vector<6x1xf32>
    %cst_157 = arith.constant 1.000000e+00 : f32
    %333 = vector.broadcast %cst_157 : f32 to vector<6x1xf32>
    %334 = arith.addf %333, %332 : vector<6x1xf32>
    %cst_158 = arith.constant 1.000000e+00 : f32
    %335 = vector.broadcast %cst_158 : f32 to vector<6x1xf32>
    %336 = arith.divf %335, %334 : vector<6x1xf32>
    %cst_159 = arith.constant dense<0.000000e+00> : vector<1xf32>
    %337 = vector.multi_reduction <add>, %336, %cst_159 [0] : vector<6x1xf32> to vector<1xf32>
    %338 = vector.shape_cast %337 : vector<1xf32> to vector<1x1xf32>
    %c0_160 = arith.constant 0 : index
    %c0_161 = arith.constant 0 : index
    %c0_162 = arith.constant 0 : index
    %339 = vector.load %arg22[%c0_160, %c0_161, %c0_162] : memref<1x1x1xf32, #tpu.memory_space<vmem>>, vector<1x1x1xf32>
    %340 = vector.shape_cast %339 : vector<1x1x1xf32> to vector<1x1xf32>
    %341 = vector.shape_cast %338 : vector<1x1xf32> to vector<1x1x1xf32>
    tpu.vector_store %arg22[%c0_160, %c0_161, %c0_162], %341 {strides = array<i32>} : memref<1x1x1xf32, #tpu.memory_space<vmem>>, vector<1x1x1xf32>,
    return
  }
  func.func @transform_0(%arg0: i32) -> (i32, i32, i32) {
    %c0_i32 = arith.constant 0 : i32
    %c0_i32_0 = arith.constant 0 : i32
    %c0_i32_1 = arith.constant 0 : i32
    return %arg0, %c0_i32, %c0_i32_0 : i32, i32, i32
  }
  func.func @transform_1(%arg0: i32) -> (i32, i32, i32) {
    %c0_i32 = arith.constant 0 : i32
    %c0_i32_0 = arith.constant 0 : i32
    %c0_i32_1 = arith.constant 0 : i32
    return %arg0, %c0_i32, %c0_i32_0 : i32, i32, i32
  }
  func.func @transform_2(%arg0: i32) -> (i32, i32, i32) {
    %c0_i32 = arith.constant 0 : i32
    %c0_i32_0 = arith.constant 0 : i32
    %c0_i32_1 = arith.constant 0 : i32
    %c0_i32_2 = arith.constant 0 : i32
    return %c0_i32, %c0_i32_0, %c0_i32_1 : i32, i32, i32
  }
  func.func @transform_3(%arg0: i32) -> (i32, i32, i32) {
    %c0_i32 = arith.constant 0 : i32
    %c0_i32_0 = arith.constant 0 : i32
    %c0_i32_1 = arith.constant 0 : i32
    %c0_i32_2 = arith.constant 0 : i32
    return %c0_i32, %c0_i32_0, %c0_i32_1 : i32, i32, i32
  }
  func.func @transform_4(%arg0: i32) -> (i32, i32, i32) {
    %c0_i32 = arith.constant 0 : i32
    %c0_i32_0 = arith.constant 0 : i32
    %c0_i32_1 = arith.constant 0 : i32
    %c0_i32_2 = arith.constant 0 : i32
    return %c0_i32, %c0_i32_0, %c0_i32_1 : i32, i32, i32
  }
  func.func @transform_5(%arg0: i32) -> (i32, i32, i32) {
    %c0_i32 = arith.constant 0 : i32
    %c0_i32_0 = arith.constant 0 : i32
    %c0_i32_1 = arith.constant 0 : i32
    %c0_i32_2 = arith.constant 0 : i32
    return %c0_i32, %c0_i32_0, %c0_i32_1 : i32, i32, i32
  }
  func.func @transform_6(%arg0: i32) -> (i32, i32, i32) {
    %c0_i32 = arith.constant 0 : i32
    %c0_i32_0 = arith.constant 0 : i32
    %c0_i32_1 = arith.constant 0 : i32
    %c0_i32_2 = arith.constant 0 : i32
    return %c0_i32, %c0_i32_0, %c0_i32_1 : i32, i32, i32
  }
  func.func @transform_7(%arg0: i32) -> (i32, i32, i32) {
    %c0_i32 = arith.constant 0 : i32
    %c0_i32_0 = arith.constant 0 : i32
    %c0_i32_1 = arith.constant 0 : i32
    %c0_i32_2 = arith.constant 0 : i32
    return %c0_i32, %c0_i32_0, %c0_i32_1 : i32, i32, i32
  }
  func.func @transform_8(%arg0: i32) -> (i32, i32, i32) {
    %c0_i32 = arith.constant 0 : i32
    %c0_i32_0 = arith.constant 0 : i32
    %c0_i32_1 = arith.constant 0 : i32
    %c0_i32_2 = arith.constant 0 : i32
    return %c0_i32, %c0_i32_0, %c0_i32_1 : i32, i32, i32
  }
  func.func @transform_9(%arg0: i32) -> (i32, i32, i32) {
    %c0_i32 = arith.constant 0 : i32
    %c0_i32_0 = arith.constant 0 : i32
    %c0_i32_1 = arith.constant 0 : i32
    %c0_i32_2 = arith.constant 0 : i32
    return %c0_i32, %c0_i32_0, %c0_i32_1 : i32, i32, i32
  }
  func.func @transform_10(%arg0: i32) -> (i32, i32, i32) {
    %c0_i32 = arith.constant 0 : i32
    %c0_i32_0 = arith.constant 0 : i32
    %c0_i32_1 = arith.constant 0 : i32
    %c0_i32_2 = arith.constant 0 : i32
    return %c0_i32, %c0_i32_0, %c0_i32_1 : i32, i32, i32
  }
  func.func @transform_11(%arg0: i32) -> (i32, i32, i32) {
    %c0_i32 = arith.constant 0 : i32
    %c0_i32_0 = arith.constant 0 : i32
    %c0_i32_1 = arith.constant 0 : i32
    %c0_i32_2 = arith.constant 0 : i32
    return %c0_i32, %c0_i32_0, %c0_i32_1 : i32, i32, i32
  }
  func.func @transform_12(%arg0: i32) -> (i32, i32, i32) {
    %c0_i32 = arith.constant 0 : i32
    %c0_i32_0 = arith.constant 0 : i32
    %c0_i32_1 = arith.constant 0 : i32
    %c0_i32_2 = arith.constant 0 : i32
    return %c0_i32, %c0_i32_0, %c0_i32_1 : i32, i32, i32
  }
  func.func @transform_13(%arg0: i32) -> (i32, i32, i32) {
    %c0_i32 = arith.constant 0 : i32
    %c0_i32_0 = arith.constant 0 : i32
    %c0_i32_1 = arith.constant 0 : i32
    %c0_i32_2 = arith.constant 0 : i32
    return %c0_i32, %c0_i32_0, %c0_i32_1 : i32, i32, i32
  }
  func.func @transform_14(%arg0: i32) -> (i32, i32) {
    %c0_i32 = arith.constant 0 : i32
    %c0_i32_0 = arith.constant 0 : i32
    %c0_i32_1 = arith.constant 0 : i32
    return %c0_i32, %c0_i32_0 : i32, i32
  }
  func.func @transform_15(%arg0: i32) -> (i32, i32) {
    %c0_i32 = arith.constant 0 : i32
    %c0_i32_0 = arith.constant 0 : i32
    %c0_i32_1 = arith.constant 0 : i32
    return %c0_i32, %c0_i32_0 : i32, i32
  }
  func.func @transform_16(%arg0: i32) -> (i32, i32) {
    %c0_i32 = arith.constant 0 : i32
    %c0_i32_0 = arith.constant 0 : i32
    %c0_i32_1 = arith.constant 0 : i32
    return %c0_i32, %c0_i32_0 : i32, i32
  }
  func.func @transform_17(%arg0: i32) -> (i32, i32) {
    %c0_i32 = arith.constant 0 : i32
    %c0_i32_0 = arith.constant 0 : i32
    %c0_i32_1 = arith.constant 0 : i32
    return %c0_i32, %c0_i32_0 : i32, i32
  }
  func.func @transform_18(%arg0: i32) -> (i32, i32) {
    %c0_i32 = arith.constant 0 : i32
    %c0_i32_0 = arith.constant 0 : i32
    %c0_i32_1 = arith.constant 0 : i32
    return %c0_i32, %c0_i32_0 : i32, i32
  }
  func.func @transform_19(%arg0: i32) -> (i32, i32) {
    %c0_i32 = arith.constant 0 : i32
    %c0_i32_0 = arith.constant 0 : i32
    %c0_i32_1 = arith.constant 0 : i32
    return %c0_i32, %c0_i32_0 : i32, i32
  }
  func.func @transform_20(%arg0: i32) -> (i32, i32, i32) {
    %c0_i32 = arith.constant 0 : i32
    %c0_i32_0 = arith.constant 0 : i32
    %c0_i32_1 = arith.constant 0 : i32
    return %arg0, %c0_i32, %c0_i32_0 : i32, i32, i32
  }
  func.func @transform_21(%arg0: i32) -> (i32, i32, i32) {
    %c0_i32 = arith.constant 0 : i32
    %c0_i32_0 = arith.constant 0 : i32
    %c0_i32_1 = arith.constant 0 : i32
    return %arg0, %c0_i32, %c0_i32_0 : i32, i32, i32
  }
}

module attributes {stable_mosaic.version = 11 : i64} {
  func.func @_last_logits_kernel(%arg0: i32, %arg1: memref<2x8x32xf32, #tpu.memory_space<vmem>>, %arg2: memref<2x1x32xf32, #tpu.memory_space<vmem>>, %arg3: memref<2x1x32xf32, #tpu.memory_space<vmem>>, %arg4: memref<2x32x96xbf16, #tpu.memory_space<vmem>>, %arg5: memref<2x1x96xf32, #tpu.memory_space<vmem>>, %arg6: memref<2x32x32xbf16, #tpu.memory_space<vmem>>, %arg7: memref<2x1x32xf32, #tpu.memory_space<vmem>>, %arg8: memref<2x1x32xf32, #tpu.memory_space<vmem>>, %arg9: memref<2x1x32xf32, #tpu.memory_space<vmem>>, %arg10: memref<2x32x128xbf16, #tpu.memory_space<vmem>>, %arg11: memref<2x1x128xf32, #tpu.memory_space<vmem>>, %arg12: memref<2x128x32xbf16, #tpu.memory_space<vmem>>, %arg13: memref<2x1x32xf32, #tpu.memory_space<vmem>>, %arg14: memref<1x32xf32, #tpu.memory_space<vmem>>, %arg15: memref<1x32xf32, #tpu.memory_space<vmem>>, %arg16: memref<32x128xbf16, #tpu.memory_space<vmem>>, %arg17: memref<8x128xf32, #tpu.memory_space<vmem>>) attributes {dimension_semantics = [#tpu.dimension_semantics<parallel>], iteration_bounds = array<i64: 3>, scalar_prefetch = 0 : i64, scratch_operands = 0 : i64, tpu.core_type = #tpu.core_type<tc>, window_params = [{transform_indices = @transform_0, window_bounds = array<i64: 2, 8, 32>}, {pipeline_mode = #tpu.pipeline_mode<synchronous>, transform_indices = @transform_1, window_bounds = array<i64: 2, 1, 32>}, {pipeline_mode = #tpu.pipeline_mode<synchronous>, transform_indices = @transform_2, window_bounds = array<i64: 2, 1, 32>}, {pipeline_mode = #tpu.pipeline_mode<synchronous>, transform_indices = @transform_3, window_bounds = array<i64: 2, 32, 96>}, {pipeline_mode = #tpu.pipeline_mode<synchronous>, transform_indices = @transform_4, window_bounds = array<i64: 2, 1, 96>}, {pipeline_mode = #tpu.pipeline_mode<synchronous>, transform_indices = @transform_5, window_bounds = array<i64: 2, 32, 32>}, {pipeline_mode = #tpu.pipeline_mode<synchronous>, transform_indices = @transform_6, window_bounds = array<i64: 2, 1, 32>}, {pipeline_mode = #tpu.pipeline_mode<synchronous>, transform_indices = @transform_7, window_bounds = array<i64: 2, 1, 32>}, {pipeline_mode = #tpu.pipeline_mode<synchronous>, transform_indices = @transform_8, window_bounds = array<i64: 2, 1, 32>}, {pipeline_mode = #tpu.pipeline_mode<synchronous>, transform_indices = @transform_9, window_bounds = array<i64: 2, 32, 128>}, {pipeline_mode = #tpu.pipeline_mode<synchronous>, transform_indices = @transform_10, window_bounds = array<i64: 2, 1, 128>}, {pipeline_mode = #tpu.pipeline_mode<synchronous>, transform_indices = @transform_11, window_bounds = array<i64: 2, 128, 32>}, {pipeline_mode = #tpu.pipeline_mode<synchronous>, transform_indices = @transform_12, window_bounds = array<i64: 2, 1, 32>}, {pipeline_mode = #tpu.pipeline_mode<synchronous>, transform_indices = @transform_13, window_bounds = array<i64: 1, 32>}, {pipeline_mode = #tpu.pipeline_mode<synchronous>, transform_indices = @transform_14, window_bounds = array<i64: 1, 32>}, {pipeline_mode = #tpu.pipeline_mode<synchronous>, transform_indices = @transform_15, window_bounds = array<i64: 32, 128>}, {transform_indices = @transform_16, window_bounds = array<i64: 8, 128>}]} {
    %c0 = arith.constant 0 : index
    %c0_0 = arith.constant 0 : index
    %c0_1 = arith.constant 0 : index
    %0 = vector.load %arg1[%c0, %c0_0, %c0_1] : memref<2x8x32xf32, #tpu.memory_space<vmem>>, vector<1x8x32xf32>
    %1 = vector.shape_cast %0 : vector<1x8x32xf32> to vector<8x32xf32>
    %c1 = arith.constant 1 : index
    %c0_2 = arith.constant 0 : index
    %c0_3 = arith.constant 0 : index
    %2 = vector.load %arg1[%c1, %c0_2, %c0_3] : memref<2x8x32xf32, #tpu.memory_space<vmem>>, vector<1x8x32xf32>
    %3 = vector.shape_cast %2 : vector<1x8x32xf32> to vector<8x32xf32>
    %c0_4 = arith.constant 0 : index
    %c0_5 = arith.constant 0 : index
    %c0_6 = arith.constant 0 : index
    %4 = vector.load %arg2[%c0_4, %c0_5, %c0_6] : memref<2x1x32xf32, #tpu.memory_space<vmem>>, vector<1x1x32xf32>
    %5 = vector.shape_cast %4 : vector<1x1x32xf32> to vector<1x32xf32>
    %c0_7 = arith.constant 0 : index
    %c0_8 = arith.constant 0 : index
    %c0_9 = arith.constant 0 : index
    %6 = vector.load %arg3[%c0_7, %c0_8, %c0_9] : memref<2x1x32xf32, #tpu.memory_space<vmem>>, vector<1x1x32xf32>
    %7 = vector.shape_cast %6 : vector<1x1x32xf32> to vector<1x32xf32>
    %cst = arith.constant dense<0.000000e+00> : vector<8xf32>
    %8 = vector.multi_reduction <add>, %1, %cst [1] : vector<8x32xf32> to vector<8xf32>
    %9 = vector.shape_cast %8 : vector<8xf32> to vector<8x1xf32>
    %cst_10 = arith.constant 3.200000e+01 : f32
    %10 = vector.broadcast %cst_10 : f32 to vector<8x1xf32>
    %11 = arith.divf %9, %10 : vector<8x1xf32>
    %12 = vector.broadcast %11 : vector<8x1xf32> to vector<8x32xf32>
    %13 = arith.subf %1, %12 : vector<8x32xf32>
    %14 = arith.mulf %13, %13 : vector<8x32xf32>
    %cst_11 = arith.constant dense<0.000000e+00> : vector<8xf32>
    %15 = vector.multi_reduction <add>, %14, %cst_11 [1] : vector<8x32xf32> to vector<8xf32>
    %16 = vector.shape_cast %15 : vector<8xf32> to vector<8x1xf32>
    %cst_12 = arith.constant 3.200000e+01 : f32
    %17 = vector.broadcast %cst_12 : f32 to vector<8x1xf32>
    %18 = arith.divf %16, %17 : vector<8x1xf32>
    %19 = vector.broadcast %11 : vector<8x1xf32> to vector<8x32xf32>
    %20 = arith.subf %1, %19 : vector<8x32xf32>
    %cst_13 = arith.constant 9.99999974E-6 : f32
    %21 = vector.broadcast %cst_13 : f32 to vector<8x1xf32>
    %22 = arith.addf %18, %21 : vector<8x1xf32>
    %23 = math.rsqrt %22 : vector<8x1xf32>
    %24 = vector.broadcast %23 : vector<8x1xf32> to vector<8x32xf32>
    %25 = arith.mulf %20, %24 : vector<8x32xf32>
    %26 = vector.broadcast %5 : vector<1x32xf32> to vector<8x32xf32>
    %27 = arith.mulf %25, %26 : vector<8x32xf32>
    %28 = vector.broadcast %7 : vector<1x32xf32> to vector<8x32xf32>
    %29 = arith.addf %27, %28 : vector<8x32xf32>
    %30 = arith.truncf %29 : vector<8x32xf32> to vector<8x32xbf16>
    %c0_14 = arith.constant 0 : index
    %c0_15 = arith.constant 0 : index
    %c0_16 = arith.constant 0 : index
    %31 = vector.load %arg4[%c0_14, %c0_15, %c0_16] : memref<2x32x96xbf16, #tpu.memory_space<vmem>>, vector<1x32x96xbf16>
    %32 = vector.shape_cast %31 : vector<1x32x96xbf16> to vector<32x96xbf16>
    %cst_17 = arith.constant dense<0.000000e+00> : vector<8x96xf32>
    %33 = tpu.matmul %30, %32, %cst_17 {dimension_numbers = #tpu.dot_dimension_numbers<[1], [0], [0], [1], [0, 0, 1, 1], [], []>} : vector<8x32xbf16>, vector<32x96xbf16>, vector<8x96xf32> -> vector<8x96xf32>
    %c0_18 = arith.constant 0 : index
    %c0_19 = arith.constant 0 : index
    %c0_20 = arith.constant 0 : index
    %34 = vector.load %arg5[%c0_18, %c0_19, %c0_20] : memref<2x1x96xf32, #tpu.memory_space<vmem>>, vector<1x1x96xf32>
    %35 = vector.shape_cast %34 : vector<1x1x96xf32> to vector<1x96xf32>
    %36 = vector.broadcast %35 : vector<1x96xf32> to vector<8x96xf32>
    %37 = arith.addf %33, %36 : vector<8x96xf32>
    %c0_21 = arith.constant 0 : index
    %c0_22 = arith.constant 0 : index
    %c0_23 = arith.constant 0 : index
    %38 = vector.load %arg2[%c0_21, %c0_22, %c0_23] : memref<2x1x32xf32, #tpu.memory_space<vmem>>, vector<1x1x32xf32>
    %39 = vector.shape_cast %38 : vector<1x1x32xf32> to vector<1x32xf32>
    %c0_24 = arith.constant 0 : index
    %c0_25 = arith.constant 0 : index
    %c0_26 = arith.constant 0 : index
    %40 = vector.load %arg3[%c0_24, %c0_25, %c0_26] : memref<2x1x32xf32, #tpu.memory_space<vmem>>, vector<1x1x32xf32>
    %41 = vector.shape_cast %40 : vector<1x1x32xf32> to vector<1x32xf32>
    %cst_27 = arith.constant dense<0.000000e+00> : vector<8xf32>
    %42 = vector.multi_reduction <add>, %3, %cst_27 [1] : vector<8x32xf32> to vector<8xf32>
    %43 = vector.shape_cast %42 : vector<8xf32> to vector<8x1xf32>
    %cst_28 = arith.constant 3.200000e+01 : f32
    %44 = vector.broadcast %cst_28 : f32 to vector<8x1xf32>
    %45 = arith.divf %43, %44 : vector<8x1xf32>
    %46 = vector.broadcast %45 : vector<8x1xf32> to vector<8x32xf32>
    %47 = arith.subf %3, %46 : vector<8x32xf32>
    %48 = arith.mulf %47, %47 : vector<8x32xf32>
    %cst_29 = arith.constant dense<0.000000e+00> : vector<8xf32>
    %49 = vector.multi_reduction <add>, %48, %cst_29 [1] : vector<8x32xf32> to vector<8xf32>
    %50 = vector.shape_cast %49 : vector<8xf32> to vector<8x1xf32>
    %cst_30 = arith.constant 3.200000e+01 : f32
    %51 = vector.broadcast %cst_30 : f32 to vector<8x1xf32>
    %52 = arith.divf %50, %51 : vector<8x1xf32>
    %53 = vector.broadcast %45 : vector<8x1xf32> to vector<8x32xf32>
    %54 = arith.subf %3, %53 : vector<8x32xf32>
    %cst_31 = arith.constant 9.99999974E-6 : f32
    %55 = vector.broadcast %cst_31 : f32 to vector<8x1xf32>
    %56 = arith.addf %52, %55 : vector<8x1xf32>
    %57 = math.rsqrt %56 : vector<8x1xf32>
    %58 = vector.broadcast %57 : vector<8x1xf32> to vector<8x32xf32>
    %59 = arith.mulf %54, %58 : vector<8x32xf32>
    %60 = vector.broadcast %39 : vector<1x32xf32> to vector<8x32xf32>
    %61 = arith.mulf %59, %60 : vector<8x32xf32>
    %62 = vector.broadcast %41 : vector<1x32xf32> to vector<8x32xf32>
    %63 = arith.addf %61, %62 : vector<8x32xf32>
    %64 = arith.truncf %63 : vector<8x32xf32> to vector<8x32xbf16>
    %c0_32 = arith.constant 0 : index
    %c0_33 = arith.constant 0 : index
    %c0_34 = arith.constant 0 : index
    %65 = vector.load %arg4[%c0_32, %c0_33, %c0_34] : memref<2x32x96xbf16, #tpu.memory_space<vmem>>, vector<1x32x96xbf16>
    %66 = vector.shape_cast %65 : vector<1x32x96xbf16> to vector<32x96xbf16>
    %cst_35 = arith.constant dense<0.000000e+00> : vector<8x96xf32>
    %67 = tpu.matmul %64, %66, %cst_35 {dimension_numbers = #tpu.dot_dimension_numbers<[1], [0], [0], [1], [0, 0, 1, 1], [], []>} : vector<8x32xbf16>, vector<32x96xbf16>, vector<8x96xf32> -> vector<8x96xf32>
    %c0_36 = arith.constant 0 : index
    %c0_37 = arith.constant 0 : index
    %c0_38 = arith.constant 0 : index
    %68 = vector.load %arg5[%c0_36, %c0_37, %c0_38] : memref<2x1x96xf32, #tpu.memory_space<vmem>>, vector<1x1x96xf32>
    %69 = vector.shape_cast %68 : vector<1x1x96xf32> to vector<1x96xf32>
    %70 = vector.broadcast %69 : vector<1x96xf32> to vector<8x96xf32>
    %71 = arith.addf %67, %70 : vector<8x96xf32>
    %72 = vector.extract_strided_slice %37 {offsets = [0, 0], sizes = [8, 16], strides = [1, 1]} : vector<8x96xf32> to vector<8x16xf32>
    %73 = vector.extract_strided_slice %37 {offsets = [0, 32], sizes = [8, 16], strides = [1, 1]} : vector<8x96xf32> to vector<8x16xf32>
    %74 = vector.extract_strided_slice %37 {offsets = [0, 64], sizes = [8, 16], strides = [1, 1]} : vector<8x96xf32> to vector<8x16xf32>
    %75 = arith.mulf %72, %73 : vector<8x16xf32>
    %cst_39 = arith.constant dense<0.000000e+00> : vector<8xf32>
    %76 = vector.multi_reduction <add>, %75, %cst_39 [1] : vector<8x16xf32> to vector<8xf32>
    %77 = vector.shape_cast %76 : vector<8xf32> to vector<8x1xf32>
    %cst_40 = arith.constant 2.500000e-01 : f32
    %78 = vector.broadcast %cst_40 : f32 to vector<8x1xf32>
    %79 = arith.mulf %77, %78 : vector<8x1xf32>
    %cst_41 = arith.constant dense<0xFF800000> : vector<8xf32>
    %80 = vector.multi_reduction <maximumf>, %79, %cst_41 [1] : vector<8x1xf32> to vector<8xf32>
    %81 = vector.shape_cast %80 : vector<8xf32> to vector<8x1xf32>
    %82 = arith.subf %79, %81 : vector<8x1xf32>
    %83 = math.exp %82 : vector<8x1xf32>
    %cst_42 = arith.constant dense<0.000000e+00> : vector<8xf32>
    %84 = vector.multi_reduction <add>, %83, %cst_42 [1] : vector<8x1xf32> to vector<8xf32>
    %85 = vector.shape_cast %84 : vector<8xf32> to vector<8x1xf32>
    %86 = arith.divf %83, %85 : vector<8x1xf32>
    %87 = vector.broadcast %86 : vector<8x1xf32> to vector<8x16xf32>
    %88 = arith.mulf %87, %74 : vector<8x16xf32>
    %89 = vector.extract_strided_slice %37 {offsets = [0, 16], sizes = [8, 16], strides = [1, 1]} : vector<8x96xf32> to vector<8x16xf32>
    %90 = vector.extract_strided_slice %37 {offsets = [0, 48], sizes = [8, 16], strides = [1, 1]} : vector<8x96xf32> to vector<8x16xf32>
    %91 = vector.extract_strided_slice %37 {offsets = [0, 80], sizes = [8, 16], strides = [1, 1]} : vector<8x96xf32> to vector<8x16xf32>
    %92 = arith.mulf %89, %90 : vector<8x16xf32>
    %cst_43 = arith.constant dense<0.000000e+00> : vector<8xf32>
    %93 = vector.multi_reduction <add>, %92, %cst_43 [1] : vector<8x16xf32> to vector<8xf32>
    %94 = vector.shape_cast %93 : vector<8xf32> to vector<8x1xf32>
    %cst_44 = arith.constant 2.500000e-01 : f32
    %95 = vector.broadcast %cst_44 : f32 to vector<8x1xf32>
    %96 = arith.mulf %94, %95 : vector<8x1xf32>
    %cst_45 = arith.constant dense<0xFF800000> : vector<8xf32>
    %97 = vector.multi_reduction <maximumf>, %96, %cst_45 [1] : vector<8x1xf32> to vector<8xf32>
    %98 = vector.shape_cast %97 : vector<8xf32> to vector<8x1xf32>
    %99 = arith.subf %96, %98 : vector<8x1xf32>
    %100 = math.exp %99 : vector<8x1xf32>
    %cst_46 = arith.constant dense<0.000000e+00> : vector<8xf32>
    %101 = vector.multi_reduction <add>, %100, %cst_46 [1] : vector<8x1xf32> to vector<8xf32>
    %102 = vector.shape_cast %101 : vector<8xf32> to vector<8x1xf32>
    %103 = arith.divf %100, %102 : vector<8x1xf32>
    %104 = vector.broadcast %103 : vector<8x1xf32> to vector<8x16xf32>
    %105 = arith.mulf %104, %91 : vector<8x16xf32>
    %106 = tpu.concatenate %88, %105 in 1 : vector<8x16xf32>, vector<8x16xf32> -> vector<8x32xf32>
    %107 = arith.truncf %106 : vector<8x32xf32> to vector<8x32xbf16>
    %c0_47 = arith.constant 0 : index
    %c0_48 = arith.constant 0 : index
    %c0_49 = arith.constant 0 : index
    %108 = vector.load %arg6[%c0_47, %c0_48, %c0_49] : memref<2x32x32xbf16, #tpu.memory_space<vmem>>, vector<1x32x32xbf16>
    %109 = vector.shape_cast %108 : vector<1x32x32xbf16> to vector<32x32xbf16>
    %cst_50 = arith.constant dense<0.000000e+00> : vector<8x32xf32>
    %110 = tpu.matmul %107, %109, %cst_50 {dimension_numbers = #tpu.dot_dimension_numbers<[1], [0], [0], [1], [0, 0, 1, 1], [], []>} : vector<8x32xbf16>, vector<32x32xbf16>, vector<8x32xf32> -> vector<8x32xf32>
    %c0_51 = arith.constant 0 : index
    %c0_52 = arith.constant 0 : index
    %c0_53 = arith.constant 0 : index
    %111 = vector.load %arg7[%c0_51, %c0_52, %c0_53] : memref<2x1x32xf32, #tpu.memory_space<vmem>>, vector<1x1x32xf32>
    %112 = vector.shape_cast %111 : vector<1x1x32xf32> to vector<1x32xf32>
    %113 = vector.broadcast %112 : vector<1x32xf32> to vector<8x32xf32>
    %114 = arith.addf %110, %113 : vector<8x32xf32>
    %115 = arith.addf %1, %114 : vector<8x32xf32>
    %116 = vector.extract_strided_slice %71 {offsets = [0, 0], sizes = [8, 16], strides = [1, 1]} : vector<8x96xf32> to vector<8x16xf32>
    %117 = vector.extract_strided_slice %37 {offsets = [0, 32], sizes = [8, 16], strides = [1, 1]} : vector<8x96xf32> to vector<8x16xf32>
    %118 = vector.extract_strided_slice %71 {offsets = [0, 32], sizes = [8, 16], strides = [1, 1]} : vector<8x96xf32> to vector<8x16xf32>
    %119 = vector.extract_strided_slice %37 {offsets = [0, 64], sizes = [8, 16], strides = [1, 1]} : vector<8x96xf32> to vector<8x16xf32>
    %120 = vector.extract_strided_slice %71 {offsets = [0, 64], sizes = [8, 16], strides = [1, 1]} : vector<8x96xf32> to vector<8x16xf32>
    %121 = arith.mulf %116, %117 : vector<8x16xf32>
    %cst_54 = arith.constant dense<0.000000e+00> : vector<8xf32>
    %122 = vector.multi_reduction <add>, %121, %cst_54 [1] : vector<8x16xf32> to vector<8xf32>
    %123 = vector.shape_cast %122 : vector<8xf32> to vector<8x1xf32>
    %cst_55 = arith.constant 2.500000e-01 : f32
    %124 = vector.broadcast %cst_55 : f32 to vector<8x1xf32>
    %125 = arith.mulf %123, %124 : vector<8x1xf32>
    %126 = arith.mulf %116, %118 : vector<8x16xf32>
    %cst_56 = arith.constant dense<0.000000e+00> : vector<8xf32>
    %127 = vector.multi_reduction <add>, %126, %cst_56 [1] : vector<8x16xf32> to vector<8xf32>
    %128 = vector.shape_cast %127 : vector<8xf32> to vector<8x1xf32>
    %cst_57 = arith.constant 2.500000e-01 : f32
    %129 = vector.broadcast %cst_57 : f32 to vector<8x1xf32>
    %130 = arith.mulf %128, %129 : vector<8x1xf32>
    %131 = tpu.concatenate %125, %130 in 1 : vector<8x1xf32>, vector<8x1xf32> -> vector<8x2xf32>
    %cst_58 = arith.constant dense<0xFF800000> : vector<8xf32>
    %132 = vector.multi_reduction <maximumf>, %131, %cst_58 [1] : vector<8x2xf32> to vector<8xf32>
    %133 = vector.shape_cast %132 : vector<8xf32> to vector<8x1xf32>
    %134 = vector.broadcast %133 : vector<8x1xf32> to vector<8x2xf32>
    %135 = arith.subf %131, %134 : vector<8x2xf32>
    %136 = math.exp %135 : vector<8x2xf32>
    %cst_59 = arith.constant dense<0.000000e+00> : vector<8xf32>
    %137 = vector.multi_reduction <add>, %136, %cst_59 [1] : vector<8x2xf32> to vector<8xf32>
    %138 = vector.shape_cast %137 : vector<8xf32> to vector<8x1xf32>
    %139 = vector.broadcast %138 : vector<8x1xf32> to vector<8x2xf32>
    %140 = arith.divf %136, %139 : vector<8x2xf32>
    %141 = vector.extract_strided_slice %140 {offsets = [0, 0], sizes = [8, 1], strides = [1, 1]} : vector<8x2xf32> to vector<8x1xf32>
    %142 = vector.broadcast %141 : vector<8x1xf32> to vector<8x16xf32>
    %143 = arith.mulf %142, %119 : vector<8x16xf32>
    %144 = vector.extract_strided_slice %140 {offsets = [0, 1], sizes = [8, 1], strides = [1, 1]} : vector<8x2xf32> to vector<8x1xf32>
    %145 = vector.broadcast %144 : vector<8x1xf32> to vector<8x16xf32>
    %146 = arith.mulf %145, %120 : vector<8x16xf32>
    %147 = arith.addf %143, %146 : vector<8x16xf32>
    %148 = vector.extract_strided_slice %71 {offsets = [0, 16], sizes = [8, 16], strides = [1, 1]} : vector<8x96xf32> to vector<8x16xf32>
    %149 = vector.extract_strided_slice %37 {offsets = [0, 48], sizes = [8, 16], strides = [1, 1]} : vector<8x96xf32> to vector<8x16xf32>
    %150 = vector.extract_strided_slice %71 {offsets = [0, 48], sizes = [8, 16], strides = [1, 1]} : vector<8x96xf32> to vector<8x16xf32>
    %151 = vector.extract_strided_slice %37 {offsets = [0, 80], sizes = [8, 16], strides = [1, 1]} : vector<8x96xf32> to vector<8x16xf32>
    %152 = vector.extract_strided_slice %71 {offsets = [0, 80], sizes = [8, 16], strides = [1, 1]} : vector<8x96xf32> to vector<8x16xf32>
    %153 = arith.mulf %148, %149 : vector<8x16xf32>
    %cst_60 = arith.constant dense<0.000000e+00> : vector<8xf32>
    %154 = vector.multi_reduction <add>, %153, %cst_60 [1] : vector<8x16xf32> to vector<8xf32>
    %155 = vector.shape_cast %154 : vector<8xf32> to vector<8x1xf32>
    %cst_61 = arith.constant 2.500000e-01 : f32
    %156 = vector.broadcast %cst_61 : f32 to vector<8x1xf32>
    %157 = arith.mulf %155, %156 : vector<8x1xf32>
    %158 = arith.mulf %148, %150 : vector<8x16xf32>
    %cst_62 = arith.constant dense<0.000000e+00> : vector<8xf32>
    %159 = vector.multi_reduction <add>, %158, %cst_62 [1] : vector<8x16xf32> to vector<8xf32>
    %160 = vector.shape_cast %159 : vector<8xf32> to vector<8x1xf32>
    %cst_63 = arith.constant 2.500000e-01 : f32
    %161 = vector.broadcast %cst_63 : f32 to vector<8x1xf32>
    %162 = arith.mulf %160, %161 : vector<8x1xf32>
    %163 = tpu.concatenate %157, %162 in 1 : vector<8x1xf32>, vector<8x1xf32> -> vector<8x2xf32>
    %cst_64 = arith.constant dense<0xFF800000> : vector<8xf32>
    %164 = vector.multi_reduction <maximumf>, %163, %cst_64 [1] : vector<8x2xf32> to vector<8xf32>
    %165 = vector.shape_cast %164 : vector<8xf32> to vector<8x1xf32>
    %166 = vector.broadcast %165 : vector<8x1xf32> to vector<8x2xf32>
    %167 = arith.subf %163, %166 : vector<8x2xf32>
    %168 = math.exp %167 : vector<8x2xf32>
    %cst_65 = arith.constant dense<0.000000e+00> : vector<8xf32>
    %169 = vector.multi_reduction <add>, %168, %cst_65 [1] : vector<8x2xf32> to vector<8xf32>
    %170 = vector.shape_cast %169 : vector<8xf32> to vector<8x1xf32>
    %171 = vector.broadcast %170 : vector<8x1xf32> to vector<8x2xf32>
    %172 = arith.divf %168, %171 : vector<8x2xf32>
    %173 = vector.extract_strided_slice %172 {offsets = [0, 0], sizes = [8, 1], strides = [1, 1]} : vector<8x2xf32> to vector<8x1xf32>
    %174 = vector.broadcast %173 : vector<8x1xf32> to vector<8x16xf32>
    %175 = arith.mulf %174, %151 : vector<8x16xf32>
    %176 = vector.extract_strided_slice %172 {offsets = [0, 1], sizes = [8, 1], strides = [1, 1]} : vector<8x2xf32> to vector<8x1xf32>
    %177 = vector.broadcast %176 : vector<8x1xf32> to vector<8x16xf32>
    %178 = arith.mulf %177, %152 : vector<8x16xf32>
    %179 = arith.addf %175, %178 : vector<8x16xf32>
    %180 = tpu.concatenate %147, %179 in 1 : vector<8x16xf32>, vector<8x16xf32> -> vector<8x32xf32>
    %181 = arith.truncf %180 : vector<8x32xf32> to vector<8x32xbf16>
    %c0_66 = arith.constant 0 : index
    %c0_67 = arith.constant 0 : index
    %c0_68 = arith.constant 0 : index
    %182 = vector.load %arg6[%c0_66, %c0_67, %c0_68] : memref<2x32x32xbf16, #tpu.memory_space<vmem>>, vector<1x32x32xbf16>
    %183 = vector.shape_cast %182 : vector<1x32x32xbf16> to vector<32x32xbf16>
    %cst_69 = arith.constant dense<0.000000e+00> : vector<8x32xf32>
    %184 = tpu.matmul %181, %183, %cst_69 {dimension_numbers = #tpu.dot_dimension_numbers<[1], [0], [0], [1], [0, 0, 1, 1], [], []>} : vector<8x32xbf16>, vector<32x32xbf16>, vector<8x32xf32> -> vector<8x32xf32>
    %c0_70 = arith.constant 0 : index
    %c0_71 = arith.constant 0 : index
    %c0_72 = arith.constant 0 : index
    %185 = vector.load %arg7[%c0_70, %c0_71, %c0_72] : memref<2x1x32xf32, #tpu.memory_space<vmem>>, vector<1x1x32xf32>
    %186 = vector.shape_cast %185 : vector<1x1x32xf32> to vector<1x32xf32>
    %187 = vector.broadcast %186 : vector<1x32xf32> to vector<8x32xf32>
    %188 = arith.addf %184, %187 : vector<8x32xf32>
    %189 = arith.addf %3, %188 : vector<8x32xf32>
    %c0_73 = arith.constant 0 : index
    %c0_74 = arith.constant 0 : index
    %c0_75 = arith.constant 0 : index
    %190 = vector.load %arg8[%c0_73, %c0_74, %c0_75] : memref<2x1x32xf32, #tpu.memory_space<vmem>>, vector<1x1x32xf32>
    %191 = vector.shape_cast %190 : vector<1x1x32xf32> to vector<1x32xf32>
    %c0_76 = arith.constant 0 : index
    %c0_77 = arith.constant 0 : index
    %c0_78 = arith.constant 0 : index
    %192 = vector.load %arg9[%c0_76, %c0_77, %c0_78] : memref<2x1x32xf32, #tpu.memory_space<vmem>>, vector<1x1x32xf32>
    %193 = vector.shape_cast %192 : vector<1x1x32xf32> to vector<1x32xf32>
    %cst_79 = arith.constant dense<0.000000e+00> : vector<8xf32>
    %194 = vector.multi_reduction <add>, %115, %cst_79 [1] : vector<8x32xf32> to vector<8xf32>
    %195 = vector.shape_cast %194 : vector<8xf32> to vector<8x1xf32>
    %cst_80 = arith.constant 3.200000e+01 : f32
    %196 = vector.broadcast %cst_80 : f32 to vector<8x1xf32>
    %197 = arith.divf %195, %196 : vector<8x1xf32>
    %198 = vector.broadcast %197 : vector<8x1xf32> to vector<8x32xf32>
    %199 = arith.subf %115, %198 : vector<8x32xf32>
    %200 = arith.mulf %199, %199 : vector<8x32xf32>
    %cst_81 = arith.constant dense<0.000000e+00> : vector<8xf32>
    %201 = vector.multi_reduction <add>, %200, %cst_81 [1] : vector<8x32xf32> to vector<8xf32>
    %202 = vector.shape_cast %201 : vector<8xf32> to vector<8x1xf32>
    %cst_82 = arith.constant 3.200000e+01 : f32
    %203 = vector.broadcast %cst_82 : f32 to vector<8x1xf32>
    %204 = arith.divf %202, %203 : vector<8x1xf32>
    %205 = vector.broadcast %197 : vector<8x1xf32> to vector<8x32xf32>
    %206 = arith.subf %115, %205 : vector<8x32xf32>
    %cst_83 = arith.constant 9.99999974E-6 : f32
    %207 = vector.broadcast %cst_83 : f32 to vector<8x1xf32>
    %208 = arith.addf %204, %207 : vector<8x1xf32>
    %209 = math.rsqrt %208 : vector<8x1xf32>
    %210 = vector.broadcast %209 : vector<8x1xf32> to vector<8x32xf32>
    %211 = arith.mulf %206, %210 : vector<8x32xf32>
    %212 = vector.broadcast %191 : vector<1x32xf32> to vector<8x32xf32>
    %213 = arith.mulf %211, %212 : vector<8x32xf32>
    %214 = vector.broadcast %193 : vector<1x32xf32> to vector<8x32xf32>
    %215 = arith.addf %213, %214 : vector<8x32xf32>
    %216 = arith.truncf %215 : vector<8x32xf32> to vector<8x32xbf16>
    %c0_84 = arith.constant 0 : index
    %c0_85 = arith.constant 0 : index
    %c0_86 = arith.constant 0 : index
    %217 = vector.load %arg10[%c0_84, %c0_85, %c0_86] : memref<2x32x128xbf16, #tpu.memory_space<vmem>>, vector<1x32x128xbf16>
    %218 = vector.shape_cast %217 : vector<1x32x128xbf16> to vector<32x128xbf16>
    %cst_87 = arith.constant dense<0.000000e+00> : vector<8x128xf32>
    %219 = tpu.matmul %216, %218, %cst_87 {dimension_numbers = #tpu.dot_dimension_numbers<[1], [0], [0], [1], [0, 0, 1, 1], [], []>} : vector<8x32xbf16>, vector<32x128xbf16>, vector<8x128xf32> -> vector<8x128xf32>
    %c0_88 = arith.constant 0 : index
    %c0_89 = arith.constant 0 : index
    %c0_90 = arith.constant 0 : index
    %220 = vector.load %arg11[%c0_88, %c0_89, %c0_90] : memref<2x1x128xf32, #tpu.memory_space<vmem>>, vector<1x1x128xf32>
    %221 = vector.shape_cast %220 : vector<1x1x128xf32> to vector<1x128xf32>
    %222 = vector.broadcast %221 : vector<1x128xf32> to vector<8x128xf32>
    %223 = arith.addf %219, %222 : vector<8x128xf32>
    %cst_91 = arith.constant 5.000000e-01 : f32
    %224 = vector.broadcast %cst_91 : f32 to vector<8x128xf32>
    %225 = arith.mulf %224, %223 : vector<8x128xf32>
    %cst_92 = arith.constant 4.471500e-02 : f32
    %226 = vector.broadcast %cst_92 : f32 to vector<8x128xf32>
    %227 = arith.mulf %226, %223 : vector<8x128xf32>
    %228 = arith.mulf %227, %223 : vector<8x128xf32>
    %229 = arith.mulf %228, %223 : vector<8x128xf32>
    %230 = arith.addf %223, %229 : vector<8x128xf32>
    %cst_93 = arith.constant 0.797884583 : f32
    %231 = vector.broadcast %cst_93 : f32 to vector<8x128xf32>
    %232 = arith.mulf %231, %230 : vector<8x128xf32>
    %233 = math.tanh %232 : vector<8x128xf32>
    %cst_94 = arith.constant 1.000000e+00 : f32
    %234 = vector.broadcast %cst_94 : f32 to vector<8x128xf32>
    %235 = arith.addf %234, %233 : vector<8x128xf32>
    %236 = arith.mulf %225, %235 : vector<8x128xf32>
    %237 = arith.truncf %236 : vector<8x128xf32> to vector<8x128xbf16>
    %c0_95 = arith.constant 0 : index
    %c0_96 = arith.constant 0 : index
    %c0_97 = arith.constant 0 : index
    %238 = vector.load %arg12[%c0_95, %c0_96, %c0_97] : memref<2x128x32xbf16, #tpu.memory_space<vmem>>, vector<1x128x32xbf16>
    %239 = vector.shape_cast %238 : vector<1x128x32xbf16> to vector<128x32xbf16>
    %cst_98 = arith.constant dense<0.000000e+00> : vector<8x32xf32>
    %240 = tpu.matmul %237, %239, %cst_98 {dimension_numbers = #tpu.dot_dimension_numbers<[1], [0], [0], [1], [0, 0, 1, 1], [], []>} : vector<8x128xbf16>, vector<128x32xbf16>, vector<8x32xf32> -> vector<8x32xf32>
    %c0_99 = arith.constant 0 : index
    %c0_100 = arith.constant 0 : index
    %c0_101 = arith.constant 0 : index
    %241 = vector.load %arg13[%c0_99, %c0_100, %c0_101] : memref<2x1x32xf32, #tpu.memory_space<vmem>>, vector<1x1x32xf32>
    %242 = vector.shape_cast %241 : vector<1x1x32xf32> to vector<1x32xf32>
    %243 = vector.broadcast %242 : vector<1x32xf32> to vector<8x32xf32>
    %244 = arith.addf %240, %243 : vector<8x32xf32>
    %245 = arith.addf %115, %244 : vector<8x32xf32>
    %c0_102 = arith.constant 0 : index
    %c0_103 = arith.constant 0 : index
    %c0_104 = arith.constant 0 : index
    %246 = vector.load %arg8[%c0_102, %c0_103, %c0_104] : memref<2x1x32xf32, #tpu.memory_space<vmem>>, vector<1x1x32xf32>
    %247 = vector.shape_cast %246 : vector<1x1x32xf32> to vector<1x32xf32>
    %c0_105 = arith.constant 0 : index
    %c0_106 = arith.constant 0 : index
    %c0_107 = arith.constant 0 : index
    %248 = vector.load %arg9[%c0_105, %c0_106, %c0_107] : memref<2x1x32xf32, #tpu.memory_space<vmem>>, vector<1x1x32xf32>
    %249 = vector.shape_cast %248 : vector<1x1x32xf32> to vector<1x32xf32>
    %cst_108 = arith.constant dense<0.000000e+00> : vector<8xf32>
    %250 = vector.multi_reduction <add>, %189, %cst_108 [1] : vector<8x32xf32> to vector<8xf32>
    %251 = vector.shape_cast %250 : vector<8xf32> to vector<8x1xf32>
    %cst_109 = arith.constant 3.200000e+01 : f32
    %252 = vector.broadcast %cst_109 : f32 to vector<8x1xf32>
    %253 = arith.divf %251, %252 : vector<8x1xf32>
    %254 = vector.broadcast %253 : vector<8x1xf32> to vector<8x32xf32>
    %255 = arith.subf %189, %254 : vector<8x32xf32>
    %256 = arith.mulf %255, %255 : vector<8x32xf32>
    %cst_110 = arith.constant dense<0.000000e+00> : vector<8xf32>
    %257 = vector.multi_reduction <add>, %256, %cst_110 [1] : vector<8x32xf32> to vector<8xf32>
    %258 = vector.shape_cast %257 : vector<8xf32> to vector<8x1xf32>
    %cst_111 = arith.constant 3.200000e+01 : f32
    %259 = vector.broadcast %cst_111 : f32 to vector<8x1xf32>
    %260 = arith.divf %258, %259 : vector<8x1xf32>
    %261 = vector.broadcast %253 : vector<8x1xf32> to vector<8x32xf32>
    %262 = arith.subf %189, %261 : vector<8x32xf32>
    %cst_112 = arith.constant 9.99999974E-6 : f32
    %263 = vector.broadcast %cst_112 : f32 to vector<8x1xf32>
    %264 = arith.addf %260, %263 : vector<8x1xf32>
    %265 = math.rsqrt %264 : vector<8x1xf32>
    %266 = vector.broadcast %265 : vector<8x1xf32> to vector<8x32xf32>
    %267 = arith.mulf %262, %266 : vector<8x32xf32>
    %268 = vector.broadcast %247 : vector<1x32xf32> to vector<8x32xf32>
    %269 = arith.mulf %267, %268 : vector<8x32xf32>
    %270 = vector.broadcast %249 : vector<1x32xf32> to vector<8x32xf32>
    %271 = arith.addf %269, %270 : vector<8x32xf32>
    %272 = arith.truncf %271 : vector<8x32xf32> to vector<8x32xbf16>
    %c0_113 = arith.constant 0 : index
    %c0_114 = arith.constant 0 : index
    %c0_115 = arith.constant 0 : index
    %273 = vector.load %arg10[%c0_113, %c0_114, %c0_115] : memref<2x32x128xbf16, #tpu.memory_space<vmem>>, vector<1x32x128xbf16>
    %274 = vector.shape_cast %273 : vector<1x32x128xbf16> to vector<32x128xbf16>
    %cst_116 = arith.constant dense<0.000000e+00> : vector<8x128xf32>
    %275 = tpu.matmul %272, %274, %cst_116 {dimension_numbers = #tpu.dot_dimension_numbers<[1], [0], [0], [1], [0, 0, 1, 1], [], []>} : vector<8x32xbf16>, vector<32x128xbf16>, vector<8x128xf32> -> vector<8x128xf32>
    %c0_117 = arith.constant 0 : index
    %c0_118 = arith.constant 0 : index
    %c0_119 = arith.constant 0 : index
    %276 = vector.load %arg11[%c0_117, %c0_118, %c0_119] : memref<2x1x128xf32, #tpu.memory_space<vmem>>, vector<1x1x128xf32>
    %277 = vector.shape_cast %276 : vector<1x1x128xf32> to vector<1x128xf32>
    %278 = vector.broadcast %277 : vector<1x128xf32> to vector<8x128xf32>
    %279 = arith.addf %275, %278 : vector<8x128xf32>
    %cst_120 = arith.constant 5.000000e-01 : f32
    %280 = vector.broadcast %cst_120 : f32 to vector<8x128xf32>
    %281 = arith.mulf %280, %279 : vector<8x128xf32>
    %cst_121 = arith.constant 4.471500e-02 : f32
    %282 = vector.broadcast %cst_121 : f32 to vector<8x128xf32>
    %283 = arith.mulf %282, %279 : vector<8x128xf32>
    %284 = arith.mulf %283, %279 : vector<8x128xf32>
    %285 = arith.mulf %284, %279 : vector<8x128xf32>
    %286 = arith.addf %279, %285 : vector<8x128xf32>
    %cst_122 = arith.constant 0.797884583 : f32
    %287 = vector.broadcast %cst_122 : f32 to vector<8x128xf32>
    %288 = arith.mulf %287, %286 : vector<8x128xf32>
    %289 = math.tanh %288 : vector<8x128xf32>
    %cst_123 = arith.constant 1.000000e+00 : f32
    %290 = vector.broadcast %cst_123 : f32 to vector<8x128xf32>
    %291 = arith.addf %290, %289 : vector<8x128xf32>
    %292 = arith.mulf %281, %291 : vector<8x128xf32>
    %293 = arith.truncf %292 : vector<8x128xf32> to vector<8x128xbf16>
    %c0_124 = arith.constant 0 : index
    %c0_125 = arith.constant 0 : index
    %c0_126 = arith.constant 0 : index
    %294 = vector.load %arg12[%c0_124, %c0_125, %c0_126] : memref<2x128x32xbf16, #tpu.memory_space<vmem>>, vector<1x128x32xbf16>
    %295 = vector.shape_cast %294 : vector<1x128x32xbf16> to vector<128x32xbf16>
    %cst_127 = arith.constant dense<0.000000e+00> : vector<8x32xf32>
    %296 = tpu.matmul %293, %295, %cst_127 {dimension_numbers = #tpu.dot_dimension_numbers<[1], [0], [0], [1], [0, 0, 1, 1], [], []>} : vector<8x128xbf16>, vector<128x32xbf16>, vector<8x32xf32> -> vector<8x32xf32>
    %c0_128 = arith.constant 0 : index
    %c0_129 = arith.constant 0 : index
    %c0_130 = arith.constant 0 : index
    %297 = vector.load %arg13[%c0_128, %c0_129, %c0_130] : memref<2x1x32xf32, #tpu.memory_space<vmem>>, vector<1x1x32xf32>
    %298 = vector.shape_cast %297 : vector<1x1x32xf32> to vector<1x32xf32>
    %299 = vector.broadcast %298 : vector<1x32xf32> to vector<8x32xf32>
    %300 = arith.addf %296, %299 : vector<8x32xf32>
    %301 = arith.addf %189, %300 : vector<8x32xf32>
    %c1_131 = arith.constant 1 : index
    %c0_132 = arith.constant 0 : index
    %c0_133 = arith.constant 0 : index
    %302 = vector.load %arg2[%c1_131, %c0_132, %c0_133] : memref<2x1x32xf32, #tpu.memory_space<vmem>>, vector<1x1x32xf32>
    %303 = vector.shape_cast %302 : vector<1x1x32xf32> to vector<1x32xf32>
    %c1_134 = arith.constant 1 : index
    %c0_135 = arith.constant 0 : index
    %c0_136 = arith.constant 0 : index
    %304 = vector.load %arg3[%c1_134, %c0_135, %c0_136] : memref<2x1x32xf32, #tpu.memory_space<vmem>>, vector<1x1x32xf32>
    %305 = vector.shape_cast %304 : vector<1x1x32xf32> to vector<1x32xf32>
    %cst_137 = arith.constant dense<0.000000e+00> : vector<8xf32>
    %306 = vector.multi_reduction <add>, %245, %cst_137 [1] : vector<8x32xf32> to vector<8xf32>
    %307 = vector.shape_cast %306 : vector<8xf32> to vector<8x1xf32>
    %cst_138 = arith.constant 3.200000e+01 : f32
    %308 = vector.broadcast %cst_138 : f32 to vector<8x1xf32>
    %309 = arith.divf %307, %308 : vector<8x1xf32>
    %310 = vector.broadcast %309 : vector<8x1xf32> to vector<8x32xf32>
    %311 = arith.subf %245, %310 : vector<8x32xf32>
    %312 = arith.mulf %311, %311 : vector<8x32xf32>
    %cst_139 = arith.constant dense<0.000000e+00> : vector<8xf32>
    %313 = vector.multi_reduction <add>, %312, %cst_139 [1] : vector<8x32xf32> to vector<8xf32>
    %314 = vector.shape_cast %313 : vector<8xf32> to vector<8x1xf32>
    %cst_140 = arith.constant 3.200000e+01 : f32
    %315 = vector.broadcast %cst_140 : f32 to vector<8x1xf32>
    %316 = arith.divf %314, %315 : vector<8x1xf32>
    %317 = vector.broadcast %309 : vector<8x1xf32> to vector<8x32xf32>
    %318 = arith.subf %245, %317 : vector<8x32xf32>
    %cst_141 = arith.constant 9.99999974E-6 : f32
    %319 = vector.broadcast %cst_141 : f32 to vector<8x1xf32>
    %320 = arith.addf %316, %319 : vector<8x1xf32>
    %321 = math.rsqrt %320 : vector<8x1xf32>
    %322 = vector.broadcast %321 : vector<8x1xf32> to vector<8x32xf32>
    %323 = arith.mulf %318, %322 : vector<8x32xf32>
    %324 = vector.broadcast %303 : vector<1x32xf32> to vector<8x32xf32>
    %325 = arith.mulf %323, %324 : vector<8x32xf32>
    %326 = vector.broadcast %305 : vector<1x32xf32> to vector<8x32xf32>
    %327 = arith.addf %325, %326 : vector<8x32xf32>
    %328 = arith.truncf %327 : vector<8x32xf32> to vector<8x32xbf16>
    %c1_142 = arith.constant 1 : index
    %c0_143 = arith.constant 0 : index
    %c0_144 = arith.constant 0 : index
    %329 = vector.load %arg4[%c1_142, %c0_143, %c0_144] : memref<2x32x96xbf16, #tpu.memory_space<vmem>>, vector<1x32x96xbf16>
    %330 = vector.shape_cast %329 : vector<1x32x96xbf16> to vector<32x96xbf16>
    %cst_145 = arith.constant dense<0.000000e+00> : vector<8x96xf32>
    %331 = tpu.matmul %328, %330, %cst_145 {dimension_numbers = #tpu.dot_dimension_numbers<[1], [0], [0], [1], [0, 0, 1, 1], [], []>} : vector<8x32xbf16>, vector<32x96xbf16>, vector<8x96xf32> -> vector<8x96xf32>
    %c1_146 = arith.constant 1 : index
    %c0_147 = arith.constant 0 : index
    %c0_148 = arith.constant 0 : index
    %332 = vector.load %arg5[%c1_146, %c0_147, %c0_148] : memref<2x1x96xf32, #tpu.memory_space<vmem>>, vector<1x1x96xf32>
    %333 = vector.shape_cast %332 : vector<1x1x96xf32> to vector<1x96xf32>
    %334 = vector.broadcast %333 : vector<1x96xf32> to vector<8x96xf32>
    %335 = arith.addf %331, %334 : vector<8x96xf32>
    %c1_149 = arith.constant 1 : index
    %c0_150 = arith.constant 0 : index
    %c0_151 = arith.constant 0 : index
    %336 = vector.load %arg2[%c1_149, %c0_150, %c0_151] : memref<2x1x32xf32, #tpu.memory_space<vmem>>, vector<1x1x32xf32>
    %337 = vector.shape_cast %336 : vector<1x1x32xf32> to vector<1x32xf32>
    %c1_152 = arith.constant 1 : index
    %c0_153 = arith.constant 0 : index
    %c0_154 = arith.constant 0 : index
    %338 = vector.load %arg3[%c1_152, %c0_153, %c0_154] : memref<2x1x32xf32, #tpu.memory_space<vmem>>, vector<1x1x32xf32>
    %339 = vector.shape_cast %338 : vector<1x1x32xf32> to vector<1x32xf32>
    %cst_155 = arith.constant dense<0.000000e+00> : vector<8xf32>
    %340 = vector.multi_reduction <add>, %301, %cst_155 [1] : vector<8x32xf32> to vector<8xf32>
    %341 = vector.shape_cast %340 : vector<8xf32> to vector<8x1xf32>
    %cst_156 = arith.constant 3.200000e+01 : f32
    %342 = vector.broadcast %cst_156 : f32 to vector<8x1xf32>
    %343 = arith.divf %341, %342 : vector<8x1xf32>
    %344 = vector.broadcast %343 : vector<8x1xf32> to vector<8x32xf32>
    %345 = arith.subf %301, %344 : vector<8x32xf32>
    %346 = arith.mulf %345, %345 : vector<8x32xf32>
    %cst_157 = arith.constant dense<0.000000e+00> : vector<8xf32>
    %347 = vector.multi_reduction <add>, %346, %cst_157 [1] : vector<8x32xf32> to vector<8xf32>
    %348 = vector.shape_cast %347 : vector<8xf32> to vector<8x1xf32>
    %cst_158 = arith.constant 3.200000e+01 : f32
    %349 = vector.broadcast %cst_158 : f32 to vector<8x1xf32>
    %350 = arith.divf %348, %349 : vector<8x1xf32>
    %351 = vector.broadcast %343 : vector<8x1xf32> to vector<8x32xf32>
    %352 = arith.subf %301, %351 : vector<8x32xf32>
    %cst_159 = arith.constant 9.99999974E-6 : f32
    %353 = vector.broadcast %cst_159 : f32 to vector<8x1xf32>
    %354 = arith.addf %350, %353 : vector<8x1xf32>
    %355 = math.rsqrt %354 : vector<8x1xf32>
    %356 = vector.broadcast %355 : vector<8x1xf32> to vector<8x32xf32>
    %357 = arith.mulf %352, %356 : vector<8x32xf32>
    %358 = vector.broadcast %337 : vector<1x32xf32> to vector<8x32xf32>
    %359 = arith.mulf %357, %358 : vector<8x32xf32>
    %360 = vector.broadcast %339 : vector<1x32xf32> to vector<8x32xf32>
    %361 = arith.addf %359, %360 : vector<8x32xf32>
    %362 = arith.truncf %361 : vector<8x32xf32> to vector<8x32xbf16>
    %c1_160 = arith.constant 1 : index
    %c0_161 = arith.constant 0 : index
    %c0_162 = arith.constant 0 : index
    %363 = vector.load %arg4[%c1_160, %c0_161, %c0_162] : memref<2x32x96xbf16, #tpu.memory_space<vmem>>, vector<1x32x96xbf16>
    %364 = vector.shape_cast %363 : vector<1x32x96xbf16> to vector<32x96xbf16>
    %cst_163 = arith.constant dense<0.000000e+00> : vector<8x96xf32>
    %365 = tpu.matmul %362, %364, %cst_163 {dimension_numbers = #tpu.dot_dimension_numbers<[1], [0], [0], [1], [0, 0, 1, 1], [], []>} : vector<8x32xbf16>, vector<32x96xbf16>, vector<8x96xf32> -> vector<8x96xf32>
    %c1_164 = arith.constant 1 : index
    %c0_165 = arith.constant 0 : index
    %c0_166 = arith.constant 0 : index
    %366 = vector.load %arg5[%c1_164, %c0_165, %c0_166] : memref<2x1x96xf32, #tpu.memory_space<vmem>>, vector<1x1x96xf32>
    %367 = vector.shape_cast %366 : vector<1x1x96xf32> to vector<1x96xf32>
    %368 = vector.broadcast %367 : vector<1x96xf32> to vector<8x96xf32>
    %369 = arith.addf %365, %368 : vector<8x96xf32>
    %370 = vector.extract_strided_slice %369 {offsets = [0, 0], sizes = [8, 16], strides = [1, 1]} : vector<8x96xf32> to vector<8x16xf32>
    %371 = vector.extract_strided_slice %335 {offsets = [0, 32], sizes = [8, 16], strides = [1, 1]} : vector<8x96xf32> to vector<8x16xf32>
    %372 = vector.extract_strided_slice %369 {offsets = [0, 32], sizes = [8, 16], strides = [1, 1]} : vector<8x96xf32> to vector<8x16xf32>
    %373 = vector.extract_strided_slice %335 {offsets = [0, 64], sizes = [8, 16], strides = [1, 1]} : vector<8x96xf32> to vector<8x16xf32>
    %374 = vector.extract_strided_slice %369 {offsets = [0, 64], sizes = [8, 16], strides = [1, 1]} : vector<8x96xf32> to vector<8x16xf32>
    %375 = arith.mulf %370, %371 : vector<8x16xf32>
    %cst_167 = arith.constant dense<0.000000e+00> : vector<8xf32>
    %376 = vector.multi_reduction <add>, %375, %cst_167 [1] : vector<8x16xf32> to vector<8xf32>
    %377 = vector.shape_cast %376 : vector<8xf32> to vector<8x1xf32>
    %cst_168 = arith.constant 2.500000e-01 : f32
    %378 = vector.broadcast %cst_168 : f32 to vector<8x1xf32>
    %379 = arith.mulf %377, %378 : vector<8x1xf32>
    %380 = arith.mulf %370, %372 : vector<8x16xf32>
    %cst_169 = arith.constant dense<0.000000e+00> : vector<8xf32>
    %381 = vector.multi_reduction <add>, %380, %cst_169 [1] : vector<8x16xf32> to vector<8xf32>
    %382 = vector.shape_cast %381 : vector<8xf32> to vector<8x1xf32>
    %cst_170 = arith.constant 2.500000e-01 : f32
    %383 = vector.broadcast %cst_170 : f32 to vector<8x1xf32>
    %384 = arith.mulf %382, %383 : vector<8x1xf32>
    %385 = tpu.concatenate %379, %384 in 1 : vector<8x1xf32>, vector<8x1xf32> -> vector<8x2xf32>
    %cst_171 = arith.constant dense<0xFF800000> : vector<8xf32>
    %386 = vector.multi_reduction <maximumf>, %385, %cst_171 [1] : vector<8x2xf32> to vector<8xf32>
    %387 = vector.shape_cast %386 : vector<8xf32> to vector<8x1xf32>
    %388 = vector.broadcast %387 : vector<8x1xf32> to vector<8x2xf32>
    %389 = arith.subf %385, %388 : vector<8x2xf32>
    %390 = math.exp %389 : vector<8x2xf32>
    %cst_172 = arith.constant dense<0.000000e+00> : vector<8xf32>
    %391 = vector.multi_reduction <add>, %390, %cst_172 [1] : vector<8x2xf32> to vector<8xf32>
    %392 = vector.shape_cast %391 : vector<8xf32> to vector<8x1xf32>
    %393 = vector.broadcast %392 : vector<8x1xf32> to vector<8x2xf32>
    %394 = arith.divf %390, %393 : vector<8x2xf32>
    %395 = vector.extract_strided_slice %394 {offsets = [0, 0], sizes = [8, 1], strides = [1, 1]} : vector<8x2xf32> to vector<8x1xf32>
    %396 = vector.broadcast %395 : vector<8x1xf32> to vector<8x16xf32>
    %397 = arith.mulf %396, %373 : vector<8x16xf32>
    %398 = vector.extract_strided_slice %394 {offsets = [0, 1], sizes = [8, 1], strides = [1, 1]} : vector<8x2xf32> to vector<8x1xf32>
    %399 = vector.broadcast %398 : vector<8x1xf32> to vector<8x16xf32>
    %400 = arith.mulf %399, %374 : vector<8x16xf32>
    %401 = arith.addf %397, %400 : vector<8x16xf32>
    %402 = vector.extract_strided_slice %369 {offsets = [0, 16], sizes = [8, 16], strides = [1, 1]} : vector<8x96xf32> to vector<8x16xf32>
    %403 = vector.extract_strided_slice %335 {offsets = [0, 48], sizes = [8, 16], strides = [1, 1]} : vector<8x96xf32> to vector<8x16xf32>
    %404 = vector.extract_strided_slice %369 {offsets = [0, 48], sizes = [8, 16], strides = [1, 1]} : vector<8x96xf32> to vector<8x16xf32>
    %405 = vector.extract_strided_slice %335 {offsets = [0, 80], sizes = [8, 16], strides = [1, 1]} : vector<8x96xf32> to vector<8x16xf32>
    %406 = vector.extract_strided_slice %369 {offsets = [0, 80], sizes = [8, 16], strides = [1, 1]} : vector<8x96xf32> to vector<8x16xf32>
    %407 = arith.mulf %402, %403 : vector<8x16xf32>
    %cst_173 = arith.constant dense<0.000000e+00> : vector<8xf32>
    %408 = vector.multi_reduction <add>, %407, %cst_173 [1] : vector<8x16xf32> to vector<8xf32>
    %409 = vector.shape_cast %408 : vector<8xf32> to vector<8x1xf32>
    %cst_174 = arith.constant 2.500000e-01 : f32
    %410 = vector.broadcast %cst_174 : f32 to vector<8x1xf32>
    %411 = arith.mulf %409, %410 : vector<8x1xf32>
    %412 = arith.mulf %402, %404 : vector<8x16xf32>
    %cst_175 = arith.constant dense<0.000000e+00> : vector<8xf32>
    %413 = vector.multi_reduction <add>, %412, %cst_175 [1] : vector<8x16xf32> to vector<8xf32>
    %414 = vector.shape_cast %413 : vector<8xf32> to vector<8x1xf32>
    %cst_176 = arith.constant 2.500000e-01 : f32
    %415 = vector.broadcast %cst_176 : f32 to vector<8x1xf32>
    %416 = arith.mulf %414, %415 : vector<8x1xf32>
    %417 = tpu.concatenate %411, %416 in 1 : vector<8x1xf32>, vector<8x1xf32> -> vector<8x2xf32>
    %cst_177 = arith.constant dense<0xFF800000> : vector<8xf32>
    %418 = vector.multi_reduction <maximumf>, %417, %cst_177 [1] : vector<8x2xf32> to vector<8xf32>
    %419 = vector.shape_cast %418 : vector<8xf32> to vector<8x1xf32>
    %420 = vector.broadcast %419 : vector<8x1xf32> to vector<8x2xf32>
    %421 = arith.subf %417, %420 : vector<8x2xf32>
    %422 = math.exp %421 : vector<8x2xf32>
    %cst_178 = arith.constant dense<0.000000e+00> : vector<8xf32>
    %423 = vector.multi_reduction <add>, %422, %cst_178 [1] : vector<8x2xf32> to vector<8xf32>
    %424 = vector.shape_cast %423 : vector<8xf32> to vector<8x1xf32>
    %425 = vector.broadcast %424 : vector<8x1xf32> to vector<8x2xf32>
    %426 = arith.divf %422, %425 : vector<8x2xf32>
    %427 = vector.extract_strided_slice %426 {offsets = [0, 0], sizes = [8, 1], strides = [1, 1]} : vector<8x2xf32> to vector<8x1xf32>
    %428 = vector.broadcast %427 : vector<8x1xf32> to vector<8x16xf32>
    %429 = arith.mulf %428, %405 : vector<8x16xf32>
    %430 = vector.extract_strided_slice %426 {offsets = [0, 1], sizes = [8, 1], strides = [1, 1]} : vector<8x2xf32> to vector<8x1xf32>
    %431 = vector.broadcast %430 : vector<8x1xf32> to vector<8x16xf32>
    %432 = arith.mulf %431, %406 : vector<8x16xf32>
    %433 = arith.addf %429, %432 : vector<8x16xf32>
    %434 = tpu.concatenate %401, %433 in 1 : vector<8x16xf32>, vector<8x16xf32> -> vector<8x32xf32>
    %435 = arith.truncf %434 : vector<8x32xf32> to vector<8x32xbf16>
    %c1_179 = arith.constant 1 : index
    %c0_180 = arith.constant 0 : index
    %c0_181 = arith.constant 0 : index
    %436 = vector.load %arg6[%c1_179, %c0_180, %c0_181] : memref<2x32x32xbf16, #tpu.memory_space<vmem>>, vector<1x32x32xbf16>
    %437 = vector.shape_cast %436 : vector<1x32x32xbf16> to vector<32x32xbf16>
    %cst_182 = arith.constant dense<0.000000e+00> : vector<8x32xf32>
    %438 = tpu.matmul %435, %437, %cst_182 {dimension_numbers = #tpu.dot_dimension_numbers<[1], [0], [0], [1], [0, 0, 1, 1], [], []>} : vector<8x32xbf16>, vector<32x32xbf16>, vector<8x32xf32> -> vector<8x32xf32>
    %c1_183 = arith.constant 1 : index
    %c0_184 = arith.constant 0 : index
    %c0_185 = arith.constant 0 : index
    %439 = vector.load %arg7[%c1_183, %c0_184, %c0_185] : memref<2x1x32xf32, #tpu.memory_space<vmem>>, vector<1x1x32xf32>
    %440 = vector.shape_cast %439 : vector<1x1x32xf32> to vector<1x32xf32>
    %441 = vector.broadcast %440 : vector<1x32xf32> to vector<8x32xf32>
    %442 = arith.addf %438, %441 : vector<8x32xf32>
    %443 = arith.addf %301, %442 : vector<8x32xf32>
    %c1_186 = arith.constant 1 : index
    %c0_187 = arith.constant 0 : index
    %c0_188 = arith.constant 0 : index
    %444 = vector.load %arg8[%c1_186, %c0_187, %c0_188] : memref<2x1x32xf32, #tpu.memory_space<vmem>>, vector<1x1x32xf32>
    %445 = vector.shape_cast %444 : vector<1x1x32xf32> to vector<1x32xf32>
    %c1_189 = arith.constant 1 : index
    %c0_190 = arith.constant 0 : index
    %c0_191 = arith.constant 0 : index
    %446 = vector.load %arg9[%c1_189, %c0_190, %c0_191] : memref<2x1x32xf32, #tpu.memory_space<vmem>>, vector<1x1x32xf32>
    %447 = vector.shape_cast %446 : vector<1x1x32xf32> to vector<1x32xf32>
    %cst_192 = arith.constant dense<0.000000e+00> : vector<8xf32>
    %448 = vector.multi_reduction <add>, %443, %cst_192 [1] : vector<8x32xf32> to vector<8xf32>
    %449 = vector.shape_cast %448 : vector<8xf32> to vector<8x1xf32>
    %cst_193 = arith.constant 3.200000e+01 : f32
    %450 = vector.broadcast %cst_193 : f32 to vector<8x1xf32>
    %451 = arith.divf %449, %450 : vector<8x1xf32>
    %452 = vector.broadcast %451 : vector<8x1xf32> to vector<8x32xf32>
    %453 = arith.subf %443, %452 : vector<8x32xf32>
    %454 = arith.mulf %453, %453 : vector<8x32xf32>
    %cst_194 = arith.constant dense<0.000000e+00> : vector<8xf32>
    %455 = vector.multi_reduction <add>, %454, %cst_194 [1] : vector<8x32xf32> to vector<8xf32>
    %456 = vector.shape_cast %455 : vector<8xf32> to vector<8x1xf32>
    %cst_195 = arith.constant 3.200000e+01 : f32
    %457 = vector.broadcast %cst_195 : f32 to vector<8x1xf32>
    %458 = arith.divf %456, %457 : vector<8x1xf32>
    %459 = vector.broadcast %451 : vector<8x1xf32> to vector<8x32xf32>
    %460 = arith.subf %443, %459 : vector<8x32xf32>
    %cst_196 = arith.constant 9.99999974E-6 : f32
    %461 = vector.broadcast %cst_196 : f32 to vector<8x1xf32>
    %462 = arith.addf %458, %461 : vector<8x1xf32>
    %463 = math.rsqrt %462 : vector<8x1xf32>
    %464 = vector.broadcast %463 : vector<8x1xf32> to vector<8x32xf32>
    %465 = arith.mulf %460, %464 : vector<8x32xf32>
    %466 = vector.broadcast %445 : vector<1x32xf32> to vector<8x32xf32>
    %467 = arith.mulf %465, %466 : vector<8x32xf32>
    %468 = vector.broadcast %447 : vector<1x32xf32> to vector<8x32xf32>
    %469 = arith.addf %467, %468 : vector<8x32xf32>
    %470 = arith.truncf %469 : vector<8x32xf32> to vector<8x32xbf16>
    %c1_197 = arith.constant 1 : index
    %c0_198 = arith.constant 0 : index
    %c0_199 = arith.constant 0 : index
    %471 = vector.load %arg10[%c1_197, %c0_198, %c0_199] : memref<2x32x128xbf16, #tpu.memory_space<vmem>>, vector<1x32x128xbf16>
    %472 = vector.shape_cast %471 : vector<1x32x128xbf16> to vector<32x128xbf16>
    %cst_200 = arith.constant dense<0.000000e+00> : vector<8x128xf32>
    %473 = tpu.matmul %470, %472, %cst_200 {dimension_numbers = #tpu.dot_dimension_numbers<[1], [0], [0], [1], [0, 0, 1, 1], [], []>} : vector<8x32xbf16>, vector<32x128xbf16>, vector<8x128xf32> -> vector<8x128xf32>
    %c1_201 = arith.constant 1 : index
    %c0_202 = arith.constant 0 : index
    %c0_203 = arith.constant 0 : index
    %474 = vector.load %arg11[%c1_201, %c0_202, %c0_203] : memref<2x1x128xf32, #tpu.memory_space<vmem>>, vector<1x1x128xf32>
    %475 = vector.shape_cast %474 : vector<1x1x128xf32> to vector<1x128xf32>
    %476 = vector.broadcast %475 : vector<1x128xf32> to vector<8x128xf32>
    %477 = arith.addf %473, %476 : vector<8x128xf32>
    %cst_204 = arith.constant 5.000000e-01 : f32
    %478 = vector.broadcast %cst_204 : f32 to vector<8x128xf32>
    %479 = arith.mulf %478, %477 : vector<8x128xf32>
    %cst_205 = arith.constant 4.471500e-02 : f32
    %480 = vector.broadcast %cst_205 : f32 to vector<8x128xf32>
    %481 = arith.mulf %480, %477 : vector<8x128xf32>
    %482 = arith.mulf %481, %477 : vector<8x128xf32>
    %483 = arith.mulf %482, %477 : vector<8x128xf32>
    %484 = arith.addf %477, %483 : vector<8x128xf32>
    %cst_206 = arith.constant 0.797884583 : f32
    %485 = vector.broadcast %cst_206 : f32 to vector<8x128xf32>
    %486 = arith.mulf %485, %484 : vector<8x128xf32>
    %487 = math.tanh %486 : vector<8x128xf32>
    %cst_207 = arith.constant 1.000000e+00 : f32
    %488 = vector.broadcast %cst_207 : f32 to vector<8x128xf32>
    %489 = arith.addf %488, %487 : vector<8x128xf32>
    %490 = arith.mulf %479, %489 : vector<8x128xf32>
    %491 = arith.truncf %490 : vector<8x128xf32> to vector<8x128xbf16>
    %c1_208 = arith.constant 1 : index
    %c0_209 = arith.constant 0 : index
    %c0_210 = arith.constant 0 : index
    %492 = vector.load %arg12[%c1_208, %c0_209, %c0_210] : memref<2x128x32xbf16, #tpu.memory_space<vmem>>, vector<1x128x32xbf16>
    %493 = vector.shape_cast %492 : vector<1x128x32xbf16> to vector<128x32xbf16>
    %cst_211 = arith.constant dense<0.000000e+00> : vector<8x32xf32>
    %494 = tpu.matmul %491, %493, %cst_211 {dimension_numbers = #tpu.dot_dimension_numbers<[1], [0], [0], [1], [0, 0, 1, 1], [], []>} : vector<8x128xbf16>, vector<128x32xbf16>, vector<8x32xf32> -> vector<8x32xf32>
    %c1_212 = arith.constant 1 : index
    %c0_213 = arith.constant 0 : index
    %c0_214 = arith.constant 0 : index
    %495 = vector.load %arg13[%c1_212, %c0_213, %c0_214] : memref<2x1x32xf32, #tpu.memory_space<vmem>>, vector<1x1x32xf32>
    %496 = vector.shape_cast %495 : vector<1x1x32xf32> to vector<1x32xf32>
    %497 = vector.broadcast %496 : vector<1x32xf32> to vector<8x32xf32>
    %498 = arith.addf %494, %497 : vector<8x32xf32>
    %499 = arith.addf %443, %498 : vector<8x32xf32>
    %c0_215 = arith.constant 0 : index
    %c0_216 = arith.constant 0 : index
    %500 = vector.load %arg14[%c0_215, %c0_216] : memref<1x32xf32, #tpu.memory_space<vmem>>, vector<1x32xf32>
    %c0_217 = arith.constant 0 : index
    %c0_218 = arith.constant 0 : index
    %501 = vector.load %arg15[%c0_217, %c0_218] : memref<1x32xf32, #tpu.memory_space<vmem>>, vector<1x32xf32>
    %cst_219 = arith.constant dense<0.000000e+00> : vector<8xf32>
    %502 = vector.multi_reduction <add>, %499, %cst_219 [1] : vector<8x32xf32> to vector<8xf32>
    %503 = vector.shape_cast %502 : vector<8xf32> to vector<8x1xf32>
    %cst_220 = arith.constant 3.200000e+01 : f32
    %504 = vector.broadcast %cst_220 : f32 to vector<8x1xf32>
    %505 = arith.divf %503, %504 : vector<8x1xf32>
    %506 = vector.broadcast %505 : vector<8x1xf32> to vector<8x32xf32>
    %507 = arith.subf %499, %506 : vector<8x32xf32>
    %508 = arith.mulf %507, %507 : vector<8x32xf32>
    %cst_221 = arith.constant dense<0.000000e+00> : vector<8xf32>
    %509 = vector.multi_reduction <add>, %508, %cst_221 [1] : vector<8x32xf32> to vector<8xf32>
    %510 = vector.shape_cast %509 : vector<8xf32> to vector<8x1xf32>
    %cst_222 = arith.constant 3.200000e+01 : f32
    %511 = vector.broadcast %cst_222 : f32 to vector<8x1xf32>
    %512 = arith.divf %510, %511 : vector<8x1xf32>
    %513 = vector.broadcast %505 : vector<8x1xf32> to vector<8x32xf32>
    %514 = arith.subf %499, %513 : vector<8x32xf32>
    %cst_223 = arith.constant 9.99999974E-6 : f32
    %515 = vector.broadcast %cst_223 : f32 to vector<8x1xf32>
    %516 = arith.addf %512, %515 : vector<8x1xf32>
    %517 = math.rsqrt %516 : vector<8x1xf32>
    %518 = vector.broadcast %517 : vector<8x1xf32> to vector<8x32xf32>
    %519 = arith.mulf %514, %518 : vector<8x32xf32>
    %520 = vector.broadcast %500 : vector<1x32xf32> to vector<8x32xf32>
    %521 = arith.mulf %519, %520 : vector<8x32xf32>
    %522 = vector.broadcast %501 : vector<1x32xf32> to vector<8x32xf32>
    %523 = arith.addf %521, %522 : vector<8x32xf32>
    %524 = arith.truncf %523 : vector<8x32xf32> to vector<8x32xbf16>
    %c0_224 = arith.constant 0 : index
    %c0_225 = arith.constant 0 : index
    %525 = vector.load %arg16[%c0_224, %c0_225] : memref<32x128xbf16, #tpu.memory_space<vmem>>, vector<32x128xbf16>
    %cst_226 = arith.constant dense<0.000000e+00> : vector<8x128xf32>
    %526 = tpu.matmul %524, %525, %cst_226 {dimension_numbers = #tpu.dot_dimension_numbers<[1], [0], [0], [1], [0, 0, 1, 1], [], []>} : vector<8x32xbf16>, vector<32x128xbf16>, vector<8x128xf32> -> vector<8x128xf32>
    %c0_227 = arith.constant 0 : index
    %c0_228 = arith.constant 0 : index
    %527 = vector.load %arg17[%c0_227, %c0_228] : memref<8x128xf32, #tpu.memory_space<vmem>>, vector<8x128xf32>
    tpu.vector_store %arg17[%c0_227, %c0_228], %526 {strides = array<i32>} : memref<8x128xf32, #tpu.memory_space<vmem>>, vector<8x128xf32>,
    return
  }
  func.func @transform_0(%arg0: i32) -> (i32, i32, i32) {
    %c0_i32 = arith.constant 0 : i32
    %c0_i32_0 = arith.constant 0 : i32
    %c0_i32_1 = arith.constant 0 : i32
    return %c0_i32, %arg0, %c0_i32_0 : i32, i32, i32
  }
  func.func @transform_1(%arg0: i32) -> (i32, i32, i32) {
    %c0_i32 = arith.constant 0 : i32
    %c0_i32_0 = arith.constant 0 : i32
    %c0_i32_1 = arith.constant 0 : i32
    %c0_i32_2 = arith.constant 0 : i32
    return %c0_i32, %c0_i32_0, %c0_i32_1 : i32, i32, i32
  }
  func.func @transform_2(%arg0: i32) -> (i32, i32, i32) {
    %c0_i32 = arith.constant 0 : i32
    %c0_i32_0 = arith.constant 0 : i32
    %c0_i32_1 = arith.constant 0 : i32
    %c0_i32_2 = arith.constant 0 : i32
    return %c0_i32, %c0_i32_0, %c0_i32_1 : i32, i32, i32
  }
  func.func @transform_3(%arg0: i32) -> (i32, i32, i32) {
    %c0_i32 = arith.constant 0 : i32
    %c0_i32_0 = arith.constant 0 : i32
    %c0_i32_1 = arith.constant 0 : i32
    %c0_i32_2 = arith.constant 0 : i32
    return %c0_i32, %c0_i32_0, %c0_i32_1 : i32, i32, i32
  }
  func.func @transform_4(%arg0: i32) -> (i32, i32, i32) {
    %c0_i32 = arith.constant 0 : i32
    %c0_i32_0 = arith.constant 0 : i32
    %c0_i32_1 = arith.constant 0 : i32
    %c0_i32_2 = arith.constant 0 : i32
    return %c0_i32, %c0_i32_0, %c0_i32_1 : i32, i32, i32
  }
  func.func @transform_5(%arg0: i32) -> (i32, i32, i32) {
    %c0_i32 = arith.constant 0 : i32
    %c0_i32_0 = arith.constant 0 : i32
    %c0_i32_1 = arith.constant 0 : i32
    %c0_i32_2 = arith.constant 0 : i32
    return %c0_i32, %c0_i32_0, %c0_i32_1 : i32, i32, i32
  }
  func.func @transform_6(%arg0: i32) -> (i32, i32, i32) {
    %c0_i32 = arith.constant 0 : i32
    %c0_i32_0 = arith.constant 0 : i32
    %c0_i32_1 = arith.constant 0 : i32
    %c0_i32_2 = arith.constant 0 : i32
    return %c0_i32, %c0_i32_0, %c0_i32_1 : i32, i32, i32
  }
  func.func @transform_7(%arg0: i32) -> (i32, i32, i32) {
    %c0_i32 = arith.constant 0 : i32
    %c0_i32_0 = arith.constant 0 : i32
    %c0_i32_1 = arith.constant 0 : i32
    %c0_i32_2 = arith.constant 0 : i32
    return %c0_i32, %c0_i32_0, %c0_i32_1 : i32, i32, i32
  }
  func.func @transform_8(%arg0: i32) -> (i32, i32, i32) {
    %c0_i32 = arith.constant 0 : i32
    %c0_i32_0 = arith.constant 0 : i32
    %c0_i32_1 = arith.constant 0 : i32
    %c0_i32_2 = arith.constant 0 : i32
    return %c0_i32, %c0_i32_0, %c0_i32_1 : i32, i32, i32
  }
  func.func @transform_9(%arg0: i32) -> (i32, i32, i32) {
    %c0_i32 = arith.constant 0 : i32
    %c0_i32_0 = arith.constant 0 : i32
    %c0_i32_1 = arith.constant 0 : i32
    %c0_i32_2 = arith.constant 0 : i32
    return %c0_i32, %c0_i32_0, %c0_i32_1 : i32, i32, i32
  }
  func.func @transform_10(%arg0: i32) -> (i32, i32, i32) {
    %c0_i32 = arith.constant 0 : i32
    %c0_i32_0 = arith.constant 0 : i32
    %c0_i32_1 = arith.constant 0 : i32
    %c0_i32_2 = arith.constant 0 : i32
    return %c0_i32, %c0_i32_0, %c0_i32_1 : i32, i32, i32
  }
  func.func @transform_11(%arg0: i32) -> (i32, i32, i32) {
    %c0_i32 = arith.constant 0 : i32
    %c0_i32_0 = arith.constant 0 : i32
    %c0_i32_1 = arith.constant 0 : i32
    %c0_i32_2 = arith.constant 0 : i32
    return %c0_i32, %c0_i32_0, %c0_i32_1 : i32, i32, i32
  }
  func.func @transform_12(%arg0: i32) -> (i32, i32, i32) {
    %c0_i32 = arith.constant 0 : i32
    %c0_i32_0 = arith.constant 0 : i32
    %c0_i32_1 = arith.constant 0 : i32
    %c0_i32_2 = arith.constant 0 : i32
    return %c0_i32, %c0_i32_0, %c0_i32_1 : i32, i32, i32
  }
  func.func @transform_13(%arg0: i32) -> (i32, i32) {
    %c0_i32 = arith.constant 0 : i32
    %c0_i32_0 = arith.constant 0 : i32
    %c0_i32_1 = arith.constant 0 : i32
    return %c0_i32, %c0_i32_0 : i32, i32
  }
  func.func @transform_14(%arg0: i32) -> (i32, i32) {
    %c0_i32 = arith.constant 0 : i32
    %c0_i32_0 = arith.constant 0 : i32
    %c0_i32_1 = arith.constant 0 : i32
    return %c0_i32, %c0_i32_0 : i32, i32
  }
  func.func @transform_15(%arg0: i32) -> (i32, i32) {
    %c0_i32 = arith.constant 0 : i32
    %c0_i32_0 = arith.constant 0 : i32
    %c0_i32_1 = arith.constant 0 : i32
    return %c0_i32, %c0_i32_0 : i32, i32
  }
  func.func @transform_16(%arg0: i32) -> (i32, i32) {
    %c0_i32 = arith.constant 0 : i32
    %c0_i32_0 = arith.constant 0 : i32
    return %arg0, %c0_i32 : i32, i32
  }
}

module attributes {stable_mosaic.version = 11 : i64} {
  func.func @_last_logits_kernel(%arg0: i32, %arg1: memref<3x8x32xf32, #tpu.memory_space<vmem>>, %arg2: memref<2x1x32xf32, #tpu.memory_space<vmem>>, %arg3: memref<2x1x32xf32, #tpu.memory_space<vmem>>, %arg4: memref<2x32x96xbf16, #tpu.memory_space<vmem>>, %arg5: memref<2x1x96xf32, #tpu.memory_space<vmem>>, %arg6: memref<2x32x32xbf16, #tpu.memory_space<vmem>>, %arg7: memref<2x1x32xf32, #tpu.memory_space<vmem>>, %arg8: memref<2x1x32xf32, #tpu.memory_space<vmem>>, %arg9: memref<2x1x32xf32, #tpu.memory_space<vmem>>, %arg10: memref<2x32x128xbf16, #tpu.memory_space<vmem>>, %arg11: memref<2x1x128xf32, #tpu.memory_space<vmem>>, %arg12: memref<2x128x32xbf16, #tpu.memory_space<vmem>>, %arg13: memref<2x1x32xf32, #tpu.memory_space<vmem>>, %arg14: memref<1x32xf32, #tpu.memory_space<vmem>>, %arg15: memref<1x32xf32, #tpu.memory_space<vmem>>, %arg16: memref<32x128xbf16, #tpu.memory_space<vmem>>, %arg17: memref<8x128xf32, #tpu.memory_space<vmem>>) attributes {dimension_semantics = [#tpu.dimension_semantics<parallel>], iteration_bounds = array<i64: 3>, scalar_prefetch = 0 : i64, scratch_operands = 0 : i64, tpu.core_type = #tpu.core_type<tc>, window_params = [{transform_indices = @transform_0, window_bounds = array<i64: 3, 8, 32>}, {pipeline_mode = #tpu.pipeline_mode<synchronous>, transform_indices = @transform_1, window_bounds = array<i64: 2, 1, 32>}, {pipeline_mode = #tpu.pipeline_mode<synchronous>, transform_indices = @transform_2, window_bounds = array<i64: 2, 1, 32>}, {pipeline_mode = #tpu.pipeline_mode<synchronous>, transform_indices = @transform_3, window_bounds = array<i64: 2, 32, 96>}, {pipeline_mode = #tpu.pipeline_mode<synchronous>, transform_indices = @transform_4, window_bounds = array<i64: 2, 1, 96>}, {pipeline_mode = #tpu.pipeline_mode<synchronous>, transform_indices = @transform_5, window_bounds = array<i64: 2, 32, 32>}, {pipeline_mode = #tpu.pipeline_mode<synchronous>, transform_indices = @transform_6, window_bounds = array<i64: 2, 1, 32>}, {pipeline_mode = #tpu.pipeline_mode<synchronous>, transform_indices = @transform_7, window_bounds = array<i64: 2, 1, 32>}, {pipeline_mode = #tpu.pipeline_mode<synchronous>, transform_indices = @transform_8, window_bounds = array<i64: 2, 1, 32>}, {pipeline_mode = #tpu.pipeline_mode<synchronous>, transform_indices = @transform_9, window_bounds = array<i64: 2, 32, 128>}, {pipeline_mode = #tpu.pipeline_mode<synchronous>, transform_indices = @transform_10, window_bounds = array<i64: 2, 1, 128>}, {pipeline_mode = #tpu.pipeline_mode<synchronous>, transform_indices = @transform_11, window_bounds = array<i64: 2, 128, 32>}, {pipeline_mode = #tpu.pipeline_mode<synchronous>, transform_indices = @transform_12, window_bounds = array<i64: 2, 1, 32>}, {pipeline_mode = #tpu.pipeline_mode<synchronous>, transform_indices = @transform_13, window_bounds = array<i64: 1, 32>}, {pipeline_mode = #tpu.pipeline_mode<synchronous>, transform_indices = @transform_14, window_bounds = array<i64: 1, 32>}, {pipeline_mode = #tpu.pipeline_mode<synchronous>, transform_indices = @transform_15, window_bounds = array<i64: 32, 128>}, {transform_indices = @transform_16, window_bounds = array<i64: 8, 128>}]} {
    %c0 = arith.constant 0 : index
    %c0_0 = arith.constant 0 : index
    %c0_1 = arith.constant 0 : index
    %0 = vector.load %arg1[%c0, %c0_0, %c0_1] : memref<3x8x32xf32, #tpu.memory_space<vmem>>, vector<1x8x32xf32>
    %1 = vector.shape_cast %0 : vector<1x8x32xf32> to vector<8x32xf32>
    %c1 = arith.constant 1 : index
    %c0_2 = arith.constant 0 : index
    %c0_3 = arith.constant 0 : index
    %2 = vector.load %arg1[%c1, %c0_2, %c0_3] : memref<3x8x32xf32, #tpu.memory_space<vmem>>, vector<1x8x32xf32>
    %3 = vector.shape_cast %2 : vector<1x8x32xf32> to vector<8x32xf32>
    %c2 = arith.constant 2 : index
    %c0_4 = arith.constant 0 : index
    %c0_5 = arith.constant 0 : index
    %4 = vector.load %arg1[%c2, %c0_4, %c0_5] : memref<3x8x32xf32, #tpu.memory_space<vmem>>, vector<1x8x32xf32>
    %5 = vector.shape_cast %4 : vector<1x8x32xf32> to vector<8x32xf32>
    %c0_6 = arith.constant 0 : index
    %c0_7 = arith.constant 0 : index
    %c0_8 = arith.constant 0 : index
    %6 = vector.load %arg2[%c0_6, %c0_7, %c0_8] : memref<2x1x32xf32, #tpu.memory_space<vmem>>, vector<1x1x32xf32>
    %7 = vector.shape_cast %6 : vector<1x1x32xf32> to vector<1x32xf32>
    %c0_9 = arith.constant 0 : index
    %c0_10 = arith.constant 0 : index
    %c0_11 = arith.constant 0 : index
    %8 = vector.load %arg3[%c0_9, %c0_10, %c0_11] : memref<2x1x32xf32, #tpu.memory_space<vmem>>, vector<1x1x32xf32>
    %9 = vector.shape_cast %8 : vector<1x1x32xf32> to vector<1x32xf32>
    %cst = arith.constant dense<0.000000e+00> : vector<8xf32>
    %10 = vector.multi_reduction <add>, %1, %cst [1] : vector<8x32xf32> to vector<8xf32>
    %11 = vector.shape_cast %10 : vector<8xf32> to vector<8x1xf32>
    %cst_12 = arith.constant 3.200000e+01 : f32
    %12 = vector.broadcast %cst_12 : f32 to vector<8x1xf32>
    %13 = arith.divf %11, %12 : vector<8x1xf32>
    %14 = vector.broadcast %13 : vector<8x1xf32> to vector<8x32xf32>
    %15 = arith.subf %1, %14 : vector<8x32xf32>
    %16 = arith.mulf %15, %15 : vector<8x32xf32>
    %cst_13 = arith.constant dense<0.000000e+00> : vector<8xf32>
    %17 = vector.multi_reduction <add>, %16, %cst_13 [1] : vector<8x32xf32> to vector<8xf32>
    %18 = vector.shape_cast %17 : vector<8xf32> to vector<8x1xf32>
    %cst_14 = arith.constant 3.200000e+01 : f32
    %19 = vector.broadcast %cst_14 : f32 to vector<8x1xf32>
    %20 = arith.divf %18, %19 : vector<8x1xf32>
    %21 = vector.broadcast %13 : vector<8x1xf32> to vector<8x32xf32>
    %22 = arith.subf %1, %21 : vector<8x32xf32>
    %cst_15 = arith.constant 9.99999974E-6 : f32
    %23 = vector.broadcast %cst_15 : f32 to vector<8x1xf32>
    %24 = arith.addf %20, %23 : vector<8x1xf32>
    %25 = math.rsqrt %24 : vector<8x1xf32>
    %26 = vector.broadcast %25 : vector<8x1xf32> to vector<8x32xf32>
    %27 = arith.mulf %22, %26 : vector<8x32xf32>
    %28 = vector.broadcast %7 : vector<1x32xf32> to vector<8x32xf32>
    %29 = arith.mulf %27, %28 : vector<8x32xf32>
    %30 = vector.broadcast %9 : vector<1x32xf32> to vector<8x32xf32>
    %31 = arith.addf %29, %30 : vector<8x32xf32>
    %32 = arith.truncf %31 : vector<8x32xf32> to vector<8x32xbf16>
    %c0_16 = arith.constant 0 : index
    %c0_17 = arith.constant 0 : index
    %c0_18 = arith.constant 0 : index
    %33 = vector.load %arg4[%c0_16, %c0_17, %c0_18] : memref<2x32x96xbf16, #tpu.memory_space<vmem>>, vector<1x32x96xbf16>
    %34 = vector.shape_cast %33 : vector<1x32x96xbf16> to vector<32x96xbf16>
    %cst_19 = arith.constant dense<0.000000e+00> : vector<8x96xf32>
    %35 = tpu.matmul %32, %34, %cst_19 {dimension_numbers = #tpu.dot_dimension_numbers<[1], [0], [0], [1], [0, 0, 1, 1], [], []>} : vector<8x32xbf16>, vector<32x96xbf16>, vector<8x96xf32> -> vector<8x96xf32>
    %c0_20 = arith.constant 0 : index
    %c0_21 = arith.constant 0 : index
    %c0_22 = arith.constant 0 : index
    %36 = vector.load %arg5[%c0_20, %c0_21, %c0_22] : memref<2x1x96xf32, #tpu.memory_space<vmem>>, vector<1x1x96xf32>
    %37 = vector.shape_cast %36 : vector<1x1x96xf32> to vector<1x96xf32>
    %38 = vector.broadcast %37 : vector<1x96xf32> to vector<8x96xf32>
    %39 = arith.addf %35, %38 : vector<8x96xf32>
    %c0_23 = arith.constant 0 : index
    %c0_24 = arith.constant 0 : index
    %c0_25 = arith.constant 0 : index
    %40 = vector.load %arg2[%c0_23, %c0_24, %c0_25] : memref<2x1x32xf32, #tpu.memory_space<vmem>>, vector<1x1x32xf32>
    %41 = vector.shape_cast %40 : vector<1x1x32xf32> to vector<1x32xf32>
    %c0_26 = arith.constant 0 : index
    %c0_27 = arith.constant 0 : index
    %c0_28 = arith.constant 0 : index
    %42 = vector.load %arg3[%c0_26, %c0_27, %c0_28] : memref<2x1x32xf32, #tpu.memory_space<vmem>>, vector<1x1x32xf32>
    %43 = vector.shape_cast %42 : vector<1x1x32xf32> to vector<1x32xf32>
    %cst_29 = arith.constant dense<0.000000e+00> : vector<8xf32>
    %44 = vector.multi_reduction <add>, %3, %cst_29 [1] : vector<8x32xf32> to vector<8xf32>
    %45 = vector.shape_cast %44 : vector<8xf32> to vector<8x1xf32>
    %cst_30 = arith.constant 3.200000e+01 : f32
    %46 = vector.broadcast %cst_30 : f32 to vector<8x1xf32>
    %47 = arith.divf %45, %46 : vector<8x1xf32>
    %48 = vector.broadcast %47 : vector<8x1xf32> to vector<8x32xf32>
    %49 = arith.subf %3, %48 : vector<8x32xf32>
    %50 = arith.mulf %49, %49 : vector<8x32xf32>
    %cst_31 = arith.constant dense<0.000000e+00> : vector<8xf32>
    %51 = vector.multi_reduction <add>, %50, %cst_31 [1] : vector<8x32xf32> to vector<8xf32>
    %52 = vector.shape_cast %51 : vector<8xf32> to vector<8x1xf32>
    %cst_32 = arith.constant 3.200000e+01 : f32
    %53 = vector.broadcast %cst_32 : f32 to vector<8x1xf32>
    %54 = arith.divf %52, %53 : vector<8x1xf32>
    %55 = vector.broadcast %47 : vector<8x1xf32> to vector<8x32xf32>
    %56 = arith.subf %3, %55 : vector<8x32xf32>
    %cst_33 = arith.constant 9.99999974E-6 : f32
    %57 = vector.broadcast %cst_33 : f32 to vector<8x1xf32>
    %58 = arith.addf %54, %57 : vector<8x1xf32>
    %59 = math.rsqrt %58 : vector<8x1xf32>
    %60 = vector.broadcast %59 : vector<8x1xf32> to vector<8x32xf32>
    %61 = arith.mulf %56, %60 : vector<8x32xf32>
    %62 = vector.broadcast %41 : vector<1x32xf32> to vector<8x32xf32>
    %63 = arith.mulf %61, %62 : vector<8x32xf32>
    %64 = vector.broadcast %43 : vector<1x32xf32> to vector<8x32xf32>
    %65 = arith.addf %63, %64 : vector<8x32xf32>
    %66 = arith.truncf %65 : vector<8x32xf32> to vector<8x32xbf16>
    %c0_34 = arith.constant 0 : index
    %c0_35 = arith.constant 0 : index
    %c0_36 = arith.constant 0 : index
    %67 = vector.load %arg4[%c0_34, %c0_35, %c0_36] : memref<2x32x96xbf16, #tpu.memory_space<vmem>>, vector<1x32x96xbf16>
    %68 = vector.shape_cast %67 : vector<1x32x96xbf16> to vector<32x96xbf16>
    %cst_37 = arith.constant dense<0.000000e+00> : vector<8x96xf32>
    %69 = tpu.matmul %66, %68, %cst_37 {dimension_numbers = #tpu.dot_dimension_numbers<[1], [0], [0], [1], [0, 0, 1, 1], [], []>} : vector<8x32xbf16>, vector<32x96xbf16>, vector<8x96xf32> -> vector<8x96xf32>
    %c0_38 = arith.constant 0 : index
    %c0_39 = arith.constant 0 : index
    %c0_40 = arith.constant 0 : index
    %70 = vector.load %arg5[%c0_38, %c0_39, %c0_40] : memref<2x1x96xf32, #tpu.memory_space<vmem>>, vector<1x1x96xf32>
    %71 = vector.shape_cast %70 : vector<1x1x96xf32> to vector<1x96xf32>
    %72 = vector.broadcast %71 : vector<1x96xf32> to vector<8x96xf32>
    %73 = arith.addf %69, %72 : vector<8x96xf32>
    %c0_41 = arith.constant 0 : index
    %c0_42 = arith.constant 0 : index
    %c0_43 = arith.constant 0 : index
    %74 = vector.load %arg2[%c0_41, %c0_42, %c0_43] : memref<2x1x32xf32, #tpu.memory_space<vmem>>, vector<1x1x32xf32>
    %75 = vector.shape_cast %74 : vector<1x1x32xf32> to vector<1x32xf32>
    %c0_44 = arith.constant 0 : index
    %c0_45 = arith.constant 0 : index
    %c0_46 = arith.constant 0 : index
    %76 = vector.load %arg3[%c0_44, %c0_45, %c0_46] : memref<2x1x32xf32, #tpu.memory_space<vmem>>, vector<1x1x32xf32>
    %77 = vector.shape_cast %76 : vector<1x1x32xf32> to vector<1x32xf32>
    %cst_47 = arith.constant dense<0.000000e+00> : vector<8xf32>
    %78 = vector.multi_reduction <add>, %5, %cst_47 [1] : vector<8x32xf32> to vector<8xf32>
    %79 = vector.shape_cast %78 : vector<8xf32> to vector<8x1xf32>
    %cst_48 = arith.constant 3.200000e+01 : f32
    %80 = vector.broadcast %cst_48 : f32 to vector<8x1xf32>
    %81 = arith.divf %79, %80 : vector<8x1xf32>
    %82 = vector.broadcast %81 : vector<8x1xf32> to vector<8x32xf32>
    %83 = arith.subf %5, %82 : vector<8x32xf32>
    %84 = arith.mulf %83, %83 : vector<8x32xf32>
    %cst_49 = arith.constant dense<0.000000e+00> : vector<8xf32>
    %85 = vector.multi_reduction <add>, %84, %cst_49 [1] : vector<8x32xf32> to vector<8xf32>
    %86 = vector.shape_cast %85 : vector<8xf32> to vector<8x1xf32>
    %cst_50 = arith.constant 3.200000e+01 : f32
    %87 = vector.broadcast %cst_50 : f32 to vector<8x1xf32>
    %88 = arith.divf %86, %87 : vector<8x1xf32>
    %89 = vector.broadcast %81 : vector<8x1xf32> to vector<8x32xf32>
    %90 = arith.subf %5, %89 : vector<8x32xf32>
    %cst_51 = arith.constant 9.99999974E-6 : f32
    %91 = vector.broadcast %cst_51 : f32 to vector<8x1xf32>
    %92 = arith.addf %88, %91 : vector<8x1xf32>
    %93 = math.rsqrt %92 : vector<8x1xf32>
    %94 = vector.broadcast %93 : vector<8x1xf32> to vector<8x32xf32>
    %95 = arith.mulf %90, %94 : vector<8x32xf32>
    %96 = vector.broadcast %75 : vector<1x32xf32> to vector<8x32xf32>
    %97 = arith.mulf %95, %96 : vector<8x32xf32>
    %98 = vector.broadcast %77 : vector<1x32xf32> to vector<8x32xf32>
    %99 = arith.addf %97, %98 : vector<8x32xf32>
    %100 = arith.truncf %99 : vector<8x32xf32> to vector<8x32xbf16>
    %c0_52 = arith.constant 0 : index
    %c0_53 = arith.constant 0 : index
    %c0_54 = arith.constant 0 : index
    %101 = vector.load %arg4[%c0_52, %c0_53, %c0_54] : memref<2x32x96xbf16, #tpu.memory_space<vmem>>, vector<1x32x96xbf16>
    %102 = vector.shape_cast %101 : vector<1x32x96xbf16> to vector<32x96xbf16>
    %cst_55 = arith.constant dense<0.000000e+00> : vector<8x96xf32>
    %103 = tpu.matmul %100, %102, %cst_55 {dimension_numbers = #tpu.dot_dimension_numbers<[1], [0], [0], [1], [0, 0, 1, 1], [], []>} : vector<8x32xbf16>, vector<32x96xbf16>, vector<8x96xf32> -> vector<8x96xf32>
    %c0_56 = arith.constant 0 : index
    %c0_57 = arith.constant 0 : index
    %c0_58 = arith.constant 0 : index
    %104 = vector.load %arg5[%c0_56, %c0_57, %c0_58] : memref<2x1x96xf32, #tpu.memory_space<vmem>>, vector<1x1x96xf32>
    %105 = vector.shape_cast %104 : vector<1x1x96xf32> to vector<1x96xf32>
    %106 = vector.broadcast %105 : vector<1x96xf32> to vector<8x96xf32>
    %107 = arith.addf %103, %106 : vector<8x96xf32>
    %108 = vector.extract_strided_slice %39 {offsets = [0, 0], sizes = [8, 16], strides = [1, 1]} : vector<8x96xf32> to vector<8x16xf32>
    %109 = vector.extract_strided_slice %39 {offsets = [0, 32], sizes = [8, 16], strides = [1, 1]} : vector<8x96xf32> to vector<8x16xf32>
    %110 = vector.extract_strided_slice %39 {offsets = [0, 64], sizes = [8, 16], strides = [1, 1]} : vector<8x96xf32> to vector<8x16xf32>
    %111 = arith.mulf %108, %109 : vector<8x16xf32>
    %cst_59 = arith.constant dense<0.000000e+00> : vector<8xf32>
    %112 = vector.multi_reduction <add>, %111, %cst_59 [1] : vector<8x16xf32> to vector<8xf32>
    %113 = vector.shape_cast %112 : vector<8xf32> to vector<8x1xf32>
    %cst_60 = arith.constant 2.500000e-01 : f32
    %114 = vector.broadcast %cst_60 : f32 to vector<8x1xf32>
    %115 = arith.mulf %113, %114 : vector<8x1xf32>
    %cst_61 = arith.constant dense<0xFF800000> : vector<8xf32>
    %116 = vector.multi_reduction <maximumf>, %115, %cst_61 [1] : vector<8x1xf32> to vector<8xf32>
    %117 = vector.shape_cast %116 : vector<8xf32> to vector<8x1xf32>
    %118 = arith.subf %115, %117 : vector<8x1xf32>
    %119 = math.exp %118 : vector<8x1xf32>
    %cst_62 = arith.constant dense<0.000000e+00> : vector<8xf32>
    %120 = vector.multi_reduction <add>, %119, %cst_62 [1] : vector<8x1xf32> to vector<8xf32>
    %121 = vector.shape_cast %120 : vector<8xf32> to vector<8x1xf32>
    %122 = arith.divf %119, %121 : vector<8x1xf32>
    %123 = vector.broadcast %122 : vector<8x1xf32> to vector<8x16xf32>
    %124 = arith.mulf %123, %110 : vector<8x16xf32>
    %125 = vector.extract_strided_slice %39 {offsets = [0, 16], sizes = [8, 16], strides = [1, 1]} : vector<8x96xf32> to vector<8x16xf32>
    %126 = vector.extract_strided_slice %39 {offsets = [0, 48], sizes = [8, 16], strides = [1, 1]} : vector<8x96xf32> to vector<8x16xf32>
    %127 = vector.extract_strided_slice %39 {offsets = [0, 80], sizes = [8, 16], strides = [1, 1]} : vector<8x96xf32> to vector<8x16xf32>
    %128 = arith.mulf %125, %126 : vector<8x16xf32>
    %cst_63 = arith.constant dense<0.000000e+00> : vector<8xf32>
    %129 = vector.multi_reduction <add>, %128, %cst_63 [1] : vector<8x16xf32> to vector<8xf32>
    %130 = vector.shape_cast %129 : vector<8xf32> to vector<8x1xf32>
    %cst_64 = arith.constant 2.500000e-01 : f32
    %131 = vector.broadcast %cst_64 : f32 to vector<8x1xf32>
    %132 = arith.mulf %130, %131 : vector<8x1xf32>
    %cst_65 = arith.constant dense<0xFF800000> : vector<8xf32>
    %133 = vector.multi_reduction <maximumf>, %132, %cst_65 [1] : vector<8x1xf32> to vector<8xf32>
    %134 = vector.shape_cast %133 : vector<8xf32> to vector<8x1xf32>
    %135 = arith.subf %132, %134 : vector<8x1xf32>
    %136 = math.exp %135 : vector<8x1xf32>
    %cst_66 = arith.constant dense<0.000000e+00> : vector<8xf32>
    %137 = vector.multi_reduction <add>, %136, %cst_66 [1] : vector<8x1xf32> to vector<8xf32>
    %138 = vector.shape_cast %137 : vector<8xf32> to vector<8x1xf32>
    %139 = arith.divf %136, %138 : vector<8x1xf32>
    %140 = vector.broadcast %139 : vector<8x1xf32> to vector<8x16xf32>
    %141 = arith.mulf %140, %127 : vector<8x16xf32>
    %142 = tpu.concatenate %124, %141 in 1 : vector<8x16xf32>, vector<8x16xf32> -> vector<8x32xf32>
    %143 = arith.truncf %142 : vector<8x32xf32> to vector<8x32xbf16>
    %c0_67 = arith.constant 0 : index
    %c0_68 = arith.constant 0 : index
    %c0_69 = arith.constant 0 : index
    %144 = vector.load %arg6[%c0_67, %c0_68, %c0_69] : memref<2x32x32xbf16, #tpu.memory_space<vmem>>, vector<1x32x32xbf16>
    %145 = vector.shape_cast %144 : vector<1x32x32xbf16> to vector<32x32xbf16>
    %cst_70 = arith.constant dense<0.000000e+00> : vector<8x32xf32>
    %146 = tpu.matmul %143, %145, %cst_70 {dimension_numbers = #tpu.dot_dimension_numbers<[1], [0], [0], [1], [0, 0, 1, 1], [], []>} : vector<8x32xbf16>, vector<32x32xbf16>, vector<8x32xf32> -> vector<8x32xf32>
    %c0_71 = arith.constant 0 : index
    %c0_72 = arith.constant 0 : index
    %c0_73 = arith.constant 0 : index
    %147 = vector.load %arg7[%c0_71, %c0_72, %c0_73] : memref<2x1x32xf32, #tpu.memory_space<vmem>>, vector<1x1x32xf32>
    %148 = vector.shape_cast %147 : vector<1x1x32xf32> to vector<1x32xf32>
    %149 = vector.broadcast %148 : vector<1x32xf32> to vector<8x32xf32>
    %150 = arith.addf %146, %149 : vector<8x32xf32>
    %151 = arith.addf %1, %150 : vector<8x32xf32>
    %152 = vector.extract_strided_slice %73 {offsets = [0, 0], sizes = [8, 16], strides = [1, 1]} : vector<8x96xf32> to vector<8x16xf32>
    %153 = vector.extract_strided_slice %39 {offsets = [0, 32], sizes = [8, 16], strides = [1, 1]} : vector<8x96xf32> to vector<8x16xf32>
    %154 = vector.extract_strided_slice %73 {offsets = [0, 32], sizes = [8, 16], strides = [1, 1]} : vector<8x96xf32> to vector<8x16xf32>
    %155 = vector.extract_strided_slice %39 {offsets = [0, 64], sizes = [8, 16], strides = [1, 1]} : vector<8x96xf32> to vector<8x16xf32>
    %156 = vector.extract_strided_slice %73 {offsets = [0, 64], sizes = [8, 16], strides = [1, 1]} : vector<8x96xf32> to vector<8x16xf32>
    %157 = arith.mulf %152, %153 : vector<8x16xf32>
    %cst_74 = arith.constant dense<0.000000e+00> : vector<8xf32>
    %158 = vector.multi_reduction <add>, %157, %cst_74 [1] : vector<8x16xf32> to vector<8xf32>
    %159 = vector.shape_cast %158 : vector<8xf32> to vector<8x1xf32>
    %cst_75 = arith.constant 2.500000e-01 : f32
    %160 = vector.broadcast %cst_75 : f32 to vector<8x1xf32>
    %161 = arith.mulf %159, %160 : vector<8x1xf32>
    %162 = arith.mulf %152, %154 : vector<8x16xf32>
    %cst_76 = arith.constant dense<0.000000e+00> : vector<8xf32>
    %163 = vector.multi_reduction <add>, %162, %cst_76 [1] : vector<8x16xf32> to vector<8xf32>
    %164 = vector.shape_cast %163 : vector<8xf32> to vector<8x1xf32>
    %cst_77 = arith.constant 2.500000e-01 : f32
    %165 = vector.broadcast %cst_77 : f32 to vector<8x1xf32>
    %166 = arith.mulf %164, %165 : vector<8x1xf32>
    %167 = tpu.concatenate %161, %166 in 1 : vector<8x1xf32>, vector<8x1xf32> -> vector<8x2xf32>
    %cst_78 = arith.constant dense<0xFF800000> : vector<8xf32>
    %168 = vector.multi_reduction <maximumf>, %167, %cst_78 [1] : vector<8x2xf32> to vector<8xf32>
    %169 = vector.shape_cast %168 : vector<8xf32> to vector<8x1xf32>
    %170 = vector.broadcast %169 : vector<8x1xf32> to vector<8x2xf32>
    %171 = arith.subf %167, %170 : vector<8x2xf32>
    %172 = math.exp %171 : vector<8x2xf32>
    %cst_79 = arith.constant dense<0.000000e+00> : vector<8xf32>
    %173 = vector.multi_reduction <add>, %172, %cst_79 [1] : vector<8x2xf32> to vector<8xf32>
    %174 = vector.shape_cast %173 : vector<8xf32> to vector<8x1xf32>
    %175 = vector.broadcast %174 : vector<8x1xf32> to vector<8x2xf32>
    %176 = arith.divf %172, %175 : vector<8x2xf32>
    %177 = vector.extract_strided_slice %176 {offsets = [0, 0], sizes = [8, 1], strides = [1, 1]} : vector<8x2xf32> to vector<8x1xf32>
    %178 = vector.broadcast %177 : vector<8x1xf32> to vector<8x16xf32>
    %179 = arith.mulf %178, %155 : vector<8x16xf32>
    %180 = vector.extract_strided_slice %176 {offsets = [0, 1], sizes = [8, 1], strides = [1, 1]} : vector<8x2xf32> to vector<8x1xf32>
    %181 = vector.broadcast %180 : vector<8x1xf32> to vector<8x16xf32>
    %182 = arith.mulf %181, %156 : vector<8x16xf32>
    %183 = arith.addf %179, %182 : vector<8x16xf32>
    %184 = vector.extract_strided_slice %73 {offsets = [0, 16], sizes = [8, 16], strides = [1, 1]} : vector<8x96xf32> to vector<8x16xf32>
    %185 = vector.extract_strided_slice %39 {offsets = [0, 48], sizes = [8, 16], strides = [1, 1]} : vector<8x96xf32> to vector<8x16xf32>
    %186 = vector.extract_strided_slice %73 {offsets = [0, 48], sizes = [8, 16], strides = [1, 1]} : vector<8x96xf32> to vector<8x16xf32>
    %187 = vector.extract_strided_slice %39 {offsets = [0, 80], sizes = [8, 16], strides = [1, 1]} : vector<8x96xf32> to vector<8x16xf32>
    %188 = vector.extract_strided_slice %73 {offsets = [0, 80], sizes = [8, 16], strides = [1, 1]} : vector<8x96xf32> to vector<8x16xf32>
    %189 = arith.mulf %184, %185 : vector<8x16xf32>
    %cst_80 = arith.constant dense<0.000000e+00> : vector<8xf32>
    %190 = vector.multi_reduction <add>, %189, %cst_80 [1] : vector<8x16xf32> to vector<8xf32>
    %191 = vector.shape_cast %190 : vector<8xf32> to vector<8x1xf32>
    %cst_81 = arith.constant 2.500000e-01 : f32
    %192 = vector.broadcast %cst_81 : f32 to vector<8x1xf32>
    %193 = arith.mulf %191, %192 : vector<8x1xf32>
    %194 = arith.mulf %184, %186 : vector<8x16xf32>
    %cst_82 = arith.constant dense<0.000000e+00> : vector<8xf32>
    %195 = vector.multi_reduction <add>, %194, %cst_82 [1] : vector<8x16xf32> to vector<8xf32>
    %196 = vector.shape_cast %195 : vector<8xf32> to vector<8x1xf32>
    %cst_83 = arith.constant 2.500000e-01 : f32
    %197 = vector.broadcast %cst_83 : f32 to vector<8x1xf32>
    %198 = arith.mulf %196, %197 : vector<8x1xf32>
    %199 = tpu.concatenate %193, %198 in 1 : vector<8x1xf32>, vector<8x1xf32> -> vector<8x2xf32>
    %cst_84 = arith.constant dense<0xFF800000> : vector<8xf32>
    %200 = vector.multi_reduction <maximumf>, %199, %cst_84 [1] : vector<8x2xf32> to vector<8xf32>
    %201 = vector.shape_cast %200 : vector<8xf32> to vector<8x1xf32>
    %202 = vector.broadcast %201 : vector<8x1xf32> to vector<8x2xf32>
    %203 = arith.subf %199, %202 : vector<8x2xf32>
    %204 = math.exp %203 : vector<8x2xf32>
    %cst_85 = arith.constant dense<0.000000e+00> : vector<8xf32>
    %205 = vector.multi_reduction <add>, %204, %cst_85 [1] : vector<8x2xf32> to vector<8xf32>
    %206 = vector.shape_cast %205 : vector<8xf32> to vector<8x1xf32>
    %207 = vector.broadcast %206 : vector<8x1xf32> to vector<8x2xf32>
    %208 = arith.divf %204, %207 : vector<8x2xf32>
    %209 = vector.extract_strided_slice %208 {offsets = [0, 0], sizes = [8, 1], strides = [1, 1]} : vector<8x2xf32> to vector<8x1xf32>
    %210 = vector.broadcast %209 : vector<8x1xf32> to vector<8x16xf32>
    %211 = arith.mulf %210, %187 : vector<8x16xf32>
    %212 = vector.extract_strided_slice %208 {offsets = [0, 1], sizes = [8, 1], strides = [1, 1]} : vector<8x2xf32> to vector<8x1xf32>
    %213 = vector.broadcast %212 : vector<8x1xf32> to vector<8x16xf32>
    %214 = arith.mulf %213, %188 : vector<8x16xf32>
    %215 = arith.addf %211, %214 : vector<8x16xf32>
    %216 = tpu.concatenate %183, %215 in 1 : vector<8x16xf32>, vector<8x16xf32> -> vector<8x32xf32>
    %217 = arith.truncf %216 : vector<8x32xf32> to vector<8x32xbf16>
    %c0_86 = arith.constant 0 : index
    %c0_87 = arith.constant 0 : index
    %c0_88 = arith.constant 0 : index
    %218 = vector.load %arg6[%c0_86, %c0_87, %c0_88] : memref<2x32x32xbf16, #tpu.memory_space<vmem>>, vector<1x32x32xbf16>
    %219 = vector.shape_cast %218 : vector<1x32x32xbf16> to vector<32x32xbf16>
    %cst_89 = arith.constant dense<0.000000e+00> : vector<8x32xf32>
    %220 = tpu.matmul %217, %219, %cst_89 {dimension_numbers = #tpu.dot_dimension_numbers<[1], [0], [0], [1], [0, 0, 1, 1], [], []>} : vector<8x32xbf16>, vector<32x32xbf16>, vector<8x32xf32> -> vector<8x32xf32>
    %c0_90 = arith.constant 0 : index
    %c0_91 = arith.constant 0 : index
    %c0_92 = arith.constant 0 : index
    %221 = vector.load %arg7[%c0_90, %c0_91, %c0_92] : memref<2x1x32xf32, #tpu.memory_space<vmem>>, vector<1x1x32xf32>
    %222 = vector.shape_cast %221 : vector<1x1x32xf32> to vector<1x32xf32>
    %223 = vector.broadcast %222 : vector<1x32xf32> to vector<8x32xf32>
    %224 = arith.addf %220, %223 : vector<8x32xf32>
    %225 = arith.addf %3, %224 : vector<8x32xf32>
    %226 = vector.extract_strided_slice %107 {offsets = [0, 0], sizes = [8, 16], strides = [1, 1]} : vector<8x96xf32> to vector<8x16xf32>
    %227 = vector.extract_strided_slice %39 {offsets = [0, 32], sizes = [8, 16], strides = [1, 1]} : vector<8x96xf32> to vector<8x16xf32>
    %228 = vector.extract_strided_slice %73 {offsets = [0, 32], sizes = [8, 16], strides = [1, 1]} : vector<8x96xf32> to vector<8x16xf32>
    %229 = vector.extract_strided_slice %107 {offsets = [0, 32], sizes = [8, 16], strides = [1, 1]} : vector<8x96xf32> to vector<8x16xf32>
    %230 = vector.extract_strided_slice %39 {offsets = [0, 64], sizes = [8, 16], strides = [1, 1]} : vector<8x96xf32> to vector<8x16xf32>
    %231 = vector.extract_strided_slice %73 {offsets = [0, 64], sizes = [8, 16], strides = [1, 1]} : vector<8x96xf32> to vector<8x16xf32>
    %232 = vector.extract_strided_slice %107 {offsets = [0, 64], sizes = [8, 16], strides = [1, 1]} : vector<8x96xf32> to vector<8x16xf32>
    %233 = arith.mulf %226, %227 : vector<8x16xf32>
    %cst_93 = arith.constant dense<0.000000e+00> : vector<8xf32>
    %234 = vector.multi_reduction <add>, %233, %cst_93 [1] : vector<8x16xf32> to vector<8xf32>
    %235 = vector.shape_cast %234 : vector<8xf32> to vector<8x1xf32>
    %cst_94 = arith.constant 2.500000e-01 : f32
    %236 = vector.broadcast %cst_94 : f32 to vector<8x1xf32>
    %237 = arith.mulf %235, %236 : vector<8x1xf32>
    %238 = arith.mulf %226, %228 : vector<8x16xf32>
    %cst_95 = arith.constant dense<0.000000e+00> : vector<8xf32>
    %239 = vector.multi_reduction <add>, %238, %cst_95 [1] : vector<8x16xf32> to vector<8xf32>
    %240 = vector.shape_cast %239 : vector<8xf32> to vector<8x1xf32>
    %cst_96 = arith.constant 2.500000e-01 : f32
    %241 = vector.broadcast %cst_96 : f32 to vector<8x1xf32>
    %242 = arith.mulf %240, %241 : vector<8x1xf32>
    %243 = arith.mulf %226, %229 : vector<8x16xf32>
    %cst_97 = arith.constant dense<0.000000e+00> : vector<8xf32>
    %244 = vector.multi_reduction <add>, %243, %cst_97 [1] : vector<8x16xf32> to vector<8xf32>
    %245 = vector.shape_cast %244 : vector<8xf32> to vector<8x1xf32>
    %cst_98 = arith.constant 2.500000e-01 : f32
    %246 = vector.broadcast %cst_98 : f32 to vector<8x1xf32>
    %247 = arith.mulf %245, %246 : vector<8x1xf32>
    %248 = tpu.concatenate %237, %242, %247 in 1 : vector<8x1xf32>, vector<8x1xf32>, vector<8x1xf32> -> vector<8x3xf32>
    %cst_99 = arith.constant dense<0xFF800000> : vector<8xf32>
    %249 = vector.multi_reduction <maximumf>, %248, %cst_99 [1] : vector<8x3xf32> to vector<8xf32>
    %250 = vector.shape_cast %249 : vector<8xf32> to vector<8x1xf32>
    %251 = vector.broadcast %250 : vector<8x1xf32> to vector<8x3xf32>
    %252 = arith.subf %248, %251 : vector<8x3xf32>
    %253 = math.exp %252 : vector<8x3xf32>
    %cst_100 = arith.constant dense<0.000000e+00> : vector<8xf32>
    %254 = vector.multi_reduction <add>, %253, %cst_100 [1] : vector<8x3xf32> to vector<8xf32>
    %255 = vector.shape_cast %254 : vector<8xf32> to vector<8x1xf32>
    %256 = vector.broadcast %255 : vector<8x1xf32> to vector<8x3xf32>
    %257 = arith.divf %253, %256 : vector<8x3xf32>
    %258 = vector.extract_strided_slice %257 {offsets = [0, 0], sizes = [8, 1], strides = [1, 1]} : vector<8x3xf32> to vector<8x1xf32>
    %259 = vector.broadcast %258 : vector<8x1xf32> to vector<8x16xf32>
    %260 = arith.mulf %259, %230 : vector<8x16xf32>
    %261 = vector.extract_strided_slice %257 {offsets = [0, 1], sizes = [8, 1], strides = [1, 1]} : vector<8x3xf32> to vector<8x1xf32>
    %262 = vector.broadcast %261 : vector<8x1xf32> to vector<8x16xf32>
    %263 = arith.mulf %262, %231 : vector<8x16xf32>
    %264 = arith.addf %260, %263 : vector<8x16xf32>
    %265 = vector.extract_strided_slice %257 {offsets = [0, 2], sizes = [8, 1], strides = [1, 1]} : vector<8x3xf32> to vector<8x1xf32>
    %266 = vector.broadcast %265 : vector<8x1xf32> to vector<8x16xf32>
    %267 = arith.mulf %266, %232 : vector<8x16xf32>
    %268 = arith.addf %264, %267 : vector<8x16xf32>
    %269 = vector.extract_strided_slice %107 {offsets = [0, 16], sizes = [8, 16], strides = [1, 1]} : vector<8x96xf32> to vector<8x16xf32>
    %270 = vector.extract_strided_slice %39 {offsets = [0, 48], sizes = [8, 16], strides = [1, 1]} : vector<8x96xf32> to vector<8x16xf32>
    %271 = vector.extract_strided_slice %73 {offsets = [0, 48], sizes = [8, 16], strides = [1, 1]} : vector<8x96xf32> to vector<8x16xf32>
    %272 = vector.extract_strided_slice %107 {offsets = [0, 48], sizes = [8, 16], strides = [1, 1]} : vector<8x96xf32> to vector<8x16xf32>
    %273 = vector.extract_strided_slice %39 {offsets = [0, 80], sizes = [8, 16], strides = [1, 1]} : vector<8x96xf32> to vector<8x16xf32>
    %274 = vector.extract_strided_slice %73 {offsets = [0, 80], sizes = [8, 16], strides = [1, 1]} : vector<8x96xf32> to vector<8x16xf32>
    %275 = vector.extract_strided_slice %107 {offsets = [0, 80], sizes = [8, 16], strides = [1, 1]} : vector<8x96xf32> to vector<8x16xf32>
    %276 = arith.mulf %269, %270 : vector<8x16xf32>
    %cst_101 = arith.constant dense<0.000000e+00> : vector<8xf32>
    %277 = vector.multi_reduction <add>, %276, %cst_101 [1] : vector<8x16xf32> to vector<8xf32>
    %278 = vector.shape_cast %277 : vector<8xf32> to vector<8x1xf32>
    %cst_102 = arith.constant 2.500000e-01 : f32
    %279 = vector.broadcast %cst_102 : f32 to vector<8x1xf32>
    %280 = arith.mulf %278, %279 : vector<8x1xf32>
    %281 = arith.mulf %269, %271 : vector<8x16xf32>
    %cst_103 = arith.constant dense<0.000000e+00> : vector<8xf32>
    %282 = vector.multi_reduction <add>, %281, %cst_103 [1] : vector<8x16xf32> to vector<8xf32>
    %283 = vector.shape_cast %282 : vector<8xf32> to vector<8x1xf32>
    %cst_104 = arith.constant 2.500000e-01 : f32
    %284 = vector.broadcast %cst_104 : f32 to vector<8x1xf32>
    %285 = arith.mulf %283, %284 : vector<8x1xf32>
    %286 = arith.mulf %269, %272 : vector<8x16xf32>
    %cst_105 = arith.constant dense<0.000000e+00> : vector<8xf32>
    %287 = vector.multi_reduction <add>, %286, %cst_105 [1] : vector<8x16xf32> to vector<8xf32>
    %288 = vector.shape_cast %287 : vector<8xf32> to vector<8x1xf32>
    %cst_106 = arith.constant 2.500000e-01 : f32
    %289 = vector.broadcast %cst_106 : f32 to vector<8x1xf32>
    %290 = arith.mulf %288, %289 : vector<8x1xf32>
    %291 = tpu.concatenate %280, %285, %290 in 1 : vector<8x1xf32>, vector<8x1xf32>, vector<8x1xf32> -> vector<8x3xf32>
    %cst_107 = arith.constant dense<0xFF800000> : vector<8xf32>
    %292 = vector.multi_reduction <maximumf>, %291, %cst_107 [1] : vector<8x3xf32> to vector<8xf32>
    %293 = vector.shape_cast %292 : vector<8xf32> to vector<8x1xf32>
    %294 = vector.broadcast %293 : vector<8x1xf32> to vector<8x3xf32>
    %295 = arith.subf %291, %294 : vector<8x3xf32>
    %296 = math.exp %295 : vector<8x3xf32>
    %cst_108 = arith.constant dense<0.000000e+00> : vector<8xf32>
    %297 = vector.multi_reduction <add>, %296, %cst_108 [1] : vector<8x3xf32> to vector<8xf32>
    %298 = vector.shape_cast %297 : vector<8xf32> to vector<8x1xf32>
    %299 = vector.broadcast %298 : vector<8x1xf32> to vector<8x3xf32>
    %300 = arith.divf %296, %299 : vector<8x3xf32>
    %301 = vector.extract_strided_slice %300 {offsets = [0, 0], sizes = [8, 1], strides = [1, 1]} : vector<8x3xf32> to vector<8x1xf32>
    %302 = vector.broadcast %301 : vector<8x1xf32> to vector<8x16xf32>
    %303 = arith.mulf %302, %273 : vector<8x16xf32>
    %304 = vector.extract_strided_slice %300 {offsets = [0, 1], sizes = [8, 1], strides = [1, 1]} : vector<8x3xf32> to vector<8x1xf32>
    %305 = vector.broadcast %304 : vector<8x1xf32> to vector<8x16xf32>
    %306 = arith.mulf %305, %274 : vector<8x16xf32>
    %307 = arith.addf %303, %306 : vector<8x16xf32>
    %308 = vector.extract_strided_slice %300 {offsets = [0, 2], sizes = [8, 1], strides = [1, 1]} : vector<8x3xf32> to vector<8x1xf32>
    %309 = vector.broadcast %308 : vector<8x1xf32> to vector<8x16xf32>
    %310 = arith.mulf %309, %275 : vector<8x16xf32>
    %311 = arith.addf %307, %310 : vector<8x16xf32>
    %312 = tpu.concatenate %268, %311 in 1 : vector<8x16xf32>, vector<8x16xf32> -> vector<8x32xf32>
    %313 = arith.truncf %312 : vector<8x32xf32> to vector<8x32xbf16>
    %c0_109 = arith.constant 0 : index
    %c0_110 = arith.constant 0 : index
    %c0_111 = arith.constant 0 : index
    %314 = vector.load %arg6[%c0_109, %c0_110, %c0_111] : memref<2x32x32xbf16, #tpu.memory_space<vmem>>, vector<1x32x32xbf16>
    %315 = vector.shape_cast %314 : vector<1x32x32xbf16> to vector<32x32xbf16>
    %cst_112 = arith.constant dense<0.000000e+00> : vector<8x32xf32>
    %316 = tpu.matmul %313, %315, %cst_112 {dimension_numbers = #tpu.dot_dimension_numbers<[1], [0], [0], [1], [0, 0, 1, 1], [], []>} : vector<8x32xbf16>, vector<32x32xbf16>, vector<8x32xf32> -> vector<8x32xf32>
    %c0_113 = arith.constant 0 : index
    %c0_114 = arith.constant 0 : index
    %c0_115 = arith.constant 0 : index
    %317 = vector.load %arg7[%c0_113, %c0_114, %c0_115] : memref<2x1x32xf32, #tpu.memory_space<vmem>>, vector<1x1x32xf32>
    %318 = vector.shape_cast %317 : vector<1x1x32xf32> to vector<1x32xf32>
    %319 = vector.broadcast %318 : vector<1x32xf32> to vector<8x32xf32>
    %320 = arith.addf %316, %319 : vector<8x32xf32>
    %321 = arith.addf %5, %320 : vector<8x32xf32>
    %c0_116 = arith.constant 0 : index
    %c0_117 = arith.constant 0 : index
    %c0_118 = arith.constant 0 : index
    %322 = vector.load %arg8[%c0_116, %c0_117, %c0_118] : memref<2x1x32xf32, #tpu.memory_space<vmem>>, vector<1x1x32xf32>
    %323 = vector.shape_cast %322 : vector<1x1x32xf32> to vector<1x32xf32>
    %c0_119 = arith.constant 0 : index
    %c0_120 = arith.constant 0 : index
    %c0_121 = arith.constant 0 : index
    %324 = vector.load %arg9[%c0_119, %c0_120, %c0_121] : memref<2x1x32xf32, #tpu.memory_space<vmem>>, vector<1x1x32xf32>
    %325 = vector.shape_cast %324 : vector<1x1x32xf32> to vector<1x32xf32>
    %cst_122 = arith.constant dense<0.000000e+00> : vector<8xf32>
    %326 = vector.multi_reduction <add>, %151, %cst_122 [1] : vector<8x32xf32> to vector<8xf32>
    %327 = vector.shape_cast %326 : vector<8xf32> to vector<8x1xf32>
    %cst_123 = arith.constant 3.200000e+01 : f32
    %328 = vector.broadcast %cst_123 : f32 to vector<8x1xf32>
    %329 = arith.divf %327, %328 : vector<8x1xf32>
    %330 = vector.broadcast %329 : vector<8x1xf32> to vector<8x32xf32>
    %331 = arith.subf %151, %330 : vector<8x32xf32>
    %332 = arith.mulf %331, %331 : vector<8x32xf32>
    %cst_124 = arith.constant dense<0.000000e+00> : vector<8xf32>
    %333 = vector.multi_reduction <add>, %332, %cst_124 [1] : vector<8x32xf32> to vector<8xf32>
    %334 = vector.shape_cast %333 : vector<8xf32> to vector<8x1xf32>
    %cst_125 = arith.constant 3.200000e+01 : f32
    %335 = vector.broadcast %cst_125 : f32 to vector<8x1xf32>
    %336 = arith.divf %334, %335 : vector<8x1xf32>
    %337 = vector.broadcast %329 : vector<8x1xf32> to vector<8x32xf32>
    %338 = arith.subf %151, %337 : vector<8x32xf32>
    %cst_126 = arith.constant 9.99999974E-6 : f32
    %339 = vector.broadcast %cst_126 : f32 to vector<8x1xf32>
    %340 = arith.addf %336, %339 : vector<8x1xf32>
    %341 = math.rsqrt %340 : vector<8x1xf32>
    %342 = vector.broadcast %341 : vector<8x1xf32> to vector<8x32xf32>
    %343 = arith.mulf %338, %342 : vector<8x32xf32>
    %344 = vector.broadcast %323 : vector<1x32xf32> to vector<8x32xf32>
    %345 = arith.mulf %343, %344 : vector<8x32xf32>
    %346 = vector.broadcast %325 : vector<1x32xf32> to vector<8x32xf32>
    %347 = arith.addf %345, %346 : vector<8x32xf32>
    %348 = arith.truncf %347 : vector<8x32xf32> to vector<8x32xbf16>
    %c0_127 = arith.constant 0 : index
    %c0_128 = arith.constant 0 : index
    %c0_129 = arith.constant 0 : index
    %349 = vector.load %arg10[%c0_127, %c0_128, %c0_129] : memref<2x32x128xbf16, #tpu.memory_space<vmem>>, vector<1x32x128xbf16>
    %350 = vector.shape_cast %349 : vector<1x32x128xbf16> to vector<32x128xbf16>
    %cst_130 = arith.constant dense<0.000000e+00> : vector<8x128xf32>
    %351 = tpu.matmul %348, %350, %cst_130 {dimension_numbers = #tpu.dot_dimension_numbers<[1], [0], [0], [1], [0, 0, 1, 1], [], []>} : vector<8x32xbf16>, vector<32x128xbf16>, vector<8x128xf32> -> vector<8x128xf32>
    %c0_131 = arith.constant 0 : index
    %c0_132 = arith.constant 0 : index
    %c0_133 = arith.constant 0 : index
    %352 = vector.load %arg11[%c0_131, %c0_132, %c0_133] : memref<2x1x128xf32, #tpu.memory_space<vmem>>, vector<1x1x128xf32>
    %353 = vector.shape_cast %352 : vector<1x1x128xf32> to vector<1x128xf32>
    %354 = vector.broadcast %353 : vector<1x128xf32> to vector<8x128xf32>
    %355 = arith.addf %351, %354 : vector<8x128xf32>
    %cst_134 = arith.constant 5.000000e-01 : f32
    %356 = vector.broadcast %cst_134 : f32 to vector<8x128xf32>
    %357 = arith.mulf %356, %355 : vector<8x128xf32>
    %cst_135 = arith.constant 4.471500e-02 : f32
    %358 = vector.broadcast %cst_135 : f32 to vector<8x128xf32>
    %359 = arith.mulf %358, %355 : vector<8x128xf32>
    %360 = arith.mulf %359, %355 : vector<8x128xf32>
    %361 = arith.mulf %360, %355 : vector<8x128xf32>
    %362 = arith.addf %355, %361 : vector<8x128xf32>
    %cst_136 = arith.constant 0.797884583 : f32
    %363 = vector.broadcast %cst_136 : f32 to vector<8x128xf32>
    %364 = arith.mulf %363, %362 : vector<8x128xf32>
    %365 = math.tanh %364 : vector<8x128xf32>
    %cst_137 = arith.constant 1.000000e+00 : f32
    %366 = vector.broadcast %cst_137 : f32 to vector<8x128xf32>
    %367 = arith.addf %366, %365 : vector<8x128xf32>
    %368 = arith.mulf %357, %367 : vector<8x128xf32>
    %369 = arith.truncf %368 : vector<8x128xf32> to vector<8x128xbf16>
    %c0_138 = arith.constant 0 : index
    %c0_139 = arith.constant 0 : index
    %c0_140 = arith.constant 0 : index
    %370 = vector.load %arg12[%c0_138, %c0_139, %c0_140] : memref<2x128x32xbf16, #tpu.memory_space<vmem>>, vector<1x128x32xbf16>
    %371 = vector.shape_cast %370 : vector<1x128x32xbf16> to vector<128x32xbf16>
    %cst_141 = arith.constant dense<0.000000e+00> : vector<8x32xf32>
    %372 = tpu.matmul %369, %371, %cst_141 {dimension_numbers = #tpu.dot_dimension_numbers<[1], [0], [0], [1], [0, 0, 1, 1], [], []>} : vector<8x128xbf16>, vector<128x32xbf16>, vector<8x32xf32> -> vector<8x32xf32>
    %c0_142 = arith.constant 0 : index
    %c0_143 = arith.constant 0 : index
    %c0_144 = arith.constant 0 : index
    %373 = vector.load %arg13[%c0_142, %c0_143, %c0_144] : memref<2x1x32xf32, #tpu.memory_space<vmem>>, vector<1x1x32xf32>
    %374 = vector.shape_cast %373 : vector<1x1x32xf32> to vector<1x32xf32>
    %375 = vector.broadcast %374 : vector<1x32xf32> to vector<8x32xf32>
    %376 = arith.addf %372, %375 : vector<8x32xf32>
    %377 = arith.addf %151, %376 : vector<8x32xf32>
    %c0_145 = arith.constant 0 : index
    %c0_146 = arith.constant 0 : index
    %c0_147 = arith.constant 0 : index
    %378 = vector.load %arg8[%c0_145, %c0_146, %c0_147] : memref<2x1x32xf32, #tpu.memory_space<vmem>>, vector<1x1x32xf32>
    %379 = vector.shape_cast %378 : vector<1x1x32xf32> to vector<1x32xf32>
    %c0_148 = arith.constant 0 : index
    %c0_149 = arith.constant 0 : index
    %c0_150 = arith.constant 0 : index
    %380 = vector.load %arg9[%c0_148, %c0_149, %c0_150] : memref<2x1x32xf32, #tpu.memory_space<vmem>>, vector<1x1x32xf32>
    %381 = vector.shape_cast %380 : vector<1x1x32xf32> to vector<1x32xf32>
    %cst_151 = arith.constant dense<0.000000e+00> : vector<8xf32>
    %382 = vector.multi_reduction <add>, %225, %cst_151 [1] : vector<8x32xf32> to vector<8xf32>
    %383 = vector.shape_cast %382 : vector<8xf32> to vector<8x1xf32>
    %cst_152 = arith.constant 3.200000e+01 : f32
    %384 = vector.broadcast %cst_152 : f32 to vector<8x1xf32>
    %385 = arith.divf %383, %384 : vector<8x1xf32>
    %386 = vector.broadcast %385 : vector<8x1xf32> to vector<8x32xf32>
    %387 = arith.subf %225, %386 : vector<8x32xf32>
    %388 = arith.mulf %387, %387 : vector<8x32xf32>
    %cst_153 = arith.constant dense<0.000000e+00> : vector<8xf32>
    %389 = vector.multi_reduction <add>, %388, %cst_153 [1] : vector<8x32xf32> to vector<8xf32>
    %390 = vector.shape_cast %389 : vector<8xf32> to vector<8x1xf32>
    %cst_154 = arith.constant 3.200000e+01 : f32
    %391 = vector.broadcast %cst_154 : f32 to vector<8x1xf32>
    %392 = arith.divf %390, %391 : vector<8x1xf32>
    %393 = vector.broadcast %385 : vector<8x1xf32> to vector<8x32xf32>
    %394 = arith.subf %225, %393 : vector<8x32xf32>
    %cst_155 = arith.constant 9.99999974E-6 : f32
    %395 = vector.broadcast %cst_155 : f32 to vector<8x1xf32>
    %396 = arith.addf %392, %395 : vector<8x1xf32>
    %397 = math.rsqrt %396 : vector<8x1xf32>
    %398 = vector.broadcast %397 : vector<8x1xf32> to vector<8x32xf32>
    %399 = arith.mulf %394, %398 : vector<8x32xf32>
    %400 = vector.broadcast %379 : vector<1x32xf32> to vector<8x32xf32>
    %401 = arith.mulf %399, %400 : vector<8x32xf32>
    %402 = vector.broadcast %381 : vector<1x32xf32> to vector<8x32xf32>
    %403 = arith.addf %401, %402 : vector<8x32xf32>
    %404 = arith.truncf %403 : vector<8x32xf32> to vector<8x32xbf16>
    %c0_156 = arith.constant 0 : index
    %c0_157 = arith.constant 0 : index
    %c0_158 = arith.constant 0 : index
    %405 = vector.load %arg10[%c0_156, %c0_157, %c0_158] : memref<2x32x128xbf16, #tpu.memory_space<vmem>>, vector<1x32x128xbf16>
    %406 = vector.shape_cast %405 : vector<1x32x128xbf16> to vector<32x128xbf16>
    %cst_159 = arith.constant dense<0.000000e+00> : vector<8x128xf32>
    %407 = tpu.matmul %404, %406, %cst_159 {dimension_numbers = #tpu.dot_dimension_numbers<[1], [0], [0], [1], [0, 0, 1, 1], [], []>} : vector<8x32xbf16>, vector<32x128xbf16>, vector<8x128xf32> -> vector<8x128xf32>
    %c0_160 = arith.constant 0 : index
    %c0_161 = arith.constant 0 : index
    %c0_162 = arith.constant 0 : index
    %408 = vector.load %arg11[%c0_160, %c0_161, %c0_162] : memref<2x1x128xf32, #tpu.memory_space<vmem>>, vector<1x1x128xf32>
    %409 = vector.shape_cast %408 : vector<1x1x128xf32> to vector<1x128xf32>
    %410 = vector.broadcast %409 : vector<1x128xf32> to vector<8x128xf32>
    %411 = arith.addf %407, %410 : vector<8x128xf32>
    %cst_163 = arith.constant 5.000000e-01 : f32
    %412 = vector.broadcast %cst_163 : f32 to vector<8x128xf32>
    %413 = arith.mulf %412, %411 : vector<8x128xf32>
    %cst_164 = arith.constant 4.471500e-02 : f32
    %414 = vector.broadcast %cst_164 : f32 to vector<8x128xf32>
    %415 = arith.mulf %414, %411 : vector<8x128xf32>
    %416 = arith.mulf %415, %411 : vector<8x128xf32>
    %417 = arith.mulf %416, %411 : vector<8x128xf32>
    %418 = arith.addf %411, %417 : vector<8x128xf32>
    %cst_165 = arith.constant 0.797884583 : f32
    %419 = vector.broadcast %cst_165 : f32 to vector<8x128xf32>
    %420 = arith.mulf %419, %418 : vector<8x128xf32>
    %421 = math.tanh %420 : vector<8x128xf32>
    %cst_166 = arith.constant 1.000000e+00 : f32
    %422 = vector.broadcast %cst_166 : f32 to vector<8x128xf32>
    %423 = arith.addf %422, %421 : vector<8x128xf32>
    %424 = arith.mulf %413, %423 : vector<8x128xf32>
    %425 = arith.truncf %424 : vector<8x128xf32> to vector<8x128xbf16>
    %c0_167 = arith.constant 0 : index
    %c0_168 = arith.constant 0 : index
    %c0_169 = arith.constant 0 : index
    %426 = vector.load %arg12[%c0_167, %c0_168, %c0_169] : memref<2x128x32xbf16, #tpu.memory_space<vmem>>, vector<1x128x32xbf16>
    %427 = vector.shape_cast %426 : vector<1x128x32xbf16> to vector<128x32xbf16>
    %cst_170 = arith.constant dense<0.000000e+00> : vector<8x32xf32>
    %428 = tpu.matmul %425, %427, %cst_170 {dimension_numbers = #tpu.dot_dimension_numbers<[1], [0], [0], [1], [0, 0, 1, 1], [], []>} : vector<8x128xbf16>, vector<128x32xbf16>, vector<8x32xf32> -> vector<8x32xf32>
    %c0_171 = arith.constant 0 : index
    %c0_172 = arith.constant 0 : index
    %c0_173 = arith.constant 0 : index
    %429 = vector.load %arg13[%c0_171, %c0_172, %c0_173] : memref<2x1x32xf32, #tpu.memory_space<vmem>>, vector<1x1x32xf32>
    %430 = vector.shape_cast %429 : vector<1x1x32xf32> to vector<1x32xf32>
    %431 = vector.broadcast %430 : vector<1x32xf32> to vector<8x32xf32>
    %432 = arith.addf %428, %431 : vector<8x32xf32>
    %433 = arith.addf %225, %432 : vector<8x32xf32>
    %c0_174 = arith.constant 0 : index
    %c0_175 = arith.constant 0 : index
    %c0_176 = arith.constant 0 : index
    %434 = vector.load %arg8[%c0_174, %c0_175, %c0_176] : memref<2x1x32xf32, #tpu.memory_space<vmem>>, vector<1x1x32xf32>
    %435 = vector.shape_cast %434 : vector<1x1x32xf32> to vector<1x32xf32>
    %c0_177 = arith.constant 0 : index
    %c0_178 = arith.constant 0 : index
    %c0_179 = arith.constant 0 : index
    %436 = vector.load %arg9[%c0_177, %c0_178, %c0_179] : memref<2x1x32xf32, #tpu.memory_space<vmem>>, vector<1x1x32xf32>
    %437 = vector.shape_cast %436 : vector<1x1x32xf32> to vector<1x32xf32>
    %cst_180 = arith.constant dense<0.000000e+00> : vector<8xf32>
    %438 = vector.multi_reduction <add>, %321, %cst_180 [1] : vector<8x32xf32> to vector<8xf32>
    %439 = vector.shape_cast %438 : vector<8xf32> to vector<8x1xf32>
    %cst_181 = arith.constant 3.200000e+01 : f32
    %440 = vector.broadcast %cst_181 : f32 to vector<8x1xf32>
    %441 = arith.divf %439, %440 : vector<8x1xf32>
    %442 = vector.broadcast %441 : vector<8x1xf32> to vector<8x32xf32>
    %443 = arith.subf %321, %442 : vector<8x32xf32>
    %444 = arith.mulf %443, %443 : vector<8x32xf32>
    %cst_182 = arith.constant dense<0.000000e+00> : vector<8xf32>
    %445 = vector.multi_reduction <add>, %444, %cst_182 [1] : vector<8x32xf32> to vector<8xf32>
    %446 = vector.shape_cast %445 : vector<8xf32> to vector<8x1xf32>
    %cst_183 = arith.constant 3.200000e+01 : f32
    %447 = vector.broadcast %cst_183 : f32 to vector<8x1xf32>
    %448 = arith.divf %446, %447 : vector<8x1xf32>
    %449 = vector.broadcast %441 : vector<8x1xf32> to vector<8x32xf32>
    %450 = arith.subf %321, %449 : vector<8x32xf32>
    %cst_184 = arith.constant 9.99999974E-6 : f32
    %451 = vector.broadcast %cst_184 : f32 to vector<8x1xf32>
    %452 = arith.addf %448, %451 : vector<8x1xf32>
    %453 = math.rsqrt %452 : vector<8x1xf32>
    %454 = vector.broadcast %453 : vector<8x1xf32> to vector<8x32xf32>
    %455 = arith.mulf %450, %454 : vector<8x32xf32>
    %456 = vector.broadcast %435 : vector<1x32xf32> to vector<8x32xf32>
    %457 = arith.mulf %455, %456 : vector<8x32xf32>
    %458 = vector.broadcast %437 : vector<1x32xf32> to vector<8x32xf32>
    %459 = arith.addf %457, %458 : vector<8x32xf32>
    %460 = arith.truncf %459 : vector<8x32xf32> to vector<8x32xbf16>
    %c0_185 = arith.constant 0 : index
    %c0_186 = arith.constant 0 : index
    %c0_187 = arith.constant 0 : index
    %461 = vector.load %arg10[%c0_185, %c0_186, %c0_187] : memref<2x32x128xbf16, #tpu.memory_space<vmem>>, vector<1x32x128xbf16>
    %462 = vector.shape_cast %461 : vector<1x32x128xbf16> to vector<32x128xbf16>
    %cst_188 = arith.constant dense<0.000000e+00> : vector<8x128xf32>
    %463 = tpu.matmul %460, %462, %cst_188 {dimension_numbers = #tpu.dot_dimension_numbers<[1], [0], [0], [1], [0, 0, 1, 1], [], []>} : vector<8x32xbf16>, vector<32x128xbf16>, vector<8x128xf32> -> vector<8x128xf32>
    %c0_189 = arith.constant 0 : index
    %c0_190 = arith.constant 0 : index
    %c0_191 = arith.constant 0 : index
    %464 = vector.load %arg11[%c0_189, %c0_190, %c0_191] : memref<2x1x128xf32, #tpu.memory_space<vmem>>, vector<1x1x128xf32>
    %465 = vector.shape_cast %464 : vector<1x1x128xf32> to vector<1x128xf32>
    %466 = vector.broadcast %465 : vector<1x128xf32> to vector<8x128xf32>
    %467 = arith.addf %463, %466 : vector<8x128xf32>
    %cst_192 = arith.constant 5.000000e-01 : f32
    %468 = vector.broadcast %cst_192 : f32 to vector<8x128xf32>
    %469 = arith.mulf %468, %467 : vector<8x128xf32>
    %cst_193 = arith.constant 4.471500e-02 : f32
    %470 = vector.broadcast %cst_193 : f32 to vector<8x128xf32>
    %471 = arith.mulf %470, %467 : vector<8x128xf32>
    %472 = arith.mulf %471, %467 : vector<8x128xf32>
    %473 = arith.mulf %472, %467 : vector<8x128xf32>
    %474 = arith.addf %467, %473 : vector<8x128xf32>
    %cst_194 = arith.constant 0.797884583 : f32
    %475 = vector.broadcast %cst_194 : f32 to vector<8x128xf32>
    %476 = arith.mulf %475, %474 : vector<8x128xf32>
    %477 = math.tanh %476 : vector<8x128xf32>
    %cst_195 = arith.constant 1.000000e+00 : f32
    %478 = vector.broadcast %cst_195 : f32 to vector<8x128xf32>
    %479 = arith.addf %478, %477 : vector<8x128xf32>
    %480 = arith.mulf %469, %479 : vector<8x128xf32>
    %481 = arith.truncf %480 : vector<8x128xf32> to vector<8x128xbf16>
    %c0_196 = arith.constant 0 : index
    %c0_197 = arith.constant 0 : index
    %c0_198 = arith.constant 0 : index
    %482 = vector.load %arg12[%c0_196, %c0_197, %c0_198] : memref<2x128x32xbf16, #tpu.memory_space<vmem>>, vector<1x128x32xbf16>
    %483 = vector.shape_cast %482 : vector<1x128x32xbf16> to vector<128x32xbf16>
    %cst_199 = arith.constant dense<0.000000e+00> : vector<8x32xf32>
    %484 = tpu.matmul %481, %483, %cst_199 {dimension_numbers = #tpu.dot_dimension_numbers<[1], [0], [0], [1], [0, 0, 1, 1], [], []>} : vector<8x128xbf16>, vector<128x32xbf16>, vector<8x32xf32> -> vector<8x32xf32>
    %c0_200 = arith.constant 0 : index
    %c0_201 = arith.constant 0 : index
    %c0_202 = arith.constant 0 : index
    %485 = vector.load %arg13[%c0_200, %c0_201, %c0_202] : memref<2x1x32xf32, #tpu.memory_space<vmem>>, vector<1x1x32xf32>
    %486 = vector.shape_cast %485 : vector<1x1x32xf32> to vector<1x32xf32>
    %487 = vector.broadcast %486 : vector<1x32xf32> to vector<8x32xf32>
    %488 = arith.addf %484, %487 : vector<8x32xf32>
    %489 = arith.addf %321, %488 : vector<8x32xf32>
    %c1_203 = arith.constant 1 : index
    %c0_204 = arith.constant 0 : index
    %c0_205 = arith.constant 0 : index
    %490 = vector.load %arg2[%c1_203, %c0_204, %c0_205] : memref<2x1x32xf32, #tpu.memory_space<vmem>>, vector<1x1x32xf32>
    %491 = vector.shape_cast %490 : vector<1x1x32xf32> to vector<1x32xf32>
    %c1_206 = arith.constant 1 : index
    %c0_207 = arith.constant 0 : index
    %c0_208 = arith.constant 0 : index
    %492 = vector.load %arg3[%c1_206, %c0_207, %c0_208] : memref<2x1x32xf32, #tpu.memory_space<vmem>>, vector<1x1x32xf32>
    %493 = vector.shape_cast %492 : vector<1x1x32xf32> to vector<1x32xf32>
    %cst_209 = arith.constant dense<0.000000e+00> : vector<8xf32>
    %494 = vector.multi_reduction <add>, %377, %cst_209 [1] : vector<8x32xf32> to vector<8xf32>
    %495 = vector.shape_cast %494 : vector<8xf32> to vector<8x1xf32>
    %cst_210 = arith.constant 3.200000e+01 : f32
    %496 = vector.broadcast %cst_210 : f32 to vector<8x1xf32>
    %497 = arith.divf %495, %496 : vector<8x1xf32>
    %498 = vector.broadcast %497 : vector<8x1xf32> to vector<8x32xf32>
    %499 = arith.subf %377, %498 : vector<8x32xf32>
    %500 = arith.mulf %499, %499 : vector<8x32xf32>
    %cst_211 = arith.constant dense<0.000000e+00> : vector<8xf32>
    %501 = vector.multi_reduction <add>, %500, %cst_211 [1] : vector<8x32xf32> to vector<8xf32>
    %502 = vector.shape_cast %501 : vector<8xf32> to vector<8x1xf32>
    %cst_212 = arith.constant 3.200000e+01 : f32
    %503 = vector.broadcast %cst_212 : f32 to vector<8x1xf32>
    %504 = arith.divf %502, %503 : vector<8x1xf32>
    %505 = vector.broadcast %497 : vector<8x1xf32> to vector<8x32xf32>
    %506 = arith.subf %377, %505 : vector<8x32xf32>
    %cst_213 = arith.constant 9.99999974E-6 : f32
    %507 = vector.broadcast %cst_213 : f32 to vector<8x1xf32>
    %508 = arith.addf %504, %507 : vector<8x1xf32>
    %509 = math.rsqrt %508 : vector<8x1xf32>
    %510 = vector.broadcast %509 : vector<8x1xf32> to vector<8x32xf32>
    %511 = arith.mulf %506, %510 : vector<8x32xf32>
    %512 = vector.broadcast %491 : vector<1x32xf32> to vector<8x32xf32>
    %513 = arith.mulf %511, %512 : vector<8x32xf32>
    %514 = vector.broadcast %493 : vector<1x32xf32> to vector<8x32xf32>
    %515 = arith.addf %513, %514 : vector<8x32xf32>
    %516 = arith.truncf %515 : vector<8x32xf32> to vector<8x32xbf16>
    %c1_214 = arith.constant 1 : index
    %c0_215 = arith.constant 0 : index
    %c0_216 = arith.constant 0 : index
    %517 = vector.load %arg4[%c1_214, %c0_215, %c0_216] : memref<2x32x96xbf16, #tpu.memory_space<vmem>>, vector<1x32x96xbf16>
    %518 = vector.shape_cast %517 : vector<1x32x96xbf16> to vector<32x96xbf16>
    %cst_217 = arith.constant dense<0.000000e+00> : vector<8x96xf32>
    %519 = tpu.matmul %516, %518, %cst_217 {dimension_numbers = #tpu.dot_dimension_numbers<[1], [0], [0], [1], [0, 0, 1, 1], [], []>} : vector<8x32xbf16>, vector<32x96xbf16>, vector<8x96xf32> -> vector<8x96xf32>
    %c1_218 = arith.constant 1 : index
    %c0_219 = arith.constant 0 : index
    %c0_220 = arith.constant 0 : index
    %520 = vector.load %arg5[%c1_218, %c0_219, %c0_220] : memref<2x1x96xf32, #tpu.memory_space<vmem>>, vector<1x1x96xf32>
    %521 = vector.shape_cast %520 : vector<1x1x96xf32> to vector<1x96xf32>
    %522 = vector.broadcast %521 : vector<1x96xf32> to vector<8x96xf32>
    %523 = arith.addf %519, %522 : vector<8x96xf32>
    %c1_221 = arith.constant 1 : index
    %c0_222 = arith.constant 0 : index
    %c0_223 = arith.constant 0 : index
    %524 = vector.load %arg2[%c1_221, %c0_222, %c0_223] : memref<2x1x32xf32, #tpu.memory_space<vmem>>, vector<1x1x32xf32>
    %525 = vector.shape_cast %524 : vector<1x1x32xf32> to vector<1x32xf32>
    %c1_224 = arith.constant 1 : index
    %c0_225 = arith.constant 0 : index
    %c0_226 = arith.constant 0 : index
    %526 = vector.load %arg3[%c1_224, %c0_225, %c0_226] : memref<2x1x32xf32, #tpu.memory_space<vmem>>, vector<1x1x32xf32>
    %527 = vector.shape_cast %526 : vector<1x1x32xf32> to vector<1x32xf32>
    %cst_227 = arith.constant dense<0.000000e+00> : vector<8xf32>
    %528 = vector.multi_reduction <add>, %433, %cst_227 [1] : vector<8x32xf32> to vector<8xf32>
    %529 = vector.shape_cast %528 : vector<8xf32> to vector<8x1xf32>
    %cst_228 = arith.constant 3.200000e+01 : f32
    %530 = vector.broadcast %cst_228 : f32 to vector<8x1xf32>
    %531 = arith.divf %529, %530 : vector<8x1xf32>
    %532 = vector.broadcast %531 : vector<8x1xf32> to vector<8x32xf32>
    %533 = arith.subf %433, %532 : vector<8x32xf32>
    %534 = arith.mulf %533, %533 : vector<8x32xf32>
    %cst_229 = arith.constant dense<0.000000e+00> : vector<8xf32>
    %535 = vector.multi_reduction <add>, %534, %cst_229 [1] : vector<8x32xf32> to vector<8xf32>
    %536 = vector.shape_cast %535 : vector<8xf32> to vector<8x1xf32>
    %cst_230 = arith.constant 3.200000e+01 : f32
    %537 = vector.broadcast %cst_230 : f32 to vector<8x1xf32>
    %538 = arith.divf %536, %537 : vector<8x1xf32>
    %539 = vector.broadcast %531 : vector<8x1xf32> to vector<8x32xf32>
    %540 = arith.subf %433, %539 : vector<8x32xf32>
    %cst_231 = arith.constant 9.99999974E-6 : f32
    %541 = vector.broadcast %cst_231 : f32 to vector<8x1xf32>
    %542 = arith.addf %538, %541 : vector<8x1xf32>
    %543 = math.rsqrt %542 : vector<8x1xf32>
    %544 = vector.broadcast %543 : vector<8x1xf32> to vector<8x32xf32>
    %545 = arith.mulf %540, %544 : vector<8x32xf32>
    %546 = vector.broadcast %525 : vector<1x32xf32> to vector<8x32xf32>
    %547 = arith.mulf %545, %546 : vector<8x32xf32>
    %548 = vector.broadcast %527 : vector<1x32xf32> to vector<8x32xf32>
    %549 = arith.addf %547, %548 : vector<8x32xf32>
    %550 = arith.truncf %549 : vector<8x32xf32> to vector<8x32xbf16>
    %c1_232 = arith.constant 1 : index
    %c0_233 = arith.constant 0 : index
    %c0_234 = arith.constant 0 : index
    %551 = vector.load %arg4[%c1_232, %c0_233, %c0_234] : memref<2x32x96xbf16, #tpu.memory_space<vmem>>, vector<1x32x96xbf16>
    %552 = vector.shape_cast %551 : vector<1x32x96xbf16> to vector<32x96xbf16>
    %cst_235 = arith.constant dense<0.000000e+00> : vector<8x96xf32>
    %553 = tpu.matmul %550, %552, %cst_235 {dimension_numbers = #tpu.dot_dimension_numbers<[1], [0], [0], [1], [0, 0, 1, 1], [], []>} : vector<8x32xbf16>, vector<32x96xbf16>, vector<8x96xf32> -> vector<8x96xf32>
    %c1_236 = arith.constant 1 : index
    %c0_237 = arith.constant 0 : index
    %c0_238 = arith.constant 0 : index
    %554 = vector.load %arg5[%c1_236, %c0_237, %c0_238] : memref<2x1x96xf32, #tpu.memory_space<vmem>>, vector<1x1x96xf32>
    %555 = vector.shape_cast %554 : vector<1x1x96xf32> to vector<1x96xf32>
    %556 = vector.broadcast %555 : vector<1x96xf32> to vector<8x96xf32>
    %557 = arith.addf %553, %556 : vector<8x96xf32>
    %c1_239 = arith.constant 1 : index
    %c0_240 = arith.constant 0 : index
    %c0_241 = arith.constant 0 : index
    %558 = vector.load %arg2[%c1_239, %c0_240, %c0_241] : memref<2x1x32xf32, #tpu.memory_space<vmem>>, vector<1x1x32xf32>
    %559 = vector.shape_cast %558 : vector<1x1x32xf32> to vector<1x32xf32>
    %c1_242 = arith.constant 1 : index
    %c0_243 = arith.constant 0 : index
    %c0_244 = arith.constant 0 : index
    %560 = vector.load %arg3[%c1_242, %c0_243, %c0_244] : memref<2x1x32xf32, #tpu.memory_space<vmem>>, vector<1x1x32xf32>
    %561 = vector.shape_cast %560 : vector<1x1x32xf32> to vector<1x32xf32>
    %cst_245 = arith.constant dense<0.000000e+00> : vector<8xf32>
    %562 = vector.multi_reduction <add>, %489, %cst_245 [1] : vector<8x32xf32> to vector<8xf32>
    %563 = vector.shape_cast %562 : vector<8xf32> to vector<8x1xf32>
    %cst_246 = arith.constant 3.200000e+01 : f32
    %564 = vector.broadcast %cst_246 : f32 to vector<8x1xf32>
    %565 = arith.divf %563, %564 : vector<8x1xf32>
    %566 = vector.broadcast %565 : vector<8x1xf32> to vector<8x32xf32>
    %567 = arith.subf %489, %566 : vector<8x32xf32>
    %568 = arith.mulf %567, %567 : vector<8x32xf32>
    %cst_247 = arith.constant dense<0.000000e+00> : vector<8xf32>
    %569 = vector.multi_reduction <add>, %568, %cst_247 [1] : vector<8x32xf32> to vector<8xf32>
    %570 = vector.shape_cast %569 : vector<8xf32> to vector<8x1xf32>
    %cst_248 = arith.constant 3.200000e+01 : f32
    %571 = vector.broadcast %cst_248 : f32 to vector<8x1xf32>
    %572 = arith.divf %570, %571 : vector<8x1xf32>
    %573 = vector.broadcast %565 : vector<8x1xf32> to vector<8x32xf32>
    %574 = arith.subf %489, %573 : vector<8x32xf32>
    %cst_249 = arith.constant 9.99999974E-6 : f32
    %575 = vector.broadcast %cst_249 : f32 to vector<8x1xf32>
    %576 = arith.addf %572, %575 : vector<8x1xf32>
    %577 = math.rsqrt %576 : vector<8x1xf32>
    %578 = vector.broadcast %577 : vector<8x1xf32> to vector<8x32xf32>
    %579 = arith.mulf %574, %578 : vector<8x32xf32>
    %580 = vector.broadcast %559 : vector<1x32xf32> to vector<8x32xf32>
    %581 = arith.mulf %579, %580 : vector<8x32xf32>
    %582 = vector.broadcast %561 : vector<1x32xf32> to vector<8x32xf32>
    %583 = arith.addf %581, %582 : vector<8x32xf32>
    %584 = arith.truncf %583 : vector<8x32xf32> to vector<8x32xbf16>
    %c1_250 = arith.constant 1 : index
    %c0_251 = arith.constant 0 : index
    %c0_252 = arith.constant 0 : index
    %585 = vector.load %arg4[%c1_250, %c0_251, %c0_252] : memref<2x32x96xbf16, #tpu.memory_space<vmem>>, vector<1x32x96xbf16>
    %586 = vector.shape_cast %585 : vector<1x32x96xbf16> to vector<32x96xbf16>
    %cst_253 = arith.constant dense<0.000000e+00> : vector<8x96xf32>
    %587 = tpu.matmul %584, %586, %cst_253 {dimension_numbers = #tpu.dot_dimension_numbers<[1], [0], [0], [1], [0, 0, 1, 1], [], []>} : vector<8x32xbf16>, vector<32x96xbf16>, vector<8x96xf32> -> vector<8x96xf32>
    %c1_254 = arith.constant 1 : index
    %c0_255 = arith.constant 0 : index
    %c0_256 = arith.constant 0 : index
    %588 = vector.load %arg5[%c1_254, %c0_255, %c0_256] : memref<2x1x96xf32, #tpu.memory_space<vmem>>, vector<1x1x96xf32>
    %589 = vector.shape_cast %588 : vector<1x1x96xf32> to vector<1x96xf32>
    %590 = vector.broadcast %589 : vector<1x96xf32> to vector<8x96xf32>
    %591 = arith.addf %587, %590 : vector<8x96xf32>
    %592 = vector.extract_strided_slice %591 {offsets = [0, 0], sizes = [8, 16], strides = [1, 1]} : vector<8x96xf32> to vector<8x16xf32>
    %593 = vector.extract_strided_slice %523 {offsets = [0, 32], sizes = [8, 16], strides = [1, 1]} : vector<8x96xf32> to vector<8x16xf32>
    %594 = vector.extract_strided_slice %557 {offsets = [0, 32], sizes = [8, 16], strides = [1, 1]} : vector<8x96xf32> to vector<8x16xf32>
    %595 = vector.extract_strided_slice %591 {offsets = [0, 32], sizes = [8, 16], strides = [1, 1]} : vector<8x96xf32> to vector<8x16xf32>
    %596 = vector.extract_strided_slice %523 {offsets = [0, 64], sizes = [8, 16], strides = [1, 1]} : vector<8x96xf32> to vector<8x16xf32>
    %597 = vector.extract_strided_slice %557 {offsets = [0, 64], sizes = [8, 16], strides = [1, 1]} : vector<8x96xf32> to vector<8x16xf32>
    %598 = vector.extract_strided_slice %591 {offsets = [0, 64], sizes = [8, 16], strides = [1, 1]} : vector<8x96xf32> to vector<8x16xf32>
    %599 = arith.mulf %592, %593 : vector<8x16xf32>
    %cst_257 = arith.constant dense<0.000000e+00> : vector<8xf32>
    %600 = vector.multi_reduction <add>, %599, %cst_257 [1] : vector<8x16xf32> to vector<8xf32>
    %601 = vector.shape_cast %600 : vector<8xf32> to vector<8x1xf32>
    %cst_258 = arith.constant 2.500000e-01 : f32
    %602 = vector.broadcast %cst_258 : f32 to vector<8x1xf32>
    %603 = arith.mulf %601, %602 : vector<8x1xf32>
    %604 = arith.mulf %592, %594 : vector<8x16xf32>
    %cst_259 = arith.constant dense<0.000000e+00> : vector<8xf32>
    %605 = vector.multi_reduction <add>, %604, %cst_259 [1] : vector<8x16xf32> to vector<8xf32>
    %606 = vector.shape_cast %605 : vector<8xf32> to vector<8x1xf32>
    %cst_260 = arith.constant 2.500000e-01 : f32
    %607 = vector.broadcast %cst_260 : f32 to vector<8x1xf32>
    %608 = arith.mulf %606, %607 : vector<8x1xf32>
    %609 = arith.mulf %592, %595 : vector<8x16xf32>
    %cst_261 = arith.constant dense<0.000000e+00> : vector<8xf32>
    %610 = vector.multi_reduction <add>, %609, %cst_261 [1] : vector<8x16xf32> to vector<8xf32>
    %611 = vector.shape_cast %610 : vector<8xf32> to vector<8x1xf32>
    %cst_262 = arith.constant 2.500000e-01 : f32
    %612 = vector.broadcast %cst_262 : f32 to vector<8x1xf32>
    %613 = arith.mulf %611, %612 : vector<8x1xf32>
    %614 = tpu.concatenate %603, %608, %613 in 1 : vector<8x1xf32>, vector<8x1xf32>, vector<8x1xf32> -> vector<8x3xf32>
    %cst_263 = arith.constant dense<0xFF800000> : vector<8xf32>
    %615 = vector.multi_reduction <maximumf>, %614, %cst_263 [1] : vector<8x3xf32> to vector<8xf32>
    %616 = vector.shape_cast %615 : vector<8xf32> to vector<8x1xf32>
    %617 = vector.broadcast %616 : vector<8x1xf32> to vector<8x3xf32>
    %618 = arith.subf %614, %617 : vector<8x3xf32>
    %619 = math.exp %618 : vector<8x3xf32>
    %cst_264 = arith.constant dense<0.000000e+00> : vector<8xf32>
    %620 = vector.multi_reduction <add>, %619, %cst_264 [1] : vector<8x3xf32> to vector<8xf32>
    %621 = vector.shape_cast %620 : vector<8xf32> to vector<8x1xf32>
    %622 = vector.broadcast %621 : vector<8x1xf32> to vector<8x3xf32>
    %623 = arith.divf %619, %622 : vector<8x3xf32>
    %624 = vector.extract_strided_slice %623 {offsets = [0, 0], sizes = [8, 1], strides = [1, 1]} : vector<8x3xf32> to vector<8x1xf32>
    %625 = vector.broadcast %624 : vector<8x1xf32> to vector<8x16xf32>
    %626 = arith.mulf %625, %596 : vector<8x16xf32>
    %627 = vector.extract_strided_slice %623 {offsets = [0, 1], sizes = [8, 1], strides = [1, 1]} : vector<8x3xf32> to vector<8x1xf32>
    %628 = vector.broadcast %627 : vector<8x1xf32> to vector<8x16xf32>
    %629 = arith.mulf %628, %597 : vector<8x16xf32>
    %630 = arith.addf %626, %629 : vector<8x16xf32>
    %631 = vector.extract_strided_slice %623 {offsets = [0, 2], sizes = [8, 1], strides = [1, 1]} : vector<8x3xf32> to vector<8x1xf32>
    %632 = vector.broadcast %631 : vector<8x1xf32> to vector<8x16xf32>
    %633 = arith.mulf %632, %598 : vector<8x16xf32>
    %634 = arith.addf %630, %633 : vector<8x16xf32>
    %635 = vector.extract_strided_slice %591 {offsets = [0, 16], sizes = [8, 16], strides = [1, 1]} : vector<8x96xf32> to vector<8x16xf32>
    %636 = vector.extract_strided_slice %523 {offsets = [0, 48], sizes = [8, 16], strides = [1, 1]} : vector<8x96xf32> to vector<8x16xf32>
    %637 = vector.extract_strided_slice %557 {offsets = [0, 48], sizes = [8, 16], strides = [1, 1]} : vector<8x96xf32> to vector<8x16xf32>
    %638 = vector.extract_strided_slice %591 {offsets = [0, 48], sizes = [8, 16], strides = [1, 1]} : vector<8x96xf32> to vector<8x16xf32>
    %639 = vector.extract_strided_slice %523 {offsets = [0, 80], sizes = [8, 16], strides = [1, 1]} : vector<8x96xf32> to vector<8x16xf32>
    %640 = vector.extract_strided_slice %557 {offsets = [0, 80], sizes = [8, 16], strides = [1, 1]} : vector<8x96xf32> to vector<8x16xf32>
    %641 = vector.extract_strided_slice %591 {offsets = [0, 80], sizes = [8, 16], strides = [1, 1]} : vector<8x96xf32> to vector<8x16xf32>
    %642 = arith.mulf %635, %636 : vector<8x16xf32>
    %cst_265 = arith.constant dense<0.000000e+00> : vector<8xf32>
    %643 = vector.multi_reduction <add>, %642, %cst_265 [1] : vector<8x16xf32> to vector<8xf32>
    %644 = vector.shape_cast %643 : vector<8xf32> to vector<8x1xf32>
    %cst_266 = arith.constant 2.500000e-01 : f32
    %645 = vector.broadcast %cst_266 : f32 to vector<8x1xf32>
    %646 = arith.mulf %644, %645 : vector<8x1xf32>
    %647 = arith.mulf %635, %637 : vector<8x16xf32>
    %cst_267 = arith.constant dense<0.000000e+00> : vector<8xf32>
    %648 = vector.multi_reduction <add>, %647, %cst_267 [1] : vector<8x16xf32> to vector<8xf32>
    %649 = vector.shape_cast %648 : vector<8xf32> to vector<8x1xf32>
    %cst_268 = arith.constant 2.500000e-01 : f32
    %650 = vector.broadcast %cst_268 : f32 to vector<8x1xf32>
    %651 = arith.mulf %649, %650 : vector<8x1xf32>
    %652 = arith.mulf %635, %638 : vector<8x16xf32>
    %cst_269 = arith.constant dense<0.000000e+00> : vector<8xf32>
    %653 = vector.multi_reduction <add>, %652, %cst_269 [1] : vector<8x16xf32> to vector<8xf32>
    %654 = vector.shape_cast %653 : vector<8xf32> to vector<8x1xf32>
    %cst_270 = arith.constant 2.500000e-01 : f32
    %655 = vector.broadcast %cst_270 : f32 to vector<8x1xf32>
    %656 = arith.mulf %654, %655 : vector<8x1xf32>
    %657 = tpu.concatenate %646, %651, %656 in 1 : vector<8x1xf32>, vector<8x1xf32>, vector<8x1xf32> -> vector<8x3xf32>
    %cst_271 = arith.constant dense<0xFF800000> : vector<8xf32>
    %658 = vector.multi_reduction <maximumf>, %657, %cst_271 [1] : vector<8x3xf32> to vector<8xf32>
    %659 = vector.shape_cast %658 : vector<8xf32> to vector<8x1xf32>
    %660 = vector.broadcast %659 : vector<8x1xf32> to vector<8x3xf32>
    %661 = arith.subf %657, %660 : vector<8x3xf32>
    %662 = math.exp %661 : vector<8x3xf32>
    %cst_272 = arith.constant dense<0.000000e+00> : vector<8xf32>
    %663 = vector.multi_reduction <add>, %662, %cst_272 [1] : vector<8x3xf32> to vector<8xf32>
    %664 = vector.shape_cast %663 : vector<8xf32> to vector<8x1xf32>
    %665 = vector.broadcast %664 : vector<8x1xf32> to vector<8x3xf32>
    %666 = arith.divf %662, %665 : vector<8x3xf32>
    %667 = vector.extract_strided_slice %666 {offsets = [0, 0], sizes = [8, 1], strides = [1, 1]} : vector<8x3xf32> to vector<8x1xf32>
    %668 = vector.broadcast %667 : vector<8x1xf32> to vector<8x16xf32>
    %669 = arith.mulf %668, %639 : vector<8x16xf32>
    %670 = vector.extract_strided_slice %666 {offsets = [0, 1], sizes = [8, 1], strides = [1, 1]} : vector<8x3xf32> to vector<8x1xf32>
    %671 = vector.broadcast %670 : vector<8x1xf32> to vector<8x16xf32>
    %672 = arith.mulf %671, %640 : vector<8x16xf32>
    %673 = arith.addf %669, %672 : vector<8x16xf32>
    %674 = vector.extract_strided_slice %666 {offsets = [0, 2], sizes = [8, 1], strides = [1, 1]} : vector<8x3xf32> to vector<8x1xf32>
    %675 = vector.broadcast %674 : vector<8x1xf32> to vector<8x16xf32>
    %676 = arith.mulf %675, %641 : vector<8x16xf32>
    %677 = arith.addf %673, %676 : vector<8x16xf32>
    %678 = tpu.concatenate %634, %677 in 1 : vector<8x16xf32>, vector<8x16xf32> -> vector<8x32xf32>
    %679 = arith.truncf %678 : vector<8x32xf32> to vector<8x32xbf16>
    %c1_273 = arith.constant 1 : index
    %c0_274 = arith.constant 0 : index
    %c0_275 = arith.constant 0 : index
    %680 = vector.load %arg6[%c1_273, %c0_274, %c0_275] : memref<2x32x32xbf16, #tpu.memory_space<vmem>>, vector<1x32x32xbf16>
    %681 = vector.shape_cast %680 : vector<1x32x32xbf16> to vector<32x32xbf16>
    %cst_276 = arith.constant dense<0.000000e+00> : vector<8x32xf32>
    %682 = tpu.matmul %679, %681, %cst_276 {dimension_numbers = #tpu.dot_dimension_numbers<[1], [0], [0], [1], [0, 0, 1, 1], [], []>} : vector<8x32xbf16>, vector<32x32xbf16>, vector<8x32xf32> -> vector<8x32xf32>
    %c1_277 = arith.constant 1 : index
    %c0_278 = arith.constant 0 : index
    %c0_279 = arith.constant 0 : index
    %683 = vector.load %arg7[%c1_277, %c0_278, %c0_279] : memref<2x1x32xf32, #tpu.memory_space<vmem>>, vector<1x1x32xf32>
    %684 = vector.shape_cast %683 : vector<1x1x32xf32> to vector<1x32xf32>
    %685 = vector.broadcast %684 : vector<1x32xf32> to vector<8x32xf32>
    %686 = arith.addf %682, %685 : vector<8x32xf32>
    %687 = arith.addf %489, %686 : vector<8x32xf32>
    %c1_280 = arith.constant 1 : index
    %c0_281 = arith.constant 0 : index
    %c0_282 = arith.constant 0 : index
    %688 = vector.load %arg8[%c1_280, %c0_281, %c0_282] : memref<2x1x32xf32, #tpu.memory_space<vmem>>, vector<1x1x32xf32>
    %689 = vector.shape_cast %688 : vector<1x1x32xf32> to vector<1x32xf32>
    %c1_283 = arith.constant 1 : index
    %c0_284 = arith.constant 0 : index
    %c0_285 = arith.constant 0 : index
    %690 = vector.load %arg9[%c1_283, %c0_284, %c0_285] : memref<2x1x32xf32, #tpu.memory_space<vmem>>, vector<1x1x32xf32>
    %691 = vector.shape_cast %690 : vector<1x1x32xf32> to vector<1x32xf32>
    %cst_286 = arith.constant dense<0.000000e+00> : vector<8xf32>
    %692 = vector.multi_reduction <add>, %687, %cst_286 [1] : vector<8x32xf32> to vector<8xf32>
    %693 = vector.shape_cast %692 : vector<8xf32> to vector<8x1xf32>
    %cst_287 = arith.constant 3.200000e+01 : f32
    %694 = vector.broadcast %cst_287 : f32 to vector<8x1xf32>
    %695 = arith.divf %693, %694 : vector<8x1xf32>
    %696 = vector.broadcast %695 : vector<8x1xf32> to vector<8x32xf32>
    %697 = arith.subf %687, %696 : vector<8x32xf32>
    %698 = arith.mulf %697, %697 : vector<8x32xf32>
    %cst_288 = arith.constant dense<0.000000e+00> : vector<8xf32>
    %699 = vector.multi_reduction <add>, %698, %cst_288 [1] : vector<8x32xf32> to vector<8xf32>
    %700 = vector.shape_cast %699 : vector<8xf32> to vector<8x1xf32>
    %cst_289 = arith.constant 3.200000e+01 : f32
    %701 = vector.broadcast %cst_289 : f32 to vector<8x1xf32>
    %702 = arith.divf %700, %701 : vector<8x1xf32>
    %703 = vector.broadcast %695 : vector<8x1xf32> to vector<8x32xf32>
    %704 = arith.subf %687, %703 : vector<8x32xf32>
    %cst_290 = arith.constant 9.99999974E-6 : f32
    %705 = vector.broadcast %cst_290 : f32 to vector<8x1xf32>
    %706 = arith.addf %702, %705 : vector<8x1xf32>
    %707 = math.rsqrt %706 : vector<8x1xf32>
    %708 = vector.broadcast %707 : vector<8x1xf32> to vector<8x32xf32>
    %709 = arith.mulf %704, %708 : vector<8x32xf32>
    %710 = vector.broadcast %689 : vector<1x32xf32> to vector<8x32xf32>
    %711 = arith.mulf %709, %710 : vector<8x32xf32>
    %712 = vector.broadcast %691 : vector<1x32xf32> to vector<8x32xf32>
    %713 = arith.addf %711, %712 : vector<8x32xf32>
    %714 = arith.truncf %713 : vector<8x32xf32> to vector<8x32xbf16>
    %c1_291 = arith.constant 1 : index
    %c0_292 = arith.constant 0 : index
    %c0_293 = arith.constant 0 : index
    %715 = vector.load %arg10[%c1_291, %c0_292, %c0_293] : memref<2x32x128xbf16, #tpu.memory_space<vmem>>, vector<1x32x128xbf16>
    %716 = vector.shape_cast %715 : vector<1x32x128xbf16> to vector<32x128xbf16>
    %cst_294 = arith.constant dense<0.000000e+00> : vector<8x128xf32>
    %717 = tpu.matmul %714, %716, %cst_294 {dimension_numbers = #tpu.dot_dimension_numbers<[1], [0], [0], [1], [0, 0, 1, 1], [], []>} : vector<8x32xbf16>, vector<32x128xbf16>, vector<8x128xf32> -> vector<8x128xf32>
    %c1_295 = arith.constant 1 : index
    %c0_296 = arith.constant 0 : index
    %c0_297 = arith.constant 0 : index
    %718 = vector.load %arg11[%c1_295, %c0_296, %c0_297] : memref<2x1x128xf32, #tpu.memory_space<vmem>>, vector<1x1x128xf32>
    %719 = vector.shape_cast %718 : vector<1x1x128xf32> to vector<1x128xf32>
    %720 = vector.broadcast %719 : vector<1x128xf32> to vector<8x128xf32>
    %721 = arith.addf %717, %720 : vector<8x128xf32>
    %cst_298 = arith.constant 5.000000e-01 : f32
    %722 = vector.broadcast %cst_298 : f32 to vector<8x128xf32>
    %723 = arith.mulf %722, %721 : vector<8x128xf32>
    %cst_299 = arith.constant 4.471500e-02 : f32
    %724 = vector.broadcast %cst_299 : f32 to vector<8x128xf32>
    %725 = arith.mulf %724, %721 : vector<8x128xf32>
    %726 = arith.mulf %725, %721 : vector<8x128xf32>
    %727 = arith.mulf %726, %721 : vector<8x128xf32>
    %728 = arith.addf %721, %727 : vector<8x128xf32>
    %cst_300 = arith.constant 0.797884583 : f32
    %729 = vector.broadcast %cst_300 : f32 to vector<8x128xf32>
    %730 = arith.mulf %729, %728 : vector<8x128xf32>
    %731 = math.tanh %730 : vector<8x128xf32>
    %cst_301 = arith.constant 1.000000e+00 : f32
    %732 = vector.broadcast %cst_301 : f32 to vector<8x128xf32>
    %733 = arith.addf %732, %731 : vector<8x128xf32>
    %734 = arith.mulf %723, %733 : vector<8x128xf32>
    %735 = arith.truncf %734 : vector<8x128xf32> to vector<8x128xbf16>
    %c1_302 = arith.constant 1 : index
    %c0_303 = arith.constant 0 : index
    %c0_304 = arith.constant 0 : index
    %736 = vector.load %arg12[%c1_302, %c0_303, %c0_304] : memref<2x128x32xbf16, #tpu.memory_space<vmem>>, vector<1x128x32xbf16>
    %737 = vector.shape_cast %736 : vector<1x128x32xbf16> to vector<128x32xbf16>
    %cst_305 = arith.constant dense<0.000000e+00> : vector<8x32xf32>
    %738 = tpu.matmul %735, %737, %cst_305 {dimension_numbers = #tpu.dot_dimension_numbers<[1], [0], [0], [1], [0, 0, 1, 1], [], []>} : vector<8x128xbf16>, vector<128x32xbf16>, vector<8x32xf32> -> vector<8x32xf32>
    %c1_306 = arith.constant 1 : index
    %c0_307 = arith.constant 0 : index
    %c0_308 = arith.constant 0 : index
    %739 = vector.load %arg13[%c1_306, %c0_307, %c0_308] : memref<2x1x32xf32, #tpu.memory_space<vmem>>, vector<1x1x32xf32>
    %740 = vector.shape_cast %739 : vector<1x1x32xf32> to vector<1x32xf32>
    %741 = vector.broadcast %740 : vector<1x32xf32> to vector<8x32xf32>
    %742 = arith.addf %738, %741 : vector<8x32xf32>
    %743 = arith.addf %687, %742 : vector<8x32xf32>
    %c0_309 = arith.constant 0 : index
    %c0_310 = arith.constant 0 : index
    %744 = vector.load %arg14[%c0_309, %c0_310] : memref<1x32xf32, #tpu.memory_space<vmem>>, vector<1x32xf32>
    %c0_311 = arith.constant 0 : index
    %c0_312 = arith.constant 0 : index
    %745 = vector.load %arg15[%c0_311, %c0_312] : memref<1x32xf32, #tpu.memory_space<vmem>>, vector<1x32xf32>
    %cst_313 = arith.constant dense<0.000000e+00> : vector<8xf32>
    %746 = vector.multi_reduction <add>, %743, %cst_313 [1] : vector<8x32xf32> to vector<8xf32>
    %747 = vector.shape_cast %746 : vector<8xf32> to vector<8x1xf32>
    %cst_314 = arith.constant 3.200000e+01 : f32
    %748 = vector.broadcast %cst_314 : f32 to vector<8x1xf32>
    %749 = arith.divf %747, %748 : vector<8x1xf32>
    %750 = vector.broadcast %749 : vector<8x1xf32> to vector<8x32xf32>
    %751 = arith.subf %743, %750 : vector<8x32xf32>
    %752 = arith.mulf %751, %751 : vector<8x32xf32>
    %cst_315 = arith.constant dense<0.000000e+00> : vector<8xf32>
    %753 = vector.multi_reduction <add>, %752, %cst_315 [1] : vector<8x32xf32> to vector<8xf32>
    %754 = vector.shape_cast %753 : vector<8xf32> to vector<8x1xf32>
    %cst_316 = arith.constant 3.200000e+01 : f32
    %755 = vector.broadcast %cst_316 : f32 to vector<8x1xf32>
    %756 = arith.divf %754, %755 : vector<8x1xf32>
    %757 = vector.broadcast %749 : vector<8x1xf32> to vector<8x32xf32>
    %758 = arith.subf %743, %757 : vector<8x32xf32>
    %cst_317 = arith.constant 9.99999974E-6 : f32
    %759 = vector.broadcast %cst_317 : f32 to vector<8x1xf32>
    %760 = arith.addf %756, %759 : vector<8x1xf32>
    %761 = math.rsqrt %760 : vector<8x1xf32>
    %762 = vector.broadcast %761 : vector<8x1xf32> to vector<8x32xf32>
    %763 = arith.mulf %758, %762 : vector<8x32xf32>
    %764 = vector.broadcast %744 : vector<1x32xf32> to vector<8x32xf32>
    %765 = arith.mulf %763, %764 : vector<8x32xf32>
    %766 = vector.broadcast %745 : vector<1x32xf32> to vector<8x32xf32>
    %767 = arith.addf %765, %766 : vector<8x32xf32>
    %768 = arith.truncf %767 : vector<8x32xf32> to vector<8x32xbf16>
    %c0_318 = arith.constant 0 : index
    %c0_319 = arith.constant 0 : index
    %769 = vector.load %arg16[%c0_318, %c0_319] : memref<32x128xbf16, #tpu.memory_space<vmem>>, vector<32x128xbf16>
    %cst_320 = arith.constant dense<0.000000e+00> : vector<8x128xf32>
    %770 = tpu.matmul %768, %769, %cst_320 {dimension_numbers = #tpu.dot_dimension_numbers<[1], [0], [0], [1], [0, 0, 1, 1], [], []>} : vector<8x32xbf16>, vector<32x128xbf16>, vector<8x128xf32> -> vector<8x128xf32>
    %c0_321 = arith.constant 0 : index
    %c0_322 = arith.constant 0 : index
    %771 = vector.load %arg17[%c0_321, %c0_322] : memref<8x128xf32, #tpu.memory_space<vmem>>, vector<8x128xf32>
    tpu.vector_store %arg17[%c0_321, %c0_322], %770 {strides = array<i32>} : memref<8x128xf32, #tpu.memory_space<vmem>>, vector<8x128xf32>,
    return
  }
  func.func @transform_0(%arg0: i32) -> (i32, i32, i32) {
    %c0_i32 = arith.constant 0 : i32
    %c0_i32_0 = arith.constant 0 : i32
    %c0_i32_1 = arith.constant 0 : i32
    return %c0_i32, %arg0, %c0_i32_0 : i32, i32, i32
  }
  func.func @transform_1(%arg0: i32) -> (i32, i32, i32) {
    %c0_i32 = arith.constant 0 : i32
    %c0_i32_0 = arith.constant 0 : i32
    %c0_i32_1 = arith.constant 0 : i32
    %c0_i32_2 = arith.constant 0 : i32
    return %c0_i32, %c0_i32_0, %c0_i32_1 : i32, i32, i32
  }
  func.func @transform_2(%arg0: i32) -> (i32, i32, i32) {
    %c0_i32 = arith.constant 0 : i32
    %c0_i32_0 = arith.constant 0 : i32
    %c0_i32_1 = arith.constant 0 : i32
    %c0_i32_2 = arith.constant 0 : i32
    return %c0_i32, %c0_i32_0, %c0_i32_1 : i32, i32, i32
  }
  func.func @transform_3(%arg0: i32) -> (i32, i32, i32) {
    %c0_i32 = arith.constant 0 : i32
    %c0_i32_0 = arith.constant 0 : i32
    %c0_i32_1 = arith.constant 0 : i32
    %c0_i32_2 = arith.constant 0 : i32
    return %c0_i32, %c0_i32_0, %c0_i32_1 : i32, i32, i32
  }
  func.func @transform_4(%arg0: i32) -> (i32, i32, i32) {
    %c0_i32 = arith.constant 0 : i32
    %c0_i32_0 = arith.constant 0 : i32
    %c0_i32_1 = arith.constant 0 : i32
    %c0_i32_2 = arith.constant 0 : i32
    return %c0_i32, %c0_i32_0, %c0_i32_1 : i32, i32, i32
  }
  func.func @transform_5(%arg0: i32) -> (i32, i32, i32) {
    %c0_i32 = arith.constant 0 : i32
    %c0_i32_0 = arith.constant 0 : i32
    %c0_i32_1 = arith.constant 0 : i32
    %c0_i32_2 = arith.constant 0 : i32
    return %c0_i32, %c0_i32_0, %c0_i32_1 : i32, i32, i32
  }
  func.func @transform_6(%arg0: i32) -> (i32, i32, i32) {
    %c0_i32 = arith.constant 0 : i32
    %c0_i32_0 = arith.constant 0 : i32
    %c0_i32_1 = arith.constant 0 : i32
    %c0_i32_2 = arith.constant 0 : i32
    return %c0_i32, %c0_i32_0, %c0_i32_1 : i32, i32, i32
  }
  func.func @transform_7(%arg0: i32) -> (i32, i32, i32) {
    %c0_i32 = arith.constant 0 : i32
    %c0_i32_0 = arith.constant 0 : i32
    %c0_i32_1 = arith.constant 0 : i32
    %c0_i32_2 = arith.constant 0 : i32
    return %c0_i32, %c0_i32_0, %c0_i32_1 : i32, i32, i32
  }
  func.func @transform_8(%arg0: i32) -> (i32, i32, i32) {
    %c0_i32 = arith.constant 0 : i32
    %c0_i32_0 = arith.constant 0 : i32
    %c0_i32_1 = arith.constant 0 : i32
    %c0_i32_2 = arith.constant 0 : i32
    return %c0_i32, %c0_i32_0, %c0_i32_1 : i32, i32, i32
  }
  func.func @transform_9(%arg0: i32) -> (i32, i32, i32) {
    %c0_i32 = arith.constant 0 : i32
    %c0_i32_0 = arith.constant 0 : i32
    %c0_i32_1 = arith.constant 0 : i32
    %c0_i32_2 = arith.constant 0 : i32
    return %c0_i32, %c0_i32_0, %c0_i32_1 : i32, i32, i32
  }
  func.func @transform_10(%arg0: i32) -> (i32, i32, i32) {
    %c0_i32 = arith.constant 0 : i32
    %c0_i32_0 = arith.constant 0 : i32
    %c0_i32_1 = arith.constant 0 : i32
    %c0_i32_2 = arith.constant 0 : i32
    return %c0_i32, %c0_i32_0, %c0_i32_1 : i32, i32, i32
  }
  func.func @transform_11(%arg0: i32) -> (i32, i32, i32) {
    %c0_i32 = arith.constant 0 : i32
    %c0_i32_0 = arith.constant 0 : i32
    %c0_i32_1 = arith.constant 0 : i32
    %c0_i32_2 = arith.constant 0 : i32
    return %c0_i32, %c0_i32_0, %c0_i32_1 : i32, i32, i32
  }
  func.func @transform_12(%arg0: i32) -> (i32, i32, i32) {
    %c0_i32 = arith.constant 0 : i32
    %c0_i32_0 = arith.constant 0 : i32
    %c0_i32_1 = arith.constant 0 : i32
    %c0_i32_2 = arith.constant 0 : i32
    return %c0_i32, %c0_i32_0, %c0_i32_1 : i32, i32, i32
  }
  func.func @transform_13(%arg0: i32) -> (i32, i32) {
    %c0_i32 = arith.constant 0 : i32
    %c0_i32_0 = arith.constant 0 : i32
    %c0_i32_1 = arith.constant 0 : i32
    return %c0_i32, %c0_i32_0 : i32, i32
  }
  func.func @transform_14(%arg0: i32) -> (i32, i32) {
    %c0_i32 = arith.constant 0 : i32
    %c0_i32_0 = arith.constant 0 : i32
    %c0_i32_1 = arith.constant 0 : i32
    return %c0_i32, %c0_i32_0 : i32, i32
  }
  func.func @transform_15(%arg0: i32) -> (i32, i32) {
    %c0_i32 = arith.constant 0 : i32
    %c0_i32_0 = arith.constant 0 : i32
    %c0_i32_1 = arith.constant 0 : i32
    return %c0_i32, %c0_i32_0 : i32, i32
  }
  func.func @transform_16(%arg0: i32) -> (i32, i32) {
    %c0_i32 = arith.constant 0 : i32
    %c0_i32_0 = arith.constant 0 : i32
    return %arg0, %c0_i32 : i32, i32
  }
}

module attributes {stable_mosaic.version = 11 : i64} {
  func.func @_last_logprob_kernel(%arg0: i32, %arg1: memref<1x16x32xf32, #tpu.memory_space<vmem>>, %arg2: memref<16x1xi32, #tpu.memory_space<vmem>>, %arg3: memref<2x1x32xf32, #tpu.memory_space<vmem>>, %arg4: memref<2x1x32xf32, #tpu.memory_space<vmem>>, %arg5: memref<2x32x96xbf16, #tpu.memory_space<vmem>>, %arg6: memref<2x1x96xf32, #tpu.memory_space<vmem>>, %arg7: memref<2x32x32xbf16, #tpu.memory_space<vmem>>, %arg8: memref<2x1x32xf32, #tpu.memory_space<vmem>>, %arg9: memref<2x1x32xf32, #tpu.memory_space<vmem>>, %arg10: memref<2x1x32xf32, #tpu.memory_space<vmem>>, %arg11: memref<2x32x128xbf16, #tpu.memory_space<vmem>>, %arg12: memref<2x1x128xf32, #tpu.memory_space<vmem>>, %arg13: memref<2x128x32xbf16, #tpu.memory_space<vmem>>, %arg14: memref<2x1x32xf32, #tpu.memory_space<vmem>>, %arg15: memref<1x32xf32, #tpu.memory_space<vmem>>, %arg16: memref<1x32xf32, #tpu.memory_space<vmem>>, %arg17: memref<32x128xbf16, #tpu.memory_space<vmem>>, %arg18: memref<16x1xf32, #tpu.memory_space<vmem>>) attributes {dimension_semantics = [#tpu.dimension_semantics<parallel>], iteration_bounds = array<i64: 3>, scalar_prefetch = 0 : i64, scratch_operands = 0 : i64, tpu.core_type = #tpu.core_type<tc>, window_params = [{transform_indices = @transform_0, window_bounds = array<i64: 1, 16, 32>}, {transform_indices = @transform_1, window_bounds = array<i64: 16, 1>}, {pipeline_mode = #tpu.pipeline_mode<synchronous>, transform_indices = @transform_2, window_bounds = array<i64: 2, 1, 32>}, {pipeline_mode = #tpu.pipeline_mode<synchronous>, transform_indices = @transform_3, window_bounds = array<i64: 2, 1, 32>}, {pipeline_mode = #tpu.pipeline_mode<synchronous>, transform_indices = @transform_4, window_bounds = array<i64: 2, 32, 96>}, {pipeline_mode = #tpu.pipeline_mode<synchronous>, transform_indices = @transform_5, window_bounds = array<i64: 2, 1, 96>}, {pipeline_mode = #tpu.pipeline_mode<synchronous>, transform_indices = @transform_6, window_bounds = array<i64: 2, 32, 32>}, {pipeline_mode = #tpu.pipeline_mode<synchronous>, transform_indices = @transform_7, window_bounds = array<i64: 2, 1, 32>}, {pipeline_mode = #tpu.pipeline_mode<synchronous>, transform_indices = @transform_8, window_bounds = array<i64: 2, 1, 32>}, {pipeline_mode = #tpu.pipeline_mode<synchronous>, transform_indices = @transform_9, window_bounds = array<i64: 2, 1, 32>}, {pipeline_mode = #tpu.pipeline_mode<synchronous>, transform_indices = @transform_10, window_bounds = array<i64: 2, 32, 128>}, {pipeline_mode = #tpu.pipeline_mode<synchronous>, transform_indices = @transform_11, window_bounds = array<i64: 2, 1, 128>}, {pipeline_mode = #tpu.pipeline_mode<synchronous>, transform_indices = @transform_12, window_bounds = array<i64: 2, 128, 32>}, {pipeline_mode = #tpu.pipeline_mode<synchronous>, transform_indices = @transform_13, window_bounds = array<i64: 2, 1, 32>}, {pipeline_mode = #tpu.pipeline_mode<synchronous>, transform_indices = @transform_14, window_bounds = array<i64: 1, 32>}, {pipeline_mode = #tpu.pipeline_mode<synchronous>, transform_indices = @transform_15, window_bounds = array<i64: 1, 32>}, {pipeline_mode = #tpu.pipeline_mode<synchronous>, transform_indices = @transform_16, window_bounds = array<i64: 32, 128>}, {transform_indices = @transform_17, window_bounds = array<i64: 16, 1>}]} {
    %c0 = arith.constant 0 : index
    %c0_0 = arith.constant 0 : index
    %c0_1 = arith.constant 0 : index
    %0 = vector.load %arg1[%c0, %c0_0, %c0_1] : memref<1x16x32xf32, #tpu.memory_space<vmem>>, vector<1x16x32xf32>
    %1 = vector.shape_cast %0 : vector<1x16x32xf32> to vector<16x32xf32>
    %c0_2 = arith.constant 0 : index
    %c0_3 = arith.constant 0 : index
    %c0_4 = arith.constant 0 : index
    %2 = vector.load %arg3[%c0_2, %c0_3, %c0_4] : memref<2x1x32xf32, #tpu.memory_space<vmem>>, vector<1x1x32xf32>
    %3 = vector.shape_cast %2 : vector<1x1x32xf32> to vector<1x32xf32>
    %c0_5 = arith.constant 0 : index
    %c0_6 = arith.constant 0 : index
    %c0_7 = arith.constant 0 : index
    %4 = vector.load %arg4[%c0_5, %c0_6, %c0_7] : memref<2x1x32xf32, #tpu.memory_space<vmem>>, vector<1x1x32xf32>
    %5 = vector.shape_cast %4 : vector<1x1x32xf32> to vector<1x32xf32>
    %cst = arith.constant dense<0.000000e+00> : vector<16xf32>
    %6 = vector.multi_reduction <add>, %1, %cst [1] : vector<16x32xf32> to vector<16xf32>
    %7 = vector.shape_cast %6 : vector<16xf32> to vector<16x1xf32>
    %cst_8 = arith.constant 3.200000e+01 : f32
    %8 = vector.broadcast %cst_8 : f32 to vector<16x1xf32>
    %9 = arith.divf %7, %8 : vector<16x1xf32>
    %10 = vector.broadcast %9 : vector<16x1xf32> to vector<16x32xf32>
    %11 = arith.subf %1, %10 : vector<16x32xf32>
    %12 = arith.mulf %11, %11 : vector<16x32xf32>
    %cst_9 = arith.constant dense<0.000000e+00> : vector<16xf32>
    %13 = vector.multi_reduction <add>, %12, %cst_9 [1] : vector<16x32xf32> to vector<16xf32>
    %14 = vector.shape_cast %13 : vector<16xf32> to vector<16x1xf32>
    %cst_10 = arith.constant 3.200000e+01 : f32
    %15 = vector.broadcast %cst_10 : f32 to vector<16x1xf32>
    %16 = arith.divf %14, %15 : vector<16x1xf32>
    %17 = vector.broadcast %9 : vector<16x1xf32> to vector<16x32xf32>
    %18 = arith.subf %1, %17 : vector<16x32xf32>
    %cst_11 = arith.constant 9.99999974E-6 : f32
    %19 = vector.broadcast %cst_11 : f32 to vector<16x1xf32>
    %20 = arith.addf %16, %19 : vector<16x1xf32>
    %21 = math.rsqrt %20 : vector<16x1xf32>
    %22 = vector.broadcast %21 : vector<16x1xf32> to vector<16x32xf32>
    %23 = arith.mulf %18, %22 : vector<16x32xf32>
    %24 = vector.broadcast %3 : vector<1x32xf32> to vector<16x32xf32>
    %25 = arith.mulf %23, %24 : vector<16x32xf32>
    %26 = vector.broadcast %5 : vector<1x32xf32> to vector<16x32xf32>
    %27 = arith.addf %25, %26 : vector<16x32xf32>
    %28 = arith.truncf %27 : vector<16x32xf32> to vector<16x32xbf16>
    %c0_12 = arith.constant 0 : index
    %c0_13 = arith.constant 0 : index
    %c0_14 = arith.constant 0 : index
    %29 = vector.load %arg5[%c0_12, %c0_13, %c0_14] : memref<2x32x96xbf16, #tpu.memory_space<vmem>>, vector<1x32x96xbf16>
    %30 = vector.shape_cast %29 : vector<1x32x96xbf16> to vector<32x96xbf16>
    %cst_15 = arith.constant dense<0.000000e+00> : vector<16x96xf32>
    %31 = tpu.matmul %28, %30, %cst_15 {dimension_numbers = #tpu.dot_dimension_numbers<[1], [0], [0], [1], [0, 0, 1, 1], [], []>} : vector<16x32xbf16>, vector<32x96xbf16>, vector<16x96xf32> -> vector<16x96xf32>
    %c0_16 = arith.constant 0 : index
    %c0_17 = arith.constant 0 : index
    %c0_18 = arith.constant 0 : index
    %32 = vector.load %arg6[%c0_16, %c0_17, %c0_18] : memref<2x1x96xf32, #tpu.memory_space<vmem>>, vector<1x1x96xf32>
    %33 = vector.shape_cast %32 : vector<1x1x96xf32> to vector<1x96xf32>
    %34 = vector.broadcast %33 : vector<1x96xf32> to vector<16x96xf32>
    %35 = arith.addf %31, %34 : vector<16x96xf32>
    %36 = vector.extract_strided_slice %35 {offsets = [0, 0], sizes = [16, 16], strides = [1, 1]} : vector<16x96xf32> to vector<16x16xf32>
    %37 = vector.extract_strided_slice %35 {offsets = [0, 32], sizes = [16, 16], strides = [1, 1]} : vector<16x96xf32> to vector<16x16xf32>
    %38 = vector.extract_strided_slice %35 {offsets = [0, 64], sizes = [16, 16], strides = [1, 1]} : vector<16x96xf32> to vector<16x16xf32>
    %39 = arith.mulf %36, %37 : vector<16x16xf32>
    %cst_19 = arith.constant dense<0.000000e+00> : vector<16xf32>
    %40 = vector.multi_reduction <add>, %39, %cst_19 [1] : vector<16x16xf32> to vector<16xf32>
    %41 = vector.shape_cast %40 : vector<16xf32> to vector<16x1xf32>
    %cst_20 = arith.constant 2.500000e-01 : f32
    %42 = vector.broadcast %cst_20 : f32 to vector<16x1xf32>
    %43 = arith.mulf %41, %42 : vector<16x1xf32>
    %cst_21 = arith.constant dense<0xFF800000> : vector<16xf32>
    %44 = vector.multi_reduction <maximumf>, %43, %cst_21 [1] : vector<16x1xf32> to vector<16xf32>
    %45 = vector.shape_cast %44 : vector<16xf32> to vector<16x1xf32>
    %46 = arith.subf %43, %45 : vector<16x1xf32>
    %47 = math.exp %46 : vector<16x1xf32>
    %cst_22 = arith.constant dense<0.000000e+00> : vector<16xf32>
    %48 = vector.multi_reduction <add>, %47, %cst_22 [1] : vector<16x1xf32> to vector<16xf32>
    %49 = vector.shape_cast %48 : vector<16xf32> to vector<16x1xf32>
    %50 = arith.divf %47, %49 : vector<16x1xf32>
    %51 = vector.broadcast %50 : vector<16x1xf32> to vector<16x16xf32>
    %52 = arith.mulf %51, %38 : vector<16x16xf32>
    %53 = vector.extract_strided_slice %35 {offsets = [0, 16], sizes = [16, 16], strides = [1, 1]} : vector<16x96xf32> to vector<16x16xf32>
    %54 = vector.extract_strided_slice %35 {offsets = [0, 48], sizes = [16, 16], strides = [1, 1]} : vector<16x96xf32> to vector<16x16xf32>
    %55 = vector.extract_strided_slice %35 {offsets = [0, 80], sizes = [16, 16], strides = [1, 1]} : vector<16x96xf32> to vector<16x16xf32>
    %56 = arith.mulf %53, %54 : vector<16x16xf32>
    %cst_23 = arith.constant dense<0.000000e+00> : vector<16xf32>
    %57 = vector.multi_reduction <add>, %56, %cst_23 [1] : vector<16x16xf32> to vector<16xf32>
    %58 = vector.shape_cast %57 : vector<16xf32> to vector<16x1xf32>
    %cst_24 = arith.constant 2.500000e-01 : f32
    %59 = vector.broadcast %cst_24 : f32 to vector<16x1xf32>
    %60 = arith.mulf %58, %59 : vector<16x1xf32>
    %cst_25 = arith.constant dense<0xFF800000> : vector<16xf32>
    %61 = vector.multi_reduction <maximumf>, %60, %cst_25 [1] : vector<16x1xf32> to vector<16xf32>
    %62 = vector.shape_cast %61 : vector<16xf32> to vector<16x1xf32>
    %63 = arith.subf %60, %62 : vector<16x1xf32>
    %64 = math.exp %63 : vector<16x1xf32>
    %cst_26 = arith.constant dense<0.000000e+00> : vector<16xf32>
    %65 = vector.multi_reduction <add>, %64, %cst_26 [1] : vector<16x1xf32> to vector<16xf32>
    %66 = vector.shape_cast %65 : vector<16xf32> to vector<16x1xf32>
    %67 = arith.divf %64, %66 : vector<16x1xf32>
    %68 = vector.broadcast %67 : vector<16x1xf32> to vector<16x16xf32>
    %69 = arith.mulf %68, %55 : vector<16x16xf32>
    %70 = tpu.concatenate %52, %69 in 1 : vector<16x16xf32>, vector<16x16xf32> -> vector<16x32xf32>
    %71 = arith.truncf %70 : vector<16x32xf32> to vector<16x32xbf16>
    %c0_27 = arith.constant 0 : index
    %c0_28 = arith.constant 0 : index
    %c0_29 = arith.constant 0 : index
    %72 = vector.load %arg7[%c0_27, %c0_28, %c0_29] : memref<2x32x32xbf16, #tpu.memory_space<vmem>>, vector<1x32x32xbf16>
    %73 = vector.shape_cast %72 : vector<1x32x32xbf16> to vector<32x32xbf16>
    %cst_30 = arith.constant dense<0.000000e+00> : vector<16x32xf32>
    %74 = tpu.matmul %71, %73, %cst_30 {dimension_numbers = #tpu.dot_dimension_numbers<[1], [0], [0], [1], [0, 0, 1, 1], [], []>} : vector<16x32xbf16>, vector<32x32xbf16>, vector<16x32xf32> -> vector<16x32xf32>
    %c0_31 = arith.constant 0 : index
    %c0_32 = arith.constant 0 : index
    %c0_33 = arith.constant 0 : index
    %75 = vector.load %arg8[%c0_31, %c0_32, %c0_33] : memref<2x1x32xf32, #tpu.memory_space<vmem>>, vector<1x1x32xf32>
    %76 = vector.shape_cast %75 : vector<1x1x32xf32> to vector<1x32xf32>
    %77 = vector.broadcast %76 : vector<1x32xf32> to vector<16x32xf32>
    %78 = arith.addf %74, %77 : vector<16x32xf32>
    %79 = arith.addf %1, %78 : vector<16x32xf32>
    %c0_34 = arith.constant 0 : index
    %c0_35 = arith.constant 0 : index
    %c0_36 = arith.constant 0 : index
    %80 = vector.load %arg9[%c0_34, %c0_35, %c0_36] : memref<2x1x32xf32, #tpu.memory_space<vmem>>, vector<1x1x32xf32>
    %81 = vector.shape_cast %80 : vector<1x1x32xf32> to vector<1x32xf32>
    %c0_37 = arith.constant 0 : index
    %c0_38 = arith.constant 0 : index
    %c0_39 = arith.constant 0 : index
    %82 = vector.load %arg10[%c0_37, %c0_38, %c0_39] : memref<2x1x32xf32, #tpu.memory_space<vmem>>, vector<1x1x32xf32>
    %83 = vector.shape_cast %82 : vector<1x1x32xf32> to vector<1x32xf32>
    %cst_40 = arith.constant dense<0.000000e+00> : vector<16xf32>
    %84 = vector.multi_reduction <add>, %79, %cst_40 [1] : vector<16x32xf32> to vector<16xf32>
    %85 = vector.shape_cast %84 : vector<16xf32> to vector<16x1xf32>
    %cst_41 = arith.constant 3.200000e+01 : f32
    %86 = vector.broadcast %cst_41 : f32 to vector<16x1xf32>
    %87 = arith.divf %85, %86 : vector<16x1xf32>
    %88 = vector.broadcast %87 : vector<16x1xf32> to vector<16x32xf32>
    %89 = arith.subf %79, %88 : vector<16x32xf32>
    %90 = arith.mulf %89, %89 : vector<16x32xf32>
    %cst_42 = arith.constant dense<0.000000e+00> : vector<16xf32>
    %91 = vector.multi_reduction <add>, %90, %cst_42 [1] : vector<16x32xf32> to vector<16xf32>
    %92 = vector.shape_cast %91 : vector<16xf32> to vector<16x1xf32>
    %cst_43 = arith.constant 3.200000e+01 : f32
    %93 = vector.broadcast %cst_43 : f32 to vector<16x1xf32>
    %94 = arith.divf %92, %93 : vector<16x1xf32>
    %95 = vector.broadcast %87 : vector<16x1xf32> to vector<16x32xf32>
    %96 = arith.subf %79, %95 : vector<16x32xf32>
    %cst_44 = arith.constant 9.99999974E-6 : f32
    %97 = vector.broadcast %cst_44 : f32 to vector<16x1xf32>
    %98 = arith.addf %94, %97 : vector<16x1xf32>
    %99 = math.rsqrt %98 : vector<16x1xf32>
    %100 = vector.broadcast %99 : vector<16x1xf32> to vector<16x32xf32>
    %101 = arith.mulf %96, %100 : vector<16x32xf32>
    %102 = vector.broadcast %81 : vector<1x32xf32> to vector<16x32xf32>
    %103 = arith.mulf %101, %102 : vector<16x32xf32>
    %104 = vector.broadcast %83 : vector<1x32xf32> to vector<16x32xf32>
    %105 = arith.addf %103, %104 : vector<16x32xf32>
    %106 = arith.truncf %105 : vector<16x32xf32> to vector<16x32xbf16>
    %c0_45 = arith.constant 0 : index
    %c0_46 = arith.constant 0 : index
    %c0_47 = arith.constant 0 : index
    %107 = vector.load %arg11[%c0_45, %c0_46, %c0_47] : memref<2x32x128xbf16, #tpu.memory_space<vmem>>, vector<1x32x128xbf16>
    %108 = vector.shape_cast %107 : vector<1x32x128xbf16> to vector<32x128xbf16>
    %cst_48 = arith.constant dense<0.000000e+00> : vector<16x128xf32>
    %109 = tpu.matmul %106, %108, %cst_48 {dimension_numbers = #tpu.dot_dimension_numbers<[1], [0], [0], [1], [0, 0, 1, 1], [], []>} : vector<16x32xbf16>, vector<32x128xbf16>, vector<16x128xf32> -> vector<16x128xf32>
    %c0_49 = arith.constant 0 : index
    %c0_50 = arith.constant 0 : index
    %c0_51 = arith.constant 0 : index
    %110 = vector.load %arg12[%c0_49, %c0_50, %c0_51] : memref<2x1x128xf32, #tpu.memory_space<vmem>>, vector<1x1x128xf32>
    %111 = vector.shape_cast %110 : vector<1x1x128xf32> to vector<1x128xf32>
    %112 = vector.broadcast %111 : vector<1x128xf32> to vector<16x128xf32>
    %113 = arith.addf %109, %112 : vector<16x128xf32>
    %cst_52 = arith.constant 5.000000e-01 : f32
    %114 = vector.broadcast %cst_52 : f32 to vector<16x128xf32>
    %115 = arith.mulf %114, %113 : vector<16x128xf32>
    %cst_53 = arith.constant 4.471500e-02 : f32
    %116 = vector.broadcast %cst_53 : f32 to vector<16x128xf32>
    %117 = arith.mulf %116, %113 : vector<16x128xf32>
    %118 = arith.mulf %117, %113 : vector<16x128xf32>
    %119 = arith.mulf %118, %113 : vector<16x128xf32>
    %120 = arith.addf %113, %119 : vector<16x128xf32>
    %cst_54 = arith.constant 0.797884583 : f32
    %121 = vector.broadcast %cst_54 : f32 to vector<16x128xf32>
    %122 = arith.mulf %121, %120 : vector<16x128xf32>
    %123 = math.tanh %122 : vector<16x128xf32>
    %cst_55 = arith.constant 1.000000e+00 : f32
    %124 = vector.broadcast %cst_55 : f32 to vector<16x128xf32>
    %125 = arith.addf %124, %123 : vector<16x128xf32>
    %126 = arith.mulf %115, %125 : vector<16x128xf32>
    %127 = arith.truncf %126 : vector<16x128xf32> to vector<16x128xbf16>
    %c0_56 = arith.constant 0 : index
    %c0_57 = arith.constant 0 : index
    %c0_58 = arith.constant 0 : index
    %128 = vector.load %arg13[%c0_56, %c0_57, %c0_58] : memref<2x128x32xbf16, #tpu.memory_space<vmem>>, vector<1x128x32xbf16>
    %129 = vector.shape_cast %128 : vector<1x128x32xbf16> to vector<128x32xbf16>
    %cst_59 = arith.constant dense<0.000000e+00> : vector<16x32xf32>
    %130 = tpu.matmul %127, %129, %cst_59 {dimension_numbers = #tpu.dot_dimension_numbers<[1], [0], [0], [1], [0, 0, 1, 1], [], []>} : vector<16x128xbf16>, vector<128x32xbf16>, vector<16x32xf32> -> vector<16x32xf32>
    %c0_60 = arith.constant 0 : index
    %c0_61 = arith.constant 0 : index
    %c0_62 = arith.constant 0 : index
    %131 = vector.load %arg14[%c0_60, %c0_61, %c0_62] : memref<2x1x32xf32, #tpu.memory_space<vmem>>, vector<1x1x32xf32>
    %132 = vector.shape_cast %131 : vector<1x1x32xf32> to vector<1x32xf32>
    %133 = vector.broadcast %132 : vector<1x32xf32> to vector<16x32xf32>
    %134 = arith.addf %130, %133 : vector<16x32xf32>
    %135 = arith.addf %79, %134 : vector<16x32xf32>
    %c1 = arith.constant 1 : index
    %c0_63 = arith.constant 0 : index
    %c0_64 = arith.constant 0 : index
    %136 = vector.load %arg3[%c1, %c0_63, %c0_64] : memref<2x1x32xf32, #tpu.memory_space<vmem>>, vector<1x1x32xf32>
    %137 = vector.shape_cast %136 : vector<1x1x32xf32> to vector<1x32xf32>
    %c1_65 = arith.constant 1 : index
    %c0_66 = arith.constant 0 : index
    %c0_67 = arith.constant 0 : index
    %138 = vector.load %arg4[%c1_65, %c0_66, %c0_67] : memref<2x1x32xf32, #tpu.memory_space<vmem>>, vector<1x1x32xf32>
    %139 = vector.shape_cast %138 : vector<1x1x32xf32> to vector<1x32xf32>
    %cst_68 = arith.constant dense<0.000000e+00> : vector<16xf32>
    %140 = vector.multi_reduction <add>, %135, %cst_68 [1] : vector<16x32xf32> to vector<16xf32>
    %141 = vector.shape_cast %140 : vector<16xf32> to vector<16x1xf32>
    %cst_69 = arith.constant 3.200000e+01 : f32
    %142 = vector.broadcast %cst_69 : f32 to vector<16x1xf32>
    %143 = arith.divf %141, %142 : vector<16x1xf32>
    %144 = vector.broadcast %143 : vector<16x1xf32> to vector<16x32xf32>
    %145 = arith.subf %135, %144 : vector<16x32xf32>
    %146 = arith.mulf %145, %145 : vector<16x32xf32>
    %cst_70 = arith.constant dense<0.000000e+00> : vector<16xf32>
    %147 = vector.multi_reduction <add>, %146, %cst_70 [1] : vector<16x32xf32> to vector<16xf32>
    %148 = vector.shape_cast %147 : vector<16xf32> to vector<16x1xf32>
    %cst_71 = arith.constant 3.200000e+01 : f32
    %149 = vector.broadcast %cst_71 : f32 to vector<16x1xf32>
    %150 = arith.divf %148, %149 : vector<16x1xf32>
    %151 = vector.broadcast %143 : vector<16x1xf32> to vector<16x32xf32>
    %152 = arith.subf %135, %151 : vector<16x32xf32>
    %cst_72 = arith.constant 9.99999974E-6 : f32
    %153 = vector.broadcast %cst_72 : f32 to vector<16x1xf32>
    %154 = arith.addf %150, %153 : vector<16x1xf32>
    %155 = math.rsqrt %154 : vector<16x1xf32>
    %156 = vector.broadcast %155 : vector<16x1xf32> to vector<16x32xf32>
    %157 = arith.mulf %152, %156 : vector<16x32xf32>
    %158 = vector.broadcast %137 : vector<1x32xf32> to vector<16x32xf32>
    %159 = arith.mulf %157, %158 : vector<16x32xf32>
    %160 = vector.broadcast %139 : vector<1x32xf32> to vector<16x32xf32>
    %161 = arith.addf %159, %160 : vector<16x32xf32>
    %162 = arith.truncf %161 : vector<16x32xf32> to vector<16x32xbf16>
    %c1_73 = arith.constant 1 : index
    %c0_74 = arith.constant 0 : index
    %c0_75 = arith.constant 0 : index
    %163 = vector.load %arg5[%c1_73, %c0_74, %c0_75] : memref<2x32x96xbf16, #tpu.memory_space<vmem>>, vector<1x32x96xbf16>
    %164 = vector.shape_cast %163 : vector<1x32x96xbf16> to vector<32x96xbf16>
    %cst_76 = arith.constant dense<0.000000e+00> : vector<16x96xf32>
    %165 = tpu.matmul %162, %164, %cst_76 {dimension_numbers = #tpu.dot_dimension_numbers<[1], [0], [0], [1], [0, 0, 1, 1], [], []>} : vector<16x32xbf16>, vector<32x96xbf16>, vector<16x96xf32> -> vector<16x96xf32>
    %c1_77 = arith.constant 1 : index
    %c0_78 = arith.constant 0 : index
    %c0_79 = arith.constant 0 : index
    %166 = vector.load %arg6[%c1_77, %c0_78, %c0_79] : memref<2x1x96xf32, #tpu.memory_space<vmem>>, vector<1x1x96xf32>
    %167 = vector.shape_cast %166 : vector<1x1x96xf32> to vector<1x96xf32>
    %168 = vector.broadcast %167 : vector<1x96xf32> to vector<16x96xf32>
    %169 = arith.addf %165, %168 : vector<16x96xf32>
    %170 = vector.extract_strided_slice %169 {offsets = [0, 0], sizes = [16, 16], strides = [1, 1]} : vector<16x96xf32> to vector<16x16xf32>
    %171 = vector.extract_strided_slice %169 {offsets = [0, 32], sizes = [16, 16], strides = [1, 1]} : vector<16x96xf32> to vector<16x16xf32>
    %172 = vector.extract_strided_slice %169 {offsets = [0, 64], sizes = [16, 16], strides = [1, 1]} : vector<16x96xf32> to vector<16x16xf32>
    %173 = arith.mulf %170, %171 : vector<16x16xf32>
    %cst_80 = arith.constant dense<0.000000e+00> : vector<16xf32>
    %174 = vector.multi_reduction <add>, %173, %cst_80 [1] : vector<16x16xf32> to vector<16xf32>
    %175 = vector.shape_cast %174 : vector<16xf32> to vector<16x1xf32>
    %cst_81 = arith.constant 2.500000e-01 : f32
    %176 = vector.broadcast %cst_81 : f32 to vector<16x1xf32>
    %177 = arith.mulf %175, %176 : vector<16x1xf32>
    %cst_82 = arith.constant dense<0xFF800000> : vector<16xf32>
    %178 = vector.multi_reduction <maximumf>, %177, %cst_82 [1] : vector<16x1xf32> to vector<16xf32>
    %179 = vector.shape_cast %178 : vector<16xf32> to vector<16x1xf32>
    %180 = arith.subf %177, %179 : vector<16x1xf32>
    %181 = math.exp %180 : vector<16x1xf32>
    %cst_83 = arith.constant dense<0.000000e+00> : vector<16xf32>
    %182 = vector.multi_reduction <add>, %181, %cst_83 [1] : vector<16x1xf32> to vector<16xf32>
    %183 = vector.shape_cast %182 : vector<16xf32> to vector<16x1xf32>
    %184 = arith.divf %181, %183 : vector<16x1xf32>
    %185 = vector.broadcast %184 : vector<16x1xf32> to vector<16x16xf32>
    %186 = arith.mulf %185, %172 : vector<16x16xf32>
    %187 = vector.extract_strided_slice %169 {offsets = [0, 16], sizes = [16, 16], strides = [1, 1]} : vector<16x96xf32> to vector<16x16xf32>
    %188 = vector.extract_strided_slice %169 {offsets = [0, 48], sizes = [16, 16], strides = [1, 1]} : vector<16x96xf32> to vector<16x16xf32>
    %189 = vector.extract_strided_slice %169 {offsets = [0, 80], sizes = [16, 16], strides = [1, 1]} : vector<16x96xf32> to vector<16x16xf32>
    %190 = arith.mulf %187, %188 : vector<16x16xf32>
    %cst_84 = arith.constant dense<0.000000e+00> : vector<16xf32>
    %191 = vector.multi_reduction <add>, %190, %cst_84 [1] : vector<16x16xf32> to vector<16xf32>
    %192 = vector.shape_cast %191 : vector<16xf32> to vector<16x1xf32>
    %cst_85 = arith.constant 2.500000e-01 : f32
    %193 = vector.broadcast %cst_85 : f32 to vector<16x1xf32>
    %194 = arith.mulf %192, %193 : vector<16x1xf32>
    %cst_86 = arith.constant dense<0xFF800000> : vector<16xf32>
    %195 = vector.multi_reduction <maximumf>, %194, %cst_86 [1] : vector<16x1xf32> to vector<16xf32>
    %196 = vector.shape_cast %195 : vector<16xf32> to vector<16x1xf32>
    %197 = arith.subf %194, %196 : vector<16x1xf32>
    %198 = math.exp %197 : vector<16x1xf32>
    %cst_87 = arith.constant dense<0.000000e+00> : vector<16xf32>
    %199 = vector.multi_reduction <add>, %198, %cst_87 [1] : vector<16x1xf32> to vector<16xf32>
    %200 = vector.shape_cast %199 : vector<16xf32> to vector<16x1xf32>
    %201 = arith.divf %198, %200 : vector<16x1xf32>
    %202 = vector.broadcast %201 : vector<16x1xf32> to vector<16x16xf32>
    %203 = arith.mulf %202, %189 : vector<16x16xf32>
    %204 = tpu.concatenate %186, %203 in 1 : vector<16x16xf32>, vector<16x16xf32> -> vector<16x32xf32>
    %205 = arith.truncf %204 : vector<16x32xf32> to vector<16x32xbf16>
    %c1_88 = arith.constant 1 : index
    %c0_89 = arith.constant 0 : index
    %c0_90 = arith.constant 0 : index
    %206 = vector.load %arg7[%c1_88, %c0_89, %c0_90] : memref<2x32x32xbf16, #tpu.memory_space<vmem>>, vector<1x32x32xbf16>
    %207 = vector.shape_cast %206 : vector<1x32x32xbf16> to vector<32x32xbf16>
    %cst_91 = arith.constant dense<0.000000e+00> : vector<16x32xf32>
    %208 = tpu.matmul %205, %207, %cst_91 {dimension_numbers = #tpu.dot_dimension_numbers<[1], [0], [0], [1], [0, 0, 1, 1], [], []>} : vector<16x32xbf16>, vector<32x32xbf16>, vector<16x32xf32> -> vector<16x32xf32>
    %c1_92 = arith.constant 1 : index
    %c0_93 = arith.constant 0 : index
    %c0_94 = arith.constant 0 : index
    %209 = vector.load %arg8[%c1_92, %c0_93, %c0_94] : memref<2x1x32xf32, #tpu.memory_space<vmem>>, vector<1x1x32xf32>
    %210 = vector.shape_cast %209 : vector<1x1x32xf32> to vector<1x32xf32>
    %211 = vector.broadcast %210 : vector<1x32xf32> to vector<16x32xf32>
    %212 = arith.addf %208, %211 : vector<16x32xf32>
    %213 = arith.addf %135, %212 : vector<16x32xf32>
    %c1_95 = arith.constant 1 : index
    %c0_96 = arith.constant 0 : index
    %c0_97 = arith.constant 0 : index
    %214 = vector.load %arg9[%c1_95, %c0_96, %c0_97] : memref<2x1x32xf32, #tpu.memory_space<vmem>>, vector<1x1x32xf32>
    %215 = vector.shape_cast %214 : vector<1x1x32xf32> to vector<1x32xf32>
    %c1_98 = arith.constant 1 : index
    %c0_99 = arith.constant 0 : index
    %c0_100 = arith.constant 0 : index
    %216 = vector.load %arg10[%c1_98, %c0_99, %c0_100] : memref<2x1x32xf32, #tpu.memory_space<vmem>>, vector<1x1x32xf32>
    %217 = vector.shape_cast %216 : vector<1x1x32xf32> to vector<1x32xf32>
    %cst_101 = arith.constant dense<0.000000e+00> : vector<16xf32>
    %218 = vector.multi_reduction <add>, %213, %cst_101 [1] : vector<16x32xf32> to vector<16xf32>
    %219 = vector.shape_cast %218 : vector<16xf32> to vector<16x1xf32>
    %cst_102 = arith.constant 3.200000e+01 : f32
    %220 = vector.broadcast %cst_102 : f32 to vector<16x1xf32>
    %221 = arith.divf %219, %220 : vector<16x1xf32>
    %222 = vector.broadcast %221 : vector<16x1xf32> to vector<16x32xf32>
    %223 = arith.subf %213, %222 : vector<16x32xf32>
    %224 = arith.mulf %223, %223 : vector<16x32xf32>
    %cst_103 = arith.constant dense<0.000000e+00> : vector<16xf32>
    %225 = vector.multi_reduction <add>, %224, %cst_103 [1] : vector<16x32xf32> to vector<16xf32>
    %226 = vector.shape_cast %225 : vector<16xf32> to vector<16x1xf32>
    %cst_104 = arith.constant 3.200000e+01 : f32
    %227 = vector.broadcast %cst_104 : f32 to vector<16x1xf32>
    %228 = arith.divf %226, %227 : vector<16x1xf32>
    %229 = vector.broadcast %221 : vector<16x1xf32> to vector<16x32xf32>
    %230 = arith.subf %213, %229 : vector<16x32xf32>
    %cst_105 = arith.constant 9.99999974E-6 : f32
    %231 = vector.broadcast %cst_105 : f32 to vector<16x1xf32>
    %232 = arith.addf %228, %231 : vector<16x1xf32>
    %233 = math.rsqrt %232 : vector<16x1xf32>
    %234 = vector.broadcast %233 : vector<16x1xf32> to vector<16x32xf32>
    %235 = arith.mulf %230, %234 : vector<16x32xf32>
    %236 = vector.broadcast %215 : vector<1x32xf32> to vector<16x32xf32>
    %237 = arith.mulf %235, %236 : vector<16x32xf32>
    %238 = vector.broadcast %217 : vector<1x32xf32> to vector<16x32xf32>
    %239 = arith.addf %237, %238 : vector<16x32xf32>
    %240 = arith.truncf %239 : vector<16x32xf32> to vector<16x32xbf16>
    %c1_106 = arith.constant 1 : index
    %c0_107 = arith.constant 0 : index
    %c0_108 = arith.constant 0 : index
    %241 = vector.load %arg11[%c1_106, %c0_107, %c0_108] : memref<2x32x128xbf16, #tpu.memory_space<vmem>>, vector<1x32x128xbf16>
    %242 = vector.shape_cast %241 : vector<1x32x128xbf16> to vector<32x128xbf16>
    %cst_109 = arith.constant dense<0.000000e+00> : vector<16x128xf32>
    %243 = tpu.matmul %240, %242, %cst_109 {dimension_numbers = #tpu.dot_dimension_numbers<[1], [0], [0], [1], [0, 0, 1, 1], [], []>} : vector<16x32xbf16>, vector<32x128xbf16>, vector<16x128xf32> -> vector<16x128xf32>
    %c1_110 = arith.constant 1 : index
    %c0_111 = arith.constant 0 : index
    %c0_112 = arith.constant 0 : index
    %244 = vector.load %arg12[%c1_110, %c0_111, %c0_112] : memref<2x1x128xf32, #tpu.memory_space<vmem>>, vector<1x1x128xf32>
    %245 = vector.shape_cast %244 : vector<1x1x128xf32> to vector<1x128xf32>
    %246 = vector.broadcast %245 : vector<1x128xf32> to vector<16x128xf32>
    %247 = arith.addf %243, %246 : vector<16x128xf32>
    %cst_113 = arith.constant 5.000000e-01 : f32
    %248 = vector.broadcast %cst_113 : f32 to vector<16x128xf32>
    %249 = arith.mulf %248, %247 : vector<16x128xf32>
    %cst_114 = arith.constant 4.471500e-02 : f32
    %250 = vector.broadcast %cst_114 : f32 to vector<16x128xf32>
    %251 = arith.mulf %250, %247 : vector<16x128xf32>
    %252 = arith.mulf %251, %247 : vector<16x128xf32>
    %253 = arith.mulf %252, %247 : vector<16x128xf32>
    %254 = arith.addf %247, %253 : vector<16x128xf32>
    %cst_115 = arith.constant 0.797884583 : f32
    %255 = vector.broadcast %cst_115 : f32 to vector<16x128xf32>
    %256 = arith.mulf %255, %254 : vector<16x128xf32>
    %257 = math.tanh %256 : vector<16x128xf32>
    %cst_116 = arith.constant 1.000000e+00 : f32
    %258 = vector.broadcast %cst_116 : f32 to vector<16x128xf32>
    %259 = arith.addf %258, %257 : vector<16x128xf32>
    %260 = arith.mulf %249, %259 : vector<16x128xf32>
    %261 = arith.truncf %260 : vector<16x128xf32> to vector<16x128xbf16>
    %c1_117 = arith.constant 1 : index
    %c0_118 = arith.constant 0 : index
    %c0_119 = arith.constant 0 : index
    %262 = vector.load %arg13[%c1_117, %c0_118, %c0_119] : memref<2x128x32xbf16, #tpu.memory_space<vmem>>, vector<1x128x32xbf16>
    %263 = vector.shape_cast %262 : vector<1x128x32xbf16> to vector<128x32xbf16>
    %cst_120 = arith.constant dense<0.000000e+00> : vector<16x32xf32>
    %264 = tpu.matmul %261, %263, %cst_120 {dimension_numbers = #tpu.dot_dimension_numbers<[1], [0], [0], [1], [0, 0, 1, 1], [], []>} : vector<16x128xbf16>, vector<128x32xbf16>, vector<16x32xf32> -> vector<16x32xf32>
    %c1_121 = arith.constant 1 : index
    %c0_122 = arith.constant 0 : index
    %c0_123 = arith.constant 0 : index
    %265 = vector.load %arg14[%c1_121, %c0_122, %c0_123] : memref<2x1x32xf32, #tpu.memory_space<vmem>>, vector<1x1x32xf32>
    %266 = vector.shape_cast %265 : vector<1x1x32xf32> to vector<1x32xf32>
    %267 = vector.broadcast %266 : vector<1x32xf32> to vector<16x32xf32>
    %268 = arith.addf %264, %267 : vector<16x32xf32>
    %269 = arith.addf %213, %268 : vector<16x32xf32>
    %c0_124 = arith.constant 0 : index
    %c0_125 = arith.constant 0 : index
    %270 = vector.load %arg15[%c0_124, %c0_125] : memref<1x32xf32, #tpu.memory_space<vmem>>, vector<1x32xf32>
    %c0_126 = arith.constant 0 : index
    %c0_127 = arith.constant 0 : index
    %271 = vector.load %arg16[%c0_126, %c0_127] : memref<1x32xf32, #tpu.memory_space<vmem>>, vector<1x32xf32>
    %cst_128 = arith.constant dense<0.000000e+00> : vector<16xf32>
    %272 = vector.multi_reduction <add>, %269, %cst_128 [1] : vector<16x32xf32> to vector<16xf32>
    %273 = vector.shape_cast %272 : vector<16xf32> to vector<16x1xf32>
    %cst_129 = arith.constant 3.200000e+01 : f32
    %274 = vector.broadcast %cst_129 : f32 to vector<16x1xf32>
    %275 = arith.divf %273, %274 : vector<16x1xf32>
    %276 = vector.broadcast %275 : vector<16x1xf32> to vector<16x32xf32>
    %277 = arith.subf %269, %276 : vector<16x32xf32>
    %278 = arith.mulf %277, %277 : vector<16x32xf32>
    %cst_130 = arith.constant dense<0.000000e+00> : vector<16xf32>
    %279 = vector.multi_reduction <add>, %278, %cst_130 [1] : vector<16x32xf32> to vector<16xf32>
    %280 = vector.shape_cast %279 : vector<16xf32> to vector<16x1xf32>
    %cst_131 = arith.constant 3.200000e+01 : f32
    %281 = vector.broadcast %cst_131 : f32 to vector<16x1xf32>
    %282 = arith.divf %280, %281 : vector<16x1xf32>
    %283 = vector.broadcast %275 : vector<16x1xf32> to vector<16x32xf32>
    %284 = arith.subf %269, %283 : vector<16x32xf32>
    %cst_132 = arith.constant 9.99999974E-6 : f32
    %285 = vector.broadcast %cst_132 : f32 to vector<16x1xf32>
    %286 = arith.addf %282, %285 : vector<16x1xf32>
    %287 = math.rsqrt %286 : vector<16x1xf32>
    %288 = vector.broadcast %287 : vector<16x1xf32> to vector<16x32xf32>
    %289 = arith.mulf %284, %288 : vector<16x32xf32>
    %290 = vector.broadcast %270 : vector<1x32xf32> to vector<16x32xf32>
    %291 = arith.mulf %289, %290 : vector<16x32xf32>
    %292 = vector.broadcast %271 : vector<1x32xf32> to vector<16x32xf32>
    %293 = arith.addf %291, %292 : vector<16x32xf32>
    %294 = arith.truncf %293 : vector<16x32xf32> to vector<16x32xbf16>
    %c0_133 = arith.constant 0 : index
    %c0_134 = arith.constant 0 : index
    %295 = vector.load %arg17[%c0_133, %c0_134] : memref<32x128xbf16, #tpu.memory_space<vmem>>, vector<32x128xbf16>
    %cst_135 = arith.constant dense<0.000000e+00> : vector<16x128xf32>
    %296 = tpu.matmul %294, %295, %cst_135 {dimension_numbers = #tpu.dot_dimension_numbers<[1], [0], [0], [1], [0, 0, 1, 1], [], []>} : vector<16x32xbf16>, vector<32x128xbf16>, vector<16x128xf32> -> vector<16x128xf32>
    %cst_136 = arith.constant dense<0xFF800000> : vector<16xf32>
    %297 = vector.multi_reduction <maximumf>, %296, %cst_136 [1] : vector<16x128xf32> to vector<16xf32>
    %298 = vector.shape_cast %297 : vector<16xf32> to vector<16x1xf32>
    %299 = vector.broadcast %298 : vector<16x1xf32> to vector<16x128xf32>
    %300 = arith.subf %296, %299 : vector<16x128xf32>
    %301 = math.exp %300 : vector<16x128xf32>
    %cst_137 = arith.constant dense<0.000000e+00> : vector<16xf32>
    %302 = vector.multi_reduction <add>, %301, %cst_137 [1] : vector<16x128xf32> to vector<16xf32>
    %303 = vector.shape_cast %302 : vector<16xf32> to vector<16x1xf32>
    %304 = math.log %303 : vector<16x1xf32>
    %305 = arith.addf %298, %304 : vector<16x1xf32>
    %c0_138 = arith.constant 0 : index
    %c0_139 = arith.constant 0 : index
    %306 = vector.load %arg2[%c0_138, %c0_139] : memref<16x1xi32, #tpu.memory_space<vmem>>, vector<16x1xi32>
    %307 = tpu.iota {dimensions = array<i32: 1>} : vector<16x128xi32>
    %308 = vector.broadcast %306 : vector<16x1xi32> to vector<16x128xi32>
    %309 = arith.cmpi eq, %307, %308 : vector<16x128xi32>
    %cst_140 = arith.constant 0.000000e+00 : f32
    %310 = vector.broadcast %cst_140 : f32 to vector<16x128xf32>
    %311 = arith.select %309, %296, %310 : vector<16x128xi1>, vector<16x128xf32>
    %cst_141 = arith.constant dense<0.000000e+00> : vector<16xf32>
    %312 = vector.multi_reduction <add>, %311, %cst_141 [1] : vector<16x128xf32> to vector<16xf32>
    %313 = vector.shape_cast %312 : vector<16xf32> to vector<16x1xf32>
    %314 = arith.subf %313, %305 : vector<16x1xf32>
    %c0_142 = arith.constant 0 : index
    %c0_143 = arith.constant 0 : index
    %315 = vector.load %arg18[%c0_142, %c0_143] : memref<16x1xf32, #tpu.memory_space<vmem>>, vector<16x1xf32>
    tpu.vector_store %arg18[%c0_142, %c0_143], %314 {strides = array<i32>} : memref<16x1xf32, #tpu.memory_space<vmem>>, vector<16x1xf32>,
    return
  }
  func.func @transform_0(%arg0: i32) -> (i32, i32, i32) {
    %c0_i32 = arith.constant 0 : i32
    %c0_i32_0 = arith.constant 0 : i32
    %c0_i32_1 = arith.constant 0 : i32
    return %c0_i32, %arg0, %c0_i32_0 : i32, i32, i32
  }
  func.func @transform_1(%arg0: i32) -> (i32, i32) {
    %c0_i32 = arith.constant 0 : i32
    %c0_i32_0 = arith.constant 0 : i32
    return %arg0, %c0_i32 : i32, i32
  }
  func.func @transform_2(%arg0: i32) -> (i32, i32, i32) {
    %c0_i32 = arith.constant 0 : i32
    %c0_i32_0 = arith.constant 0 : i32
    %c0_i32_1 = arith.constant 0 : i32
    %c0_i32_2 = arith.constant 0 : i32
    return %c0_i32, %c0_i32_0, %c0_i32_1 : i32, i32, i32
  }
  func.func @transform_3(%arg0: i32) -> (i32, i32, i32) {
    %c0_i32 = arith.constant 0 : i32
    %c0_i32_0 = arith.constant 0 : i32
    %c0_i32_1 = arith.constant 0 : i32
    %c0_i32_2 = arith.constant 0 : i32
    return %c0_i32, %c0_i32_0, %c0_i32_1 : i32, i32, i32
  }
  func.func @transform_4(%arg0: i32) -> (i32, i32, i32) {
    %c0_i32 = arith.constant 0 : i32
    %c0_i32_0 = arith.constant 0 : i32
    %c0_i32_1 = arith.constant 0 : i32
    %c0_i32_2 = arith.constant 0 : i32
    return %c0_i32, %c0_i32_0, %c0_i32_1 : i32, i32, i32
  }
  func.func @transform_5(%arg0: i32) -> (i32, i32, i32) {
    %c0_i32 = arith.constant 0 : i32
    %c0_i32_0 = arith.constant 0 : i32
    %c0_i32_1 = arith.constant 0 : i32
    %c0_i32_2 = arith.constant 0 : i32
    return %c0_i32, %c0_i32_0, %c0_i32_1 : i32, i32, i32
  }
  func.func @transform_6(%arg0: i32) -> (i32, i32, i32) {
    %c0_i32 = arith.constant 0 : i32
    %c0_i32_0 = arith.constant 0 : i32
    %c0_i32_1 = arith.constant 0 : i32
    %c0_i32_2 = arith.constant 0 : i32
    return %c0_i32, %c0_i32_0, %c0_i32_1 : i32, i32, i32
  }
  func.func @transform_7(%arg0: i32) -> (i32, i32, i32) {
    %c0_i32 = arith.constant 0 : i32
    %c0_i32_0 = arith.constant 0 : i32
    %c0_i32_1 = arith.constant 0 : i32
    %c0_i32_2 = arith.constant 0 : i32
    return %c0_i32, %c0_i32_0, %c0_i32_1 : i32, i32, i32
  }
  func.func @transform_8(%arg0: i32) -> (i32, i32, i32) {
    %c0_i32 = arith.constant 0 : i32
    %c0_i32_0 = arith.constant 0 : i32
    %c0_i32_1 = arith.constant 0 : i32
    %c0_i32_2 = arith.constant 0 : i32
    return %c0_i32, %c0_i32_0, %c0_i32_1 : i32, i32, i32
  }
  func.func @transform_9(%arg0: i32) -> (i32, i32, i32) {
    %c0_i32 = arith.constant 0 : i32
    %c0_i32_0 = arith.constant 0 : i32
    %c0_i32_1 = arith.constant 0 : i32
    %c0_i32_2 = arith.constant 0 : i32
    return %c0_i32, %c0_i32_0, %c0_i32_1 : i32, i32, i32
  }
  func.func @transform_10(%arg0: i32) -> (i32, i32, i32) {
    %c0_i32 = arith.constant 0 : i32
    %c0_i32_0 = arith.constant 0 : i32
    %c0_i32_1 = arith.constant 0 : i32
    %c0_i32_2 = arith.constant 0 : i32
    return %c0_i32, %c0_i32_0, %c0_i32_1 : i32, i32, i32
  }
  func.func @transform_11(%arg0: i32) -> (i32, i32, i32) {
    %c0_i32 = arith.constant 0 : i32
    %c0_i32_0 = arith.constant 0 : i32
    %c0_i32_1 = arith.constant 0 : i32
    %c0_i32_2 = arith.constant 0 : i32
    return %c0_i32, %c0_i32_0, %c0_i32_1 : i32, i32, i32
  }
  func.func @transform_12(%arg0: i32) -> (i32, i32, i32) {
    %c0_i32 = arith.constant 0 : i32
    %c0_i32_0 = arith.constant 0 : i32
    %c0_i32_1 = arith.constant 0 : i32
    %c0_i32_2 = arith.constant 0 : i32
    return %c0_i32, %c0_i32_0, %c0_i32_1 : i32, i32, i32
  }
  func.func @transform_13(%arg0: i32) -> (i32, i32, i32) {
    %c0_i32 = arith.constant 0 : i32
    %c0_i32_0 = arith.constant 0 : i32
    %c0_i32_1 = arith.constant 0 : i32
    %c0_i32_2 = arith.constant 0 : i32
    return %c0_i32, %c0_i32_0, %c0_i32_1 : i32, i32, i32
  }
  func.func @transform_14(%arg0: i32) -> (i32, i32) {
    %c0_i32 = arith.constant 0 : i32
    %c0_i32_0 = arith.constant 0 : i32
    %c0_i32_1 = arith.constant 0 : i32
    return %c0_i32, %c0_i32_0 : i32, i32
  }
  func.func @transform_15(%arg0: i32) -> (i32, i32) {
    %c0_i32 = arith.constant 0 : i32
    %c0_i32_0 = arith.constant 0 : i32
    %c0_i32_1 = arith.constant 0 : i32
    return %c0_i32, %c0_i32_0 : i32, i32
  }
  func.func @transform_16(%arg0: i32) -> (i32, i32) {
    %c0_i32 = arith.constant 0 : i32
    %c0_i32_0 = arith.constant 0 : i32
    %c0_i32_1 = arith.constant 0 : i32
    return %c0_i32, %c0_i32_0 : i32, i32
  }
  func.func @transform_17(%arg0: i32) -> (i32, i32) {
    %c0_i32 = arith.constant 0 : i32
    %c0_i32_0 = arith.constant 0 : i32
    return %arg0, %c0_i32 : i32, i32
  }
}

module attributes {stable_mosaic.version = 11 : i64} {
  func.func @_true_logprob_kernel(%arg0: i32, %arg1: memref<48x128xf32, #tpu.memory_space<vmem>>, %arg2: memref<48x1xi32, #tpu.memory_space<vmem>>, %arg3: memref<48x1xf32, #tpu.memory_space<vmem>>) attributes {dimension_semantics = [#tpu.dimension_semantics<arbitrary>], iteration_bounds = array<i64: 1>, scalar_prefetch = 0 : i64, scratch_operands = 0 : i64, tpu.core_type = #tpu.core_type<tc>, window_params = [{pipeline_mode = #tpu.pipeline_mode<synchronous>, transform_indices = @transform_0, window_bounds = array<i64: 48, 128>}, {pipeline_mode = #tpu.pipeline_mode<synchronous>, transform_indices = @transform_1, window_bounds = array<i64: 48, 1>}, {pipeline_mode = #tpu.pipeline_mode<synchronous>, transform_indices = @transform_2, window_bounds = array<i64: 48, 1>}]} {
    %c0 = arith.constant 0 : index
    %c0_0 = arith.constant 0 : index
    %0 = vector.load %arg1[%c0, %c0_0] : memref<48x128xf32, #tpu.memory_space<vmem>>, vector<48x128xf32>
    %c0_1 = arith.constant 0 : index
    %c0_2 = arith.constant 0 : index
    %1 = vector.load %arg2[%c0_1, %c0_2] : memref<48x1xi32, #tpu.memory_space<vmem>>, vector<48x1xi32>
    %cst = arith.constant dense<0xFF800000> : vector<48xf32>
    %2 = vector.multi_reduction <maximumf>, %0, %cst [1] : vector<48x128xf32> to vector<48xf32>
    %3 = vector.shape_cast %2 : vector<48xf32> to vector<48x1xf32>
    %4 = vector.broadcast %3 : vector<48x1xf32> to vector<48x128xf32>
    %5 = arith.subf %0, %4 : vector<48x128xf32>
    %6 = math.exp %5 : vector<48x128xf32>
    %cst_3 = arith.constant dense<0.000000e+00> : vector<48xf32>
    %7 = vector.multi_reduction <add>, %6, %cst_3 [1] : vector<48x128xf32> to vector<48xf32>
    %8 = vector.shape_cast %7 : vector<48xf32> to vector<48x1xf32>
    %9 = math.log %8 : vector<48x1xf32>
    %10 = arith.addf %3, %9 : vector<48x1xf32>
    %11 = tpu.iota {dimensions = array<i32: 1>} : vector<48x128xi32>
    %12 = vector.broadcast %1 : vector<48x1xi32> to vector<48x128xi32>
    %13 = arith.cmpi eq, %11, %12 : vector<48x128xi32>
    %cst_4 = arith.constant 0.000000e+00 : f32
    %14 = vector.broadcast %cst_4 : f32 to vector<48x128xf32>
    %15 = arith.select %13, %0, %14 : vector<48x128xi1>, vector<48x128xf32>
    %cst_5 = arith.constant dense<0.000000e+00> : vector<48xf32>
    %16 = vector.multi_reduction <add>, %15, %cst_5 [1] : vector<48x128xf32> to vector<48xf32>
    %17 = vector.shape_cast %16 : vector<48xf32> to vector<48x1xf32>
    %18 = arith.subf %17, %10 : vector<48x1xf32>
    %c0_6 = arith.constant 0 : index
    %c0_7 = arith.constant 0 : index
    %19 = vector.load %arg3[%c0_6, %c0_7] : memref<48x1xf32, #tpu.memory_space<vmem>>, vector<48x1xf32>
    tpu.vector_store %arg3[%c0_6, %c0_7], %18 {strides = array<i32>} : memref<48x1xf32, #tpu.memory_space<vmem>>, vector<48x1xf32>,
    return
  }
  func.func @transform_0(%arg0: i32) -> (i32, i32) {
    %c0_i32 = arith.constant 0 : i32
    %c0_i32_0 = arith.constant 0 : i32
    %c0_i32_1 = arith.constant 0 : i32
    return %c0_i32, %c0_i32_0 : i32, i32
  }
  func.func @transform_1(%arg0: i32) -> (i32, i32) {
    %c0_i32 = arith.constant 0 : i32
    %c0_i32_0 = arith.constant 0 : i32
    %c0_i32_1 = arith.constant 0 : i32
    return %c0_i32, %c0_i32_0 : i32, i32
  }
  func.func @transform_2(%arg0: i32) -> (i32, i32) {
    %c0_i32 = arith.constant 0 : i32
    %c0_i32_0 = arith.constant 0 : i32
    %c0_i32_1 = arith.constant 0 : i32
    return %c0_i32, %c0_i32_0 : i32, i32
  }
}

</mosaic_0001>

<bundles_post_ra>
// kernel: forward.5
= control target key start
LH: loop header
LB: loop body
LE: loop exit
PB: predicated region body
PF: predicated region fallthrough
CT: control target
= control target key end

     0   :  { %s2733_s26 = smov 0   ;;  %s3091_s0 = inlined_call_operand.vmem [shape: f32[2,7,32], index: 0, kind: input, shape index: {}]   ;;  %s3092_s1 = inlined_call_operand.vmem [shape: s32[2,1,7], index: 1, kind: input, shape index: {}]   ;;  %s3093_s2 = inlined_call_operand.vmem [shape: f32[2,1,32], index: 2, kind: input, shape index: {}]   ;;  %s3094_s3 = inlined_call_operand.vmem [shape: f32[2,1,32], index: 3, kind: input, shape index: {}]   ;;  %s3095_s4 = inlined_call_operand.vmem [shape: bf16[2,32,96], index: 4, kind: input, shape index: {}]   ;;  %s3096_s5 = inlined_call_operand.vmem [shape: f32[2,1,96], index: 5, kind: input, shape index: {}]   ;;  %s3097_s6 = inlined_call_operand.vmem [shape: bf16[2,32,32], index: 6, kind: input, shape index: {}]   ;;  %s3098_s7 = inlined_call_operand.vmem [shape: f32[2,1,32], index: 7, kind: input, shape index: {}]   ;;  %s3099_s8 = inlined_call_operand.vmem [shape: f32[2,1,32], index: 8, kind: input, shape index: {}]   ;;  %s3100_s9 = inlined_call_operand.vmem [shape: f32[2,1,32], index: 9, kind: input, shape index: {}]   ;;  %s3101_s10 = inlined_call_operand.vmem [shape: bf16[2,32,128], index: 10, kind: input, shape index: {}]   ;;  %s3102_s11 = inlined_call_operand.vmem [shape: f32[2,1,128], index: 11, kind: input, shape index: {}]   ;;  %s3103_s12 = inlined_call_operand.vmem [shape: bf16[2,128,32], index: 12, kind: input, shape index: {}]   ;;  %s3104_s13 = inlined_call_operand.vmem [shape: f32[2,1,32], index: 13, kind: input, shape index: {}]   ;;  %s3105_s14 = inlined_call_operand.vmem [shape: f32[1,32], index: 14, kind: input, shape index: {}]   ;;  %s3106_s15 = inlined_call_operand.vmem [shape: f32[1,32], index: 15, kind: input, shape index: {}]   ;;  %s3107_s16 = inlined_call_operand.vmem [shape: bf16[32,16], index: 16, kind: input, shape index: {}]   ;;  %s3108_s17 = inlined_call_operand.vmem [shape: f32[1,16], index: 17, kind: input, shape index: {}]   ;;  %s3109_s18 = inlined_call_operand.vmem [shape: bf16[16,1], index: 18, kind: input, shape index: {}]   ;;  %s3110_s19 = inlined_call_operand.<no memory space> [shape: f32[1,1], index: 19, kind: input, shape index: {}]   ;;  %s3111_s20 = inlined_call_operand.vmem [shape: f32[2,7,32], index: 20, kind: output, shape index: {0}]   ;;  %s3112_s21 = inlined_call_operand.vmem [shape: f32[2,1,1], index: 21, kind: output, shape index: {1}]  }
   0x1   :  { %3122 = sst [smem:[#allocation3_spill]] %s3091_s0  ;;  %v27_v0 = vstv %s3110_s19 }
   0x2   :  { %3123 = sst [smem:[#allocation4_spill]] %s3092_s1  ;;  %28 = vst [vmem:[#allocation2] sm:$0x1] %v27_v0 }
   0x3   :  { %3124 = sst [smem:[#allocation5_spill]] %s3093_s2 }
   0x4   :  { %3125 = sst [smem:[#allocation6_spill]] %s3094_s3 }
   0x5   :  { %3126 = sst [smem:[#allocation7_spill]] %s3095_s4 }
   0x6   :  { %3127 = sst [smem:[#allocation8_spill]] %s3096_s5 }
   0x7 LB: > { %s2198_s27 = sadd.s32 4294967295, %s2607_s26   ;;  %p2202_p0 = scmp.ge.s32.totalorder %s2607_s26, 1  ;;  %s2607_s26 = sphi %s2733_s26, %s34_s26  }
   0x8   : > { %p599_p1 = scmp.lt.s32.totalorder %s2607_s26, 3 }
   0xa   : > { %p600_p2 = pnand %p2202_p0, %p599_p1 }
   0xb   : > { %p663_p3 = scmp.lt.s32.totalorder (!%p600_p2), %s2198_s27, 1  ;;  %s3128_s29 = sld [smem:[#allocation3_spill]] (!%p600_p2) }
   0xc   : > { %603 = sbr.rel (%p600_p2) target bundleno = 6062 (0x17ae), region = 100  ;;  %s3129_s5 = sld [smem:[#allocation7_spill]] (!%p600_p2) }
   0xd   : > { %s3130_s2 = sld [smem:[#allocation5_spill]] (!%p600_p2)  ;;  %s3121_s30 = smov (!%p600_p2), 112  }
   0xe   : > { %s3131_s28 = sld [smem:[#allocation6_spill]] (!%p600_p2)  ;;  %s2612_s22 = smov (!%p600_p2), 96  }
   0xf   : > { %s3132_s4 = sld [smem:[#allocation8_spill]] (!%p600_p2)  ;;  %s2613_s23 = smov (!%p600_p2), 80  }
  0x10   : > { %s3133_s25 = sld [smem:[#allocation4_spill]] (!%p600_p2) }
  0x11   : > { %s3140_s27 = smov (!%p663_p3, %s2198_s27), 1  ;;  %vm696_vm0 = vcmask 260096   ;;  %v2609_v9 = vmov 0.0   ;;  %vm2610_vm1 = vmmov 0   ;;  %vm749_vm2 = vcmask 261120  }
  0x12   : > { %s3117_s19 = sshll.u32 %s3140_s27, 3  ;;  %v2536_v8 = vld [vmem:[%s3129_s5 + $0x8] sm:$0xff]   ;;  %2367 = vmatprep.subr.bf16.mxu1 %v2609_v9  ;;  %2371 = vmatprep.mubr.msk.bf16.mxu1 %vm2610_vm1, %v2609_v9  ;;  %v2537_v10 = vld [vmem:[%s3129_s5] sm:$0xff]   ;;  %vm797_vm3 = vcmask 130048   ;;  %v679_v33 = vlaneseq  ;;  %v2614_v37 = vmov 0   ;;  %vm846_vm8 = vcmask 55296  }
  0x13   : > { %s666_s0 = scalar_lea.vmem %s3128_s29, %s3117_s19  ;;  %2368 = vmatpush3.bf16.msra.mxu1 %v2536_v8  ;;  %2381 = vmatprep.subr.bf16.mxu0 %v2609_v9  ;;  %v2205_v15 = vld [vmem:[%s3130_s2] ss:$0 sm:$0xff]  ;;  %v2615_v42 = vmov -1e+09   ;;  %s3119_s29 = smov 48   ;;  %vm865_vm9 = vcmask 1042432  }
  0x14   : > { %v2749_v1 = vld [vmem:[%s666_s0] sm:$0x7f]  ;;  %2369 = vmatprep.subr.bf16.mxu1 %v2609_v9  ;;  %2383 = vmatprep.mubr.msk.bf16.mxu0 %vm2610_vm1, %v2609_v9  ;;  %v680_v35 = vshrl.u32 %v679_v33, 7  ;;  %v682_v39 = vand.u32 127, %v679_v33  ;;  %s3120_s0 = smov 64   ;;  %vm866_vm10 = vcmask 1043456  }
  0x15   : > { %v697_v2 = vsel %vm696_vm0, %v2749_v1, 0.0  ;;  %v2206_v17 = vld [vmem:[%s3131_s28] ss:$0 sm:$0xff]  ;;  %vm861_vm11 = vcmask 56320   ;;  %s3118_s19 = smov 16   ;;  %vm2101_vm12 = vcmask 5120  }
  0x16   : > { %698 = vadd.xlane.f32.xlu0 %v697_v2  ;;  %v2207_v21 = vld [vmem:[%s3132_s4] ss:$0 sm:$0xff]  ;;  %s669_s3 = scalar_lea.vmem %s3133_s25, %s3140_s27  ;;  %v689_v36 = vsub.s32 0, %v680_v35  ;;  %vm685_vm5 = vcmp.le.s32.totalorder %v682_v39, %v680_v35  ;;  %vm2109_vm13 = vcmask 0  }
  0x17   : > { %2370 = vmatpush3.bf16.msra.mxu1 %v2537_v10  ;;  %v683_v34 = vld [vmem:[%s669_s3] sm:$0x1] }
  0x18   : > { %2375 = vmatprep.subr.bf16.mxu1 %v2609_v9  ;;  %vm684_vm4 = vcmp.gt.s32.totalorder %v683_v34, 0  ;;  %v2215_v33 = vld [vmem:[%s3098_s7] ss:$0 sm:$0xff] }
  0x19   : > { %v686_v38 = vsel %vm684_vm4, 1, %v2614_v37 }
  0x1a   : > { %v690_v40 = vrot.slane %v686_v38, %v689_v36 }
  0x1c   : > { %vm691_vm6 = vcmp.eq.s32.totalorder %v690_v40, 1 }
  0x1d   : > { %vm692_vm7 = vmand %vm685_vm5, %vm691_vm6 }
  0x1e   : > { %v2804_v43 = vsel %vm692_vm7, 0.0, %v2615_v42 }
  0x9f   : > { %v699_v3 = vpop.xlane.xlu0 %698 }
  0xa0   : > { %v701_v4 = vmul.f32 0.03125, %v699_v3 }
  0xa2   : > { %v702_v5 = vsub.f32 %v2749_v1, %v701_v4 }
  0xa4   : > { %v703_v6 = vmul.f32 %v702_v5, %v702_v5 }
  0xa6   : > { %v704_v7 = vsel %vm696_vm0, %v703_v6, 0.0  ;;  %v2618_v6 = vmov 65535  }
  0xa7   : > { %705 = vadd.xlane.f32.xlu0 %v704_v7  ;;  %v867_v7 = vsel %vm865_vm9, 4294967295, %v2618_v6 }
  0xa8   : > { %v2816_v8 = vsel %vm866_vm10, %v867_v7, 0 }
 0x130   : > { %v706_v11 = vpop.xlane.xlu0 %705 }
 0x131   : > { %v707_v12 = vmul.f32 0.03125, %v706_v11 }
 0x133   : > { %v708_v13 = vadd.f32 1e-05, %v707_v12 }
 0x135   : > { %2567 = vrsqrt.f32 %v708_v13 }
 0x142   : > { %v2568_v14 = vpop.eup %2567 }
 0x143   : > { %v710_v16 = vmul.f32 %v2568_v14, %v702_v5 }
 0x145   : > { %v717_v18 = vmul.f32 %v2205_v15, %v710_v16 }
 0x147   : > { %v724_v19 = vadd.f32 %v2206_v17, %v717_v18 }
 0x149   : > { %v725_v20 = vpack.c.bf16 %v724_v19, %v724_v19 }
 0x14b   : > { %2372 = vmatmul.mubr.msk.bf16.vlgmr.msra.gmra.mxu1 %vm749_vm2, %v725_v20  ;;  %v2538_v20 = vld [vmem:[%s3097_s6 + $0x8] sm:$0xff]  }
 0x14c   : > { %2377 = vmatprep.mubr.msk.bf16.mxu1 %vm2610_vm1, %v2609_v9 }
 0x20b   : > { %v787_v22 = vpop.f32.mrf.mxu1 }
 0x20c   : > { %v788_v23 = vadd.f32 %v2207_v21, %v787_v22  ;;  %v2539_v21 = vld [vmem:[%s3097_s6] sm:$0xff]  }
 0x20d   : > { %v2373_v24 = vpop.f32.mrf.mxu1 }
 0x20e   : > { %v2781_v25 = vpack.c.bf16 %v788_v23, %v788_v23 }
 0x20f   : > { %v790_v26 = vpop.f32.mrf.mxu1 }
 0x210   : > { %912 = vrot.lane.b32.xlu0 %v2781_v25, %s3121_s30  ;;  %795 = vrot.lane.b32.xlu1 %v2781_v25, %s2612_s22 }
 0x211   : > { %v2374_v27 = vpop.f32.mrf.mxu1 }
 0x214   : > { %914 = vrot.lane.b32.xlu1 %v2781_v25, %s2613_s23 }
 0x282   : > { %v796_v28 = vpop.permute.xlu1 %795  ;;  %v913_v32 = vpop.permute.xlu0 %912 }
 0x283   : > { %v802_v29 = vsel %vm797_vm3, %v796_v28, 0 }
 0x284   : > { %2376 = vmatpush3.bf16.xpose.msra.mxu1 %v802_v29 }
 0x285   : > { %2387 = vmatprep.subr.bf16.mxu1 %v2609_v9 }
 0x286   : > { %v915_v30 = vpop.permute.xlu1 %914 }
 0x287   : > { %v920_v31 = vsel %vm797_vm3, %v915_v30, 0 }
 0x28b   : > { %2378 = vmatmul.mubr.msk.bf16.vlgmr.msra.gmra.mxu1 %vm797_vm3, %v2781_v25 }
 0x28c   : > { %2388 = vmatpush3.bf16.xpose.msra.mxu1 %v920_v31  ;;  %2389 = vmatprep.mubr.msk.bf16.mxu1 %vm2610_vm1, %v2609_v9 }
 0x28d   : > { %2399 = vmatprep.subr.bf16.mxu1 %v2609_v9 }
 0x293   : > { %2390 = vmatmul.mubr.msk.bf16.vlgmr.msra.gmra.mxu1 %vm797_vm3, %v913_v32 }
 0x294   : > { %2403 = vmatprep.mubr.msk.bf16.mxu1 %vm2610_vm1, %v2609_v9  ;;  %2400 = vmatpush3.bf16.msra.mxu1 %v2538_v20 }
 0x295   : > { %2401 = vmatprep.subr.bf16.mxu1 %v2609_v9 }
 0x298   : > { %2402 = vmatpush3.bf16.msra.mxu1 %v2539_v21  ;;  %v2225_v21 = vld [vmem:[%s3104_s13] ss:$0 sm:$0xff] }
 0x299   : > { %2415 = vmatprep.subr.bf16.mxu1 %v2609_v9 }
 0x34b   : > { %v838_v41 = vpop.f32.mrf.mxu1 }
 0x34c   : > { %v844_v44 = vmul.f32 0.25, %v838_v41 }
 0x34d   : > { %v2379_v45 = vpop.f32.mrf.mxu1 }
 0x34e   : > { %v845_v46 = vadd.f32 %v844_v44, %v2804_v43 }
 0x34f   : > { %v841_v47 = vpop.f32.mrf.mxu1 }
 0x350   : > { %v847_v48 = vsel %vm846_vm8, %v845_v46, -inf  ;;  %v2540_v47 = vld [vmem:[%s3101_s10 + $0x8] sm:$0xff]  }
 0x351   : > { %848 = vmax.xlane.f32.xlu1 %v847_v48  ;;  %v2380_v49 = vpop.f32.mrf.mxu1 }
 0x353   : > { %v956_v50 = vpop.f32.mrf.mxu1 }
 0x354   : > { %v962_v51 = vmul.f32 0.25, %v956_v50 }
 0x355   : > { %v2391_v52 = vpop.f32.mrf.mxu1 }
 0x356   : > { %v963_v53 = vadd.f32 %v962_v51, %v2804_v43  ;;  %v2219_v52 = vld [vmem:[%s3099_s8] ss:$0 sm:$0xff] }
 0x357   : > { %v959_v54 = vpop.f32.mrf.mxu1 }
 0x358   : > { %v964_v55 = vsel %vm846_vm8, %v963_v53, -inf  ;;  %v2220_v54 = vld [vmem:[%s3100_s9] ss:$0 sm:$0xff] }
 0x359   : > { %965 = vmax.xlane.f32.xlu0 %v964_v55  ;;  %v2392_v56 = vpop.f32.mrf.mxu1 }
 0x36f   : > { %976 = vrot.lane.b32.xlu0 %v2781_v25, %s3119_s29  ;;  %s3137_s29 = smov 16  }
 0x3da   : > { %v849_v57 = vpop.xlane.xlu1 %848 }
 0x3db   : > { %v850_v58 = vsub.f32 %v845_v46, %v849_v57 }
 0x3dd   : > { %v851_v59 = vmul.f32 1.442695, %v850_v58  ;;  %v2542_v58 = vld [vmem:[%s3103_s12 + $0x38] sm:$0xff]  }
 0x3df   : > { %2569 = vpow2.f32 %v851_v59  ;;  %v2543_v59 = vld [vmem:[%s3103_s12 + $0x30] sm:$0xff]  }
 0x3e2   : > { %v966_v60 = vpop.xlane.xlu0 %965 }
 0x3e3   : > { %v967_v61 = vsub.f32 %v963_v53, %v966_v60  ;;  %v2544_v60 = vld [vmem:[%s3103_s12 + $0x28] sm:$0xff]  }
 0x3e5   : > { %v968_v62 = vmul.f32 1.442695, %v967_v61  ;;  %v2545_v61 = vld [vmem:[%s3103_s12 + $0x20] sm:$0xff]  }
 0x3e6   : > { %v977_v13 = vpop.permute.xlu0 %976 }
 0x3e7   : > { %2571 = vpow2.f32 %v968_v62  ;;  %v982_v16 = vand.u32 %v977_v13, %v2816_v8  ;;  %v2546_v62 = vld [vmem:[%s3103_s12 + $0x18] sm:$0xff]  }
 0x3ec   : > { %v2570_v63 = vpop.eup %2569 }
 0x3ed   : > { %v853_v0 = vsel %vm846_vm8, %v2570_v63, 0.0 }
 0x3ee   : > { %854 = vadd.xlane.f32.xlu1 %v853_v0  ;;  %v2548_v0 = vld [vmem:[%s3103_s12 + $0x8] sm:$0xff]  }
 0x3f4   : > { %v2572_v2 = vpop.eup %2571 }
 0x3f5   : > { %v970_v3 = vsel %vm846_vm8, %v2572_v2, 0.0 }
 0x3f6   : > { %971 = vadd.xlane.f32.xlu1 %v970_v3  ;;  %v2221_v3 = vld [vmem:[%s3102_s11] ss:$0 sm:$0xff] }
 0x407   : > { %859 = vrot.lane.b32.xlu1 %v2781_v25, %s3120_s0  ;;  %s3134_s0 = smov 112  }
 0x477   : > { %v855_v4 = vpop.xlane.xlu1 %854 }
 0x478   : > { %2573 = vrcp.f32 %v855_v4 }
 0x47f   : > { %v972_v5 = vpop.xlane.xlu1 %971 }
 0x480   : > { %2575 = vrcp.f32 %v972_v5 }
 0x483   : > { %v860_v10 = vpop.permute.xlu1 %859 }
 0x484   : > { %v870_v11 = vand.u32 %v2816_v8, %v860_v10 }
 0x485   : > { %v2574_v12 = vpop.eup %2573 }
 0x486   : > { %2382 = vmatpush3.bf16.msra.mxu0 %v870_v11  ;;  %v857_v14 = vmul.f32 %v2574_v12, %v2570_v63  ;;  %v2547_v63 = vld [vmem:[%s3103_s12 + $0x10] sm:$0xff]  }
 0x487   : > { %2393 = vmatprep.subr.bf16.mxu0 %v2609_v9 }
 0x488   : > { %v858_v15 = vpack.c.bf16 %v857_v14, %v857_v14 }
 0x48a   : > { %2384 = vmatmul.mubr.msk.bf16.vlgmr.msra.gmra.mxu0 %vm861_vm11, %v858_v15 }
 0x48b   : > { %2394 = vmatpush3.bf16.msra.mxu0 %v982_v16  ;;  %2395 = vmatprep.mubr.msk.bf16.mxu0 %vm2610_vm1, %v2609_v9 }
 0x48c   : > { %2407 = vmatprep.subr.bf16.mxu0 %v2609_v9 }
 0x48d   : > { %v2576_v17 = vpop.eup %2575 }
 0x48e   : > { %v974_v18 = vmul.f32 %v2576_v17, %v2572_v2  ;;  %v2549_v2 = vld [vmem:[%s3103_s12] sm:$0xff]  }
 0x490   : > { %v975_v19 = vpack.c.bf16 %v974_v18, %v974_v18 }
 0x492   : > { %2396 = vmatmul.mubr.msk.bf16.vlgmr.msra.gmra.mxu0 %vm861_vm11, %v975_v19 }
 0x493   : > { %2411 = vmatprep.mubr.msk.bf16.mxu0 %vm2610_vm1, %v2609_v9  ;;  %2408 = vmatpush3.bf16.msra.mxu0 %v2540_v47  ;;  %v2243_v47 = vld [vmem:[%s3132_s4 + $0x1] ss:$0 sm:$0xff] }
 0x494   : > { %2409 = vmatprep.subr.bf16.mxu0 %v2609_v9 }
 0x54a   : > { %v906_v22 = vpop.f32.mrf.mxu0 }
 0x54c   : > { %v2385_v23 = vpop.f32.mrf.mxu0 }
 0x54e   : > { %v909_v24 = vpop.f32.mrf.mxu0 }
 0x550   : > { %v2386_v25 = vpop.f32.mrf.mxu0 }
 0x552   : > { %v1018_v26 = vpop.f32.mrf.mxu0 }
 0x553   : > { %1025 = vrot.lane.b32.xlu1 %v1018_v26, %s3118_s19  ;;  %s3138_s19 = sshll.u32 %s3140_s27, 3 }
 0x554   : > { %v2397_v27 = vpop.f32.mrf.mxu0  ;;  %s673_s30 = scalar_lea.vmem %s3111_s20, %s3138_s19  ;;  %s676_s19 = scalar_lea.vmem %s3112_s21, %s3140_s27 }
 0x556   : > { %v1021_v28 = vpop.f32.mrf.mxu0 }
 0x558   : > { %v2398_v29 = vpop.f32.mrf.mxu0 }
 0x5c5   : > { %v1026_v30 = vpop.permute.xlu1 %1025 }
 0x5c6   : > { %v1028_v31 = vsel %vm797_vm3, %v906_v22, %v1026_v30 }
 0x5c7   : > { %v1029_v32 = vpack.c.bf16 %v1028_v31, %v1028_v31 }
 0x5c9   : > { %2404 = vmatmul.mubr.msk.bf16.vlgmr.msra.gmra.mxu1 %vm749_vm2, %v1029_v32 }
 0x5ca   : > { %2431 = vmatprep.mubr.msk.bf16.mxu1 %vm2610_vm1, %v2609_v9  ;;  %2416 = vmatpush3.bf16.msra.mxu1 %v2542_v58 }
 0x5cb   : > { %2417 = vmatprep.subr.bf16.mxu1 %v2609_v9 }
 0x5ce   : > { %2418 = vmatpush3.bf16.msra.mxu1 %v2543_v59 }
 0x5cf   : > { %2419 = vmatprep.subr.bf16.mxu1 %v2609_v9 }
 0x5d2   : > { %2420 = vmatpush3.bf16.msra.mxu1 %v2544_v60 }
 0x5d3   : > { %2421 = vmatprep.subr.bf16.mxu1 %v2609_v9 }
 0x5d6   : > { %2422 = vmatpush3.bf16.msra.mxu1 %v2545_v61 }
 0x5d7   : > { %2423 = vmatprep.subr.bf16.mxu1 %v2609_v9 }
 0x5da   : > { %2424 = vmatpush3.bf16.msra.mxu1 %v2546_v62 }
 0x5db   : > { %2425 = vmatprep.subr.bf16.mxu1 %v2609_v9 }
 0x5de   : > { %2426 = vmatpush3.bf16.msra.mxu1 %v2547_v63 }
 0x5df   : > { %2427 = vmatprep.subr.bf16.mxu1 %v2609_v9 }
 0x5e2   : > { %2428 = vmatpush3.bf16.msra.mxu1 %v2548_v0 }
 0x5e3   : > { %2429 = vmatprep.subr.bf16.mxu1 %v2609_v9 }
 0x5e6   : > { %2430 = vmatpush3.bf16.msra.mxu1 %v2549_v2 }
 0x5e7   : > { %2461 = vmatprep.subr.bf16.mxu1 %v2609_v9 }
 0x689   : > { %v1090_v34 = vpop.f32.mrf.mxu1 }
 0x68a   : > { %v1091_v35 = vadd.f32 %v2215_v33, %v1090_v34  ;;  %v2550_v34 = vld [vmem:[%s3129_s5 + $0x18] sm:$0xff]  }
 0x68b   : > { %v2405_v36 = vpop.f32.mrf.mxu1 }
 0x68c   : > { %v2845_v37 = vadd.f32 %v1091_v35, %v2749_v1  ;;  %v2541_v1 = vld [vmem:[%s3101_s10] sm:$0xff]   ;;  %v2551_v35 = vld [vmem:[%s3129_s5 + $0x10] sm:$0xff]  }
 0x68d   : > { %v1093_v38 = vpop.f32.mrf.mxu1  ;;  %2410 = vmatpush3.bf16.msra.mxu0 %v2541_v1 }
 0x68e   : > { %v1099_v39 = vsel %vm696_vm0, %v2845_v37, 0.0  ;;  %2435 = vmatprep.subr.bf16.mxu0 %v2609_v9 }
 0x68f   : > { %1100 = vadd.xlane.f32.xlu1 %v1099_v39  ;;  %v2406_v40 = vpop.f32.mrf.mxu1 }
 0x690   : > { %v2236_v40 = vld [vmem:[%s3130_s2 + $0x1] ss:$0 sm:$0xff] }
 0x718   : > { %v1101_v41 = vpop.xlane.xlu1 %1100 }
 0x719   : > { %v1102_v42 = vmul.f32 0.03125, %v1101_v41 }
 0x71b   : > { %v1103_v44 = vsub.f32 %v2845_v37, %v1102_v42  ;;  %v2237_v42 = vld [vmem:[%s3131_s28 + $0x1] ss:$0 sm:$0xff] }
 0x71d   : > { %v1104_v45 = vmul.f32 %v1103_v44, %v1103_v44 }
 0x71f   : > { %v1105_v46 = vsel %vm696_vm0, %v1104_v45, 0.0 }
 0x720   : > { %1106 = vadd.xlane.f32.xlu0 %v1105_v46 }
 0x7a9   : > { %v1107_v48 = vpop.xlane.xlu0 %1106 }
 0x7aa   : > { %v1108_v49 = vmul.f32 0.03125, %v1107_v48 }
 0x7ac   : > { %v1109_v50 = vadd.f32 1e-05, %v1108_v49 }
 0x7ae   : > { %2577 = vrsqrt.f32 %v1109_v50 }
 0x7bb   : > { %v2578_v51 = vpop.eup %2577 }
 0x7bc   : > { %v1111_v53 = vmul.f32 %v2578_v51, %v1103_v44 }
 0x7be   : > { %v1118_v55 = vmul.f32 %v2219_v52, %v1111_v53 }
 0x7c0   : > { %v1125_v56 = vadd.f32 %v2220_v54, %v1118_v55 }
 0x7c2   : > { %v1126_v57 = vpack.c.bf16 %v1125_v56, %v1125_v56 }
 0x7c4   : > { %2412 = vmatmul.mubr.msk.bf16.vlgmr.msra.gmra.mxu0 %vm749_vm2, %v1126_v57 }
 0x7c5   : > { %2439 = vmatprep.mubr.msk.bf16.mxu0 %vm2610_vm1, %v2609_v9  ;;  %2436 = vmatpush3.bf16.msra.mxu0 %v2550_v34 }
 0x7c6   : > { %2437 = vmatprep.subr.bf16.mxu0 %v2609_v9 }
 0x7c9   : > { %2438 = vmatpush3.bf16.msra.mxu0 %v2551_v35 }
 0x7ca   : > { %2443 = vmatprep.subr.bf16.mxu0 %v2609_v9 }
 0x884   : > { %v1187_v4 = vpop.f32.mrf.mxu0 }
 0x885   : > { %v1188_v5 = vadd.f32 %v2221_v3, %v1187_v4 }
 0x886   : > { %v2413_v6 = vpop.f32.mrf.mxu0 }
 0x887   : > { %v1194_v7 = vmul.f32 0.044715, %v1188_v5  ;;  %v1193_v17 = vmul.f32 0.5, %v1188_v5 }
 0x888   : > { %v1190_v10 = vpop.f32.mrf.mxu0 }
 0x889   : > { %v1195_v11 = vmul.f32 %v1194_v7, %v1188_v5 }
 0x88a   : > { %v2414_v12 = vpop.f32.mrf.mxu0 }
 0x88b   : > { %v1196_v13 = vmul.f32 %v1195_v11, %v1188_v5 }
 0x88d   : > { %v1197_v14 = vadd.f32 %v1196_v13, %v1188_v5 }
 0x88f   : > { %v1198_v15 = vmul.f32 0.7978846, %v1197_v14 }
 0x891   : > { %2579 = vtanh.f32 %v1198_v15 }
 0x89e   : > { %v2580_v16 = vpop.eup %2579 }
 0x89f   : > { %v1200_v18 = vadd.f32 1.0, %v2580_v16 }
 0x8a1   : > { %v1201_v19 = vmul.f32 %v1200_v18, %v1193_v17 }
 0x8a3   : > { %v1202_v20 = vpack.c.bf16 %v1201_v19, %v1201_v19 }
 0x8a5   : > { %2432 = vmatmul.mubr.bf16.vlgmr.msra.gmra.mxu1 %v1202_v20 }
 0x8a6   : > { %2463 = vmatprep.mubr.msk.bf16.mxu1 %vm2610_vm1, %v2609_v9 }
 0x965   : > { %v1308_v22 = vpop.f32.mrf.mxu1 }
 0x966   : > { %v1309_v23 = vadd.f32 %v2225_v21, %v1308_v22 }
 0x967   : > { %v2433_v24 = vpop.f32.mrf.mxu1 }
 0x968   : > { %v2909_v25 = vadd.f32 %v1309_v23, %v2845_v37 }
 0x969   : > { %v1311_v26 = vpop.f32.mrf.mxu1 }
 0x96a   : > { %v1319_v27 = vsel %vm696_vm0, %v2909_v25, 0.0 }
 0x96b   : > { %1320 = vadd.xlane.f32.xlu1 %v1319_v27  ;;  %v2434_v28 = vpop.f32.mrf.mxu1 }
 0x9f4   : > { %v1321_v29 = vpop.xlane.xlu1 %1320 }
 0x9f5   : > { %v1322_v30 = vmul.f32 0.03125, %v1321_v29 }
 0x9f7   : > { %v1323_v31 = vsub.f32 %v2909_v25, %v1322_v30 }
 0x9f9   : > { %v1324_v32 = vmul.f32 %v1323_v31, %v1323_v31 }
 0x9fb   : > { %v1325_v33 = vsel %vm696_vm0, %v1324_v32, 0.0 }
 0x9fc   : > { %1326 = vadd.xlane.f32.xlu1 %v1325_v33 }
 0xa85   : > { %v1327_v36 = vpop.xlane.xlu1 %1326 }
 0xa86   : > { %v1328_v37 = vmul.f32 0.03125, %v1327_v36 }
 0xa88   : > { %v1329_v38 = vadd.f32 1e-05, %v1328_v37  ;;  %v2552_v37 = vld [vmem:[%s3097_s6 + $0x18] sm:$0xff]  }
 0xa8a   : > { %2581 = vrsqrt.f32 %v1329_v38 }
 0xa97   : > { %v2582_v39 = vpop.eup %2581 }
 0xa98   : > { %v1331_v41 = vmul.f32 %v2582_v39, %v1323_v31 }
 0xa9a   : > { %v1338_v44 = vmul.f32 %v2236_v40, %v1331_v41 }
 0xa9c   : > { %v1345_v45 = vadd.f32 %v2237_v42, %v1338_v44 }
 0xa9e   : > { %v1346_v46 = vpack.c.bf16 %v1345_v45, %v1345_v45 }
 0xaa0   : > { %2440 = vmatmul.mubr.msk.bf16.vlgmr.msra.gmra.mxu0 %vm749_vm2, %v1346_v46  ;;  %v2256_v46 = vld [vmem:[%s3098_s7 + $0x1] ss:$0 sm:$0xff] }
 0xaa1   : > { %2445 = vmatprep.mubr.msk.bf16.mxu0 %vm2610_vm1, %v2609_v9 }
 0xb60   : > { %v1409_v1 = vpop.f32.mrf.mxu0 }
 0xb61   : > { %v1410_v48 = vadd.f32 %v2243_v47, %v1409_v1 }
 0xb62   : > { %v2441_v49 = vpop.f32.mrf.mxu0 }
 0xb63   : > { %v2935_v50 = vpack.c.bf16 %v1410_v48, %v1410_v48 }
 0xb64   : > { %v1412_v51 = vpop.f32.mrf.mxu0 }
 0xb65   : > { %1417 = vrot.lane.b32.xlu0 %v2935_v50, %s2612_s22  ;;  %s3135_s22 = smov 64  }
 0xb66   : > { %v2442_v52 = vpop.f32.mrf.mxu0 }
 0xb69   : > { %1529 = vrot.lane.b32.xlu0 %v2935_v50, %s2613_s23  ;;  %s3136_s23 = smov 48  }
 0xb6d   : > { %1527 = vrot.lane.b32.xlu0 %v2935_v50, %s3134_s0 }
 0xbd7   : > { %v1418_v53 = vpop.permute.xlu0 %1417 }
 0xbd8   : > { %v1423_v54 = vsel %vm797_vm3, %v1418_v53, 0 }
 0xbd9   : > { %2444 = vmatpush3.bf16.xpose.msra.mxu0 %v1423_v54 }
 0xbda   : > { %2449 = vmatprep.subr.bf16.mxu0 %v2609_v9 }
 0xbdb   : > { %v1530_v11 = vpop.permute.xlu0 %1529 }
 0xbdc   : > { %v1535_v13 = vsel %vm797_vm3, %v1530_v11, 0  ;;  %v2559_v11 = vld [vmem:[%s3103_s12 + $0x60] sm:$0xff]  }
 0xbdf   : > { %v1528_v14 = vpop.permute.xlu0 %1527 }
 0xbe0   : > { %2446 = vmatmul.mubr.msk.bf16.vlgmr.msra.gmra.mxu0 %vm797_vm3, %v2935_v50 }
 0xbe1   : > { %2451 = vmatprep.mubr.msk.bf16.mxu0 %vm2610_vm1, %v2609_v9 }
 0xca0   : > { %v1459_v55 = vpop.f32.mrf.mxu0 }
 0xca1   : > { %v1465_v56 = vmul.f32 0.25, %v1459_v55 }
 0xca2   : > { %v2447_v57 = vpop.f32.mrf.mxu0 }
 0xca3   : > { %v1466_v58 = vadd.f32 %v1465_v56, %v2804_v43 }
 0xca4   : > { %v1462_v59 = vpop.f32.mrf.mxu0 }
 0xca5   : > { %v1467_v60 = vsel %vm846_vm8, %v1466_v58, -inf }
 0xca6   : > { %1468 = vmax.xlane.f32.xlu1 %v1467_v60  ;;  %v2448_v61 = vpop.f32.mrf.mxu0 }
 0xd2f   : > { %v1469_v62 = vpop.xlane.xlu1 %1468 }
 0xd30   : > { %v1470_v63 = vsub.f32 %v1466_v58, %v1469_v62  ;;  %v2554_v58 = vld [vmem:[%s3101_s10 + $0x18] sm:$0xff]  }
 0xd32   : > { %v1471_v0 = vmul.f32 1.442695, %v1470_v63  ;;  %v2262_v63 = vld [vmem:[%s3099_s8 + $0x1] ss:$0 sm:$0xff] }
 0xd34   : > { %2583 = vpow2.f32 %v1471_v0 }
 0xd41   : > { %v2584_v2 = vpop.eup %2583 }
 0xd42   : > { %v1473_v3 = vsel %vm846_vm8, %v2584_v2, 0.0 }
 0xd43   : > { %1474 = vadd.xlane.f32.xlu1 %v1473_v3 }
 0xd54   : > { %1479 = vrot.lane.b32.xlu1 %v2935_v50, %s3135_s22 }
 0xdcc   : > { %v1475_v4 = vpop.xlane.xlu1 %1474 }
 0xdcd   : > { %2585 = vrcp.f32 %v1475_v4 }
 0xdd0   : > { %v1480_v5 = vpop.permute.xlu1 %1479 }
 0xdd1   : > { %v1485_v6 = vand.u32 %v1480_v5, %v2816_v8 }
 0xdd3   : > { %2450 = vmatpush3.bf16.msra.mxu0 %v1485_v6  ;;  %v2556_v6 = vld [vmem:[%s3103_s12 + $0x78] sm:$0xff]  }
 0xdd4   : > { %2455 = vmatprep.subr.bf16.mxu0 %v2609_v9 }
 0xdda   : > { %v2586_v7 = vpop.eup %2585 }
 0xddb   : > { %v1477_v10 = vmul.f32 %v2586_v7, %v2584_v2  ;;  %v2263_v2 = vld [vmem:[%s3100_s9 + $0x1] ss:$0 sm:$0xff]  ;;  %v2557_v7 = vld [vmem:[%s3103_s12 + $0x70] sm:$0xff]  }
 0xddd   : > { %v1478_v12 = vpack.c.bf16 %v1477_v10, %v1477_v10  ;;  %v2558_v10 = vld [vmem:[%s3103_s12 + $0x68] sm:$0xff]  }
 0xddf   : > { %2452 = vmatmul.mubr.msk.bf16.vlgmr.msra.gmra.mxu0 %vm861_vm11, %v1478_v12  ;;  %v2560_v12 = vld [vmem:[%s3103_s12 + $0x58] sm:$0xff]  }
 0xde0   : > { %2456 = vmatpush3.bf16.xpose.msra.mxu0 %v1535_v13  ;;  %2457 = vmatprep.mubr.msk.bf16.mxu0 %vm2610_vm1, %v2609_v9  ;;  %v2561_v13 = vld [vmem:[%s3103_s12 + $0x50] sm:$0xff]  }
 0xde1   : > { %2467 = vmatprep.subr.bf16.mxu0 %v2609_v9 }
 0xde7   : > { %2458 = vmatmul.mubr.msk.bf16.vlgmr.msra.gmra.mxu0 %vm797_vm3, %v1528_v14  ;;  %v2562_v14 = vld [vmem:[%s3103_s12 + $0x48] sm:$0xff]  }
 0xde8   : > { %2471 = vmatprep.mubr.msk.bf16.mxu0 %vm2610_vm1, %v2609_v9  ;;  %2468 = vmatpush3.bf16.msra.mxu0 %v2552_v37 }
 0xde9   : > { %2469 = vmatprep.subr.bf16.mxu0 %v2609_v9 }
 0xe9f   : > { %v1521_v15 = vpop.f32.mrf.mxu0 }
 0xea1   : > { %v2453_v16 = vpop.f32.mrf.mxu0 }
 0xea2   : > { %v2269_v16 = vld [vmem:[%s3102_s11 + $0x1] ss:$0 sm:$0xff] }
 0xea3   : > { %v1524_v17 = vpop.f32.mrf.mxu0 }
 0xea5   : > { %v2454_v18 = vpop.f32.mrf.mxu0 }
 0xea7   : > { %v1571_v19 = vpop.f32.mrf.mxu0 }
 0xea8   : > { %v1577_v20 = vmul.f32 0.25, %v1571_v19 }
 0xea9   : > { %v2459_v21 = vpop.f32.mrf.mxu0 }
 0xeaa   : > { %v1578_v22 = vadd.f32 %v1577_v20, %v2804_v43 }
 0xeab   : > { %v1574_v23 = vpop.f32.mrf.mxu0 }
 0xeac   : > { %v1579_v24 = vsel %vm846_vm8, %v1578_v22, -inf }
 0xead   : > { %1580 = vmax.xlane.f32.xlu1 %v1579_v24  ;;  %v2460_v26 = vpop.f32.mrf.mxu0 }
 0xf36   : > { %v1581_v27 = vpop.xlane.xlu1 %1580 }
 0xf37   : > { %v1582_v28 = vsub.f32 %v1578_v22, %v1581_v27 }
 0xf39   : > { %v1583_v29 = vmul.f32 1.442695, %v1582_v28 }
 0xf3b   : > { %2587 = vpow2.f32 %v1583_v29 }
 0xf48   : > { %v2588_v30 = vpop.eup %2587 }
 0xf49   : > { %v1585_v31 = vsel %vm846_vm8, %v2588_v30, 0.0 }
 0xf4a   : > { %1586 = vadd.xlane.f32.xlu0 %v1585_v31 }
 0xf60   : > { %1591 = vrot.lane.b32.xlu0 %v2935_v50, %s3136_s23 }
 0xfd3   : > { %v1587_v32 = vpop.xlane.xlu0 %1586 }
 0xfd4   : > { %2589 = vrcp.f32 %v1587_v32 }
 0xfd7   : > { %v1592_v33 = vpop.permute.xlu0 %1591 }
 0xfd8   : > { %v1597_v43 = vand.u32 %v1592_v33, %v2816_v8  ;;  %v2553_v8 = vld [vmem:[%s3097_s6 + $0x10] sm:$0xff]   ;;  %v2290_v33 = vld [vmem:[%s3104_s13 + $0x1] ss:$0 sm:$0xff] }
 0xfd9   : > { %2470 = vmatpush3.bf16.msra.mxu0 %v2553_v8 }
 0xfda   : > { %2462 = vmatpush3.bf16.msra.mxu1 %v1597_v43  ;;  %2483 = vmatprep.subr.bf16.mxu0 %v2609_v9 }
 0xfdb   : > { %2475 = vmatprep.subr.bf16.mxu1 %v2609_v9 }
 0xfe1   : > { %v2590_v34 = vpop.eup %2589 }
 0xfe2   : > { %v1589_v35 = vmul.f32 %v2590_v34, %v2588_v30 }
 0xfe4   : > { %v1590_v36 = vpack.c.bf16 %v1589_v35, %v1589_v35 }
 0xfe6   : > { %2464 = vmatmul.mubr.msk.bf16.vlgmr.msra.gmra.mxu1 %vm861_vm11, %v1590_v36 }
 0xfe7   : > { %2479 = vmatprep.mubr.msk.bf16.mxu1 %vm2610_vm1, %v2609_v9  ;;  %2476 = vmatpush3.bf16.msra.mxu1 %v2554_v58 }
 0xfe8   : > { %2477 = vmatprep.subr.bf16.mxu1 %v2609_v9 }
0x10a6   : > { %v1633_v38 = vpop.f32.mrf.mxu1 }
0x10a7   : > { %1640 = vrot.lane.b32.xlu1 %v1633_v38, %s3137_s29 }
0x10a8   : > { %v2465_v39 = vpop.f32.mrf.mxu1 }
0x10aa   : > { %v1636_v40 = vpop.f32.mrf.mxu1 }
0x10ac   : > { %v2466_v41 = vpop.f32.mrf.mxu1 }
0x1119   : > { %v1641_v42 = vpop.permute.xlu1 %1640 }
0x111a   : > { %v1643_v44 = vsel %vm797_vm3, %v1521_v15, %v1641_v42  ;;  %v2563_v15 = vld [vmem:[%s3103_s12 + $0x40] sm:$0xff]  }
0x111b   : > { %v1644_v45 = vpack.c.bf16 %v1643_v44, %v1643_v44 }
0x111d   : > { %2472 = vmatmul.mubr.msk.bf16.vlgmr.msra.gmra.mxu0 %vm749_vm2, %v1644_v45  ;;  %v2564_v45 = vld [vmem:[%s3107_s16 + $0x8] sm:$0xff]  }
0x111e   : > { %2499 = vmatprep.mubr.msk.bf16.mxu0 %vm2610_vm1, %v2609_v9  ;;  %2484 = vmatpush3.bf16.msra.mxu0 %v2556_v6 }
0x111f   : > { %2485 = vmatprep.subr.bf16.mxu0 %v2609_v9 }
0x1122   : > { %2486 = vmatpush3.bf16.msra.mxu0 %v2557_v7 }
0x1123   : > { %2487 = vmatprep.subr.bf16.mxu0 %v2609_v9 }
0x1126   : > { %2488 = vmatpush3.bf16.msra.mxu0 %v2558_v10 }
0x1127   : > { %2489 = vmatprep.subr.bf16.mxu0 %v2609_v9 }
0x112a   : > { %2490 = vmatpush3.bf16.msra.mxu0 %v2559_v11 }
0x112b   : > { %2491 = vmatprep.subr.bf16.mxu0 %v2609_v9 }
0x112e   : > { %2492 = vmatpush3.bf16.msra.mxu0 %v2560_v12 }
0x112f   : > { %2493 = vmatprep.subr.bf16.mxu0 %v2609_v9 }
0x1132   : > { %2494 = vmatpush3.bf16.msra.mxu0 %v2561_v13 }
0x1133   : > { %2495 = vmatprep.subr.bf16.mxu0 %v2609_v9 }
0x1136   : > { %2496 = vmatpush3.bf16.msra.mxu0 %v2562_v14 }
0x1137   : > { %2497 = vmatprep.subr.bf16.mxu0 %v2609_v9 }
0x113a   : > { %2498 = vmatpush3.bf16.msra.mxu0 %v2563_v15 }
0x11dd   : > { %v1707_v47 = vpop.f32.mrf.mxu0 }
0x11de   : > { %v1708_v1 = vadd.f32 %v2256_v46, %v1707_v47  ;;  %v2565_v46 = vld [vmem:[%s3107_s16] sm:$0xff]  }
0x11df   : > { %v2473_v48 = vpop.f32.mrf.mxu0 }
0x11e0   : > { %v2991_v49 = vadd.f32 %v1708_v1, %v2909_v25  ;;  %v2555_v25 = vld [vmem:[%s3101_s10 + $0x10] sm:$0xff]  }
0x11e1   : > { %v1710_v50 = vpop.f32.mrf.mxu0  ;;  %2478 = vmatpush3.bf16.msra.mxu1 %v2555_v25 }
0x11e2   : > { %v1718_v51 = vsel %vm696_vm0, %v2991_v49, 0.0  ;;  %2503 = vmatprep.subr.bf16.mxu1 %v2609_v9  ;;  %v2299_v50 = vld [vmem:[%s3105_s14] ss:$0 sm:$0xff] }
0x11e3   : > { %1719 = vadd.xlane.f32.xlu1 %v1718_v51  ;;  %v2474_v52 = vpop.f32.mrf.mxu0 }
0x11e4   : > { %v2300_v52 = vld [vmem:[%s3106_s15] ss:$0 sm:$0xff] }
0x126c   : > { %v1720_v53 = vpop.xlane.xlu1 %1719 }
0x126d   : > { %v1721_v54 = vmul.f32 0.03125, %v1720_v53 }
0x126f   : > { %v1722_v55 = vsub.f32 %v2991_v49, %v1721_v54 }
0x1271   : > { %v1723_v56 = vmul.f32 %v1722_v55, %v1722_v55 }
0x1273   : > { %v1724_v57 = vsel %vm696_vm0, %v1723_v56, 0.0  ;;  %v2566_v56 = vld [vmem:[%s3109_s18] sm:$0xff]  }
0x1274   : > { %1725 = vadd.xlane.f32.xlu0 %v1724_v57  ;;  %v2301_v57 = vld [vmem:[%s3108_s17] ss:$0 sm:$0xff] }
0x12fd   : > { %v1726_v59 = vpop.xlane.xlu0 %1725 }
0x12fe   : > { %v1727_v60 = vmul.f32 0.03125, %v1726_v59 }
0x1300   : > { %v1728_v61 = vadd.f32 1e-05, %v1727_v60 }
0x1302   : > { %2591 = vrsqrt.f32 %v1728_v61 }
0x130f   : > { %v2592_v62 = vpop.eup %2591 }
0x1310   : > { %v1730_v0 = vmul.f32 %v2592_v62, %v1722_v55 }
0x1312   : > { %v1737_v3 = vmul.f32 %v2262_v63, %v1730_v0  ;;  %v2305_v0 = vld [vmem:[#allocation2] ss:$0 sm:$0xff] }
0x1314   : > { %v1744_v4 = vadd.f32 %v2263_v2, %v1737_v3 }
0x1316   : > { %v1745_v5 = vpack.c.bf16 %v1744_v4, %v1744_v4 }
0x1318   : > { %2480 = vmatmul.mubr.msk.bf16.vlgmr.msra.gmra.mxu1 %vm749_vm2, %v1745_v5 }
0x1319   : > { %2507 = vmatprep.mubr.msk.bf16.mxu1 %vm2610_vm1, %v2609_v9  ;;  %2504 = vmatpush3.bf16.msra.mxu1 %v2564_v45 }
0x131a   : > { %2505 = vmatprep.subr.bf16.mxu1 %v2609_v9 }
0x131d   : > { %2506 = vmatpush3.bf16.msra.mxu1 %v2565_v46 }
0x131e   : > { %2511 = vmatprep.subr.bf16.mxu1 %v2609_v9 }
0x13d8   : > { %v1808_v17 = vpop.f32.mrf.mxu1 }
0x13d9   : > { %v1809_v18 = vadd.f32 %v2269_v16, %v1808_v17 }
0x13da   : > { %v2481_v19 = vpop.f32.mrf.mxu1 }
0x13db   : > { %v1815_v20 = vmul.f32 0.044715, %v1809_v18  ;;  %v1814_v29 = vmul.f32 0.5, %v1809_v18 }
0x13dc   : > { %v1811_v21 = vpop.f32.mrf.mxu1 }
0x13dd   : > { %v1816_v22 = vmul.f32 %v1815_v20, %v1809_v18 }
0x13de   : > { %v2482_v23 = vpop.f32.mrf.mxu1 }
0x13df   : > { %v1817_v24 = vmul.f32 %v1816_v22, %v1809_v18 }
0x13e1   : > { %v1818_v26 = vadd.f32 %v1817_v24, %v1809_v18 }
0x13e3   : > { %v1819_v27 = vmul.f32 0.7978846, %v1818_v26 }
0x13e5   : > { %2593 = vtanh.f32 %v1819_v27 }
0x13f2   : > { %v2594_v28 = vpop.eup %2593 }
0x13f3   : > { %v1821_v30 = vadd.f32 1.0, %v2594_v28 }
0x13f5   : > { %v1822_v31 = vmul.f32 %v1821_v30, %v1814_v29 }
0x13f7   : > { %v1823_v32 = vpack.c.bf16 %v1822_v31, %v1822_v31 }
0x13f9   : > { %2500 = vmatmul.mubr.bf16.vlgmr.msra.gmra.mxu0 %v1823_v32 }
0x14b9   : > { %v1931_v43 = vpop.f32.mrf.mxu0 }
0x14ba   : > { %v1932_v34 = vadd.f32 %v2290_v33, %v1931_v43 }
0x14bb   : > { %v2501_v35 = vpop.f32.mrf.mxu0 }
0x14bc   : > { %v1937_v36 = vadd.f32 %v1932_v34, %v2991_v49 }
0x14bd   : > { %v1934_v37 = vpop.f32.mrf.mxu0 }
0x14be   : > { %v1940_v8 = vsel %vm696_vm0, %v1937_v36, 0.0 }
0x14bf   : > { %1941 = vadd.xlane.f32.xlu0 %v1940_v8  ;;  %v2502_v38 = vpop.f32.mrf.mxu0 }
0x1548   : > { %v1942_v39 = vpop.xlane.xlu0 %1941 }
0x1549   : > { %v1943_v40 = vmul.f32 0.03125, %v1942_v39 }
0x154b   : > { %v1944_v41 = vsub.f32 %v1937_v36, %v1943_v40 }
0x154d   : > { %v1945_v42 = vmul.f32 %v1944_v41, %v1944_v41 }
0x154f   : > { %v1946_v44 = vsel %vm696_vm0, %v1945_v42, 0.0 }
0x1550   : > { %1947 = vadd.xlane.f32.xlu1 %v1946_v44 }
0x15d9   : > { %v1948_v47 = vpop.xlane.xlu1 %1947 }
0x15da   : > { %v1949_v1 = vmul.f32 0.03125, %v1948_v47 }
0x15dc   : > { %v1950_v48 = vadd.f32 1e-05, %v1949_v1 }
0x15de   : > { %2595 = vrsqrt.f32 %v1950_v48 }
0x15eb   : > { %v2596_v49 = vpop.eup %2595 }
0x15ec   : > { %v1952_v51 = vmul.f32 %v2596_v49, %v1944_v41 }
0x15ee   : > { %v1959_v53 = vmul.f32 %v2299_v50, %v1952_v51 }
0x15f0   : > { %v1966_v54 = vadd.f32 %v2300_v52, %v1959_v53 }
0x15f2   : > { %1967 = vst.msk [vmem:[%s673_s30] sm:$0x7f] %vm696_vm0, %v1966_v54  ;;  %v1968_v55 = vpack.c.bf16 %v1966_v54, %v1966_v54 }
0x15f4   : > { %2508 = vmatmul.mubr.msk.bf16.vlgmr.msra.gmra.mxu1 %vm749_vm2, %v1968_v55 }
0x15f5   : > { %2513 = vmatprep.mubr.msk.bf16.mxu1 %vm2610_vm1, %v2609_v9  ;;  %2512 = vmatpush3.bf16.msra.mxu1 %v2566_v56 }
0x16b4   : > { %v2029_v58 = vpop.f32.mrf.mxu1 }
0x16b5   : > { %v2030_v25 = vadd.f32 %v2301_v57, %v2029_v58 }
0x16b6   : > { %v2509_v59 = vpop.f32.mrf.mxu1 }
0x16b7   : > { %v2035_v60 = vmax.f32 %v2030_v25, 0.0 }
0x16b8   : > { %v2032_v61 = vpop.f32.mrf.mxu1 }
0x16b9   : > { %v2036_v62 = vpack.c.bf16 %v2035_v60, %v2035_v60 }
0x16ba   : > { %v2510_v63 = vpop.f32.mrf.mxu1 }
0x16bb   : > { %2514 = vmatmul.mubr.msk.bf16.vlgmr.msra.gmra.mxu1 %vm797_vm3, %v2036_v62 }
0x177b   : > { %v2089_v9 = vpop.f32.mrf.mxu1 }
0x177c   : > { %v2090_v2 = vadd.f32 %v2305_v0, %v2089_v9 }
0x177d   : > { %v2515_v3 = vpop.f32.mrf.mxu1 }
0x177e   : > { %v2095_v4 = vsub.f32 0.0, %v2090_v2 }
0x177f   : > { %v2092_v5 = vpop.f32.mrf.mxu1 }
0x1780   : > { %v2096_v6 = vmul.f32 1.442695, %v2095_v4 }
0x1781   : > { %v2516_v7 = vpop.f32.mrf.mxu1 }
0x1782   : > { %2597 = vpow2.f32 %v2096_v6 }
0x178f   : > { %v2598_v10 = vpop.eup %2597 }
0x1790   : > { %v2098_v11 = vadd.f32 1.0, %v2598_v10 }
0x1792   : > { %2599 = vrcp.f32 %v2098_v11 }
0x179f   : > { %v2600_v12 = vpop.eup %2599 }
0x17a0   : > { %v2102_v13 = vsel %vm2101_vm12, %v2600_v12, 0.0 }
0x17a1   : > { %v2103_v14 = vrot.slane %v2102_v13, 4 }
0x17a3   : > { %v2104_v15 = vadd.f32 %v2103_v14, %v2102_v13 }
0x17a5   : > { %v2105_v16 = vrot.slane %v2104_v15, 2 }
0x17a7   : > { %v2106_v17 = vadd.f32 %v2105_v16, %v2104_v15 }
0x17a9   : > { %v2107_v18 = vrot.slane %v2106_v17, 1 }
0x17ab   : > { %v2108_v19 = vadd.f32 %v2107_v18, %v2106_v17 }
0x17ad   : > { %2110 = vst.msk [vmem:[%s676_s19] sm:$0x1] %vm2109_vm13, %v2108_v19 }
0x17ae PF: > { %s34_s26 = sadd.s32 1, %s2607_s26  }
0x17af   : > { %p31_p4 = scmp.ge.s32.totalorder %s34_s26, 4  }
0x17b1   :  { %33 = sbr.rel (!%p31_p4) target bundleno = 7 (0x7), region = 157 }

// kernel: forward.6
= control target key start
LH: loop header
LB: loop body
LE: loop exit
PB: predicated region body
PF: predicated region fallthrough
CT: control target
= control target key end

     0   :  { %s2941_s0 = inlined_call_operand.vmem [shape: f32[2,24,32], index: 0, kind: input, shape index: {}]   ;;  %s2942_s1 = inlined_call_operand.vmem [shape: f32[2,1,32], index: 1, kind: input, shape index: {}]   ;;  %s2943_s2 = inlined_call_operand.vmem [shape: f32[2,1,32], index: 2, kind: input, shape index: {}]   ;;  %s2944_s3 = inlined_call_operand.vmem [shape: bf16[2,32,96], index: 3, kind: input, shape index: {}]   ;;  %s2945_s4 = inlined_call_operand.vmem [shape: f32[2,1,96], index: 4, kind: input, shape index: {}]   ;;  %s2946_s5 = inlined_call_operand.vmem [shape: bf16[2,32,32], index: 5, kind: input, shape index: {}]   ;;  %s2947_s6 = inlined_call_operand.vmem [shape: f32[2,1,32], index: 6, kind: input, shape index: {}]   ;;  %s2948_s7 = inlined_call_operand.vmem [shape: f32[2,1,32], index: 7, kind: input, shape index: {}]   ;;  %s2949_s8 = inlined_call_operand.vmem [shape: f32[2,1,32], index: 8, kind: input, shape index: {}]   ;;  %s2950_s9 = inlined_call_operand.vmem [shape: bf16[2,32,128], index: 9, kind: input, shape index: {}]   ;;  %s2951_s10 = inlined_call_operand.vmem [shape: f32[2,1,128], index: 10, kind: input, shape index: {}]   ;;  %s2952_s11 = inlined_call_operand.vmem [shape: bf16[2,128,32], index: 11, kind: input, shape index: {}]   ;;  %s2953_s12 = inlined_call_operand.vmem [shape: f32[2,1,32], index: 12, kind: input, shape index: {}]   ;;  %s2954_s13 = inlined_call_operand.vmem [shape: f32[1,32], index: 13, kind: input, shape index: {}]   ;;  %s2955_s14 = inlined_call_operand.vmem [shape: f32[1,32], index: 14, kind: input, shape index: {}]   ;;  %s2956_s15 = inlined_call_operand.vmem [shape: bf16[32,128], index: 15, kind: input, shape index: {}]   ;;  %s2957_s16 = inlined_call_operand.vmem [shape: f32[24,128], index: 16, kind: output, shape index: {}]  }
   0x1   :  { %2958 = sst [smem:[#allocation3_spill]] %s2941_s0 }
   0x2   :  { %s2544_s21 = smov 0   ;;  %s2546_s22 = smov 0  }
   0x3   :  { %s2548_s23 = smov 0  }
   0x4 LB: > { %s2561_s25 = sadd.s32 1, %s2450_s23   ;;  %s33_s27 = sadd.s32 1, %s2446_s22  ;;  %s2450_s23 = sphi %s2548_s23, %s2964_s23   ;;  %s2446_s22 = sphi %s2546_s22, %s2963_s22   ;;  %s2442_s21 = sphi %s2544_s21, %s2962_s21  }
   0x5   : > { %s30_s26 = ssub.s32 %s2450_s23, %s2561_s25  ;;  %p40_p1 = scmp.ne.s32.totalorder %s2446_s22, %s2442_s21 }
   0x6   : > { %p31_p0 = scmp.eq.s32.totalorder %s30_s26, 0  ;;  %p41_p2 = scmp.eq.s32.totalorder %s2450_s23, 0 }
   0x7   : > { %p1987_p4 = scmp.ge.s32.totalorder %s2450_s23, 3 }
   0x8   : > { %s2570_s28 = scalar_select %p31_p0, %s2446_s22, %s33_s27  }
   0x9   : > { %p42_p3 = por %p41_p2, %p40_p1  ;;  %452 = sbr.rel (%p1987_p4) target bundleno = 25 (0x19), region = 76 }
   0xe   : > { %455 = sbr.rel (!%p42_p3) target bundleno = 25 (0x19), region = 80  ;;  %s457_s29 = sand.u32 (%p42_p3), 1, %s2446_s22  }
   0xf   : > { %s1989_s30 = sshll.u32 (%p42_p3), %s2450_s23, 3  ;;  %s1988_s0 = sshll.u32 (%p42_p3), %s457_s29, 4 }
  0x10   : > { %s2959_s19 = sld [smem:[#allocation3_spill]] (%p42_p3)  ;;  %s459_s26 = scalar_lea.vmem (%p42_p3), [#allocation2], %s1988_s0 }
  0x16   : > { %s461_s20 = scalar_lea.vmem %s2959_s19, %s1989_s30 }
  0x17   : > { %v492_v0 = vld [vmem:[%s461_s20] sm:$0xff]  ;;  %v494_v1 = vld [vmem:[%s461_s20 + $0x18] sm:$0xff] }
  0x18   : > { %493 = vst [vmem:[%s459_s26] sm:$0xff] %v492_v0  ;;  %495 = vst [vmem:[%s459_s26 + $0x8] sm:$0xff] %v494_v1 }
  0x19 PF: > { %p1990_p5 = scmp.ge.s32.totalorder %s2450_s23, 1  ;;  %p500_p6 = scmp.lt.s32.totalorder %s2450_s23, 4 }
  0x1b   : > { %p501_p7 = pnand %p1990_p5, %p500_p6 }
  0x1c   : > { %s507_s27 = sand.u32 (!%p501_p7), 1, %s2442_s21   ;;  %s2455_s21 = smov (!%p501_p7), 112  }
  0x1d   : > { %504 = sbr.rel (%p501_p7) target bundleno = 5297 (0x14b1), region = 118  ;;  %s1991_s29 = sshll.u32 (!%p501_p7), %s507_s27, 4 }
  0x1e   : > { %s509_s24 = scalar_lea.vmem (!%p501_p7), [#allocation2], %s1991_s29  ;;  %s2454_s29 = smov (!%p501_p7), 96  }
  0x1f   : > { %s2458_s18 = smov (!%p501_p7), 64   ;;  %s2960_s0 = sadd.s32 (!%p501_p7), 4294967295, %s2450_s23  }
  0x20   : > { %p555_p8 = scmp.lt.s32.totalorder (!%p501_p7), %s2960_s0, 2  ;;  %s2961_s17 = smov (!%p501_p7), %s2960_s0 }
  0x22   : > { %vm565_vm0 = vcmask 261120   ;;  %v2581_v2 = vld [vmem:[%s509_s24] sm:$0xff]  ;;  %v2583_v3 = vld [vmem:[%s509_s24 + $0x8] sm:$0xff]  ;;  %v2452_v17 = vmov 0.0   ;;  %vm2453_vm1 = vmmov 0   ;;  %vm725_vm2 = vcmask 130048  }
  0x23   : > { %v566_v4 = vsel %vm565_vm0, %v2581_v2, 0.0  ;;  %v661_v5 = vsel %vm565_vm0, %v2583_v3, 0.0  ;;  %v2352_v16 = vld [vmem:[%s2944_s3 + $0x8] sm:$0xff]   ;;  %2151 = vmatprep.subr.bf16.mxu1 %v2452_v17  ;;  %2155 = vmatprep.mubr.msk.bf16.mxu1 %vm2453_vm1, %v2452_v17  ;;  %v2353_v18 = vld [vmem:[%s2944_s3] sm:$0xff]   ;;  %vm843_vm3 = vcmask 7168   ;;  %vm845_vm4 = vcmask 15360  }
  0x24   : > { %567 = vadd.xlane.f32.xlu0 %v566_v4  ;;  %2152 = vmatpush3.bf16.msra.mxu1 %v2352_v16  ;;  %v1994_v26 = vld [vmem:[%s2942_s1] ss:$0 sm:$0xff]  ;;  %s2966_s17 = smov (!%p555_p8, %s2961_s17), 2 }
  0x25   : > { %2167 = vmatprep.subr.bf16.mxu0 %v2452_v17  ;;  %2153 = vmatprep.subr.bf16.mxu1 %v2452_v17  ;;  %v1995_v28 = vld [vmem:[%s2943_s2] ss:$0 sm:$0xff] }
  0x26   : > { %2171 = vmatprep.mubr.msk.bf16.mxu0 %vm2453_vm1, %v2452_v17  ;;  %v1996_v37 = vld [vmem:[%s2945_s4] ss:$0 sm:$0xff] }
  0x28   : > { %662 = vadd.xlane.f32.xlu0 %v661_v5  ;;  %2154 = vmatpush3.bf16.msra.mxu1 %v2353_v18 }
  0x29   : > { %2159 = vmatprep.subr.bf16.mxu1 %v2452_v17 }
  0xad   : > { %v568_v6 = vpop.xlane.xlu0 %567 }
  0xae   : > { %v570_v7 = vmul.f32 0.03125, %v568_v6 }
  0xb0   : > { %v571_v8 = vsub.f32 %v2581_v2, %v570_v7 }
  0xb1   : > { %v663_v9 = vpop.xlane.xlu0 %662 }
  0xb2   : > { %v664_v10 = vmul.f32 0.03125, %v663_v9  ;;  %v572_v11 = vmul.f32 %v571_v8, %v571_v8 }
  0xb4   : > { %v665_v12 = vsub.f32 %v2583_v3, %v664_v10  ;;  %v573_v13 = vsel %vm565_vm0, %v572_v11, 0.0 }
  0xb5   : > { %574 = vadd.xlane.f32.xlu1 %v573_v13 }
  0xb6   : > { %v666_v14 = vmul.f32 %v665_v12, %v665_v12 }
  0xb8   : > { %v667_v15 = vsel %vm565_vm0, %v666_v14, 0.0  ;;  %v2456_v14 = vmov 1  }
  0xb9   : > { %668 = vadd.xlane.f32.xlu1 %v667_v15  ;;  %2331 = vset.pattern.permute.xlu0 %v2456_v14  ;;  %v2457_v15 = vmov 0  }
  0xba   : > { %2330 = vset.pattern.permute.xlu1 %v2457_v15 }
 0x13e   : > { %v575_v19 = vpop.xlane.xlu1 %574 }
 0x13f   : > { %v576_v20 = vmul.f32 0.03125, %v575_v19 }
 0x141   : > { %v577_v21 = vadd.f32 1e-05, %v576_v20 }
 0x142   : > { %v669_v22 = vpop.xlane.xlu1 %668 }
 0x143   : > { %2382 = vrsqrt.f32 %v577_v21  ;;  %v670_v23 = vmul.f32 0.03125, %v669_v22 }
 0x145   : > { %v671_v24 = vadd.f32 1e-05, %v670_v23 }
 0x147   : > { %2384 = vrsqrt.f32 %v671_v24 }
 0x150   : > { %v2383_v25 = vpop.eup %2382 }
 0x151   : > { %v579_v27 = vmul.f32 %v2383_v25, %v571_v8 }
 0x153   : > { %v586_v29 = vmul.f32 %v1994_v26, %v579_v27 }
 0x154   : > { %v2385_v30 = vpop.eup %2384 }
 0x155   : > { %v593_v31 = vadd.f32 %v1995_v28, %v586_v29  ;;  %v673_v32 = vmul.f32 %v2385_v30, %v665_v12 }
 0x157   : > { %v594_v33 = vpack.c.bf16 %v593_v31, %v593_v31  ;;  %v674_v34 = vmul.f32 %v1994_v26, %v673_v32 }
 0x159   : > { %2156 = vmatmul.mubr.msk.bf16.vlgmr.msra.gmra.mxu1 %vm565_vm0, %v594_v33  ;;  %v675_v35 = vadd.f32 %v1995_v28, %v674_v34 }
 0x15a   : > { %2160 = vmatpush3.bf16.msra.mxu1 %v2352_v16  ;;  %2163 = vmatprep.mubr.msk.bf16.mxu1 %vm2453_vm1, %v2452_v17 }
 0x15b   : > { %2161 = vmatprep.subr.bf16.mxu1 %v2452_v17  ;;  %v676_v36 = vpack.c.bf16 %v675_v35, %v675_v35 }
 0x15e   : > { %2162 = vmatpush3.bf16.msra.mxu1 %v2353_v18 }
 0x15f   : > { %2175 = vmatprep.subr.bf16.mxu1 %v2452_v17 }
 0x161   : > { %2164 = vmatmul.mubr.msk.bf16.vlgmr.msra.gmra.mxu1 %vm565_vm0, %v676_v36 }
 0x162   : > { %2179 = vmatprep.mubr.msk.bf16.mxu1 %vm2453_vm1, %v2452_v17 }
 0x219   : > { %v655_v38 = vpop.f32.mrf.mxu1 }
 0x21a   : > { %v2624_v39 = vadd.f32 %v1996_v37, %v655_v38 }
 0x21b   : > { %v2157_v40 = vpop.f32.mrf.mxu1 }
 0x21c   : > { %721 = vrot.lane.b32.xlu0 %v2624_v39, %s2454_s29  ;;  %v2354_v40 = vld [vmem:[%s2946_s5 + $0x8] sm:$0xff]  }
 0x21d   : > { %v658_v41 = vpop.f32.mrf.mxu1  ;;  %2168 = vmatpush3.bf16.msra.mxu0 %v2354_v40  ;;  %2176 = vmatpush3.bf16.msra.mxu1 %v2354_v40 }
 0x21e   : > { %2169 = vmatprep.subr.bf16.mxu0 %v2452_v17  ;;  %2177 = vmatprep.subr.bf16.mxu1 %v2452_v17 }
 0x21f   : > { %v2158_v42 = vpop.f32.mrf.mxu1 }
 0x221   : > { %v714_v43 = vpop.f32.mrf.mxu1 }
 0x222   : > { %v2628_v44 = vadd.f32 %v1996_v37, %v714_v43  ;;  %v2355_v43 = vld [vmem:[%s2946_s5] sm:$0xff]  }
 0x223   : > { %v2165_v45 = vpop.f32.mrf.mxu1  ;;  %2170 = vmatpush3.bf16.msra.mxu0 %v2355_v43  ;;  %2178 = vmatpush3.bf16.msra.mxu1 %v2355_v43  ;;  %v2007_v43 = vld [vmem:[%s2949_s8] ss:$0 sm:$0xff] }
 0x224   : > { %835 = vrot.lane.b32.xlu1 %v2628_v44, %s2454_s29  ;;  %2183 = vmatprep.subr.bf16.mxu0 %v2452_v17 }
 0x225   : > { %v717_v46 = vpop.f32.mrf.mxu1  ;;  %2191 = vmatprep.subr.bf16.mxu1 %v2452_v17 }
 0x227   : > { %v2166_v47 = vpop.f32.mrf.mxu1 }
 0x28e   : > { %v722_v48 = vpop.permute.xlu0 %721 }
 0x28f   : > { %v829_v49 = vmul.f32 %v722_v48, %v2628_v44  ;;  %v724_v0 = vmul.f32 %v722_v48, %v2624_v39 }
 0x291   : > { %870 = vrot.lane.b32.xlu1 %v829_v49, %s2455_s21  ;;  %v830_v50 = vsel %vm725_vm2, %v829_v49, 0.0  ;;  %v726_v22 = vsel %vm725_vm2, %v724_v0, 0.0 }
 0x292   : > { %831 = vadd.xlane.f32.xlu0 %v830_v50 }
 0x296   : > { %v836_v51 = vpop.permute.xlu1 %835 }
 0x297   : > { %v838_v52 = vmul.f32 %v836_v51, %v2628_v44 }
 0x299   : > { %878 = vrot.lane.b32.xlu1 %v838_v52, %s2455_s21  ;;  %v839_v53 = vsel %vm725_vm2, %v838_v52, 0.0 }
 0x2bd   : > { %840 = vadd.xlane.f32.xlu1 %v839_v53 }
 0x303   : > { %v871_v54 = vpop.permute.xlu1 %870 }
 0x304   : > { %v873_v55 = vsel %vm725_vm2, %v871_v54, 0.0 }
 0x305   : > { %874 = vadd.xlane.f32.xlu0 %v873_v55 }
 0x30b   : > { %v879_v56 = vpop.permute.xlu1 %878 }
 0x30c   : > { %v881_v57 = vsel %vm725_vm2, %v879_v56, 0.0 }
 0x30d   : > { %882 = vadd.xlane.f32.xlu0 %v881_v57 }
 0x31b   : > { %v832_v58 = vpop.xlane.xlu0 %831 }
 0x31c   : > { %v833_v60 = vmul.f32 0.25, %v832_v58 }
 0x346   : > { %v841_v59 = vpop.xlane.xlu1 %840 }
 0x347   : > { %v842_v61 = vmul.f32 0.25, %v841_v59 }
 0x349   : > { %v844_v62 = vsel %vm843_vm3, %v833_v60, %v842_v61 }
 0x34a   : > { %v846_v63 = vsel %vm845_vm4, %v844_v62, -inf }
 0x34b   : > { %847 = vmax.xlane.f32.xlu0 %v846_v63 }
 0x361   : > { %738 = vrot.lane.b32.xlu0 %v724_v0, %s2455_s21 }
 0x38e   : > { %v875_v1 = vpop.xlane.xlu0 %874 }
 0x38f   : > { %v876_v5 = vmul.f32 0.25, %v875_v1 }
 0x396   : > { %v883_v4 = vpop.xlane.xlu0 %882 }
 0x397   : > { %v884_v6 = vmul.f32 0.25, %v883_v4 }
 0x399   : > { %v885_v7 = vsel %vm843_vm3, %v876_v5, %v884_v6 }
 0x39a   : > { %v886_v8 = vsel %vm845_vm4, %v885_v7, -inf }
 0x39b   : > { %887 = vmax.xlane.f32.xlu1 %v886_v8 }
 0x3d4   : > { %v848_v9 = vpop.xlane.xlu0 %847 }
 0x3d5   : > { %v849_v10 = vsub.f32 %v844_v62, %v848_v9  ;;  %v2001_v9 = vld [vmem:[%s2947_s6] ss:$0 sm:$0xff] }
 0x3d7   : > { %v850_v11 = vmul.f32 1.442695, %v849_v10 }
 0x3d8   : > { %v739_v23 = vpop.permute.xlu0 %738 }
 0x3d9   : > { %2386 = vpow2.f32 %v850_v11  ;;  %v741_v24 = vsel %vm725_vm2, %v739_v23, 0.0 }
 0x3e6   : > { %v2387_v12 = vpop.eup %2386 }
 0x3e7   : > { %v852_v13 = vsel %vm845_vm4, %v2387_v12, 0.0 }
 0x3e8   : > { %853 = vadd.xlane.f32.xlu1 %v852_v13 }
 0x424   : > { %v888_v16 = vpop.xlane.xlu1 %887 }
 0x425   : > { %v889_v18 = vsub.f32 %v885_v7, %v888_v16 }
 0x427   : > { %v890_v19 = vmul.f32 1.442695, %v889_v18 }
 0x429   : > { %2388 = vpow2.f32 %v890_v19 }
 0x436   : > { %v2389_v20 = vpop.eup %2388 }
 0x437   : > { %v892_v21 = vsel %vm845_vm4, %v2389_v20, 0.0 }
 0x438   : > { %893 = vadd.xlane.f32.xlu1 %v892_v21 }
 0x43c   : > { %727 = vadd.xlane.f32.xlu1 %v726_v22 }
 0x440   : > { %742 = vadd.xlane.f32.xlu1 %v741_v24 }
 0x471   : > { %v854_v25 = vpop.xlane.xlu1 %853 }
 0x472   : > { %2390 = vrcp.f32 %v854_v25 }
 0x47f   : > { %v2391_v26 = vpop.eup %2390 }
 0x480   : > { %v856_v27 = vmul.f32 %v2391_v26, %v2387_v12 }
 0x482   : > { %864 = vperm.xlu0 %2331, %v856_v27   ;;  %859 = vperm.xlu1 %2330, %v856_v27  }
 0x486   : > { %2332 = vset.pattern.permute.xlu0 %v2457_v15  ;;  %2333 = vset.pattern.permute.xlu1 %v2456_v14 }
 0x4c1   : > { %v894_v28 = vpop.xlane.xlu1 %893 }
 0x4c2   : > { %2392 = vrcp.f32 %v894_v28 }
 0x4c5   : > { %v728_v29 = vpop.xlane.xlu1 %727 }
 0x4c6   : > { %v729_v30 = vmul.f32 0.25, %v728_v29 }
 0x4c8   : > { %v730_v31 = vsub.f32 %v729_v30, %v729_v30  ;;  %v2356_v30 = vld [vmem:[%s2950_s9 + $0x8] sm:$0xff]  }
 0x4c9   : > { %v743_v32 = vpop.xlane.xlu1 %742 }
 0x4ca   : > { %v731_v33 = vmul.f32 1.442695, %v730_v31  ;;  %v744_v34 = vmul.f32 0.25, %v743_v32 }
 0x4cc   : > { %2394 = vpow2.f32 %v731_v33  ;;  %v745_v35 = vsub.f32 %v744_v34, %v744_v34 }
 0x4ce   : > { %v746_v36 = vmul.f32 1.442695, %v745_v35 }
 0x4cf   : > { %v2393_v37 = vpop.eup %2392 }
 0x4d0   : > { %2396 = vpow2.f32 %v746_v36  ;;  %v896_v38 = vmul.f32 %v2393_v37, %v2389_v20 }
 0x4d2   : > { %899 = vperm.xlu0 %2332, %v896_v38   ;;  %904 = vperm.xlu1 %2333, %v896_v38  }
 0x4d6   : > { %2345 = vset.pattern.permute.xlu0 %v2456_v14  ;;  %2344 = vset.pattern.permute.xlu1 %v2457_v15 }
 0x4d9   : > { %v2395_v41 = vpop.eup %2394 }
 0x4da   : > { %2398 = vrcp.f32 %v2395_v41 }
 0x4dd   : > { %v2397_v42 = vpop.eup %2396 }
 0x4de   : > { %2400 = vrcp.f32 %v2397_v42 }
 0x4e7   : > { %v2399_v45 = vpop.eup %2398 }
 0x4e8   : > { %v735_v46 = vmul.f32 %v2399_v45, %v2395_v41  ;;  %v2006_v41 = vld [vmem:[%s2948_s7] ss:$0 sm:$0xff] }
 0x4ea   : > { %v736_v49 = vmul.f32 %v735_v46, %v2624_v39 }
 0x4eb   : > { %v2401_v47 = vpop.eup %2400 }
 0x4ec   : > { %v750_v48 = vmul.f32 %v2401_v47, %v2397_v42 }
 0x4ee   : > { %v751_v50 = vmul.f32 %v750_v48, %v2624_v39  ;;  %v2358_v48 = vld [vmem:[%s2952_s11 + $0x38] sm:$0xff]  }
 0x4f0   : > { %v2334_v51 = vpack.i.bf16 %v751_v50, %v736_v49  ;;  %v2359_v49 = vld [vmem:[%s2952_s11 + $0x30] sm:$0xff]  }
 0x4f2   : > { %2335 = vrot.lane.b32.xlu1 %v2334_v51, %s2458_s18 }
 0x4fd   : > { %v865_v52 = vpop.permute.xlu0 %864  ;;  %v860_v53 = vpop.permute.xlu1 %859 }
 0x4fe   : > { %v867_v54 = vmul.f32 %v865_v52, %v2628_v44  ;;  %v862_v55 = vmul.f32 %v860_v53, %v2624_v39  ;;  %v2360_v52 = vld [vmem:[%s2952_s11 + $0x28] sm:$0xff]  }
 0x500   : > { %v868_v60 = vadd.f32 %v867_v54, %v862_v55  ;;  %v2361_v54 = vld [vmem:[%s2952_s11 + $0x20] sm:$0xff]   ;;  %v2362_v55 = vld [vmem:[%s2952_s11 + $0x18] sm:$0xff]  }
 0x54d   : > { %v900_v56 = vpop.permute.xlu0 %899  ;;  %v905_v57 = vpop.permute.xlu1 %904 }
 0x54e   : > { %v902_v58 = vmul.f32 %v900_v56, %v2624_v39  ;;  %v907_v59 = vmul.f32 %v905_v57, %v2628_v44  ;;  %v2363_v56 = vld [vmem:[%s2952_s11 + $0x10] sm:$0xff]   ;;  %v2364_v57 = vld [vmem:[%s2952_s11 + $0x8] sm:$0xff]  }
 0x550   : > { %v908_v61 = vadd.f32 %v907_v59, %v902_v58 }
 0x552   : > { %v2339_v62 = vpack.i.bf16 %v908_v61, %v868_v60  ;;  %v2365_v60 = vld [vmem:[%s2952_s11] sm:$0xff]  }
 0x554   : > { %2340 = vrot.lane.b32.xlu0 %v2339_v62, %s2458_s18 }
 0x564   : > { %v2336_v63 = vpop.permute.xlu1 %2335 }
 0x565   : > { %v2338_v0 = vunpack.i.h.bf16 %v2336_v63  ;;  %v2337_v1 = vunpack.i.l.bf16 %v2336_v63 }
 0x567   : > { %v760_v4 = vsel %vm725_vm2, %v2337_v1, %v2338_v0  ;;  %v2008_v0 = vld [vmem:[%s2951_s10] ss:$0 sm:$0xff] }
 0x568   : > { %v761_v5 = vpack.c.bf16 %v760_v4, %v760_v4 }
 0x56a   : > { %2172 = vmatmul.mubr.msk.bf16.vlgmr.msra.gmra.mxu0 %vm565_vm0, %v761_v5 }
 0x56b   : > { %2187 = vmatprep.mubr.msk.bf16.mxu0 %vm2453_vm1, %v2452_v17  ;;  %2184 = vmatpush3.bf16.msra.mxu0 %v2356_v30 }
 0x56c   : > { %2185 = vmatprep.subr.bf16.mxu0 %v2452_v17 }
 0x5c6   : > { %v2341_v6 = vpop.permute.xlu0 %2340 }
 0x5c7   : > { %v2343_v39 = vunpack.i.h.bf16 %v2341_v6  ;;  %v2342_v7 = vunpack.i.l.bf16 %v2341_v6 }
 0x5c9   : > { %v917_v44 = vsel %vm725_vm2, %v2342_v7, %v2343_v39 }
 0x5ca   : > { %v918_v8 = vpack.c.bf16 %v917_v44, %v917_v44 }
 0x5cc   : > { %2180 = vmatmul.mubr.msk.bf16.vlgmr.msra.gmra.mxu1 %vm565_vm0, %v918_v8 }
 0x5cd   : > { %2207 = vmatprep.mubr.msk.bf16.mxu1 %vm2453_vm1, %v2452_v17  ;;  %2192 = vmatpush3.bf16.msra.mxu1 %v2358_v48 }
 0x5ce   : > { %2193 = vmatprep.subr.bf16.mxu1 %v2452_v17 }
 0x5d1   : > { %2194 = vmatpush3.bf16.msra.mxu1 %v2359_v49 }
 0x5d2   : > { %2195 = vmatprep.subr.bf16.mxu1 %v2452_v17 }
 0x5d5   : > { %2196 = vmatpush3.bf16.msra.mxu1 %v2360_v52 }
 0x5d6   : > { %2197 = vmatprep.subr.bf16.mxu1 %v2452_v17 }
 0x5d9   : > { %2198 = vmatpush3.bf16.msra.mxu1 %v2361_v54 }
 0x5da   : > { %2199 = vmatprep.subr.bf16.mxu1 %v2452_v17 }
 0x5dd   : > { %2200 = vmatpush3.bf16.msra.mxu1 %v2362_v55 }
 0x5de   : > { %2201 = vmatprep.subr.bf16.mxu1 %v2452_v17 }
 0x5e1   : > { %2202 = vmatpush3.bf16.msra.mxu1 %v2363_v56 }
 0x5e2   : > { %2203 = vmatprep.subr.bf16.mxu1 %v2452_v17 }
 0x5e5   : > { %2204 = vmatpush3.bf16.msra.mxu1 %v2364_v57 }
 0x5e6   : > { %2205 = vmatprep.subr.bf16.mxu1 %v2452_v17 }
 0x5e9   : > { %2206 = vmatpush3.bf16.msra.mxu1 %v2365_v60 }
 0x5ea   : > { %2239 = vmatprep.subr.bf16.mxu1 %v2452_v17 }
 0x62a   : > { %v822_v10 = vpop.f32.mrf.mxu0 }
 0x62b   : > { %v823_v11 = vadd.f32 %v2001_v9, %v822_v10 }
 0x62c   : > { %v2173_v12 = vpop.f32.mrf.mxu0 }
 0x62d   : > { %v2683_v13 = vadd.f32 %v823_v11, %v2581_v2 }
 0x62e   : > { %v825_v15 = vpop.f32.mrf.mxu0 }
 0x62f   : > { %v965_v16 = vsel %vm565_vm0, %v2683_v13, 0.0 }
 0x630   : > { %966 = vadd.xlane.f32.xlu1 %v965_v16  ;;  %v2174_v18 = vpop.f32.mrf.mxu0 }
 0x68c   : > { %v956_v19 = vpop.f32.mrf.mxu1 }
 0x68d   : > { %v957_v20 = vadd.f32 %v2001_v9, %v956_v19 }
 0x68e   : > { %v2181_v21 = vpop.f32.mrf.mxu1 }
 0x68f   : > { %v2688_v22 = vadd.f32 %v2583_v3, %v957_v20  ;;  %v2357_v3 = vld [vmem:[%s2950_s9] sm:$0xff]  }
 0x690   : > { %v959_v23 = vpop.f32.mrf.mxu1  ;;  %2186 = vmatpush3.bf16.msra.mxu0 %v2357_v3 }
 0x691   : > { %v1181_v24 = vsel %vm565_vm0, %v2688_v22, 0.0  ;;  %2211 = vmatprep.subr.bf16.mxu0 %v2452_v17 }
 0x692   : > { %1182 = vadd.xlane.f32.xlu0 %v1181_v24  ;;  %v2182_v25 = vpop.f32.mrf.mxu1 }
 0x6b9   : > { %v967_v2 = vpop.xlane.xlu1 %966 }
 0x6ba   : > { %v968_v26 = vmul.f32 0.03125, %v967_v2 }
 0x6bc   : > { %v969_v27 = vsub.f32 %v2683_v13, %v968_v26 }
 0x6be   : > { %v970_v28 = vmul.f32 %v969_v27, %v969_v27 }
 0x6c0   : > { %v971_v29 = vsel %vm565_vm0, %v970_v28, 0.0 }
 0x6c1   : > { %972 = vadd.xlane.f32.xlu0 %v971_v29 }
 0x71b   : > { %v1183_v31 = vpop.xlane.xlu0 %1182 }
 0x71c   : > { %v1184_v32 = vmul.f32 0.03125, %v1183_v31 }
 0x71e   : > { %v1185_v33 = vsub.f32 %v2688_v22, %v1184_v32 }
 0x720   : > { %v1186_v34 = vmul.f32 %v1185_v33, %v1185_v33 }
 0x722   : > { %v1187_v35 = vsel %vm565_vm0, %v1186_v34, 0.0 }
 0x723   : > { %1188 = vadd.xlane.f32.xlu0 %v1187_v35 }
 0x74a   : > { %v973_v36 = vpop.xlane.xlu0 %972 }
 0x74b   : > { %v974_v37 = vmul.f32 0.03125, %v973_v36 }
 0x74d   : > { %v975_v38 = vadd.f32 1e-05, %v974_v37 }
 0x74f   : > { %2402 = vrsqrt.f32 %v975_v38 }
 0x75c   : > { %v2403_v40 = vpop.eup %2402 }
 0x75d   : > { %v977_v42 = vmul.f32 %v2403_v40, %v969_v27 }
 0x75f   : > { %v984_v45 = vmul.f32 %v2006_v41, %v977_v42 }
 0x761   : > { %v991_v46 = vadd.f32 %v2007_v43, %v984_v45 }
 0x763   : > { %v992_v47 = vpack.c.bf16 %v991_v46, %v991_v46 }
 0x765   : > { %2188 = vmatmul.mubr.msk.bf16.vlgmr.msra.gmra.mxu0 %vm565_vm0, %v992_v47 }
 0x766   : > { %2212 = vmatpush3.bf16.msra.mxu0 %v2356_v30  ;;  %2215 = vmatprep.mubr.msk.bf16.mxu0 %vm2453_vm1, %v2452_v17 }
 0x767   : > { %2213 = vmatprep.subr.bf16.mxu0 %v2452_v17 }
 0x76a   : > { %2214 = vmatpush3.bf16.msra.mxu0 %v2357_v3 }
 0x76b   : > { %2219 = vmatprep.subr.bf16.mxu0 %v2452_v17 }
 0x7ac   : > { %v1189_v50 = vpop.xlane.xlu0 %1188 }
 0x7ad   : > { %v1190_v51 = vmul.f32 0.03125, %v1189_v50 }
 0x7af   : > { %v1191_v53 = vadd.f32 1e-05, %v1190_v51 }
 0x7b1   : > { %2404 = vrsqrt.f32 %v1191_v53 }
 0x7be   : > { %v2405_v58 = vpop.eup %2404 }
 0x7bf   : > { %v1193_v59 = vmul.f32 %v2405_v58, %v1185_v33  ;;  %v2012_v33 = vld [vmem:[%s2953_s12] ss:$0 sm:$0xff] }
 0x7c1   : > { %v1194_v61 = vmul.f32 %v2006_v41, %v1193_v59 }
 0x7c3   : > { %v1195_v62 = vadd.f32 %v2007_v43, %v1194_v61 }
 0x7c5   : > { %v1196_v63 = vpack.c.bf16 %v1195_v62, %v1195_v62 }
 0x7c7   : > { %2216 = vmatmul.mubr.msk.bf16.vlgmr.msra.gmra.mxu0 %vm565_vm0, %v1196_v63 }
 0x7c8   : > { %2220 = vmatpush3.bf16.msra.mxu0 %v2358_v48  ;;  %2235 = vmatprep.mubr.msk.bf16.mxu0 %vm2453_vm1, %v2452_v17 }
 0x7c9   : > { %2221 = vmatprep.subr.bf16.mxu0 %v2452_v17 }
 0x7cc   : > { %2222 = vmatpush3.bf16.msra.mxu0 %v2359_v49 }
 0x7cd   : > { %2223 = vmatprep.subr.bf16.mxu0 %v2452_v17 }
 0x7d0   : > { %2224 = vmatpush3.bf16.msra.mxu0 %v2360_v52 }
 0x7d1   : > { %2225 = vmatprep.subr.bf16.mxu0 %v2452_v17 }
 0x7d4   : > { %2226 = vmatpush3.bf16.msra.mxu0 %v2361_v54  ;;  %v2366_v54 = vld [vmem:[%s2944_s3 + $0x18] sm:$0xff]  }
 0x7d5   : > { %2227 = vmatprep.subr.bf16.mxu0 %v2452_v17 }
 0x7d8   : > { %2228 = vmatpush3.bf16.msra.mxu0 %v2362_v55 }
 0x7d9   : > { %2229 = vmatprep.subr.bf16.mxu0 %v2452_v17 }
 0x7dc   : > { %2230 = vmatpush3.bf16.msra.mxu0 %v2363_v56 }
 0x7dd   : > { %2231 = vmatprep.subr.bf16.mxu0 %v2452_v17 }
 0x7e0   : > { %2232 = vmatpush3.bf16.msra.mxu0 %v2364_v57 }
 0x7e1   : > { %2233 = vmatprep.subr.bf16.mxu0 %v2452_v17 }
 0x7e4   : > { %2234 = vmatpush3.bf16.msra.mxu0 %v2365_v60 }
 0x7e5   : > { %2255 = vmatprep.subr.bf16.mxu0 %v2452_v17 }
 0x825   : > { %v1053_v1 = vpop.f32.mrf.mxu0 }
 0x826   : > { %v1054_v4 = vadd.f32 %v2008_v0, %v1053_v1 }
 0x827   : > { %v2189_v5 = vpop.f32.mrf.mxu0 }
 0x828   : > { %v1060_v6 = vmul.f32 0.044715, %v1054_v4  ;;  %v1059_v12 = vmul.f32 0.5, %v1054_v4 }
 0x829   : > { %v1056_v39 = vpop.f32.mrf.mxu0 }
 0x82a   : > { %v1061_v7 = vmul.f32 %v1060_v6, %v1054_v4 }
 0x82b   : > { %v2190_v44 = vpop.f32.mrf.mxu0 }
 0x82c   : > { %v1062_v8 = vmul.f32 %v1061_v7, %v1054_v4 }
 0x82e   : > { %v1063_v9 = vadd.f32 %v1062_v8, %v1054_v4  ;;  %v2025_v4 = vld [vmem:[%s2943_s2 + $0x1] ss:$0 sm:$0xff] }
 0x830   : > { %v1064_v10 = vmul.f32 0.7978846, %v1063_v9 }
 0x832   : > { %2406 = vtanh.f32 %v1064_v10 }
 0x83f   : > { %v2407_v11 = vpop.eup %2406 }
 0x840   : > { %v1066_v15 = vadd.f32 1.0, %v2407_v11 }
 0x842   : > { %v1067_v16 = vmul.f32 %v1066_v15, %v1059_v12 }
 0x844   : > { %v1068_v18 = vpack.c.bf16 %v1067_v16, %v1067_v16  ;;  %v2031_v16 = vld [vmem:[%s2945_s4 + $0x1] ss:$0 sm:$0xff] }
 0x846   : > { %2208 = vmatmul.mubr.bf16.vlgmr.msra.gmra.mxu1 %v1068_v18 }
 0x847   : > { %2243 = vmatprep.mubr.msk.bf16.mxu1 %vm2453_vm1, %v2452_v17  ;;  %2240 = vmatpush3.bf16.msra.mxu1 %v2366_v54 }
 0x848   : > { %2241 = vmatprep.subr.bf16.mxu1 %v2452_v17 }
 0x887   : > { %v1234_v19 = vpop.f32.mrf.mxu0 }
 0x888   : > { %v1235_v20 = vadd.f32 %v2008_v0, %v1234_v19  ;;  %v2024_v0 = vld [vmem:[%s2942_s1 + $0x1] ss:$0 sm:$0xff] }
 0x889   : > { %v2217_v21 = vpop.f32.mrf.mxu0 }
 0x88a   : > { %v1241_v23 = vmul.f32 0.044715, %v1235_v20  ;;  %v1240_v30 = vmul.f32 0.5, %v1235_v20 }
 0x88b   : > { %v1237_v24 = vpop.f32.mrf.mxu0 }
 0x88c   : > { %v1242_v25 = vmul.f32 %v1241_v23, %v1235_v20 }
 0x88d   : > { %v2218_v2 = vpop.f32.mrf.mxu0 }
 0x88e   : > { %v1243_v26 = vmul.f32 %v1242_v25, %v1235_v20 }
 0x890   : > { %v1244_v27 = vadd.f32 %v1243_v26, %v1235_v20 }
 0x892   : > { %v1245_v28 = vmul.f32 0.7978846, %v1244_v27 }
 0x894   : > { %2408 = vtanh.f32 %v1245_v28 }
 0x8a1   : > { %v2409_v29 = vpop.eup %2408 }
 0x8a2   : > { %v1247_v3 = vadd.f32 1.0, %v2409_v29 }
 0x8a4   : > { %v1248_v31 = vmul.f32 %v1247_v3, %v1240_v30 }
 0x8a6   : > { %v1249_v32 = vpack.c.bf16 %v1248_v31, %v1248_v31 }
 0x8a8   : > { %2236 = vmatmul.mubr.bf16.vlgmr.msra.gmra.mxu0 %v1249_v32 }
 0x8a9   : > { %2259 = vmatprep.mubr.msk.bf16.mxu0 %vm2453_vm1, %v2452_v17 }
 0x906   : > { %v1174_v34 = vpop.f32.mrf.mxu1 }
 0x907   : > { %v1175_v35 = vadd.f32 %v2012_v33, %v1174_v34 }
 0x908   : > { %v2209_v36 = vpop.f32.mrf.mxu1 }
 0x909   : > { %v1180_v37 = vadd.f32 %v1175_v35, %v2683_v13 }
 0x90a   : > { %v1177_v38 = vpop.f32.mrf.mxu1 }
 0x90b   : > { %v1295_v40 = vsel %vm565_vm0, %v1180_v37, 0.0 }
 0x90c   : > { %1296 = vadd.xlane.f32.xlu1 %v1295_v40  ;;  %v2210_v41 = vpop.f32.mrf.mxu1 }
 0x968   : > { %v1284_v42 = vpop.f32.mrf.mxu0 }
 0x969   : > { %v1285_v43 = vadd.f32 %v2012_v33, %v1284_v42 }
 0x96a   : > { %v2237_v45 = vpop.f32.mrf.mxu0 }
 0x96b   : > { %v2771_v46 = vadd.f32 %v1285_v43, %v2688_v22  ;;  %v2367_v22 = vld [vmem:[%s2944_s3 + $0x10] sm:$0xff]  }
 0x96c   : > { %v1287_v47 = vpop.f32.mrf.mxu0  ;;  %2242 = vmatpush3.bf16.msra.mxu1 %v2367_v22 }
 0x96d   : > { %v1391_v48 = vsel %vm565_vm0, %v2771_v46, 0.0  ;;  %2247 = vmatprep.subr.bf16.mxu1 %v2452_v17 }
 0x96e   : > { %1392 = vadd.xlane.f32.xlu0 %v1391_v48  ;;  %v2238_v49 = vpop.f32.mrf.mxu0 }
 0x995   : > { %v1297_v50 = vpop.xlane.xlu1 %1296 }
 0x996   : > { %v1298_v51 = vmul.f32 0.03125, %v1297_v50 }
 0x998   : > { %v1299_v13 = vsub.f32 %v1180_v37, %v1298_v51 }
 0x99a   : > { %v1300_v52 = vmul.f32 %v1299_v13, %v1299_v13 }
 0x99c   : > { %v1301_v53 = vsel %vm565_vm0, %v1300_v52, 0.0 }
 0x99d   : > { %1302 = vadd.xlane.f32.xlu1 %v1301_v53 }
 0x9f7   : > { %v1393_v55 = vpop.xlane.xlu0 %1392 }
 0x9f8   : > { %v1394_v56 = vmul.f32 0.03125, %v1393_v55 }
 0x9fa   : > { %v1395_v57 = vsub.f32 %v2771_v46, %v1394_v56 }
 0x9fc   : > { %v1396_v58 = vmul.f32 %v1395_v57, %v1395_v57 }
 0x9fe   : > { %v1397_v59 = vsel %vm565_vm0, %v1396_v58, 0.0 }
 0x9ff   : > { %1398 = vadd.xlane.f32.xlu0 %v1397_v59 }
 0xa26   : > { %v1303_v60 = vpop.xlane.xlu1 %1302 }
 0xa27   : > { %v1304_v61 = vmul.f32 0.03125, %v1303_v60 }
 0xa29   : > { %v1305_v62 = vadd.f32 1e-05, %v1304_v61 }
 0xa2b   : > { %2410 = vrsqrt.f32 %v1305_v62 }
 0xa38   : > { %v2411_v63 = vpop.eup %2410 }
 0xa39   : > { %v1307_v1 = vmul.f32 %v2411_v63, %v1299_v13 }
 0xa3b   : > { %v1314_v5 = vmul.f32 %v2024_v0, %v1307_v1 }
 0xa3d   : > { %v1321_v6 = vadd.f32 %v2025_v4, %v1314_v5 }
 0xa3f   : > { %v1322_v39 = vpack.c.bf16 %v1321_v6, %v1321_v6  ;;  %v2369_v6 = vld [vmem:[%s2946_s5 + $0x10] sm:$0xff]  }
 0xa41   : > { %2244 = vmatmul.mubr.msk.bf16.vlgmr.msra.gmra.mxu1 %vm565_vm0, %v1322_v39 }
 0xa42   : > { %2248 = vmatpush3.bf16.msra.mxu1 %v2366_v54  ;;  %2251 = vmatprep.mubr.msk.bf16.mxu1 %vm2453_vm1, %v2452_v17 }
 0xa43   : > { %2249 = vmatprep.subr.bf16.mxu1 %v2452_v17 }
 0xa46   : > { %2250 = vmatpush3.bf16.msra.mxu1 %v2367_v22 }
 0xa47   : > { %2263 = vmatprep.subr.bf16.mxu1 %v2452_v17 }
 0xa88   : > { %v1399_v7 = vpop.xlane.xlu0 %1398 }
 0xa89   : > { %v1400_v44 = vmul.f32 0.03125, %v1399_v7 }
 0xa8b   : > { %v1401_v8 = vadd.f32 1e-05, %v1400_v44 }
 0xa8d   : > { %2412 = vrsqrt.f32 %v1401_v8 }
 0xa9a   : > { %v2413_v9 = vpop.eup %2412 }
 0xa9b   : > { %v1403_v10 = vmul.f32 %v2413_v9, %v1395_v57 }
 0xa9d   : > { %v1404_v11 = vmul.f32 %v2024_v0, %v1403_v10 }
 0xa9f   : > { %v1405_v12 = vadd.f32 %v2025_v4, %v1404_v11  ;;  %v2368_v4 = vld [vmem:[%s2946_s5 + $0x18] sm:$0xff]  }
 0xaa0   : > { %2256 = vmatpush3.bf16.msra.mxu0 %v2368_v4 }
 0xaa1   : > { %v1406_v15 = vpack.c.bf16 %v1405_v12, %v1405_v12  ;;  %2257 = vmatprep.subr.bf16.mxu0 %v2452_v17 }
 0xaa3   : > { %2252 = vmatmul.mubr.msk.bf16.vlgmr.msra.gmra.mxu1 %vm565_vm0, %v1406_v15 }
 0xaa4   : > { %2267 = vmatprep.mubr.msk.bf16.mxu1 %vm2453_vm1, %v2452_v17  ;;  %2258 = vmatpush3.bf16.msra.mxu0 %v2369_v6 }
 0xaa5   : > { %2271 = vmatprep.subr.bf16.mxu0 %v2452_v17 }
 0xb01   : > { %v1385_v18 = vpop.f32.mrf.mxu1 }
 0xb02   : > { %v2803_v19 = vadd.f32 %v2031_v16, %v1385_v18 }
 0xb03   : > { %v2245_v20 = vpop.f32.mrf.mxu1 }
 0xb04   : > { %1451 = vrot.lane.b32.xlu1 %v2803_v19, %s2454_s29 }
 0xb05   : > { %v1388_v21 = vpop.f32.mrf.mxu1 }
 0xb07   : > { %v2246_v23 = vpop.f32.mrf.mxu1 }
 0xb63   : > { %v1444_v24 = vpop.f32.mrf.mxu1 }
 0xb64   : > { %v2807_v25 = vadd.f32 %v2031_v16, %v1444_v24 }
 0xb65   : > { %v2253_v2 = vpop.f32.mrf.mxu1 }
 0xb66   : > { %1460 = vrot.lane.b32.xlu0 %v2807_v25, %s2454_s29  ;;  %s1992_s29 = sshll.u32 %s2966_s17, 3 }
 0xb67   : > { %v1447_v26 = vpop.f32.mrf.mxu1  ;;  %s558_s20 = scalar_lea.vmem %s2957_s16, %s1992_s29 }
 0xb69   : > { %v2254_v27 = vpop.f32.mrf.mxu1 }
 0xb76   : > { %v1452_v28 = vpop.permute.xlu1 %1451 }
 0xb77   : > { %v1454_v29 = vmul.f32 %v1452_v28, %v2807_v25 }
 0xb79   : > { %1493 = vrot.lane.b32.xlu1 %v1454_v29, %s2455_s21  ;;  %v1455_v34 = vsel %vm725_vm2, %v1454_v29, 0.0 }
 0xbd8   : > { %v1461_v30 = vpop.permute.xlu0 %1460 }
 0xbd9   : > { %v1463_v3 = vmul.f32 %v1461_v30, %v2807_v25 }
 0xbdb   : > { %1501 = vrot.lane.b32.xlu1 %v1463_v3, %s2455_s21  ;;  %v1464_v31 = vsel %vm725_vm2, %v1463_v3, 0.0 }
 0xbdc   : > { %1465 = vadd.xlane.f32.xlu0 %v1464_v31 }
 0xbeb   : > { %v1494_v32 = vpop.permute.xlu1 %1493 }
 0xbec   : > { %v1496_v33 = vsel %vm725_vm2, %v1494_v32, 0.0 }
 0xbed   : > { %1497 = vadd.xlane.f32.xlu0 %v1496_v33 }
 0xbff   : > { %1456 = vadd.xlane.f32.xlu1 %v1455_v34  ;;  %v2370_v34 = vld [vmem:[%s2950_s9 + $0x18] sm:$0xff]  }
 0xc00   : > { %2264 = vmatpush3.bf16.msra.mxu1 %v2370_v34 }
 0xc01   : > { %2265 = vmatprep.subr.bf16.mxu1 %v2452_v17 }
 0xc4d   : > { %v1502_v35 = vpop.permute.xlu1 %1501 }
 0xc4e   : > { %v1504_v36 = vsel %vm725_vm2, %v1502_v35, 0.0 }
 0xc4f   : > { %1505 = vadd.xlane.f32.xlu0 %v1504_v36 }
 0xc65   : > { %v1466_v37 = vpop.xlane.xlu0 %1465 }
 0xc66   : > { %v1467_v40 = vmul.f32 0.25, %v1466_v37 }
 0xc76   : > { %v1498_v45 = vpop.xlane.xlu0 %1497 }
 0xc77   : > { %v1499_v48 = vmul.f32 0.25, %v1498_v45 }
 0xc88   : > { %v1457_v38 = vpop.xlane.xlu1 %1456 }
 0xc89   : > { %v1458_v41 = vmul.f32 0.25, %v1457_v38 }
 0xc8b   : > { %v1468_v42 = vsel %vm843_vm3, %v1458_v41, %v1467_v40  ;;  %v2047_v40 = vld [vmem:[%s2948_s7 + $0x1] ss:$0 sm:$0xff] }
 0xc8c   : > { %v1469_v43 = vsel %vm845_vm4, %v1468_v42, -inf }
 0xc8d   : > { %1470 = vmax.xlane.f32.xlu1 %v1469_v43 }
 0xcd8   : > { %v1506_v47 = vpop.xlane.xlu0 %1505 }
 0xcd9   : > { %v1507_v49 = vmul.f32 0.25, %v1506_v47 }
 0xcdb   : > { %v1508_v50 = vsel %vm843_vm3, %v1499_v48, %v1507_v49  ;;  %v2372_v48 = vld [vmem:[%s2952_s11 + $0x78] sm:$0xff]   ;;  %v2373_v49 = vld [vmem:[%s2952_s11 + $0x70] sm:$0xff]  }
 0xcdc   : > { %v1509_v51 = vsel %vm845_vm4, %v1508_v50, -inf }
 0xcdd   : > { %1510 = vmax.xlane.f32.xlu0 %v1509_v51  ;;  %v2375_v51 = vld [vmem:[%s2952_s11 + $0x60] sm:$0xff]  }
 0xd16   : > { %v1471_v13 = vpop.xlane.xlu1 %1470 }
 0xd17   : > { %v1472_v52 = vsub.f32 %v1468_v42, %v1471_v13  ;;  %v2048_v42 = vld [vmem:[%s2949_s8 + $0x1] ss:$0 sm:$0xff]  ;;  %v2376_v13 = vld [vmem:[%s2952_s11 + $0x58] sm:$0xff]  }
 0xd19   : > { %v1473_v53 = vmul.f32 1.442695, %v1472_v52  ;;  %v2377_v52 = vld [vmem:[%s2952_s11 + $0x50] sm:$0xff]  }
 0xd1b   : > { %2414 = vpow2.f32 %v1473_v53  ;;  %v2378_v53 = vld [vmem:[%s2952_s11 + $0x48] sm:$0xff]  }
 0xd28   : > { %v2415_v54 = vpop.eup %2414 }
 0xd29   : > { %v1475_v22 = vsel %vm845_vm4, %v2415_v54, 0.0 }
 0xd2a   : > { %1476 = vadd.xlane.f32.xlu1 %v1475_v22  ;;  %v2054_v22 = vld [vmem:[%s2951_s10 + $0x1] ss:$0 sm:$0xff] }
 0xd66   : > { %v1511_v55 = vpop.xlane.xlu0 %1510 }
 0xd67   : > { %v1512_v56 = vsub.f32 %v1508_v50, %v1511_v55  ;;  %v2374_v50 = vld [vmem:[%s2952_s11 + $0x68] sm:$0xff]  }
 0xd69   : > { %v1513_v57 = vmul.f32 1.442695, %v1512_v56 }
 0xd6b   : > { %2416 = vpow2.f32 %v1513_v57 }
 0xd78   : > { %v2417_v58 = vpop.eup %2416 }
 0xd79   : > { %v1515_v59 = vsel %vm845_vm4, %v2417_v58, 0.0 }
 0xd7a   : > { %1516 = vadd.xlane.f32.xlu0 %v1515_v59 }
 0xdb3   : > { %v1477_v60 = vpop.xlane.xlu1 %1476 }
 0xdb4   : > { %2418 = vrcp.f32 %v1477_v60 }
 0xdc1   : > { %v2419_v61 = vpop.eup %2418 }
 0xdc2   : > { %v1479_v62 = vmul.f32 %v2419_v61, %v2415_v54  ;;  %v2379_v54 = vld [vmem:[%s2952_s11 + $0x40] sm:$0xff]  }
 0xdc4   : > { %1487 = vperm.xlu0 %2345, %v1479_v62   ;;  %1482 = vperm.xlu1 %2344, %v1479_v62  }
 0xe03   : > { %v1517_v63 = vpop.xlane.xlu0 %1516 }
 0xe04   : > { %2420 = vrcp.f32 %v1517_v63 }
 0xe11   : > { %v2421_v0 = vpop.eup %2420 }
 0xe12   : > { %v1519_v1 = vmul.f32 %v2421_v0, %v2417_v58 }
 0xe14   : > { %1522 = vperm.xlu1 %2344, %v1519_v1  }
 0xe18   : > { %2346 = vset.pattern.permute.xlu1 %v2456_v14 }
 0xe19   : > { %1527 = vperm.xlu1 %2346, %v1519_v1  }
 0xe3f   : > { %v1483_v5 = vpop.permute.xlu1 %1482  ;;  %v1488_v7 = vpop.permute.xlu0 %1487 }
 0xe40   : > { %v1490_v14 = vmul.f32 %v1488_v7, %v2807_v25  ;;  %v1485_v44 = vmul.f32 %v1483_v5, %v2803_v19  ;;  %v2075_v7 = vld [vmem:[%s2953_s12 + $0x1] ss:$0 sm:$0xff] }
 0xe42   : > { %v1491_v11 = vadd.f32 %v1490_v14, %v1485_v44 }
 0xe8f   : > { %v1523_v39 = vpop.permute.xlu1 %1522 }
 0xe90   : > { %v1525_v9 = vmul.f32 %v1523_v39, %v2803_v19  ;;  %v2041_v19 = vld [vmem:[%s2947_s6 + $0x1] ss:$0 sm:$0xff] }
 0xe94   : > { %v1528_v8 = vpop.permute.xlu1 %1527 }
 0xe95   : > { %v1530_v10 = vmul.f32 %v1528_v8, %v2807_v25 }
 0xe97   : > { %v1531_v12 = vadd.f32 %v1530_v10, %v1525_v9 }
 0xe99   : > { %v2347_v15 = vpack.i.bf16 %v1531_v12, %v1491_v11 }
 0xe9b   : > { %2348 = vrot.lane.b32.xlu1 %v2347_v15, %s2458_s18 }
 0xf0d   : > { %v2349_v16 = vpop.permute.xlu1 %2348 }
 0xf0e   : > { %v2351_v18 = vunpack.i.h.bf16 %v2349_v16  ;;  %v2350_v20 = vunpack.i.l.bf16 %v2349_v16 }
 0xf10   : > { %v1540_v21 = vsel %vm725_vm2, %v2350_v20, %v2351_v18 }
 0xf11   : > { %v1541_v23 = vpack.c.bf16 %v1540_v21, %v1540_v21 }
 0xf13   : > { %2260 = vmatmul.mubr.msk.bf16.vlgmr.msra.gmra.mxu0 %vm565_vm0, %v1541_v23  ;;  %v2380_v23 = vld [vmem:[%s2956_s15 + $0x8] sm:$0xff]  }
 0xf14   : > { %2287 = vmatprep.mubr.msk.bf16.mxu0 %vm2453_vm1, %v2452_v17  ;;  %2272 = vmatpush3.bf16.msra.mxu0 %v2372_v48 }
 0xf15   : > { %2273 = vmatprep.subr.bf16.mxu0 %v2452_v17 }
 0xf18   : > { %2274 = vmatpush3.bf16.msra.mxu0 %v2373_v49 }
 0xf19   : > { %2275 = vmatprep.subr.bf16.mxu0 %v2452_v17 }
 0xf1c   : > { %2276 = vmatpush3.bf16.msra.mxu0 %v2374_v50 }
 0xf1d   : > { %2277 = vmatprep.subr.bf16.mxu0 %v2452_v17 }
 0xf20   : > { %2278 = vmatpush3.bf16.msra.mxu0 %v2375_v51 }
 0xf21   : > { %2279 = vmatprep.subr.bf16.mxu0 %v2452_v17 }
 0xf24   : > { %2280 = vmatpush3.bf16.msra.mxu0 %v2376_v13 }
 0xf25   : > { %2281 = vmatprep.subr.bf16.mxu0 %v2452_v17 }
 0xf28   : > { %2282 = vmatpush3.bf16.msra.mxu0 %v2377_v52 }
 0xf29   : > { %2283 = vmatprep.subr.bf16.mxu0 %v2452_v17 }
 0xf2c   : > { %2284 = vmatpush3.bf16.msra.mxu0 %v2378_v53 }
 0xf2d   : > { %2285 = vmatprep.subr.bf16.mxu0 %v2452_v17 }
 0xf30   : > { %2286 = vmatpush3.bf16.msra.mxu0 %v2379_v54 }
 0xfd3   : > { %v1604_v24 = vpop.f32.mrf.mxu0 }
 0xfd4   : > { %v1605_v25 = vadd.f32 %v2041_v19, %v1604_v24  ;;  %v2381_v19 = vld [vmem:[%s2956_s15] sm:$0xff]  }
 0xfd5   : > { %v2261_v2 = vpop.f32.mrf.mxu0 }
 0xfd6   : > { %v2847_v26 = vadd.f32 %v1605_v25, %v2771_v46  ;;  %v2371_v46 = vld [vmem:[%s2950_s9 + $0x10] sm:$0xff]  }
 0xfd7   : > { %v1607_v27 = vpop.f32.mrf.mxu0  ;;  %2266 = vmatpush3.bf16.msra.mxu1 %v2371_v46 }
 0xfd8   : > { %v1615_v28 = vsel %vm565_vm0, %v2847_v26, 0.0  ;;  %2291 = vmatprep.subr.bf16.mxu1 %v2452_v17  ;;  %v2084_v27 = vld [vmem:[%s2954_s13] ss:$0 sm:$0xff] }
 0xfd9   : > { %1616 = vadd.xlane.f32.xlu1 %v1615_v28  ;;  %v2262_v29 = vpop.f32.mrf.mxu0 }
 0xfda   : > { %v2085_v29 = vld [vmem:[%s2955_s14] ss:$0 sm:$0xff] }
0x1062   : > { %v1617_v30 = vpop.xlane.xlu1 %1616 }
0x1063   : > { %v1618_v3 = vmul.f32 0.03125, %v1617_v30 }
0x1065   : > { %v1619_v31 = vsub.f32 %v2847_v26, %v1618_v3 }
0x1067   : > { %v1620_v32 = vmul.f32 %v1619_v31, %v1619_v31 }
0x1069   : > { %v1621_v33 = vsel %vm565_vm0, %v1620_v32, 0.0 }
0x106a   : > { %1622 = vadd.xlane.f32.xlu0 %v1621_v33 }
0x10f3   : > { %v1623_v35 = vpop.xlane.xlu0 %1622 }
0x10f4   : > { %v1624_v36 = vmul.f32 0.03125, %v1623_v35 }
0x10f6   : > { %v1625_v37 = vadd.f32 1e-05, %v1624_v36 }
0x10f8   : > { %2422 = vrsqrt.f32 %v1625_v37 }
0x1105   : > { %v2423_v38 = vpop.eup %2422 }
0x1106   : > { %v1627_v41 = vmul.f32 %v2423_v38, %v1619_v31 }
0x1108   : > { %v1634_v43 = vmul.f32 %v2047_v40, %v1627_v41 }
0x110a   : > { %v1641_v45 = vadd.f32 %v2048_v42, %v1634_v43 }
0x110c   : > { %v1642_v47 = vpack.c.bf16 %v1641_v45, %v1641_v45 }
0x110e   : > { %2268 = vmatmul.mubr.msk.bf16.vlgmr.msra.gmra.mxu1 %vm565_vm0, %v1642_v47 }
0x110f   : > { %2295 = vmatprep.mubr.msk.bf16.mxu1 %vm2453_vm1, %v2452_v17  ;;  %2292 = vmatpush3.bf16.msra.mxu1 %v2380_v23 }
0x1110   : > { %2293 = vmatprep.subr.bf16.mxu1 %v2452_v17 }
0x1113   : > { %2294 = vmatpush3.bf16.msra.mxu1 %v2381_v19 }
0x11ce   : > { %v1705_v55 = vpop.f32.mrf.mxu1 }
0x11cf   : > { %v1706_v56 = vadd.f32 %v2054_v22, %v1705_v55 }
0x11d0   : > { %v2269_v57 = vpop.f32.mrf.mxu1 }
0x11d1   : > { %v1712_v58 = vmul.f32 0.044715, %v1706_v56  ;;  %v1711_v4 = vmul.f32 0.5, %v1706_v56 }
0x11d2   : > { %v1708_v59 = vpop.f32.mrf.mxu1 }
0x11d3   : > { %v1713_v60 = vmul.f32 %v1712_v58, %v1706_v56 }
0x11d4   : > { %v2270_v61 = vpop.f32.mrf.mxu1 }
0x11d5   : > { %v1714_v62 = vmul.f32 %v1713_v60, %v1706_v56 }
0x11d7   : > { %v1715_v63 = vadd.f32 %v1714_v62, %v1706_v56 }
0x11d9   : > { %v1716_v0 = vmul.f32 0.7978846, %v1715_v63 }
0x11db   : > { %2424 = vtanh.f32 %v1716_v0 }
0x11e8   : > { %v2425_v1 = vpop.eup %2424 }
0x11e9   : > { %v1718_v5 = vadd.f32 1.0, %v2425_v1 }
0x11eb   : > { %v1719_v6 = vmul.f32 %v1718_v5, %v1711_v4 }
0x11ed   : > { %v1720_v39 = vpack.c.bf16 %v1719_v6, %v1719_v6 }
0x11ef   : > { %2288 = vmatmul.mubr.bf16.vlgmr.msra.gmra.mxu0 %v1720_v39 }
0x12af   : > { %v1828_v14 = vpop.f32.mrf.mxu0 }
0x12b0   : > { %v1829_v44 = vadd.f32 %v2075_v7, %v1828_v14 }
0x12b1   : > { %v2289_v8 = vpop.f32.mrf.mxu0 }
0x12b2   : > { %v1834_v9 = vadd.f32 %v1829_v44, %v2847_v26 }
0x12b3   : > { %v1831_v10 = vpop.f32.mrf.mxu0 }
0x12b4   : > { %v1837_v11 = vsel %vm565_vm0, %v1834_v9, 0.0 }
0x12b5   : > { %1838 = vadd.xlane.f32.xlu1 %v1837_v11  ;;  %v2290_v12 = vpop.f32.mrf.mxu0 }
0x133e   : > { %v1839_v15 = vpop.xlane.xlu1 %1838 }
0x133f   : > { %v1840_v16 = vmul.f32 0.03125, %v1839_v15 }
0x1341   : > { %v1841_v18 = vsub.f32 %v1834_v9, %v1840_v16 }
0x1343   : > { %v1842_v20 = vmul.f32 %v1841_v18, %v1841_v18 }
0x1345   : > { %v1843_v21 = vsel %vm565_vm0, %v1842_v20, 0.0 }
0x1346   : > { %1844 = vadd.xlane.f32.xlu1 %v1843_v21 }
0x13cf   : > { %v1845_v24 = vpop.xlane.xlu1 %1844 }
0x13d0   : > { %v1846_v25 = vmul.f32 0.03125, %v1845_v24 }
0x13d2   : > { %v1847_v2 = vadd.f32 1e-05, %v1846_v25 }
0x13d4   : > { %2426 = vrsqrt.f32 %v1847_v2 }
0x13e1   : > { %v2427_v26 = vpop.eup %2426 }
0x13e2   : > { %v1849_v28 = vmul.f32 %v2427_v26, %v1841_v18 }
0x13e4   : > { %v1856_v30 = vmul.f32 %v2084_v27, %v1849_v28 }
0x13e6   : > { %v1863_v3 = vadd.f32 %v2085_v29, %v1856_v30 }
0x13e8   : > { %v1864_v31 = vpack.c.bf16 %v1863_v3, %v1863_v3 }
0x13ea   : > { %2296 = vmatmul.mubr.msk.bf16.vlgmr.msra.gmra.mxu1 %vm565_vm0, %v1864_v31 }
0x14aa   : > { %v1918_v17 = vpop.f32.mrf.mxu1 }
0x14ab   : > { %1924 = vst [vmem:[%s558_s20] sm:$0xff] %v1918_v17 }
0x14ac   : > { %v2297_v32 = vpop.f32.mrf.mxu1 }
0x14ae   : > { %v1921_v33 = vpop.f32.mrf.mxu1 }
0x14b0   : > { %v2298_v34 = vpop.f32.mrf.mxu1 }
0x14b1 PF: > { %p23_p9 = scmp.ge.s32.totalorder %s2561_s25, 5   ;;  %s2962_s21 = smov %s2446_s22 }
0x14b2   : > { %s2963_s22 = smov %s2570_s28  ;;  %s2964_s23 = smov %s2561_s25 }
0x14b3   :  { %25 = sbr.rel (!%p23_p9) target bundleno = 4 (0x4), region = 170 }

// kernel: forward.7
= control target key start
LH: loop header
LB: loop body
LE: loop exit
PB: predicated region body
PF: predicated region fallthrough
CT: control target
= control target key end

     0   :  { %s3643_s0 = inlined_call_operand.vmem [shape: f32[3,24,32], index: 0, kind: input, shape index: {}]   ;;  %s3644_s1 = inlined_call_operand.vmem [shape: f32[2,1,32], index: 1, kind: input, shape index: {}]   ;;  %s3645_s2 = inlined_call_operand.vmem [shape: f32[2,1,32], index: 2, kind: input, shape index: {}]   ;;  %s3646_s3 = inlined_call_operand.vmem [shape: bf16[2,32,96], index: 3, kind: input, shape index: {}]   ;;  %s3647_s4 = inlined_call_operand.vmem [shape: f32[2,1,96], index: 4, kind: input, shape index: {}]   ;;  %s3648_s5 = inlined_call_operand.vmem [shape: bf16[2,32,32], index: 5, kind: input, shape index: {}]   ;;  %s3649_s6 = inlined_call_operand.vmem [shape: f32[2,1,32], index: 6, kind: input, shape index: {}]   ;;  %s3650_s7 = inlined_call_operand.vmem [shape: f32[2,1,32], index: 7, kind: input, shape index: {}]   ;;  %s3651_s8 = inlined_call_operand.vmem [shape: f32[2,1,32], index: 8, kind: input, shape index: {}]   ;;  %s3652_s9 = inlined_call_operand.vmem [shape: bf16[2,32,128], index: 9, kind: input, shape index: {}]   ;;  %s3653_s10 = inlined_call_operand.vmem [shape: f32[2,1,128], index: 10, kind: input, shape index: {}]   ;;  %s3654_s11 = inlined_call_operand.vmem [shape: bf16[2,128,32], index: 11, kind: input, shape index: {}]   ;;  %s3655_s12 = inlined_call_operand.vmem [shape: f32[2,1,32], index: 12, kind: input, shape index: {}]   ;;  %s3656_s13 = inlined_call_operand.vmem [shape: f32[1,32], index: 13, kind: input, shape index: {}]   ;;  %s3657_s14 = inlined_call_operand.vmem [shape: f32[1,32], index: 14, kind: input, shape index: {}]   ;;  %s3658_s15 = inlined_call_operand.vmem [shape: bf16[32,128], index: 15, kind: input, shape index: {}]   ;;  %s3659_s16 = inlined_call_operand.vmem [shape: f32[24,128], index: 16, kind: output, shape index: {}]  }
   0x1   :  { %3660 = sst [smem:[#allocation3_spill]] %s3643_s0 }
   0x2   :  { %s3079_s21 = smov 0   ;;  %s3081_s22 = smov 0  }
   0x3   :  { %s3083_s23 = smov 0  }
   0x4 LB: > { %s2409_s24 = sadd.s32 4294967295, %s2984_s23   ;;  %s3096_s25 = sadd.s32 1, %s2984_s23   ;;  %s2984_s23 = sphi %s3083_s23, %s3664_s23   ;;  %s2980_s22 = sphi %s3081_s22, %s3663_s22   ;;  %s2976_s21 = sphi %s3079_s21, %s3662_s21  }
   0x5   : > { %s30_s26 = ssub.s32 %s2984_s23, %s3096_s25  ;;  %s33_s27 = sadd.s32 1, %s2980_s22 }
   0x6   : > { %p31_p0 = scmp.eq.s32.totalorder %s30_s26, 0  ;;  %p40_p1 = scmp.ne.s32.totalorder %s2980_s22, %s2976_s21 }
   0x7   : > { %p41_p2 = scmp.eq.s32.totalorder %s2984_s23, 0  ;;  %p2412_p4 = scmp.ge.s32.totalorder %s2984_s23, 3 }
   0x8   : > { %s3105_s28 = scalar_select %p31_p0, %s2980_s22, %s33_s27  }
   0x9   : > { %p42_p3 = por %p41_p2, %p40_p1  ;;  %452 = sbr.rel (%p2412_p4) target bundleno = 26 (0x1a), region = 76 }
   0xe   : > { %455 = sbr.rel (!%p42_p3) target bundleno = 26 (0x1a), region = 80  ;;  %s457_s29 = sand.u32 (%p42_p3), 1, %s2980_s22  }
   0xf   : > { %s2413_s30 = sshll.u32 (%p42_p3), %s2984_s23, 3  ;;  %s2800_s0 = smul.u32 (%p42_p3), 24, %s457_s29 }
  0x10   : > { %s3661_s19 = sld [smem:[#allocation3_spill]] (%p42_p3) }
  0x11   : > { %s459_s26 = scalar_lea.vmem (%p42_p3), [#allocation2], %s2800_s0 }
  0x16   : > { %s461_s20 = scalar_lea.vmem %s3661_s19, %s2413_s30 }
  0x17   : > { %v494_v0 = vld [vmem:[%s461_s20] sm:$0xff]  ;;  %v496_v1 = vld [vmem:[%s461_s20 + $0x18] sm:$0xff]  ;;  %v498_v2 = vld [vmem:[%s461_s20 + $0x30] sm:$0xff] }
  0x18   : > { %495 = vst [vmem:[%s459_s26] sm:$0xff] %v494_v0  ;;  %497 = vst [vmem:[%s459_s26 + $0x8] sm:$0xff] %v496_v1 }
  0x19   : > { %499 = vst [vmem:[%s459_s26 + $0x10] sm:$0xff] %v498_v2 }
  0x1a PF: > { %p2414_p5 = scmp.ge.s32.totalorder %s2984_s23, 1  ;;  %p504_p6 = scmp.lt.s32.totalorder %s2984_s23, 4 }
  0x1c   : > { %p505_p7 = pnand %p2414_p5, %p504_p6 }
  0x1d   : > { %s511_s27 = sand.u32 (!%p505_p7), 1, %s2976_s21   ;;  %s2988_s21 = smov (!%p505_p7), 96  }
  0x1e   : > { %508 = sbr.rel (%p505_p7) target bundleno = 5350 (0x14e6), region = 118  ;;  %s2989_s0 = smov (!%p505_p7), 112  }
  0x1f   : > { %s2801_s29 = smul.u32 (!%p505_p7), 24, %s511_s27  ;;  %s2990_s26 = smov (!%p505_p7), 64  }
  0x20   : > { %p559_p8 = scmp.lt.s32.totalorder (!%p505_p7), %s2409_s24, 2 }
  0x21   : > { %s513_s30 = scalar_lea.vmem (!%p505_p7), [#allocation2], %s2801_s29 }
  0x23   : > { %vm571_vm0 = vcmask 261120   ;;  %v3116_v3 = vld [vmem:[%s513_s30] sm:$0xff]  ;;  %v3118_v4 = vld [vmem:[%s513_s30 + $0x10] sm:$0xff]  ;;  %v3120_v5 = vld [vmem:[%s513_s30 + $0x8] sm:$0xff]  ;;  %v2986_v25 = vmov 0.0   ;;  %vm2987_vm1 = vmmov 0  }
  0x24   : > { %v572_v6 = vsel %vm571_vm0, %v3116_v3, 0.0  ;;  %v726_v7 = vsel %vm571_vm0, %v3118_v4, 0.0  ;;  %v667_v8 = vsel %vm571_vm0, %v3120_v5, 0.0  ;;  %v2870_v24 = vld [vmem:[%s3646_s3 + $0x8] sm:$0xff]   ;;  %2600 = vmatprep.subr.bf16.mxu1 %v2986_v25  ;;  %2616 = vmatprep.subr.bf16.mxu0 %v2986_v25  ;;  %v2871_v26 = vld [vmem:[%s3646_s3] sm:$0xff]   ;;  %vm790_vm2 = vcmask 130048  }
  0x25   : > { %573 = vadd.xlane.f32.xlu0 %v572_v6  ;;  %727 = vadd.xlane.f32.xlu1 %v726_v7  ;;  %v2418_v37 = vld [vmem:[%s3644_s1] ss:$0 sm:$0xff]  ;;  %vm908_vm3 = vcmask 7168   ;;  %vm910_vm4 = vcmask 15360   ;;  %vm1049_vm5 = vcmask 23552   ;;  %s3666_s24 = smov (!%p559_p8, %s2409_s24), 2 }
  0x26   : > { %2601 = vmatpush3.bf16.msra.mxu1 %v2870_v24  ;;  %2617 = vmatpush3.bf16.msra.mxu0 %v2870_v24  ;;  %v2419_v39 = vld [vmem:[%s3645_s2] ss:$0 sm:$0xff]  ;;  %s2415_s19 = sshll.u32 %s3666_s24, 3 }
  0x27   : > { %2602 = vmatprep.subr.bf16.mxu1 %v2986_v25  ;;  %2618 = vmatprep.subr.bf16.mxu0 %v2986_v25  ;;  %v2420_v53 = vld [vmem:[%s3647_s4] ss:$0 sm:$0xff]  ;;  %s562_s29 = scalar_lea.vmem %s3659_s16, %s2415_s19 }
  0x28   : > { %2604 = vmatprep.mubr.msk.bf16.mxu1 %vm2987_vm1, %v2986_v25  ;;  %2620 = vmatprep.mubr.msk.bf16.mxu0 %vm2987_vm1, %v2986_v25 }
  0x29   : > { %668 = vadd.xlane.f32.xlu0 %v667_v8 }
  0x2a   : > { %2603 = vmatpush3.bf16.msra.mxu1 %v2871_v26  ;;  %2619 = vmatpush3.bf16.msra.mxu0 %v2871_v26 }
  0x2b   : > { %2608 = vmatprep.subr.bf16.mxu1 %v2986_v25  ;;  %2632 = vmatprep.subr.bf16.mxu0 %v2986_v25 }
  0xae   : > { %v574_v9 = vpop.xlane.xlu0 %573  ;;  %v728_v10 = vpop.xlane.xlu1 %727 }
  0xaf   : > { %v576_v11 = vmul.f32 0.03125, %v574_v9  ;;  %v729_v12 = vmul.f32 0.03125, %v728_v10 }
  0xb1   : > { %v577_v13 = vsub.f32 %v3116_v3, %v576_v11  ;;  %v730_v14 = vsub.f32 %v3118_v4, %v729_v12 }
  0xb2   : > { %v669_v15 = vpop.xlane.xlu0 %668 }
  0xb3   : > { %v670_v16 = vmul.f32 0.03125, %v669_v15  ;;  %v578_v17 = vmul.f32 %v577_v13, %v577_v13  ;;  %v731_v18 = vmul.f32 %v730_v14, %v730_v14 }
  0xb5   : > { %v671_v19 = vsub.f32 %v3120_v5, %v670_v16  ;;  %v579_v20 = vsel %vm571_vm0, %v578_v17, 0.0  ;;  %v732_v21 = vsel %vm571_vm0, %v731_v18, 0.0 }
  0xb6   : > { %580 = vadd.xlane.f32.xlu1 %v579_v20 }
  0xb7   : > { %v672_v22 = vmul.f32 %v671_v19, %v671_v19 }
  0xb9   : > { %v673_v23 = vsel %vm571_vm0, %v672_v22, 0.0 }
  0xba   : > { %733 = vadd.xlane.f32.xlu1 %v732_v21  ;;  %674 = vadd.xlane.f32.xlu0 %v673_v23 }
 0x13f   : > { %v581_v27 = vpop.xlane.xlu1 %580 }
 0x140   : > { %v582_v28 = vmul.f32 0.03125, %v581_v27 }
 0x142   : > { %v583_v29 = vadd.f32 1e-05, %v582_v28 }
 0x143   : > { %v734_v30 = vpop.xlane.xlu1 %733  ;;  %v675_v31 = vpop.xlane.xlu0 %674 }
 0x144   : > { %2900 = vrsqrt.f32 %v583_v29  ;;  %v735_v32 = vmul.f32 0.03125, %v734_v30  ;;  %v676_v33 = vmul.f32 0.03125, %v675_v31 }
 0x146   : > { %v736_v34 = vadd.f32 1e-05, %v735_v32  ;;  %v677_v35 = vadd.f32 1e-05, %v676_v33 }
 0x148   : > { %2902 = vrsqrt.f32 %v736_v34 }
 0x149   : > { %2904 = vrsqrt.f32 %v677_v35 }
 0x151   : > { %v2901_v36 = vpop.eup %2900 }
 0x152   : > { %v585_v38 = vmul.f32 %v2901_v36, %v577_v13 }
 0x154   : > { %v592_v40 = vmul.f32 %v2418_v37, %v585_v38 }
 0x155   : > { %v2903_v41 = vpop.eup %2902 }
 0x156   : > { %v2905_v42 = vpop.eup %2904  ;;  %v599_v43 = vadd.f32 %v2419_v39, %v592_v40  ;;  %v738_v44 = vmul.f32 %v2903_v41, %v730_v14 }
 0x157   : > { %v679_v45 = vmul.f32 %v2905_v42, %v671_v19 }
 0x158   : > { %v600_v46 = vpack.c.bf16 %v599_v43, %v599_v43  ;;  %v739_v47 = vmul.f32 %v2418_v37, %v738_v44 }
 0x159   : > { %v680_v48 = vmul.f32 %v2418_v37, %v679_v45 }
 0x15a   : > { %2605 = vmatmul.mubr.msk.bf16.vlgmr.msra.gmra.mxu1 %vm571_vm0, %v600_v46  ;;  %v740_v49 = vadd.f32 %v2419_v39, %v739_v47 }
 0x15b   : > { %2609 = vmatpush3.bf16.msra.mxu1 %v2870_v24  ;;  %2612 = vmatprep.mubr.msk.bf16.mxu1 %vm2987_vm1, %v2986_v25  ;;  %v681_v51 = vadd.f32 %v2419_v39, %v680_v48 }
 0x15c   : > { %2610 = vmatprep.subr.bf16.mxu1 %v2986_v25  ;;  %v741_v50 = vpack.c.bf16 %v740_v49, %v740_v49 }
 0x15d   : > { %v682_v52 = vpack.c.bf16 %v681_v51, %v681_v51 }
 0x15e   : > { %2621 = vmatmul.mubr.msk.bf16.vlgmr.msra.gmra.mxu0 %vm571_vm0, %v741_v50 }
 0x15f   : > { %2611 = vmatpush3.bf16.msra.mxu1 %v2871_v26  ;;  %2636 = vmatprep.mubr.msk.bf16.mxu0 %vm2987_vm1, %v2986_v25 }
 0x160   : > { %2624 = vmatprep.subr.bf16.mxu1 %v2986_v25 }
 0x162   : > { %2613 = vmatmul.mubr.msk.bf16.vlgmr.msra.gmra.mxu1 %vm571_vm0, %v682_v52 }
 0x163   : > { %2628 = vmatprep.mubr.msk.bf16.mxu1 %vm2987_vm1, %v2986_v25 }
 0x21a   : > { %v661_v54 = vpop.f32.mrf.mxu1 }
 0x21b   : > { %v3170_v55 = vadd.f32 %v2420_v53, %v661_v54 }
 0x21c   : > { %v2606_v56 = vpop.f32.mrf.mxu1 }
 0x21d   : > { %786 = vrot.lane.b32.xlu0 %v3170_v55, %s2988_s21 }
 0x21e   : > { %v664_v57 = vpop.f32.mrf.mxu1  ;;  %v779_v58 = vpop.f32.mrf.mxu0 }
 0x21f   : > { %v3178_v6 = vadd.f32 %v2420_v53, %v779_v58 }
 0x220   : > { %v2607_v59 = vpop.f32.mrf.mxu1  ;;  %v2622_v60 = vpop.f32.mrf.mxu0 }
 0x222   : > { %v720_v61 = vpop.f32.mrf.mxu1  ;;  %v782_v62 = vpop.f32.mrf.mxu0 }
 0x223   : > { %v3174_v63 = vadd.f32 %v2420_v53, %v720_v61 }
 0x224   : > { %v2614_v0 = vpop.f32.mrf.mxu1  ;;  %v2623_v1 = vpop.f32.mrf.mxu0 }
 0x225   : > { %900 = vrot.lane.b32.xlu1 %v3174_v63, %s2988_s21 }
 0x226   : > { %v723_v2 = vpop.f32.mrf.mxu1 }
 0x228   : > { %v2615_v7 = vpop.f32.mrf.mxu1 }
 0x229   : > { %1039 = vrot.lane.b32.xlu1 %v3178_v6, %s2988_s21 }
 0x28f   : > { %v787_v8 = vpop.permute.xlu0 %786 }
 0x290   : > { %v789_v9 = vmul.f32 %v787_v8, %v3170_v55  ;;  %v894_v10 = vmul.f32 %v787_v8, %v3174_v63  ;;  %v1028_v11 = vmul.f32 %v787_v8, %v3178_v6 }
 0x292   : > { %935 = vrot.lane.b32.xlu0 %v894_v10, %s2989_s0  ;;  %803 = vrot.lane.b32.xlu1 %v789_v9, %s2989_s0  ;;  %v791_v17 = vsel %vm790_vm2, %v789_v9, 0.0  ;;  %v1029_v18 = vsel %vm790_vm2, %v1028_v11, 0.0  ;;  %v895_v24 = vsel %vm790_vm2, %v894_v10, 0.0 }
 0x296   : > { %1080 = vrot.lane.b32.xlu0 %v1028_v11, %s2989_s0 }
 0x297   : > { %v901_v12 = vpop.permute.xlu1 %900 }
 0x298   : > { %v903_v13 = vmul.f32 %v901_v12, %v3174_v63  ;;  %v1033_v15 = vmul.f32 %v901_v12, %v3178_v6 }
 0x29a   : > { %943 = vrot.lane.b32.xlu1 %v903_v13, %s2989_s0  ;;  %v904_v27 = vsel %vm790_vm2, %v903_v13, 0.0  ;;  %v1034_v30 = vsel %vm790_vm2, %v1033_v15, 0.0 }
 0x29b   : > { %v1040_v14 = vpop.permute.xlu1 %1039 }
 0x29c   : > { %v1042_v16 = vmul.f32 %v1040_v14, %v3178_v6 }
 0x29e   : > { %1096 = vrot.lane.b32.xlu0 %v1042_v16, %s2989_s0  ;;  %1088 = vrot.lane.b32.xlu1 %v1033_v15, %s2989_s0  ;;  %v1043_v28 = vsel %vm790_vm2, %v1042_v16, 0.0 }
 0x2c2   : > { %792 = vadd.xlane.f32.xlu1 %v791_v17 }
 0x2c6   : > { %1030 = vadd.xlane.f32.xlu1 %v1029_v18  ;;  %v2872_v18 = vld [vmem:[%s3648_s5 + $0x8] sm:$0xff]  }
 0x2c7   : > { %2625 = vmatpush3.bf16.msra.mxu1 %v2872_v18  ;;  %2633 = vmatpush3.bf16.msra.mxu0 %v2872_v18 }
 0x2c8   : > { %2626 = vmatprep.subr.bf16.mxu1 %v2986_v25  ;;  %2634 = vmatprep.subr.bf16.mxu0 %v2986_v25 }
 0x304   : > { %v936_v19 = vpop.permute.xlu0 %935  ;;  %v804_v20 = vpop.permute.xlu1 %803 }
 0x305   : > { %v806_v21 = vsel %vm790_vm2, %v804_v20, 0.0  ;;  %v938_v22 = vsel %vm790_vm2, %v936_v19, 0.0 }
 0x306   : > { %807 = vadd.xlane.f32.xlu0 %v806_v21  ;;  %939 = vadd.xlane.f32.xlu1 %v938_v22  ;;  %v2873_v21 = vld [vmem:[%s3648_s5] sm:$0xff]  }
 0x307   : > { %2627 = vmatpush3.bf16.msra.mxu1 %v2873_v21  ;;  %2635 = vmatpush3.bf16.msra.mxu0 %v2873_v21 }
 0x308   : > { %v1081_v23 = vpop.permute.xlu0 %1080  ;;  %2640 = vmatprep.subr.bf16.mxu1 %v2986_v25  ;;  %2648 = vmatprep.subr.bf16.mxu0 %v2986_v25 }
 0x309   : > { %v1083_v26 = vsel %vm790_vm2, %v1081_v23, 0.0 }
 0x30a   : > { %896 = vadd.xlane.f32.xlu0 %v895_v24  ;;  %1084 = vadd.xlane.f32.xlu1 %v1083_v26 }
 0x30c   : > { %v944_v29 = vpop.permute.xlu1 %943 }
 0x30d   : > { %v946_v31 = vsel %vm790_vm2, %v944_v29, 0.0 }
 0x30e   : > { %905 = vadd.xlane.f32.xlu0 %v904_v27  ;;  %1044 = vadd.xlane.f32.xlu1 %v1043_v28 }
 0x310   : > { %v1089_v32 = vpop.permute.xlu1 %1088  ;;  %v1097_v34 = vpop.permute.xlu0 %1096 }
 0x311   : > { %v1091_v33 = vsel %vm790_vm2, %v1089_v32, 0.0  ;;  %v1099_v35 = vsel %vm790_vm2, %v1097_v34, 0.0 }
 0x312   : > { %1035 = vadd.xlane.f32.xlu0 %v1034_v30 }
 0x316   : > { %947 = vadd.xlane.f32.xlu0 %v946_v31 }
 0x31a   : > { %1092 = vadd.xlane.f32.xlu0 %v1091_v33 }
 0x31e   : > { %1100 = vadd.xlane.f32.xlu0 %v1099_v35 }
 0x34b   : > { %v793_v36 = vpop.xlane.xlu1 %792 }
 0x34c   : > { %v794_v37 = vmul.f32 0.25, %v793_v36 }
 0x34e   : > { %v795_v38 = vsub.f32 %v794_v37, %v794_v37 }
 0x34f   : > { %v1031_v39 = vpop.xlane.xlu1 %1030 }
 0x350   : > { %v796_v40 = vmul.f32 1.442695, %v795_v38  ;;  %v1032_v56 = vmul.f32 0.25, %v1031_v39 }
 0x352   : > { %2906 = vpow2.f32 %v796_v40 }
 0x35f   : > { %v2907_v58 = vpop.eup %2906 }
 0x38f   : > { %v808_v41 = vpop.xlane.xlu0 %807  ;;  %v940_v42 = vpop.xlane.xlu1 %939 }
 0x390   : > { %v809_v43 = vmul.f32 0.25, %v808_v41  ;;  %v941_v0 = vmul.f32 0.25, %v940_v42 }
 0x392   : > { %v810_v44 = vsub.f32 %v809_v43, %v809_v43 }
 0x393   : > { %v897_v45 = vpop.xlane.xlu0 %896  ;;  %v1085_v47 = vpop.xlane.xlu1 %1084 }
 0x394   : > { %v811_v46 = vmul.f32 1.442695, %v810_v44  ;;  %v898_v49 = vmul.f32 0.25, %v897_v45  ;;  %v1086_v12 = vmul.f32 0.25, %v1085_v47 }
 0x396   : > { %2908 = vpow2.f32 %v811_v46 }
 0x397   : > { %v906_v48 = vpop.xlane.xlu0 %905  ;;  %v1045_v51 = vpop.xlane.xlu1 %1044  ;;  %2910 = vrcp.f32 %v2907_v58 }
 0x398   : > { %v907_v50 = vmul.f32 0.25, %v906_v48  ;;  %v1046_v59 = vmul.f32 0.25, %v1045_v51 }
 0x39a   : > { %v909_v52 = vsel %vm908_vm3, %v898_v49, %v907_v50 }
 0x39b   : > { %v1036_v53 = vpop.xlane.xlu0 %1035  ;;  %v911_v54 = vsel %vm910_vm4, %v909_v52, -inf }
 0x39c   : > { %v1037_v57 = vmul.f32 0.25, %v1036_v53  ;;  %912 = vmax.xlane.f32.xlu1 %v911_v54  ;;  %v2991_v53 = vmov 1   ;;  %v2992_v54 = vmov 0  }
 0x39d   : > { %2840 = vset.pattern.permute.xlu0 %v2991_v53  ;;  %2839 = vset.pattern.permute.xlu1 %v2992_v54 }
 0x39e   : > { %v1047_v60 = vsel %vm908_vm3, %v1032_v56, %v1037_v57 }
 0x39f   : > { %v948_v61 = vpop.xlane.xlu0 %947  ;;  %v1048_v62 = vsel %vm910_vm4, %v1047_v60, %v1046_v59 }
 0x3a0   : > { %v949_v1 = vmul.f32 0.25, %v948_v61  ;;  %v1050_v2 = vsel %vm1049_vm5, %v1048_v62, -inf }
 0x3a1   : > { %1051 = vmax.xlane.f32.xlu1 %v1050_v2 }
 0x3a2   : > { %v950_v7 = vsel %vm908_vm3, %v941_v0, %v949_v1  ;;  %v2993_v1 = vmov 2  }
 0x3a3   : > { %v2909_v8 = vpop.eup %2908  ;;  %v1093_v9 = vpop.xlane.xlu0 %1092  ;;  %v951_v10 = vsel %vm910_vm4, %v950_v7, -inf }
 0x3a4   : > { %2912 = vrcp.f32 %v2909_v8  ;;  %952 = vmax.xlane.f32.xlu0 %v951_v10  ;;  %v1094_v11 = vmul.f32 0.25, %v1093_v9  ;;  %v2911_v19 = vpop.eup %2910 }
 0x3a5   : > { %v800_v20 = vmul.f32 %v2911_v19, %v2907_v58 }
 0x3a6   : > { %v1103_v15 = vsel %vm908_vm3, %v1086_v12, %v1094_v11 }
 0x3a7   : > { %v1101_v13 = vpop.xlane.xlu0 %1100  ;;  %v801_v24 = vmul.f32 %v800_v20, %v3170_v55 }
 0x3a8   : > { %v1102_v14 = vmul.f32 0.25, %v1101_v13 }
 0x3aa   : > { %v1104_v16 = vsel %vm910_vm4, %v1103_v15, %v1102_v14 }
 0x3ab   : > { %v1105_v17 = vsel %vm1049_vm5, %v1104_v16, -inf }
 0x3ac   : > { %1106 = vmax.xlane.f32.xlu0 %v1105_v17 }
 0x3b1   : > { %v2913_v22 = vpop.eup %2912 }
 0x3b2   : > { %v815_v23 = vmul.f32 %v2913_v22, %v2909_v8 }
 0x3b4   : > { %v816_v26 = vmul.f32 %v815_v23, %v3170_v55 }
 0x3b6   : > { %v2834_v27 = vpack.i.bf16 %v816_v26, %v801_v24 }
 0x3b8   : > { %2835 = vrot.lane.b32.xlu1 %v2834_v27, %s2990_s26 }
 0x425   : > { %v913_v28 = vpop.xlane.xlu1 %912 }
 0x426   : > { %v914_v29 = vsub.f32 %v909_v52, %v913_v28 }
 0x428   : > { %v915_v30 = vmul.f32 1.442695, %v914_v29 }
 0x42a   : > { %2914 = vpow2.f32 %v915_v30  ;;  %v1052_v31 = vpop.xlane.xlu1 %1051 }
 0x42b   : > { %v1053_v32 = vsub.f32 %v1048_v62, %v1052_v31 }
 0x42d   : > { %v953_v33 = vpop.xlane.xlu0 %952  ;;  %v1054_v38 = vmul.f32 1.442695, %v1053_v32 }
 0x42e   : > { %v954_v34 = vsub.f32 %v950_v7, %v953_v33  ;;  %v2836_v35 = vpop.permute.xlu1 %2835 }
 0x42f   : > { %v2838_v36 = vunpack.i.h.bf16 %v2836_v35  ;;  %v2837_v37 = vunpack.i.l.bf16 %v2836_v35 }
 0x430   : > { %v955_v39 = vmul.f32 1.442695, %v954_v34 }
 0x431   : > { %v825_v40 = vsel %vm790_vm2, %v2837_v37, %v2838_v36 }
 0x432   : > { %2916 = vpow2.f32 %v955_v39  ;;  %v826_v41 = vpack.c.bf16 %v825_v40, %v825_v40 }
 0x433   : > { %2918 = vpow2.f32 %v1054_v38 }
 0x434   : > { %2629 = vmatmul.mubr.msk.bf16.vlgmr.msra.gmra.mxu1 %vm571_vm0, %v826_v41 }
 0x435   : > { %v1107_v42 = vpop.xlane.xlu0 %1106  ;;  %2641 = vmatpush3.bf16.msra.mxu1 %v2872_v18  ;;  %2644 = vmatprep.mubr.msk.bf16.mxu1 %vm2987_vm1, %v2986_v25 }
 0x436   : > { %v1108_v43 = vsub.f32 %v1104_v16, %v1107_v42  ;;  %2642 = vmatprep.subr.bf16.mxu1 %v2986_v25 }
 0x437   : > { %v2915_v44 = vpop.eup %2914 }
 0x438   : > { %v1109_v45 = vmul.f32 1.442695, %v1108_v43  ;;  %v917_v46 = vsel %vm910_vm4, %v2915_v44, 0.0 }
 0x439   : > { %918 = vadd.xlane.f32.xlu0 %v917_v46  ;;  %2643 = vmatpush3.bf16.msra.mxu1 %v2873_v21 }
 0x43a   : > { %2920 = vpow2.f32 %v1109_v45  ;;  %2656 = vmatprep.subr.bf16.mxu1 %v2986_v25 }
 0x43f   : > { %v2917_v47 = vpop.eup %2916 }
 0x440   : > { %v957_v48 = vsel %vm910_vm4, %v2917_v47, 0.0  ;;  %v2919_v49 = vpop.eup %2918 }
 0x441   : > { %958 = vadd.xlane.f32.xlu0 %v957_v48  ;;  %v1056_v50 = vsel %vm1049_vm5, %v2919_v49, 0.0 }
 0x445   : > { %1057 = vadd.xlane.f32.xlu0 %v1056_v50 }
 0x447   : > { %v2921_v51 = vpop.eup %2920 }
 0x448   : > { %v1111_v52 = vsel %vm1049_vm5, %v2921_v51, 0.0 }
 0x449   : > { %1112 = vadd.xlane.f32.xlu0 %v1111_v52 }
 0x4c2   : > { %v919_v56 = vpop.xlane.xlu0 %918 }
 0x4c3   : > { %2922 = vrcp.f32 %v919_v56 }
 0x4ca   : > { %v959_v57 = vpop.xlane.xlu0 %958 }
 0x4ce   : > { %v1058_v58 = vpop.xlane.xlu0 %1057 }
 0x4cf   : > { %2924 = vrcp.f32 %v1058_v58 }
 0x4d0   : > { %v2923_v59 = vpop.eup %2922  ;;  %2926 = vrcp.f32 %v959_v57 }
 0x4d1   : > { %v921_v60 = vmul.f32 %v2923_v59, %v2915_v44 }
 0x4d2   : > { %v1113_v0 = vpop.xlane.xlu0 %1112 }
 0x4d3   : > { %924 = vperm.xlu1 %2839, %v921_v60   ;;  %929 = vperm.xlu0 %2840, %v921_v60   ;;  %2928 = vrcp.f32 %v1113_v0 }
 0x4d7   : > { %2858 = vset.pattern.permute.xlu0 %v2992_v54 }
 0x4dc   : > { %v2925_v61 = vpop.eup %2924 }
 0x4dd   : > { %v1060_v62 = vmul.f32 %v2925_v61, %v2919_v49  ;;  %v2927_v2 = vpop.eup %2926  ;;  %v3283_v61 = vld [vmem:[%s3652_s9 + $0x8] sm:$0xff]  }
 0x4de   : > { %v961_v7 = vmul.f32 %v2927_v2, %v2917_v47 }
 0x4df   : > { %1063 = vperm.xlu1 %2839, %v1060_v62  }
 0x4e0   : > { %v2929_v8 = vpop.eup %2928 }
 0x4e1   : > { %v1115_v11 = vmul.f32 %v2929_v8, %v2921_v51 }
 0x4e3   : > { %2841 = vset.pattern.permute.xlu1 %v2991_v53 }
 0x4e4   : > { %1068 = vperm.xlu1 %2841, %v1060_v62  }
 0x4e8   : > { %2842 = vset.pattern.permute.xlu1 %v2993_v1 }
 0x4e9   : > { %1074 = vperm.xlu1 %2842, %v1060_v62   ;;  %v3289_v62 = vld [vmem:[%s3652_s9] sm:$0xff]  }
 0x4ed   : > { %2843 = vset.pattern.permute.xlu1 %v2992_v54 }
 0x4ee   : > { %964 = vperm.xlu1 %2843, %v961_v7  }
 0x4f2   : > { %2844 = vset.pattern.permute.xlu1 %v2991_v53 }
 0x4f3   : > { %969 = vperm.xlu1 %2844, %v961_v7  }
 0x4f4   : > { %v887_v9 = vpop.f32.mrf.mxu1 }
 0x4f6   : > { %v2630_v10 = vpop.f32.mrf.mxu1 }
 0x4f7   : > { %2845 = vset.pattern.permute.xlu1 %v2992_v54 }
 0x4f8   : > { %1118 = vperm.xlu1 %2845, %v1115_v11   ;;  %v890_v12 = vpop.f32.mrf.mxu1 }
 0x4fa   : > { %v2631_v13 = vpop.f32.mrf.mxu1 }
 0x4fc   : > { %2846 = vset.pattern.permute.xlu1 %v2991_v53 }
 0x4fd   : > { %1123 = vperm.xlu1 %2846, %v1115_v11  }
 0x501   : > { %2847 = vset.pattern.permute.xlu1 %v2993_v1 }
 0x502   : > { %1129 = vperm.xlu1 %2847, %v1115_v11  }
 0x506   : > { %2859 = vset.pattern.permute.xlu1 %v2991_v53 }
 0x54e   : > { %v925_v14 = vpop.permute.xlu1 %924  ;;  %v930_v19 = vpop.permute.xlu0 %929 }
 0x54f   : > { %v932_v20 = vmul.f32 %v930_v19, %v3174_v63  ;;  %v927_v21 = vmul.f32 %v925_v14, %v3170_v55 }
 0x551   : > { %v933_v26 = vadd.f32 %v932_v20, %v927_v21 }
 0x55a   : > { %v1064_v15 = vpop.permute.xlu1 %1063 }
 0x55b   : > { %v1066_v33 = vmul.f32 %v1064_v15, %v3170_v55 }
 0x55f   : > { %v1069_v16 = vpop.permute.xlu1 %1068 }
 0x560   : > { %v1071_v31 = vmul.f32 %v1069_v16, %v3174_v63 }
 0x562   : > { %v1072_v37 = vadd.f32 %v1071_v31, %v1066_v33  ;;  %v3346_v31 = vld [vmem:[%s3654_s11 + $0x20] sm:$0xff]   ;;  %v3360_v33 = vld [vmem:[%s3654_s11 + $0x10] sm:$0xff]  }
 0x564   : > { %v1075_v17 = vpop.permute.xlu1 %1074 }
 0x565   : > { %v1077_v34 = vmul.f32 %v1075_v17, %v3178_v6 }
 0x567   : > { %v1078_v40 = vadd.f32 %v1077_v34, %v1072_v37  ;;  %v3367_v34 = vld [vmem:[%s3654_s11 + $0x8] sm:$0xff]  }
 0x569   : > { %v965_v18 = vpop.permute.xlu1 %964 }
 0x56a   : > { %v967_v23 = vmul.f32 %v965_v18, %v3170_v55 }
 0x56e   : > { %v970_v22 = vpop.permute.xlu1 %969 }
 0x56f   : > { %v972_v24 = vmul.f32 %v970_v22, %v3174_v63  ;;  %v3307_v22 = vld [vmem:[%s3650_s7] ss:$0 sm:$0xff] }
 0x571   : > { %v973_v27 = vadd.f32 %v972_v24, %v967_v23 }
 0x573   : > { %v1119_v28 = vpop.permute.xlu1 %1118  ;;  %v2848_v29 = vpack.i.bf16 %v973_v27, %v933_v26 }
 0x574   : > { %v1121_v35 = vmul.f32 %v1119_v28, %v3170_v55  ;;  %v3326_v28 = vld [vmem:[%s3654_s11 + $0x38] sm:$0xff]  }
 0x575   : > { %2849 = vrot.lane.b32.xlu1 %v2848_v29, %s2990_s26  ;;  %v3333_v29 = vld [vmem:[%s3654_s11 + $0x30] sm:$0xff]  }
 0x578   : > { %v1124_v30 = vpop.permute.xlu1 %1123 }
 0x579   : > { %v1126_v32 = vmul.f32 %v1124_v30, %v3174_v63  ;;  %v2426_v63 = vld [vmem:[%s3649_s6] ss:$0 sm:$0xff]  ;;  %v3340_v30 = vld [vmem:[%s3654_s11 + $0x28] sm:$0xff]  }
 0x57a   : > { %v888_v43 = vadd.f32 %v2426_v63, %v887_v9 }
 0x57b   : > { %v1127_v38 = vadd.f32 %v1126_v32, %v1121_v35  ;;  %v3353_v32 = vld [vmem:[%s3654_s11 + $0x18] sm:$0xff]   ;;  %v3374_v35 = vld [vmem:[%s3654_s11] sm:$0xff]  }
 0x57c   : > { %v3266_v44 = vadd.f32 %v888_v43, %v3116_v3 }
 0x57d   : > { %v1130_v36 = vpop.permute.xlu1 %1129 }
 0x57e   : > { %v1132_v39 = vmul.f32 %v1130_v36, %v3178_v6  ;;  %v1190_v55 = vsel %vm571_vm0, %v3266_v44, 0.0 }
 0x580   : > { %v1133_v41 = vadd.f32 %v1132_v39, %v1127_v38 }
 0x582   : > { %v2853_v42 = vpack.i.bf16 %v1133_v41, %v1078_v40 }
 0x584   : > { %2854 = vrot.lane.b32.xlu1 %v2853_v42, %s2990_s26 }
 0x5a8   : > { %1191 = vadd.xlane.f32.xlu1 %v1190_v55 }
 0x5e7   : > { %v2850_v45 = vpop.permute.xlu1 %2849 }
 0x5e8   : > { %v2852_v46 = vunpack.i.h.bf16 %v2850_v45  ;;  %v2851_v6 = vunpack.i.l.bf16 %v2850_v45  ;;  %v3386_v45 = vld [vmem:[%s3653_s10] ss:$0 sm:$0xff] }
 0x5ea   : > { %v982_v47 = vsel %vm790_vm2, %v2851_v6, %v2852_v46 }
 0x5eb   : > { %v983_v48 = vpack.c.bf16 %v982_v47, %v982_v47 }
 0x5ed   : > { %2637 = vmatmul.mubr.msk.bf16.vlgmr.msra.gmra.mxu0 %vm571_vm0, %v983_v48 }
 0x5ee   : > { %2652 = vmatprep.mubr.msk.bf16.mxu0 %vm2987_vm1, %v2986_v25  ;;  %2649 = vmatpush3.bf16.msra.mxu0 %v3283_v61 }
 0x5ef   : > { %2650 = vmatprep.subr.bf16.mxu0 %v2986_v25 }
 0x5f2   : > { %2651 = vmatpush3.bf16.msra.mxu0 %v3289_v62 }
 0x5f3   : > { %2676 = vmatprep.subr.bf16.mxu0 %v2986_v25 }
 0x5f6   : > { %v2855_v49 = vpop.permute.xlu1 %2854 }
 0x5f7   : > { %v2857_v50 = vunpack.i.h.bf16 %v2855_v49  ;;  %v2856_v51 = vunpack.i.l.bf16 %v2855_v49 }
 0x5f9   : > { %v1142_v3 = vsel %vm790_vm2, %v2856_v51, %v2857_v50 }
 0x5fa   : > { %v1143_v52 = vpack.c.bf16 %v1142_v3, %v1142_v3 }
 0x5fc   : > { %2645 = vmatmul.mubr.msk.bf16.vlgmr.msra.gmra.mxu1 %vm571_vm0, %v1143_v52 }
 0x5fd   : > { %2672 = vmatprep.mubr.msk.bf16.mxu1 %vm2987_vm1, %v2986_v25  ;;  %2657 = vmatpush3.bf16.msra.mxu1 %v3326_v28 }
 0x5fe   : > { %2658 = vmatprep.subr.bf16.mxu1 %v2986_v25 }
 0x601   : > { %2659 = vmatpush3.bf16.msra.mxu1 %v3333_v29 }
 0x602   : > { %2660 = vmatprep.subr.bf16.mxu1 %v2986_v25 }
 0x605   : > { %2661 = vmatpush3.bf16.msra.mxu1 %v3340_v30 }
 0x606   : > { %2662 = vmatprep.subr.bf16.mxu1 %v2986_v25 }
 0x609   : > { %2663 = vmatpush3.bf16.msra.mxu1 %v3346_v31 }
 0x60a   : > { %2664 = vmatprep.subr.bf16.mxu1 %v2986_v25 }
 0x60d   : > { %2665 = vmatpush3.bf16.msra.mxu1 %v3353_v32 }
 0x60e   : > { %2666 = vmatprep.subr.bf16.mxu1 %v2986_v25 }
 0x611   : > { %2667 = vmatpush3.bf16.msra.mxu1 %v3360_v33 }
 0x612   : > { %2668 = vmatprep.subr.bf16.mxu1 %v2986_v25 }
 0x615   : > { %2669 = vmatpush3.bf16.msra.mxu1 %v3367_v34 }
 0x616   : > { %2670 = vmatprep.subr.bf16.mxu1 %v2986_v25 }
 0x619   : > { %2671 = vmatpush3.bf16.msra.mxu1 %v3374_v35 }
 0x61a   : > { %2704 = vmatprep.subr.bf16.mxu1 %v2986_v25 }
 0x631   : > { %v1192_v56 = vpop.xlane.xlu1 %1191 }
 0x632   : > { %v1193_v57 = vmul.f32 0.03125, %v1192_v56 }
 0x634   : > { %v1194_v58 = vsub.f32 %v3266_v44, %v1193_v57 }
 0x636   : > { %v1195_v59 = vmul.f32 %v1194_v58, %v1194_v58 }
 0x638   : > { %v1196_v60 = vsel %vm571_vm0, %v1195_v59, 0.0 }
 0x639   : > { %1197 = vadd.xlane.f32.xlu0 %v1196_v60 }
 0x6ad   : > { %v1021_v0 = vpop.f32.mrf.mxu0 }
 0x6ae   : > { %v1022_v2 = vadd.f32 %v2426_v63, %v1021_v0 }
 0x6af   : > { %v2638_v7 = vpop.f32.mrf.mxu0 }
 0x6b0   : > { %v3295_v8 = vadd.f32 %v3120_v5, %v1022_v2 }
 0x6b1   : > { %v1024_v9 = vpop.f32.mrf.mxu0 }
 0x6b2   : > { %v1406_v10 = vsel %vm571_vm0, %v3295_v8, 0.0 }
 0x6b3   : > { %v2639_v11 = vpop.f32.mrf.mxu0  ;;  %1407 = vadd.xlane.f32.xlu0 %v1406_v10 }
 0x6bc   : > { %v1181_v12 = vpop.f32.mrf.mxu1 }
 0x6bd   : > { %v1182_v13 = vadd.f32 %v2426_v63, %v1181_v12 }
 0x6be   : > { %v2646_v14 = vpop.f32.mrf.mxu1 }
 0x6bf   : > { %v3300_v15 = vadd.f32 %v3118_v4, %v1182_v13  ;;  %v3312_v4 = vld [vmem:[%s3651_s8] ss:$0 sm:$0xff] }
 0x6c0   : > { %v1184_v16 = vpop.f32.mrf.mxu1 }
 0x6c1   : > { %v1516_v17 = vsel %vm571_vm0, %v3300_v15, 0.0 }
 0x6c2   : > { %v1198_v18 = vpop.xlane.xlu0 %1197  ;;  %1517 = vadd.xlane.f32.xlu1 %v1516_v17  ;;  %v2647_v5 = vpop.f32.mrf.mxu1 }
 0x6c3   : > { %v1199_v19 = vmul.f32 0.03125, %v1198_v18 }
 0x6c5   : > { %v1200_v20 = vadd.f32 1e-05, %v1199_v19 }
 0x6c7   : > { %2930 = vrsqrt.f32 %v1200_v20 }
 0x6d4   : > { %v2931_v21 = vpop.eup %2930 }
 0x6d5   : > { %v1202_v23 = vmul.f32 %v2931_v21, %v1194_v58  ;;  %v2438_v21 = vld [vmem:[%s3655_s12] ss:$0 sm:$0xff] }
 0x6d7   : > { %v1209_v24 = vmul.f32 %v3307_v22, %v1202_v23 }
 0x6d9   : > { %v1216_v26 = vadd.f32 %v3312_v4, %v1209_v24 }
 0x6db   : > { %v1217_v27 = vpack.c.bf16 %v1216_v26, %v1216_v26 }
 0x6dd   : > { %2653 = vmatmul.mubr.msk.bf16.vlgmr.msra.gmra.mxu0 %vm571_vm0, %v1217_v27 }
 0x6de   : > { %2677 = vmatpush3.bf16.msra.mxu0 %v3283_v61  ;;  %2680 = vmatprep.mubr.msk.bf16.mxu0 %vm2987_vm1, %v2986_v25 }
 0x6df   : > { %2678 = vmatprep.subr.bf16.mxu0 %v2986_v25 }
 0x6e2   : > { %2679 = vmatpush3.bf16.msra.mxu0 %v3289_v62 }
 0x6e3   : > { %2684 = vmatprep.subr.bf16.mxu0 %v2986_v25 }
 0x73c   : > { %v1408_v36 = vpop.xlane.xlu0 %1407 }
 0x73d   : > { %v1409_v37 = vmul.f32 0.03125, %v1408_v36 }
 0x73f   : > { %v1410_v38 = vsub.f32 %v3295_v8, %v1409_v37 }
 0x741   : > { %v1411_v39 = vmul.f32 %v1410_v38, %v1410_v38 }
 0x743   : > { %v1412_v40 = vsel %vm571_vm0, %v1411_v39, 0.0 }
 0x744   : > { %1413 = vadd.xlane.f32.xlu0 %v1412_v40 }
 0x74b   : > { %v1518_v41 = vpop.xlane.xlu1 %1517 }
 0x74c   : > { %v1519_v42 = vmul.f32 0.03125, %v1518_v41 }
 0x74e   : > { %v1520_v63 = vsub.f32 %v3300_v15, %v1519_v42 }
 0x750   : > { %v1521_v43 = vmul.f32 %v1520_v63, %v1520_v63 }
 0x752   : > { %v1522_v55 = vsel %vm571_vm0, %v1521_v43, 0.0 }
 0x753   : > { %1523 = vadd.xlane.f32.xlu1 %v1522_v55 }
 0x79d   : > { %v1278_v46 = vpop.f32.mrf.mxu0 }
 0x79e   : > { %v1279_v6 = vadd.f32 %v3386_v45, %v1278_v46 }
 0x79f   : > { %v2654_v47 = vpop.f32.mrf.mxu0 }
 0x7a0   : > { %v1285_v48 = vmul.f32 0.044715, %v1279_v6  ;;  %v1284_v58 = vmul.f32 0.5, %v1279_v6 }
 0x7a1   : > { %v1281_v49 = vpop.f32.mrf.mxu0 }
 0x7a2   : > { %v1286_v50 = vmul.f32 %v1285_v48, %v1279_v6 }
 0x7a3   : > { %v2655_v51 = vpop.f32.mrf.mxu0 }
 0x7a4   : > { %v1287_v3 = vmul.f32 %v1286_v50, %v1279_v6 }
 0x7a6   : > { %v1288_v52 = vadd.f32 %v1287_v3, %v1279_v6 }
 0x7a8   : > { %v1289_v56 = vmul.f32 0.7978846, %v1288_v52 }
 0x7aa   : > { %2932 = vtanh.f32 %v1289_v56 }
 0x7b7   : > { %v2933_v57 = vpop.eup %2932 }
 0x7b8   : > { %v1291_v59 = vadd.f32 1.0, %v2933_v57 }
 0x7ba   : > { %v1292_v60 = vmul.f32 %v1291_v59, %v1284_v58 }
 0x7bc   : > { %v1293_v0 = vpack.c.bf16 %v1292_v60, %v1292_v60 }
 0x7be   : > { %2673 = vmatmul.mubr.bf16.vlgmr.msra.gmra.mxu1 %v1293_v0 }
 0x7bf   : > { %2705 = vmatpush3.bf16.msra.mxu1 %v3283_v61  ;;  %2708 = vmatprep.mubr.msk.bf16.mxu1 %vm2987_vm1, %v2986_v25 }
 0x7c0   : > { %2706 = vmatprep.subr.bf16.mxu1 %v2986_v25 }
 0x7c3   : > { %2707 = vmatpush3.bf16.msra.mxu1 %v3289_v62 }
 0x7c4   : > { %2712 = vmatprep.subr.bf16.mxu1 %v2986_v25 }
 0x7cd   : > { %v1414_v2 = vpop.xlane.xlu0 %1413 }
 0x7ce   : > { %v1415_v7 = vmul.f32 0.03125, %v1414_v2 }
 0x7d0   : > { %v1416_v9 = vadd.f32 1e-05, %v1415_v7 }
 0x7d2   : > { %2934 = vrsqrt.f32 %v1416_v9 }
 0x7dc   : > { %v1524_v10 = vpop.xlane.xlu1 %1523 }
 0x7dd   : > { %v1525_v11 = vmul.f32 0.03125, %v1524_v10 }
 0x7df   : > { %v2935_v12 = vpop.eup %2934  ;;  %v1526_v13 = vadd.f32 1e-05, %v1525_v11 }
 0x7e0   : > { %v1418_v14 = vmul.f32 %v2935_v12, %v1410_v38 }
 0x7e1   : > { %2936 = vrsqrt.f32 %v1526_v13 }
 0x7e2   : > { %v1419_v61 = vmul.f32 %v3307_v22, %v1418_v14 }
 0x7e4   : > { %v1420_v16 = vadd.f32 %v3312_v4, %v1419_v61 }
 0x7e6   : > { %v1421_v17 = vpack.c.bf16 %v1420_v16, %v1420_v16 }
 0x7e8   : > { %2681 = vmatmul.mubr.msk.bf16.vlgmr.msra.gmra.mxu0 %vm571_vm0, %v1421_v17 }
 0x7e9   : > { %2685 = vmatpush3.bf16.msra.mxu0 %v3326_v28  ;;  %2700 = vmatprep.mubr.msk.bf16.mxu0 %vm2987_vm1, %v2986_v25 }
 0x7ea   : > { %2686 = vmatprep.subr.bf16.mxu0 %v2986_v25 }
 0x7ed   : > { %2687 = vmatpush3.bf16.msra.mxu0 %v3333_v29 }
 0x7ee   : > { %v2937_v62 = vpop.eup %2936  ;;  %2688 = vmatprep.subr.bf16.mxu0 %v2986_v25 }
 0x7ef   : > { %v1528_v18 = vmul.f32 %v2937_v62, %v1520_v63 }
 0x7f1   : > { %v1529_v5 = vmul.f32 %v3307_v22, %v1528_v18  ;;  %2689 = vmatpush3.bf16.msra.mxu0 %v3340_v30 }
 0x7f2   : > { %2690 = vmatprep.subr.bf16.mxu0 %v2986_v25 }
 0x7f3   : > { %v1530_v19 = vadd.f32 %v3312_v4, %v1529_v5 }
 0x7f5   : > { %v1531_v20 = vpack.c.bf16 %v1530_v19, %v1530_v19  ;;  %2691 = vmatpush3.bf16.msra.mxu0 %v3346_v31  ;;  %v2884_v19 = vld [vmem:[%s3646_s3 + $0x18] sm:$0xff]  }
 0x7f6   : > { %2692 = vmatprep.subr.bf16.mxu0 %v2986_v25 }
 0x7f7   : > { %2709 = vmatmul.mubr.msk.bf16.vlgmr.msra.gmra.mxu1 %vm571_vm0, %v1531_v20  ;;  %v2885_v20 = vld [vmem:[%s3646_s3 + $0x10] sm:$0xff]  }
 0x7f8   : > { %2713 = vmatpush3.bf16.msra.mxu1 %v3326_v28  ;;  %2728 = vmatprep.mubr.msk.bf16.mxu1 %vm2987_vm1, %v2986_v25 }
 0x7f9   : > { %2693 = vmatpush3.bf16.msra.mxu0 %v3353_v32  ;;  %2714 = vmatprep.subr.bf16.mxu1 %v2986_v25 }
 0x7fa   : > { %2694 = vmatprep.subr.bf16.mxu0 %v2986_v25 }
 0x7fc   : > { %2715 = vmatpush3.bf16.msra.mxu1 %v3333_v29 }
 0x7fd   : > { %2695 = vmatpush3.bf16.msra.mxu0 %v3360_v33  ;;  %2716 = vmatprep.subr.bf16.mxu1 %v2986_v25 }
 0x7fe   : > { %2696 = vmatprep.subr.bf16.mxu0 %v2986_v25 }
 0x800   : > { %2717 = vmatpush3.bf16.msra.mxu1 %v3340_v30 }
 0x801   : > { %2697 = vmatpush3.bf16.msra.mxu0 %v3367_v34  ;;  %2718 = vmatprep.subr.bf16.mxu1 %v2986_v25 }
 0x802   : > { %2698 = vmatprep.subr.bf16.mxu0 %v2986_v25 }
 0x804   : > { %2719 = vmatpush3.bf16.msra.mxu1 %v3346_v31 }
 0x805   : > { %2699 = vmatpush3.bf16.msra.mxu0 %v3374_v35  ;;  %2720 = vmatprep.subr.bf16.mxu1 %v2986_v25 }
 0x806   : > { %2732 = vmatprep.subr.bf16.mxu0 %v2986_v25 }
 0x808   : > { %2721 = vmatpush3.bf16.msra.mxu1 %v3353_v32 }
 0x809   : > { %2722 = vmatprep.subr.bf16.mxu1 %v2986_v25 }
 0x80c   : > { %2723 = vmatpush3.bf16.msra.mxu1 %v3360_v33 }
 0x80d   : > { %2724 = vmatprep.subr.bf16.mxu1 %v2986_v25 }
 0x810   : > { %2725 = vmatpush3.bf16.msra.mxu1 %v3367_v34 }
 0x811   : > { %2726 = vmatprep.subr.bf16.mxu1 %v2986_v25 }
 0x814   : > { %2727 = vmatpush3.bf16.msra.mxu1 %v3374_v35 }
 0x815   : > { %2764 = vmatprep.subr.bf16.mxu1 %v2986_v25 }
 0x87e   : > { %v1399_v22 = vpop.f32.mrf.mxu1 }
 0x87f   : > { %v1400_v23 = vadd.f32 %v2438_v21, %v1399_v22 }
 0x880   : > { %v2674_v4 = vpop.f32.mrf.mxu1 }
 0x881   : > { %v1405_v24 = vadd.f32 %v1400_v23, %v3266_v44 }
 0x882   : > { %v1402_v26 = vpop.f32.mrf.mxu1 }
 0x883   : > { %v1630_v27 = vsel %vm571_vm0, %v1405_v24, 0.0 }
 0x884   : > { %1631 = vadd.xlane.f32.xlu0 %v1630_v27  ;;  %v2675_v28 = vpop.f32.mrf.mxu1 }
 0x8a8   : > { %v1459_v29 = vpop.f32.mrf.mxu0 }
 0x8a9   : > { %v1460_v30 = vadd.f32 %v3386_v45, %v1459_v29 }
 0x8aa   : > { %v2682_v31 = vpop.f32.mrf.mxu0 }
 0x8ab   : > { %v1466_v32 = vmul.f32 0.044715, %v1460_v30  ;;  %v1465_v48 = vmul.f32 0.5, %v1460_v30 }
 0x8ac   : > { %v1462_v33 = vpop.f32.mrf.mxu0 }
 0x8ad   : > { %v1467_v34 = vmul.f32 %v1466_v32, %v1460_v30 }
 0x8ae   : > { %v2683_v35 = vpop.f32.mrf.mxu0 }
 0x8af   : > { %v1468_v36 = vmul.f32 %v1467_v34, %v1460_v30  ;;  %v2451_v34 = vld [vmem:[%s3644_s1 + $0x1] ss:$0 sm:$0xff] }
 0x8b1   : > { %v1469_v37 = vadd.f32 %v1468_v36, %v1460_v30  ;;  %v2452_v36 = vld [vmem:[%s3645_s2 + $0x1] ss:$0 sm:$0xff] }
 0x8b3   : > { %v1470_v38 = vmul.f32 0.7978846, %v1469_v37 }
 0x8b5   : > { %2938 = vtanh.f32 %v1470_v38 }
 0x8b7   : > { %v1569_v39 = vpop.f32.mrf.mxu1 }
 0x8b8   : > { %v1570_v44 = vadd.f32 %v3386_v45, %v1569_v39 }
 0x8b9   : > { %v2710_v40 = vpop.f32.mrf.mxu1 }
 0x8ba   : > { %v1576_v41 = vmul.f32 0.044715, %v1570_v44  ;;  %v1575_v45 = vmul.f32 0.5, %v1570_v44 }
 0x8bb   : > { %v1572_v42 = vpop.f32.mrf.mxu1 }
 0x8bc   : > { %v1577_v63 = vmul.f32 %v1576_v41, %v1570_v44 }
 0x8bd   : > { %v2711_v43 = vpop.f32.mrf.mxu1 }
 0x8be   : > { %v1578_v55 = vmul.f32 %v1577_v63, %v1570_v44 }
 0x8c0   : > { %v1579_v46 = vadd.f32 %v1578_v55, %v1570_v44 }
 0x8c2   : > { %v2939_v6 = vpop.eup %2938  ;;  %v1580_v47 = vmul.f32 0.7978846, %v1579_v46 }
 0x8c3   : > { %v1472_v49 = vadd.f32 1.0, %v2939_v6 }
 0x8c4   : > { %2940 = vtanh.f32 %v1580_v47 }
 0x8c5   : > { %v1473_v50 = vmul.f32 %v1472_v49, %v1465_v48 }
 0x8c7   : > { %v1474_v51 = vpack.c.bf16 %v1473_v50, %v1473_v50 }
 0x8c9   : > { %2701 = vmatmul.mubr.bf16.vlgmr.msra.gmra.mxu0 %v1474_v51 }
 0x8ca   : > { %2736 = vmatprep.mubr.msk.bf16.mxu0 %vm2987_vm1, %v2986_v25  ;;  %2733 = vmatpush3.bf16.msra.mxu0 %v2884_v19 }
 0x8cb   : > { %2734 = vmatprep.subr.bf16.mxu0 %v2986_v25 }
 0x8ce   : > { %2735 = vmatpush3.bf16.msra.mxu0 %v2885_v20 }
 0x8cf   : > { %2740 = vmatprep.subr.bf16.mxu0 %v2986_v25 }
 0x8d1   : > { %v2941_v3 = vpop.eup %2940 }
 0x8d2   : > { %v1582_v52 = vadd.f32 1.0, %v2941_v3 }
 0x8d4   : > { %v1583_v56 = vmul.f32 %v1582_v52, %v1575_v45  ;;  %v2458_v52 = vld [vmem:[%s3647_s4 + $0x1] ss:$0 sm:$0xff] }
 0x8d6   : > { %v1584_v57 = vpack.c.bf16 %v1583_v56, %v1583_v56 }
 0x8d8   : > { %2729 = vmatmul.mubr.bf16.vlgmr.msra.gmra.mxu1 %v1584_v57 }
 0x8d9   : > { %2768 = vmatprep.mubr.msk.bf16.mxu1 %vm2987_vm1, %v2986_v25 }
 0x90d   : > { %v1632_v58 = vpop.xlane.xlu0 %1631 }
 0x90e   : > { %v1633_v59 = vmul.f32 0.03125, %v1632_v58 }
 0x910   : > { %v1634_v0 = vsub.f32 %v1405_v24, %v1633_v59 }
 0x912   : > { %v1635_v12 = vmul.f32 %v1634_v0, %v1634_v0 }
 0x914   : > { %v1636_v14 = vsel %vm571_vm0, %v1635_v12, 0.0 }
 0x989   : > { %v1509_v60 = vpop.f32.mrf.mxu0 }
 0x98a   : > { %v1510_v2 = vadd.f32 %v2438_v21, %v1509_v60 }
 0x98b   : > { %v2702_v7 = vpop.f32.mrf.mxu0 }
 0x98c   : > { %v1515_v9 = vadd.f32 %v1510_v2, %v3295_v8 }
 0x98d   : > { %v1512_v10 = vpop.f32.mrf.mxu0 }
 0x98e   : > { %v1726_v11 = vsel %vm571_vm0, %v1515_v9, 0.0 }
 0x98f   : > { %v2703_v13 = vpop.f32.mrf.mxu0  ;;  %1727 = vadd.xlane.f32.xlu1 %v1726_v11 }
 0x993   : > { %1637 = vadd.xlane.f32.xlu1 %v1636_v14 }
 0x998   : > { %v1619_v61 = vpop.f32.mrf.mxu1 }
 0x999   : > { %v1620_v16 = vadd.f32 %v2438_v21, %v1619_v61 }
 0x99a   : > { %v2730_v17 = vpop.f32.mrf.mxu1 }
 0x99b   : > { %v3452_v62 = vadd.f32 %v1620_v16, %v3300_v15 }
 0x99c   : > { %v1622_v18 = vpop.f32.mrf.mxu1 }
 0x99d   : > { %v1785_v5 = vsel %vm571_vm0, %v3452_v62, 0.0 }
 0x99e   : > { %1786 = vadd.xlane.f32.xlu0 %v1785_v5  ;;  %v2731_v8 = vpop.f32.mrf.mxu1 }
 0xa18   : > { %v1728_v15 = vpop.xlane.xlu1 %1727 }
 0xa19   : > { %v1729_v21 = vmul.f32 0.03125, %v1728_v15 }
 0xa1b   : > { %v1730_v22 = vsub.f32 %v1515_v9, %v1729_v21 }
 0xa1c   : > { %v1638_v23 = vpop.xlane.xlu1 %1637 }
 0xa1d   : > { %v1639_v4 = vmul.f32 0.03125, %v1638_v23  ;;  %v1731_v24 = vmul.f32 %v1730_v22, %v1730_v22 }
 0xa1f   : > { %v1640_v26 = vadd.f32 1e-05, %v1639_v4  ;;  %v1732_v27 = vsel %vm571_vm0, %v1731_v24, 0.0 }
 0xa20   : > { %1733 = vadd.xlane.f32.xlu0 %v1732_v27 }
 0xa21   : > { %2942 = vrsqrt.f32 %v1640_v26 }
 0xa27   : > { %v1787_v28 = vpop.xlane.xlu0 %1786 }
 0xa28   : > { %v1788_v29 = vmul.f32 0.03125, %v1787_v28 }
 0xa2a   : > { %v1789_v30 = vsub.f32 %v3452_v62, %v1788_v29 }
 0xa2c   : > { %v1790_v31 = vmul.f32 %v1789_v30, %v1789_v30 }
 0xa2e   : > { %v2943_v32 = vpop.eup %2942  ;;  %v1791_v33 = vsel %vm571_vm0, %v1790_v31, 0.0 }
 0xa2f   : > { %v1642_v35 = vmul.f32 %v2943_v32, %v1634_v0  ;;  %1792 = vadd.xlane.f32.xlu1 %v1791_v33 }
 0xa31   : > { %v1649_v37 = vmul.f32 %v2451_v34, %v1642_v35 }
 0xa33   : > { %v1656_v38 = vadd.f32 %v2452_v36, %v1649_v37 }
 0xa35   : > { %v1657_v39 = vpack.c.bf16 %v1656_v38, %v1656_v38 }
 0xa37   : > { %2737 = vmatmul.mubr.msk.bf16.vlgmr.msra.gmra.mxu0 %vm571_vm0, %v1657_v39 }
 0xa38   : > { %2741 = vmatpush3.bf16.msra.mxu0 %v2884_v19  ;;  %2744 = vmatprep.mubr.msk.bf16.mxu0 %vm2987_vm1, %v2986_v25 }
 0xa39   : > { %2742 = vmatprep.subr.bf16.mxu0 %v2986_v25 }
 0xa3c   : > { %2743 = vmatpush3.bf16.msra.mxu0 %v2885_v20 }
 0xa3d   : > { %2748 = vmatprep.subr.bf16.mxu0 %v2986_v25 }
 0xaa9   : > { %v1734_v44 = vpop.xlane.xlu0 %1733 }
 0xaaa   : > { %v1735_v40 = vmul.f32 0.03125, %v1734_v44 }
 0xaac   : > { %v1736_v41 = vadd.f32 1e-05, %v1735_v40 }
 0xaae   : > { %2944 = vrsqrt.f32 %v1736_v41 }
 0xab8   : > { %v1793_v42 = vpop.xlane.xlu1 %1792 }
 0xab9   : > { %v1794_v63 = vmul.f32 0.03125, %v1793_v42 }
 0xabb   : > { %v2945_v43 = vpop.eup %2944  ;;  %v1795_v55 = vadd.f32 1e-05, %v1794_v63 }
 0xabc   : > { %v1738_v46 = vmul.f32 %v2945_v43, %v1730_v22 }
 0xabd   : > { %2946 = vrsqrt.f32 %v1795_v55 }
 0xabe   : > { %v1739_v6 = vmul.f32 %v2451_v34, %v1738_v46 }
 0xac0   : > { %v1740_v47 = vadd.f32 %v2452_v36, %v1739_v6 }
 0xac2   : > { %v1741_v48 = vpack.c.bf16 %v1740_v47, %v1740_v47 }
 0xac4   : > { %2745 = vmatmul.mubr.msk.bf16.vlgmr.msra.gmra.mxu0 %vm571_vm0, %v1741_v48 }
 0xac5   : > { %2749 = vmatpush3.bf16.msra.mxu0 %v2884_v19  ;;  %2752 = vmatprep.mubr.msk.bf16.mxu0 %vm2987_vm1, %v2986_v25 }
 0xac6   : > { %2750 = vmatprep.subr.bf16.mxu0 %v2986_v25 }
 0xac9   : > { %2751 = vmatpush3.bf16.msra.mxu0 %v2885_v20 }
 0xaca   : > { %v2947_v49 = vpop.eup %2946  ;;  %2756 = vmatprep.subr.bf16.mxu0 %v2986_v25 }
 0xacb   : > { %v1797_v50 = vmul.f32 %v2947_v49, %v1789_v30 }
 0xacd   : > { %v1798_v51 = vmul.f32 %v2451_v34, %v1797_v50 }
 0xacf   : > { %v1799_v3 = vadd.f32 %v2452_v36, %v1798_v51 }
 0xad1   : > { %v1800_v45 = vpack.c.bf16 %v1799_v3, %v1799_v3 }
 0xad3   : > { %2753 = vmatmul.mubr.msk.bf16.vlgmr.msra.gmra.mxu0 %vm571_vm0, %v1800_v45 }
 0xad4   : > { %2760 = vmatprep.mubr.msk.bf16.mxu0 %vm2987_vm1, %v2986_v25 }
 0xaf7   : > { %v1720_v56 = vpop.f32.mrf.mxu0 }
 0xaf8   : > { %v3489_v57 = vadd.f32 %v2458_v52, %v1720_v56 }
 0xaf9   : > { %v2738_v58 = vpop.f32.mrf.mxu0 }
 0xafa   : > { %1845 = vrot.lane.b32.xlu0 %v3489_v57, %s2988_s21 }
 0xafb   : > { %v1723_v59 = vpop.f32.mrf.mxu0 }
 0xafd   : > { %v2739_v60 = vpop.f32.mrf.mxu0 }
 0xb6c   : > { %v1846_v13 = vpop.permute.xlu0 %1845 }
 0xb84   : > { %v1779_v0 = vpop.f32.mrf.mxu0 }
 0xb85   : > { %v3493_v2 = vadd.f32 %v2458_v52, %v1779_v0 }
 0xb86   : > { %v2746_v7 = vpop.f32.mrf.mxu0 }
 0xb87   : > { %1854 = vrot.lane.b32.xlu1 %v3493_v2, %s2988_s21  ;;  %v2886_v7 = vld [vmem:[%s3648_s5 + $0x18] sm:$0xff]  }
 0xb88   : > { %v1782_v9 = vpop.f32.mrf.mxu0  ;;  %2757 = vmatpush3.bf16.msra.mxu0 %v2886_v7 }
 0xb89   : > { %2758 = vmatprep.subr.bf16.mxu0 %v2986_v25 }
 0xb8a   : > { %v2747_v10 = vpop.f32.mrf.mxu0 }
 0xb93   : > { %v1838_v11 = vpop.f32.mrf.mxu0 }
 0xb94   : > { %v3497_v12 = vadd.f32 %v2458_v52, %v1838_v11 }
 0xb95   : > { %v2754_v14 = vpop.f32.mrf.mxu0 }
 0xb96   : > { %1863 = vrot.lane.b32.xlu1 %v3497_v12, %s2988_s21  ;;  %v1848_v61 = vmul.f32 %v1846_v13, %v3497_v12 }
 0xb97   : > { %v1841_v16 = vpop.f32.mrf.mxu0 }
 0xb98   : > { %1903 = vrot.lane.b32.xlu0 %v1848_v61, %s2989_s0  ;;  %v1849_v20 = vsel %vm790_vm2, %v1848_v61, 0.0 }
 0xb99   : > { %v2755_v17 = vpop.f32.mrf.mxu0 }
 0xbf9   : > { %v1855_v18 = vpop.permute.xlu1 %1854 }
 0xbfa   : > { %v1857_v5 = vmul.f32 %v1855_v18, %v3497_v12 }
 0xbfc   : > { %1911 = vrot.lane.b32.xlu1 %v1857_v5, %s2989_s0  ;;  %v1858_v15 = vsel %vm790_vm2, %v1857_v5, 0.0 }
 0xc08   : > { %v1864_v8 = vpop.permute.xlu1 %1863 }
 0xc09   : > { %v1866_v19 = vmul.f32 %v1864_v8, %v3497_v12 }
 0xc0a   : > { %v1904_v21 = vpop.permute.xlu0 %1903 }
 0xc0b   : > { %1919 = vrot.lane.b32.xlu0 %v1866_v19, %s2989_s0  ;;  %v1906_v22 = vsel %vm790_vm2, %v1904_v21, 0.0  ;;  %v1867_v23 = vsel %vm790_vm2, %v1866_v19, 0.0 }
 0xc20   : > { %1850 = vadd.xlane.f32.xlu1 %v1849_v20 }
 0xc2a   : > { %1859 = vadd.xlane.f32.xlu0 %v1858_v15 }
 0xc2e   : > { %1907 = vadd.xlane.f32.xlu0 %v1906_v22 }
 0xc32   : > { %1868 = vadd.xlane.f32.xlu0 %v1867_v23 }
 0xc6e   : > { %v1912_v4 = vpop.permute.xlu1 %1911 }
 0xc6f   : > { %v1914_v24 = vsel %vm790_vm2, %v1912_v4, 0.0 }
 0xc70   : > { %1915 = vadd.xlane.f32.xlu1 %v1914_v24 }
 0xc7d   : > { %v1920_v26 = vpop.permute.xlu0 %1919 }
 0xc7e   : > { %v1922_v27 = vsel %vm790_vm2, %v1920_v26, 0.0 }
 0xc7f   : > { %1923 = vadd.xlane.f32.xlu1 %v1922_v27 }
 0xca9   : > { %v1851_v30 = vpop.xlane.xlu1 %1850 }
 0xcaa   : > { %v1852_v32 = vmul.f32 0.25, %v1851_v30 }
 0xcb3   : > { %v1860_v28 = vpop.xlane.xlu0 %1859 }
 0xcb4   : > { %v1861_v31 = vmul.f32 0.25, %v1860_v28 }
 0xcb6   : > { %v1871_v35 = vsel %vm908_vm3, %v1852_v32, %v1861_v31 }
 0xcb7   : > { %v1908_v29 = vpop.xlane.xlu0 %1907 }
 0xcb8   : > { %v1909_v44 = vmul.f32 0.25, %v1908_v29 }
 0xcbb   : > { %v1869_v33 = vpop.xlane.xlu0 %1868 }
 0xcbc   : > { %v1870_v34 = vmul.f32 0.25, %v1869_v33 }
 0xcbe   : > { %v1872_v36 = vsel %vm910_vm4, %v1871_v35, %v1870_v34 }
 0xcbf   : > { %v1873_v37 = vsel %vm1049_vm5, %v1872_v36, -inf }
 0xcc0   : > { %1874 = vmax.xlane.f32.xlu0 %v1873_v37  ;;  %v2888_v37 = vld [vmem:[%s3652_s9 + $0x18] sm:$0xff]  }
 0xcc1   : > { %2765 = vmatpush3.bf16.msra.mxu1 %v2888_v37 }
 0xcc2   : > { %2766 = vmatprep.subr.bf16.mxu1 %v2986_v25 }
 0xcf9   : > { %v1916_v38 = vpop.xlane.xlu1 %1915 }
 0xcfa   : > { %v1917_v39 = vmul.f32 0.25, %v1916_v38 }
 0xcfc   : > { %v1926_v42 = vsel %vm908_vm3, %v1909_v44, %v1917_v39 }
 0xd08   : > { %v1924_v40 = vpop.xlane.xlu1 %1923 }
 0xd09   : > { %v1925_v41 = vmul.f32 0.25, %v1924_v40 }
 0xd0b   : > { %v1927_v63 = vsel %vm910_vm4, %v1926_v42, %v1925_v41  ;;  %v2475_v41 = vld [vmem:[%s3650_s7 + $0x1] ss:$0 sm:$0xff] }
 0xd0c   : > { %v1928_v43 = vsel %vm1049_vm5, %v1927_v63, -inf }
 0xd0d   : > { %1929 = vmax.xlane.f32.xlu1 %v1928_v43 }
 0xd49   : > { %v1875_v55 = vpop.xlane.xlu0 %1874 }
 0xd4a   : > { %v1876_v46 = vsub.f32 %v1872_v36, %v1875_v55 }
 0xd4c   : > { %v1877_v6 = vmul.f32 1.442695, %v1876_v46 }
 0xd4e   : > { %2948 = vpow2.f32 %v1877_v6  ;;  %v2890_v6 = vld [vmem:[%s3654_s11 + $0x78] sm:$0xff]  }
 0xd5b   : > { %v2949_v47 = vpop.eup %2948 }
 0xd5c   : > { %v1879_v48 = vsel %vm1049_vm5, %v2949_v47, 0.0 }
 0xd5d   : > { %1880 = vadd.xlane.f32.xlu0 %v1879_v48  ;;  %v2892_v48 = vld [vmem:[%s3654_s11 + $0x68] sm:$0xff]  }
 0xd96   : > { %v1930_v49 = vpop.xlane.xlu1 %1929 }
 0xd97   : > { %v1931_v50 = vsub.f32 %v1927_v63, %v1930_v49  ;;  %v2476_v63 = vld [vmem:[%s3651_s8 + $0x1] ss:$0 sm:$0xff] }
 0xd98   : > { %v2893_v49 = vld [vmem:[%s3654_s11 + $0x60] sm:$0xff]  }
 0xd99   : > { %v1932_v51 = vmul.f32 1.442695, %v1931_v50  ;;  %v2894_v50 = vld [vmem:[%s3654_s11 + $0x58] sm:$0xff]  }
 0xd9b   : > { %2950 = vpow2.f32 %v1932_v51  ;;  %v2895_v51 = vld [vmem:[%s3654_s11 + $0x50] sm:$0xff]  }
 0xda8   : > { %v2951_v3 = vpop.eup %2950 }
 0xda9   : > { %v1934_v45 = vsel %vm1049_vm5, %v2951_v3, 0.0 }
 0xdaa   : > { %1935 = vadd.xlane.f32.xlu1 %v1934_v45  ;;  %v2897_v45 = vld [vmem:[%s3654_s11 + $0x40] sm:$0xff]  }
 0xde6   : > { %v1881_v52 = vpop.xlane.xlu0 %1880 }
 0xde7   : > { %2952 = vrcp.f32 %v1881_v52  ;;  %v2482_v52 = vld [vmem:[%s3653_s10 + $0x1] ss:$0 sm:$0xff] }
 0xdf4   : > { %v2953_v56 = vpop.eup %2952 }
 0xdf5   : > { %v1883_v58 = vmul.f32 %v2953_v56, %v2949_v47  ;;  %v2891_v47 = vld [vmem:[%s3654_s11 + $0x70] sm:$0xff]  }
 0xdf7   : > { %1886 = vperm.xlu0 %2858, %v1883_v58   ;;  %1891 = vperm.xlu1 %2859, %v1883_v58  }
 0xdfb   : > { %2860 = vset.pattern.permute.xlu1 %v2993_v1  ;;  %2869 = vset.pattern.permute.xlu0 %v2993_v1 }
 0xdfc   : > { %1897 = vperm.xlu1 %2860, %v1883_v58  }
 0xe00   : > { %2861 = vset.pattern.permute.xlu1 %v2992_v54 }
 0xe33   : > { %v1936_v59 = vpop.xlane.xlu1 %1935 }
 0xe34   : > { %2954 = vrcp.f32 %v1936_v59 }
 0xe41   : > { %v2955_v60 = vpop.eup %2954 }
 0xe42   : > { %v1938_v0 = vmul.f32 %v2955_v60, %v2951_v3  ;;  %v2896_v3 = vld [vmem:[%s3654_s11 + $0x48] sm:$0xff]  }
 0xe44   : > { %1941 = vperm.xlu1 %2861, %v1938_v0  }
 0xe48   : > { %2862 = vset.pattern.permute.xlu1 %v2991_v53  ;;  %v2887_v53 = vld [vmem:[%s3648_s5 + $0x10] sm:$0xff]  }
 0xe49   : > { %1946 = vperm.xlu1 %2862, %v1938_v0   ;;  %2759 = vmatpush3.bf16.msra.mxu0 %v2887_v53 }
 0xe4a   : > { %2772 = vmatprep.subr.bf16.mxu0 %v2986_v25 }
 0xe4d   : > { %2863 = vset.pattern.permute.xlu1 %v2993_v1 }
 0xe4e   : > { %1952 = vperm.xlu1 %2863, %v1938_v0  }
 0xe72   : > { %v1892_v9 = vpop.permute.xlu1 %1891  ;;  %v1887_v11 = vpop.permute.xlu0 %1886 }
 0xe73   : > { %v1889_v14 = vmul.f32 %v1887_v11, %v3489_v57  ;;  %v1894_v1 = vmul.f32 %v1892_v9, %v3493_v2 }
 0xe75   : > { %v1895_v5 = vadd.f32 %v1894_v1, %v1889_v14 }
 0xe77   : > { %v1898_v54 = vpop.permute.xlu1 %1897 }
 0xe78   : > { %v1900_v16 = vmul.f32 %v1898_v54, %v3497_v12 }
 0xe7a   : > { %v1901_v20 = vadd.f32 %v1900_v16, %v1895_v5  ;;  %v2503_v16 = vld [vmem:[%s3655_s12 + $0x1] ss:$0 sm:$0xff] }
 0xebf   : > { %v1942_v10 = vpop.permute.xlu1 %1941 }
 0xec0   : > { %v1944_v17 = vmul.f32 %v1942_v10, %v3489_v57  ;;  %v2469_v57 = vld [vmem:[%s3649_s6 + $0x1] ss:$0 sm:$0xff] }
 0xec4   : > { %v1947_v13 = vpop.permute.xlu1 %1946 }
 0xec5   : > { %v1949_v61 = vmul.f32 %v1947_v13, %v3493_v2 }
 0xec7   : > { %v1950_v8 = vadd.f32 %v1949_v61, %v1944_v17 }
 0xec9   : > { %v1953_v18 = vpop.permute.xlu1 %1952 }
 0xeca   : > { %v1955_v19 = vmul.f32 %v1953_v18, %v3497_v12 }
 0xecc   : > { %v1956_v15 = vadd.f32 %v1955_v19, %v1950_v8 }
 0xece   : > { %v2864_v21 = vpack.i.bf16 %v1956_v15, %v1901_v20 }
 0xed0   : > { %2865 = vrot.lane.b32.xlu1 %v2864_v21, %s2990_s26 }
 0xf42   : > { %v2866_v22 = vpop.permute.xlu1 %2865 }
 0xf43   : > { %v2868_v23 = vunpack.i.h.bf16 %v2866_v22  ;;  %v2867_v2 = vunpack.i.l.bf16 %v2866_v22 }
 0xf45   : > { %v1965_v4 = vsel %vm790_vm2, %v2867_v2, %v2868_v23 }
 0xf46   : > { %v1966_v24 = vpack.c.bf16 %v1965_v4, %v1965_v4 }
 0xf48   : > { %2761 = vmatmul.mubr.msk.bf16.vlgmr.msra.gmra.mxu0 %vm571_vm0, %v1966_v24  ;;  %v2898_v24 = vld [vmem:[%s3658_s15 + $0x8] sm:$0xff]  }
 0xf49   : > { %2788 = vmatprep.mubr.msk.bf16.mxu0 %vm2987_vm1, %v2986_v25  ;;  %2773 = vmatpush3.bf16.msra.mxu0 %v2890_v6 }
 0xf4a   : > { %2774 = vmatprep.subr.bf16.mxu0 %v2986_v25 }
 0xf4d   : > { %2775 = vmatpush3.bf16.msra.mxu0 %v2891_v47 }
 0xf4e   : > { %2776 = vmatprep.subr.bf16.mxu0 %v2986_v25 }
 0xf51   : > { %2777 = vmatpush3.bf16.msra.mxu0 %v2892_v48 }
 0xf52   : > { %2778 = vmatprep.subr.bf16.mxu0 %v2986_v25 }
 0xf55   : > { %2779 = vmatpush3.bf16.msra.mxu0 %v2893_v49 }
 0xf56   : > { %2780 = vmatprep.subr.bf16.mxu0 %v2986_v25 }
 0xf59   : > { %2781 = vmatpush3.bf16.msra.mxu0 %v2894_v50 }
 0xf5a   : > { %2782 = vmatprep.subr.bf16.mxu0 %v2986_v25 }
 0xf5d   : > { %2783 = vmatpush3.bf16.msra.mxu0 %v2895_v51 }
 0xf5e   : > { %2784 = vmatprep.subr.bf16.mxu0 %v2986_v25 }
 0xf61   : > { %2785 = vmatpush3.bf16.msra.mxu0 %v2896_v3 }
 0xf62   : > { %2786 = vmatprep.subr.bf16.mxu0 %v2986_v25 }
 0xf65   : > { %2787 = vmatpush3.bf16.msra.mxu0 %v2897_v45 }
0x1008   : > { %v2029_v12 = vpop.f32.mrf.mxu0 }
0x1009   : > { %v2030_v26 = vadd.f32 %v2469_v57, %v2029_v12  ;;  %v2899_v57 = vld [vmem:[%s3658_s15] sm:$0xff]  }
0x100a   : > { %v2762_v27 = vpop.f32.mrf.mxu0 }
0x100b   : > { %v3549_v28 = vadd.f32 %v2030_v26, %v3452_v62  ;;  %v2889_v62 = vld [vmem:[%s3652_s9 + $0x10] sm:$0xff]  }
0x100c   : > { %v2032_v29 = vpop.f32.mrf.mxu0  ;;  %2767 = vmatpush3.bf16.msra.mxu1 %v2889_v62 }
0x100d   : > { %v2040_v30 = vsel %vm571_vm0, %v3549_v28, 0.0  ;;  %2792 = vmatprep.subr.bf16.mxu1 %v2986_v25  ;;  %v2512_v29 = vld [vmem:[%s3656_s13] ss:$0 sm:$0xff] }
0x100e   : > { %2041 = vadd.xlane.f32.xlu1 %v2040_v30  ;;  %v2763_v31 = vpop.f32.mrf.mxu0 }
0x100f   : > { %v2513_v31 = vld [vmem:[%s3657_s14] ss:$0 sm:$0xff] }
0x1097   : > { %v2042_v32 = vpop.xlane.xlu1 %2041 }
0x1098   : > { %v2043_v33 = vmul.f32 0.03125, %v2042_v32 }
0x109a   : > { %v2044_v34 = vsub.f32 %v3549_v28, %v2043_v33 }
0x109c   : > { %v2045_v35 = vmul.f32 %v2044_v34, %v2044_v34 }
0x109e   : > { %v2046_v36 = vsel %vm571_vm0, %v2045_v35, 0.0 }
0x109f   : > { %2047 = vadd.xlane.f32.xlu0 %v2046_v36 }
0x1128   : > { %v2048_v38 = vpop.xlane.xlu0 %2047 }
0x1129   : > { %v2049_v39 = vmul.f32 0.03125, %v2048_v38 }
0x112b   : > { %v2050_v44 = vadd.f32 1e-05, %v2049_v39 }
0x112d   : > { %2956 = vrsqrt.f32 %v2050_v44 }
0x113a   : > { %v2957_v40 = vpop.eup %2956 }
0x113b   : > { %v2052_v42 = vmul.f32 %v2957_v40, %v2044_v34 }
0x113d   : > { %v2059_v43 = vmul.f32 %v2475_v41, %v2052_v42 }
0x113f   : > { %v2066_v55 = vadd.f32 %v2476_v63, %v2059_v43 }
0x1141   : > { %v2067_v46 = vpack.c.bf16 %v2066_v55, %v2066_v55 }
0x1143   : > { %2769 = vmatmul.mubr.msk.bf16.vlgmr.msra.gmra.mxu1 %vm571_vm0, %v2067_v46 }
0x1144   : > { %2796 = vmatprep.mubr.msk.bf16.mxu1 %vm2987_vm1, %v2986_v25  ;;  %2793 = vmatpush3.bf16.msra.mxu1 %v2898_v24 }
0x1145   : > { %2794 = vmatprep.subr.bf16.mxu1 %v2986_v25 }
0x1148   : > { %2795 = vmatpush3.bf16.msra.mxu1 %v2899_v57 }
0x1203   : > { %v2130_v56 = vpop.f32.mrf.mxu1 }
0x1204   : > { %v2131_v58 = vadd.f32 %v2482_v52, %v2130_v56 }
0x1205   : > { %v2770_v59 = vpop.f32.mrf.mxu1 }
0x1206   : > { %v2137_v60 = vmul.f32 0.044715, %v2131_v58  ;;  %v2136_v53 = vmul.f32 0.5, %v2131_v58 }
0x1207   : > { %v2133_v0 = vpop.f32.mrf.mxu1 }
0x1208   : > { %v2138_v7 = vmul.f32 %v2137_v60, %v2131_v58 }
0x1209   : > { %v2771_v9 = vpop.f32.mrf.mxu1 }
0x120a   : > { %v2139_v54 = vmul.f32 %v2138_v7, %v2131_v58 }
0x120c   : > { %v2140_v10 = vadd.f32 %v2139_v54, %v2131_v58 }
0x120e   : > { %v2141_v11 = vmul.f32 0.7978846, %v2140_v10 }
0x1210   : > { %2958 = vtanh.f32 %v2141_v11 }
0x121d   : > { %v2959_v13 = vpop.eup %2958 }
0x121e   : > { %v2143_v14 = vadd.f32 1.0, %v2959_v13 }
0x1220   : > { %v2144_v1 = vmul.f32 %v2143_v14, %v2136_v53 }
0x1222   : > { %v2145_v61 = vpack.c.bf16 %v2144_v1, %v2144_v1 }
0x1224   : > { %2789 = vmatmul.mubr.bf16.vlgmr.msra.gmra.mxu0 %v2145_v61 }
0x12e4   : > { %v2253_v17 = vpop.f32.mrf.mxu0 }
0x12e5   : > { %v2254_v18 = vadd.f32 %v2503_v16, %v2253_v17 }
0x12e6   : > { %v2790_v5 = vpop.f32.mrf.mxu0 }
0x12e7   : > { %v2259_v8 = vadd.f32 %v2254_v18, %v3549_v28 }
0x12e8   : > { %v2256_v19 = vpop.f32.mrf.mxu0 }
0x12e9   : > { %v2262_v20 = vsel %vm571_vm0, %v2259_v8, 0.0 }
0x12ea   : > { %2263 = vadd.xlane.f32.xlu0 %v2262_v20  ;;  %v2791_v15 = vpop.f32.mrf.mxu0 }
0x1373   : > { %v2264_v21 = vpop.xlane.xlu0 %2263 }
0x1374   : > { %v2265_v22 = vmul.f32 0.03125, %v2264_v21 }
0x1376   : > { %v2266_v23 = vsub.f32 %v2259_v8, %v2265_v22 }
0x1378   : > { %v2267_v2 = vmul.f32 %v2266_v23, %v2266_v23 }
0x137a   : > { %v2268_v4 = vsel %vm571_vm0, %v2267_v2, 0.0 }
0x137b   : > { %2269 = vadd.xlane.f32.xlu1 %v2268_v4 }
0x1404   : > { %v2270_v12 = vpop.xlane.xlu1 %2269 }
0x1405   : > { %v2271_v26 = vmul.f32 0.03125, %v2270_v12 }
0x1407   : > { %v2272_v27 = vadd.f32 1e-05, %v2271_v26 }
0x1409   : > { %2960 = vrsqrt.f32 %v2272_v27 }
0x1416   : > { %v2961_v28 = vpop.eup %2960 }
0x1417   : > { %v2274_v30 = vmul.f32 %v2961_v28, %v2266_v23 }
0x1419   : > { %v2281_v32 = vmul.f32 %v2512_v29, %v2274_v30 }
0x141b   : > { %v2288_v33 = vadd.f32 %v2513_v31, %v2281_v32 }
0x141d   : > { %v2289_v34 = vpack.c.bf16 %v2288_v33, %v2288_v33 }
0x141f   : > { %2797 = vmatmul.mubr.msk.bf16.vlgmr.msra.gmra.mxu1 %vm571_vm0, %v2289_v34 }
0x14df   : > { %v2343_v25 = vpop.f32.mrf.mxu1 }
0x14e0   : > { %2349 = vst [vmem:[%s562_s29] sm:$0xff] %v2343_v25 }
0x14e1   : > { %v2798_v35 = vpop.f32.mrf.mxu1 }
0x14e3   : > { %v2346_v36 = vpop.f32.mrf.mxu1 }
0x14e5   : > { %v2799_v37 = vpop.f32.mrf.mxu1 }
0x14e6 PF: > { %p23_p9 = scmp.ge.s32.totalorder %s3096_s25, 5   ;;  %s3662_s21 = smov %s2980_s22 }
0x14e7   : > { %s3663_s22 = smov %s3105_s28  ;;  %s3664_s23 = smov %s3096_s25 }
0x14e8   :  { %25 = sbr.rel (!%p23_p9) target bundleno = 4 (0x4), region = 171 }

// kernel: forward.9
= control target key start
LH: loop header
LB: loop body
LE: loop exit
PB: predicated region body
PF: predicated region fallthrough
CT: control target
= control target key end

     0   :  { %s2299_s24 = smov 0   ;;  %s2631_s0 = inlined_call_operand.vmem [shape: f32[1,48,32], index: 0, kind: input, shape index: {}]   ;;  %s2632_s1 = inlined_call_operand.vmem [shape: s32[48,1], index: 1, kind: input, shape index: {}]   ;;  %s2633_s2 = inlined_call_operand.vmem [shape: f32[2,1,32], index: 2, kind: input, shape index: {}]   ;;  %s2634_s3 = inlined_call_operand.vmem [shape: f32[2,1,32], index: 3, kind: input, shape index: {}]   ;;  %s2635_s4 = inlined_call_operand.vmem [shape: bf16[2,32,96], index: 4, kind: input, shape index: {}]   ;;  %s2636_s5 = inlined_call_operand.vmem [shape: f32[2,1,96], index: 5, kind: input, shape index: {}]   ;;  %s2637_s6 = inlined_call_operand.vmem [shape: bf16[2,32,32], index: 6, kind: input, shape index: {}]   ;;  %s2638_s7 = inlined_call_operand.vmem [shape: f32[2,1,32], index: 7, kind: input, shape index: {}]   ;;  %s2639_s8 = inlined_call_operand.vmem [shape: f32[2,1,32], index: 8, kind: input, shape index: {}]   ;;  %s2640_s9 = inlined_call_operand.vmem [shape: f32[2,1,32], index: 9, kind: input, shape index: {}]   ;;  %s2641_s10 = inlined_call_operand.vmem [shape: bf16[2,32,128], index: 10, kind: input, shape index: {}]   ;;  %s2642_s11 = inlined_call_operand.vmem [shape: f32[2,1,128], index: 11, kind: input, shape index: {}]   ;;  %s2643_s12 = inlined_call_operand.vmem [shape: bf16[2,128,32], index: 12, kind: input, shape index: {}]   ;;  %s2644_s13 = inlined_call_operand.vmem [shape: f32[2,1,32], index: 13, kind: input, shape index: {}]   ;;  %s2645_s14 = inlined_call_operand.vmem [shape: f32[1,32], index: 14, kind: input, shape index: {}]   ;;  %s2646_s15 = inlined_call_operand.vmem [shape: f32[1,32], index: 15, kind: input, shape index: {}]   ;;  %s2647_s16 = inlined_call_operand.vmem [shape: bf16[32,128], index: 16, kind: input, shape index: {}]   ;;  %s2648_s17 = inlined_call_operand.vmem [shape: f32[48,1], index: 17, kind: output, shape index: {}]  }
   0x1   :  { %2649 = sst [smem:[#allocation2_spill]] %s2631_s0 }
   0x2   :  { %2650 = sst [smem:[#allocation3_spill]] %s2632_s1 }
   0x3 LB: > { %s1822_s25 = sadd.s32 4294967295, %s2201_s24   ;;  %p1826_p0 = scmp.ge.s32.totalorder %s2201_s24, 1  ;;  %s2201_s24 = sphi %s2299_s24, %s27_s24  }
   0x4   : > { %p499_p1 = scmp.lt.s32.totalorder %s2201_s24, 4 }
   0x6   : > { %p500_p2 = pnand %p1826_p0, %p499_p1 }
   0x7   : > { %s1827_s26 = sshll.u32 (!%p500_p2), %s1822_s25, 1  ;;  %s2651_s0 = sld [smem:[#allocation2_spill]] (!%p500_p2) }
   0x8   : > { %503 = sbr.rel (%p500_p2) target bundleno = 4805 (0x12c5), region = 88  ;;  %p557_p3 = scmp.lt.s32.totalorder (!%p500_p2), %s1827_s26, 5 }
   0x9   : > { %s2205_s29 = smov (!%p500_p2), 96   ;;  %s2207_s19 = smov (!%p500_p2), 64  }
   0xa   : > { %s2652_s25 = sld [smem:[#allocation3_spill]] (!%p500_p2) }
   0xd   : > { %s2654_s26 = smov (!%p557_p3, %s1827_s26), 5  ;;  %vm579_vm0 = vcmask 261120   ;;  %v2097_v14 = vld [vmem:[%s2635_s4 + $0x8] sm:$0xff]   ;;  %v2203_v15 = vmov 0.0   ;;  %vm2204_vm1 = vmmov 0   ;;  %v2098_v16 = vld [vmem:[%s2635_s4] sm:$0xff]  }
   0xe   : > { %s2307_s27 = sshll.u32 %s2654_s26, 3  ;;  %1965 = vmatprep.subr.bf16.mxu1 %v2203_v15  ;;  %1969 = vmatprep.mubr.msk.bf16.mxu1 %vm2204_vm1, %v2203_v15  ;;  %v1833_v25 = vld [vmem:[%s2633_s2] ss:$0 sm:$0xff]  ;;  %vm701_vm2 = vcmask 130048   ;;  %v2099_v61 = vld [vmem:[%s2637_s6 + $0x8] sm:$0xff]   ;;  %vm1751_vm5 = vcmask 7168  }
   0xf   : > { %s560_s30 = scalar_lea.vmem %s2651_s0, %s2307_s27  ;;  %1966 = vmatpush3.bf16.msra.mxu1 %v2097_v14  ;;  %1981 = vmatprep.subr.bf16.mxu0 %v2203_v15  ;;  %v1834_v29 = vld [vmem:[%s2634_s3] ss:$0 sm:$0xff]  ;;  %s2206_s0 = smov 112  }
  0x10   : > { %v2313_v0 = vld [vmem:[%s560_s30] sm:$0xff]  ;;  %v2315_v1 = vld [vmem:[%s560_s30 + $0x8] sm:$0xff]  ;;  %1967 = vmatprep.subr.bf16.mxu1 %v2203_v15  ;;  %1985 = vmatprep.mubr.msk.bf16.mxu0 %vm2204_vm1, %v2203_v15  ;;  %s572_s30 = scalar_lea.vmem %s2648_s17, %s2307_s27 }
  0x11   : > { %v580_v2 = vsel %vm579_vm0, %v2313_v0, 0.0  ;;  %v583_v3 = vsel %vm579_vm0, %v2315_v1, 0.0  ;;  %v1835_v34 = vld [vmem:[%s2636_s5] ss:$0 sm:$0xff] }
  0x12   : > { %581 = vadd.xlane.f32.xlu0 %v580_v2 }
  0x13   : > { %1968 = vmatpush3.bf16.msra.mxu1 %v2098_v16 }
  0x14   : > { %1973 = vmatprep.subr.bf16.mxu1 %v2203_v15 }
  0x16   : > { %584 = vadd.xlane.f32.xlu0 %v583_v3 }
  0x9b   : > { %v582_v4 = vpop.xlane.xlu0 %581 }
  0x9c   : > { %v587_v5 = vmul.f32 0.03125, %v582_v4 }
  0x9e   : > { %v589_v6 = vsub.f32 %v2313_v0, %v587_v5 }
  0x9f   : > { %v585_v7 = vpop.xlane.xlu0 %584 }
  0xa0   : > { %v588_v8 = vmul.f32 0.03125, %v585_v7  ;;  %v591_v9 = vmul.f32 %v589_v6, %v589_v6 }
  0xa2   : > { %v590_v10 = vsub.f32 %v2315_v1, %v588_v8  ;;  %v593_v11 = vsel %vm579_vm0, %v591_v9, 0.0 }
  0xa3   : > { %594 = vadd.xlane.f32.xlu1 %v593_v11 }
  0xa4   : > { %v592_v12 = vmul.f32 %v590_v10, %v590_v10 }
  0xa6   : > { %v596_v13 = vsel %vm579_vm0, %v592_v12, 0.0 }
  0xa7   : > { %597 = vadd.xlane.f32.xlu1 %v596_v13 }
 0x12c   : > { %v595_v17 = vpop.xlane.xlu1 %594 }
 0x12d   : > { %v599_v18 = vmul.f32 0.03125, %v595_v17 }
 0x12f   : > { %v601_v19 = vadd.f32 1e-05, %v599_v18  ;;  %v2100_v18 = vld [vmem:[%s2637_s6] sm:$0xff]  }
 0x130   : > { %v598_v20 = vpop.xlane.xlu1 %597 }
 0x131   : > { %2127 = vrsqrt.f32 %v601_v19  ;;  %v600_v21 = vmul.f32 0.03125, %v598_v20 }
 0x133   : > { %v602_v22 = vadd.f32 1e-05, %v600_v21 }
 0x135   : > { %2129 = vrsqrt.f32 %v602_v22 }
 0x13e   : > { %v2128_v23 = vpop.eup %2127 }
 0x13f   : > { %v605_v24 = vmul.f32 %v2128_v23, %v589_v6 }
 0x141   : > { %v613_v28 = vmul.f32 %v1833_v25, %v605_v24 }
 0x142   : > { %v2130_v26 = vpop.eup %2129 }
 0x143   : > { %v606_v27 = vmul.f32 %v2130_v26, %v590_v10  ;;  %v621_v31 = vadd.f32 %v1834_v29, %v613_v28 }
 0x145   : > { %v614_v30 = vmul.f32 %v1833_v25, %v606_v27 }
 0x147   : > { %v622_v32 = vadd.f32 %v1834_v29, %v614_v30 }
 0x149   : > { %v623_v33 = vpack.c.bf16 %v622_v32, %v621_v31 }
 0x14b   : > { %1970 = vmatmul.mubr.msk.bf16.vlgmr.msra.gmra.mxu1 %vm579_vm0, %v623_v33 }
 0x14c   : > { %1977 = vmatprep.mubr.msk.bf16.mxu1 %vm2204_vm1, %v2203_v15  ;;  %1974 = vmatpush3.bf16.msra.mxu1 %v2099_v61 }
 0x14d   : > { %1975 = vmatprep.subr.bf16.mxu1 %v2203_v15 }
 0x150   : > { %1976 = vmatpush3.bf16.msra.mxu1 %v2100_v18  ;;  %v2109_v18 = vld [vmem:[%s2643_s12 + $0x8] sm:$0xff]  }
 0x151   : > { %1989 = vmatprep.subr.bf16.mxu1 %v2203_v15 }
 0x20b   : > { %v684_v35 = vpop.f32.mrf.mxu1 }
 0x20c   : > { %v2351_v36 = vadd.f32 %v1835_v34, %v684_v35  ;;  %v1839_v35 = vld [vmem:[%s2638_s7] ss:$0 sm:$0xff] }
 0x20d   : > { %v1971_v37 = vpop.f32.mrf.mxu1 }
 0x20e   : > { %693 = vrot.lane.b32.xlu0 %v2351_v36, %s2205_s29 }
 0x20f   : > { %v687_v38 = vpop.f32.mrf.mxu1 }
 0x210   : > { %v2355_v39 = vadd.f32 %v1835_v34, %v687_v38 }
 0x211   : > { %v1972_v40 = vpop.f32.mrf.mxu1 }
 0x212   : > { %695 = vrot.lane.b32.xlu1 %v2355_v39, %s2205_s29 }
 0x280   : > { %v694_v41 = vpop.permute.xlu0 %693 }
 0x281   : > { %v699_v42 = vmul.f32 %v694_v41, %v2351_v36 }
 0x283   : > { %726 = vrot.lane.b32.xlu1 %v699_v42, %s2206_s0  ;;  %v702_v43 = vsel %vm701_vm2, %v699_v42, 0.0 }
 0x284   : > { %703 = vadd.xlane.f32.xlu0 %v702_v43  ;;  %v696_v44 = vpop.permute.xlu1 %695 }
 0x285   : > { %v700_v45 = vmul.f32 %v696_v44, %v2355_v39 }
 0x287   : > { %728 = vrot.lane.b32.xlu1 %v700_v45, %s2206_s0  ;;  %v705_v46 = vsel %vm701_vm2, %v700_v45, 0.0 }
 0x2ab   : > { %706 = vadd.xlane.f32.xlu1 %v705_v46 }
 0x2f5   : > { %v727_v47 = vpop.permute.xlu1 %726 }
 0x2f6   : > { %v732_v48 = vsel %vm701_vm2, %v727_v47, 0.0 }
 0x2f7   : > { %733 = vadd.xlane.f32.xlu0 %v732_v48 }
 0x2f9   : > { %v729_v49 = vpop.permute.xlu1 %728 }
 0x2fa   : > { %v735_v50 = vsel %vm701_vm2, %v729_v49, 0.0 }
 0x2fb   : > { %736 = vadd.xlane.f32.xlu0 %v735_v50 }
 0x30d   : > { %v704_v51 = vpop.xlane.xlu0 %703 }
 0x30e   : > { %v708_v52 = vmul.f32 0.25, %v704_v51 }
 0x310   : > { %v710_v53 = vsub.f32 %v708_v52, %v708_v52 }
 0x312   : > { %v712_v54 = vmul.f32 1.442695, %v710_v53 }
 0x314   : > { %2131 = vpow2.f32 %v712_v54  ;;  %v2101_v54 = vld [vmem:[%s2641_s10 + $0x8] sm:$0xff]  }
 0x315   : > { %1982 = vmatpush3.bf16.msra.mxu0 %v2101_v54 }
 0x316   : > { %1983 = vmatprep.subr.bf16.mxu0 %v2203_v15 }
 0x321   : > { %v2132_v59 = vpop.eup %2131 }
 0x334   : > { %v707_v55 = vpop.xlane.xlu1 %706 }
 0x335   : > { %v709_v56 = vmul.f32 0.25, %v707_v55  ;;  %v2102_v55 = vld [vmem:[%s2641_s10] sm:$0xff]  }
 0x336   : > { %1984 = vmatpush3.bf16.msra.mxu0 %v2102_v55 }
 0x337   : > { %v711_v57 = vsub.f32 %v709_v56, %v709_v56  ;;  %2009 = vmatprep.subr.bf16.mxu0 %v2203_v15 }
 0x339   : > { %v714_v58 = vmul.f32 1.442695, %v711_v57 }
 0x33b   : > { %2133 = vpow2.f32 %v714_v58 }
 0x33c   : > { %2135 = vrcp.f32 %v2132_v59 }
 0x348   : > { %v2134_v60 = vpop.eup %2133 }
 0x349   : > { %2137 = vrcp.f32 %v2134_v60  ;;  %v2136_v62 = vpop.eup %2135 }
 0x34a   : > { %v719_v63 = vmul.f32 %v2136_v62, %v2132_v59 }
 0x34c   : > { %v722_v4 = vmul.f32 %v719_v63, %v2351_v36 }
 0x356   : > { %v2138_v2 = vpop.eup %2137 }
 0x357   : > { %v721_v3 = vmul.f32 %v2138_v2, %v2134_v60  ;;  %v1843_v2 = vld [vmem:[%s2639_s8] ss:$0 sm:$0xff] }
 0x359   : > { %v723_v5 = vmul.f32 %v721_v3, %v2355_v39 }
 0x35b   : > { %v2075_v6 = vpack.i.bf16 %v723_v5, %v722_v4 }
 0x35d   : > { %2076 = vrot.lane.b32.xlu0 %v2075_v6, %s2207_s19  ;;  %v1844_v6 = vld [vmem:[%s2640_s9] ss:$0 sm:$0xff] }
 0x380   : > { %v734_v7 = vpop.xlane.xlu0 %733 }
 0x381   : > { %v738_v8 = vmul.f32 0.25, %v734_v7 }
 0x383   : > { %v740_v9 = vsub.f32 %v738_v8, %v738_v8 }
 0x384   : > { %v737_v10 = vpop.xlane.xlu0 %736 }
 0x385   : > { %v742_v11 = vmul.f32 1.442695, %v740_v9  ;;  %v739_v12 = vmul.f32 0.25, %v737_v10 }
 0x387   : > { %2139 = vpow2.f32 %v742_v11  ;;  %v741_v13 = vsub.f32 %v739_v12, %v739_v12  ;;  %v2103_v11 = vld [vmem:[%s2643_s12 + $0x38] sm:$0xff]   ;;  %v2104_v12 = vld [vmem:[%s2643_s12 + $0x30] sm:$0xff]  }
 0x389   : > { %v744_v14 = vmul.f32 1.442695, %v741_v13  ;;  %v2105_v13 = vld [vmem:[%s2643_s12 + $0x28] sm:$0xff]  }
 0x38b   : > { %2141 = vpow2.f32 %v744_v14  ;;  %v2106_v14 = vld [vmem:[%s2643_s12 + $0x20] sm:$0xff]  }
 0x394   : > { %v2140_v16 = vpop.eup %2139 }
 0x395   : > { %2143 = vrcp.f32 %v2140_v16 }
 0x398   : > { %v2142_v17 = vpop.eup %2141 }
 0x399   : > { %2145 = vrcp.f32 %v2142_v17 }
 0x3a2   : > { %v2144_v19 = vpop.eup %2143 }
 0x3a3   : > { %v749_v20 = vmul.f32 %v2144_v19, %v2140_v16  ;;  %v2107_v16 = vld [vmem:[%s2643_s12 + $0x18] sm:$0xff]   ;;  %v2110_v19 = vld [vmem:[%s2643_s12] sm:$0xff]  }
 0x3a5   : > { %v752_v23 = vmul.f32 %v749_v20, %v2351_v36  ;;  %v1845_v20 = vld [vmem:[%s2642_s11] ss:$0 sm:$0xff] }
 0x3a6   : > { %v2146_v21 = vpop.eup %2145 }
 0x3a7   : > { %v751_v22 = vmul.f32 %v2146_v21, %v2142_v17  ;;  %v2108_v17 = vld [vmem:[%s2643_s12 + $0x10] sm:$0xff]  }
 0x3a9   : > { %v753_v24 = vmul.f32 %v751_v22, %v2355_v39 }
 0x3ab   : > { %v2080_v25 = vpack.i.bf16 %v753_v24, %v752_v23 }
 0x3ad   : > { %2081 = vrot.lane.b32.xlu1 %v2080_v25, %s2207_s19 }
 0x3cf   : > { %v2077_v26 = vpop.permute.xlu0 %2076 }
 0x3d0   : > { %v2079_v28 = vunpack.i.h.bf16 %v2077_v26  ;;  %v2078_v29 = vunpack.i.l.bf16 %v2077_v26 }
 0x41f   : > { %v2082_v27 = vpop.permute.xlu1 %2081 }
 0x420   : > { %v2084_v30 = vunpack.i.h.bf16 %v2082_v27  ;;  %v2083_v31 = vunpack.i.l.bf16 %v2082_v27 }
 0x422   : > { %v771_v32 = vsel %vm701_vm2, %v2079_v28, %v2084_v30  ;;  %v770_v33 = vsel %vm701_vm2, %v2078_v29, %v2083_v31 }
 0x423   : > { %v772_v34 = vpack.c.bf16 %v771_v32, %v770_v33 }
 0x425   : > { %1978 = vmatmul.mubr.msk.bf16.vlgmr.msra.gmra.mxu1 %vm579_vm0, %v772_v34 }
 0x426   : > { %2005 = vmatprep.mubr.msk.bf16.mxu1 %vm2204_vm1, %v2203_v15  ;;  %1990 = vmatpush3.bf16.msra.mxu1 %v2103_v11 }
 0x427   : > { %1991 = vmatprep.subr.bf16.mxu1 %v2203_v15 }
 0x42a   : > { %1992 = vmatpush3.bf16.msra.mxu1 %v2104_v12 }
 0x42b   : > { %1993 = vmatprep.subr.bf16.mxu1 %v2203_v15 }
 0x42e   : > { %1994 = vmatpush3.bf16.msra.mxu1 %v2105_v13  ;;  %v1860_v13 = vld [vmem:[%s2633_s2 + $0x1] ss:$0 sm:$0xff] }
 0x42f   : > { %1995 = vmatprep.subr.bf16.mxu1 %v2203_v15 }
 0x432   : > { %1996 = vmatpush3.bf16.msra.mxu1 %v2106_v14 }
 0x433   : > { %1997 = vmatprep.subr.bf16.mxu1 %v2203_v15 }
 0x436   : > { %1998 = vmatpush3.bf16.msra.mxu1 %v2107_v16 }
 0x437   : > { %1999 = vmatprep.subr.bf16.mxu1 %v2203_v15 }
 0x43a   : > { %2000 = vmatpush3.bf16.msra.mxu1 %v2108_v17 }
 0x43b   : > { %2001 = vmatprep.subr.bf16.mxu1 %v2203_v15 }
 0x43e   : > { %2002 = vmatpush3.bf16.msra.mxu1 %v2109_v18  ;;  %v1861_v18 = vld [vmem:[%s2634_s3 + $0x1] ss:$0 sm:$0xff] }
 0x43f   : > { %2003 = vmatprep.subr.bf16.mxu1 %v2203_v15 }
 0x442   : > { %2004 = vmatpush3.bf16.msra.mxu1 %v2110_v19 }
 0x443   : > { %2053 = vmatprep.subr.bf16.mxu1 %v2203_v15 }
 0x4e5   : > { %v833_v36 = vpop.f32.mrf.mxu1 }
 0x4e6   : > { %v834_v37 = vadd.f32 %v1839_v35, %v833_v36 }
 0x4e7   : > { %v1979_v38 = vpop.f32.mrf.mxu1 }
 0x4e8   : > { %v2390_v39 = vadd.f32 %v834_v37, %v2313_v0 }
 0x4e9   : > { %v836_v40 = vpop.f32.mrf.mxu1 }
 0x4ea   : > { %v837_v41 = vadd.f32 %v1839_v35, %v836_v40  ;;  %v844_v42 = vsel %vm579_vm0, %v2390_v39, 0.0 }
 0x4eb   : > { %845 = vadd.xlane.f32.xlu1 %v844_v42  ;;  %v1980_v43 = vpop.f32.mrf.mxu1 }
 0x4ec   : > { %v2395_v44 = vadd.f32 %v837_v41, %v2315_v1 }
 0x4ee   : > { %v847_v45 = vsel %vm579_vm0, %v2395_v44, 0.0 }
 0x4ef   : > { %848 = vadd.xlane.f32.xlu0 %v847_v45 }
 0x574   : > { %v846_v46 = vpop.xlane.xlu1 %845 }
 0x575   : > { %v850_v47 = vmul.f32 0.03125, %v846_v46 }
 0x577   : > { %v852_v48 = vsub.f32 %v2390_v39, %v850_v47 }
 0x578   : > { %v849_v0 = vpop.xlane.xlu0 %848 }
 0x579   : > { %v851_v49 = vmul.f32 0.03125, %v849_v0  ;;  %v854_v50 = vmul.f32 %v852_v48, %v852_v48 }
 0x57b   : > { %v853_v51 = vsub.f32 %v2395_v44, %v851_v49  ;;  %v856_v52 = vsel %vm579_vm0, %v854_v50, 0.0 }
 0x57c   : > { %857 = vadd.xlane.f32.xlu0 %v856_v52 }
 0x57d   : > { %v855_v53 = vmul.f32 %v853_v51, %v853_v51 }
 0x57f   : > { %v859_v1 = vsel %vm579_vm0, %v855_v53, 0.0 }
 0x580   : > { %860 = vadd.xlane.f32.xlu1 %v859_v1 }
 0x605   : > { %v858_v56 = vpop.xlane.xlu0 %857 }
 0x606   : > { %v862_v57 = vmul.f32 0.03125, %v858_v56 }
 0x608   : > { %v864_v58 = vadd.f32 1e-05, %v862_v57 }
 0x609   : > { %v861_v59 = vpop.xlane.xlu1 %860 }
 0x60a   : > { %2147 = vrsqrt.f32 %v864_v58  ;;  %v863_v60 = vmul.f32 0.03125, %v861_v59 }
 0x60c   : > { %v865_v61 = vadd.f32 1e-05, %v863_v60 }
 0x60e   : > { %2149 = vrsqrt.f32 %v865_v61 }
 0x617   : > { %v2148_v62 = vpop.eup %2147 }
 0x618   : > { %v868_v63 = vmul.f32 %v2148_v62, %v852_v48  ;;  %v1849_v48 = vld [vmem:[%s2644_s13] ss:$0 sm:$0xff] }
 0x61a   : > { %v876_v5 = vmul.f32 %v1843_v2, %v868_v63 }
 0x61b   : > { %v2150_v3 = vpop.eup %2149 }
 0x61c   : > { %v869_v4 = vmul.f32 %v2150_v3, %v853_v51  ;;  %v884_v8 = vadd.f32 %v1844_v6, %v876_v5  ;;  %v2111_v3 = vld [vmem:[%s2635_s4 + $0x18] sm:$0xff]  }
 0x61e   : > { %v877_v7 = vmul.f32 %v1843_v2, %v869_v4  ;;  %v2112_v4 = vld [vmem:[%s2635_s4 + $0x10] sm:$0xff]  }
 0x620   : > { %v885_v9 = vadd.f32 %v1844_v6, %v877_v7 }
 0x622   : > { %v886_v10 = vpack.c.bf16 %v885_v9, %v884_v8 }
 0x624   : > { %1986 = vmatmul.mubr.msk.bf16.vlgmr.msra.gmra.mxu0 %vm579_vm0, %v886_v10 }
 0x625   : > { %2013 = vmatprep.mubr.msk.bf16.mxu0 %vm2204_vm1, %v2203_v15  ;;  %2010 = vmatpush3.bf16.msra.mxu0 %v2111_v3 }
 0x626   : > { %2011 = vmatprep.subr.bf16.mxu0 %v2203_v15 }
 0x629   : > { %2012 = vmatpush3.bf16.msra.mxu0 %v2112_v4 }
 0x62a   : > { %2017 = vmatprep.subr.bf16.mxu0 %v2203_v15 }
 0x6e4   : > { %v947_v21 = vpop.f32.mrf.mxu0 }
 0x6e5   : > { %v948_v22 = vadd.f32 %v1845_v20, %v947_v21 }
 0x6e6   : > { %v1987_v23 = vpop.f32.mrf.mxu0 }
 0x6e7   : > { %v956_v24 = vmul.f32 0.044715, %v948_v22  ;;  %v954_v41 = vmul.f32 0.5, %v948_v22  ;;  %v1867_v23 = vld [vmem:[%s2636_s5 + $0x1] ss:$0 sm:$0xff] }
 0x6e8   : > { %v950_v25 = vpop.f32.mrf.mxu0 }
 0x6e9   : > { %v958_v26 = vmul.f32 %v956_v24, %v948_v22  ;;  %v951_v27 = vadd.f32 %v1845_v20, %v950_v25 }
 0x6ea   : > { %v1988_v28 = vpop.f32.mrf.mxu0 }
 0x6eb   : > { %v960_v29 = vmul.f32 %v958_v26, %v948_v22  ;;  %v957_v30 = vmul.f32 0.044715, %v951_v27  ;;  %v955_v42 = vmul.f32 0.5, %v951_v27 }
 0x6ed   : > { %v962_v31 = vadd.f32 %v960_v29, %v948_v22  ;;  %v959_v32 = vmul.f32 %v957_v30, %v951_v27 }
 0x6ef   : > { %v964_v33 = vmul.f32 0.7978846, %v962_v31  ;;  %v961_v34 = vmul.f32 %v959_v32, %v951_v27 }
 0x6f1   : > { %2151 = vtanh.f32 %v964_v33  ;;  %v963_v35 = vadd.f32 %v961_v34, %v951_v27 }
 0x6f3   : > { %v965_v36 = vmul.f32 0.7978846, %v963_v35 }
 0x6f5   : > { %2153 = vtanh.f32 %v965_v36 }
 0x6fe   : > { %v2152_v37 = vpop.eup %2151 }
 0x6ff   : > { %v968_v38 = vadd.f32 1.0, %v2152_v37 }
 0x701   : > { %v970_v45 = vmul.f32 %v968_v38, %v954_v41 }
 0x702   : > { %v2154_v40 = vpop.eup %2153 }
 0x703   : > { %v969_v43 = vadd.f32 1.0, %v2154_v40 }
 0x705   : > { %v971_v46 = vmul.f32 %v969_v43, %v955_v42 }
 0x707   : > { %v972_v47 = vpack.c.bf16 %v971_v46, %v970_v45 }
 0x709   : > { %2006 = vmatmul.mubr.bf16.vlgmr.msra.gmra.mxu1 %v972_v47 }
 0x70a   : > { %2057 = vmatprep.mubr.msk.bf16.mxu1 %vm2204_vm1, %v2203_v15 }
 0x7c9   : > { %v1078_v0 = vpop.f32.mrf.mxu1 }
 0x7ca   : > { %v1079_v49 = vadd.f32 %v1849_v48, %v1078_v0 }
 0x7cb   : > { %v2007_v50 = vpop.f32.mrf.mxu1 }
 0x7cc   : > { %v2461_v51 = vadd.f32 %v1079_v49, %v2390_v39 }
 0x7cd   : > { %v1081_v52 = vpop.f32.mrf.mxu1 }
 0x7ce   : > { %v1082_v53 = vadd.f32 %v1849_v48, %v1081_v52  ;;  %v1091_v1 = vsel %vm579_vm0, %v2461_v51, 0.0  ;;  %v2113_v52 = vld [vmem:[%s2637_s6 + $0x18] sm:$0xff]  }
 0x7cf   : > { %1092 = vadd.xlane.f32.xlu0 %v1091_v1  ;;  %v2008_v54 = vpop.f32.mrf.mxu1 }
 0x7d0   : > { %v2466_v55 = vadd.f32 %v1082_v53, %v2395_v44 }
 0x7d2   : > { %v1094_v56 = vsel %vm579_vm0, %v2466_v55, 0.0 }
 0x7d3   : > { %1095 = vadd.xlane.f32.xlu1 %v1094_v56 }
 0x858   : > { %v1093_v57 = vpop.xlane.xlu0 %1092 }
 0x859   : > { %v1097_v58 = vmul.f32 0.03125, %v1093_v57 }
 0x85b   : > { %v1099_v59 = vsub.f32 %v2461_v51, %v1097_v58 }
 0x85c   : > { %v1096_v39 = vpop.xlane.xlu1 %1095 }
 0x85d   : > { %v1098_v60 = vmul.f32 0.03125, %v1096_v39  ;;  %v1101_v61 = vmul.f32 %v1099_v59, %v1099_v59 }
 0x85f   : > { %v1100_v62 = vsub.f32 %v2466_v55, %v1098_v60  ;;  %v1103_v63 = vsel %vm579_vm0, %v1101_v61, 0.0 }
 0x860   : > { %1104 = vadd.xlane.f32.xlu0 %v1103_v63 }
 0x861   : > { %v1102_v2 = vmul.f32 %v1100_v62, %v1100_v62 }
 0x863   : > { %v1106_v44 = vsel %vm579_vm0, %v1102_v2, 0.0 }
 0x864   : > { %1107 = vadd.xlane.f32.xlu1 %v1106_v44 }
 0x8e9   : > { %v1105_v5 = vpop.xlane.xlu0 %1104 }
 0x8ea   : > { %v1109_v6 = vmul.f32 0.03125, %v1105_v5 }
 0x8ec   : > { %v1111_v7 = vadd.f32 1e-05, %v1109_v6  ;;  %v2114_v6 = vld [vmem:[%s2637_s6 + $0x10] sm:$0xff]  }
 0x8ed   : > { %v1108_v8 = vpop.xlane.xlu1 %1107 }
 0x8ee   : > { %2155 = vrsqrt.f32 %v1111_v7  ;;  %v1110_v9 = vmul.f32 0.03125, %v1108_v8 }
 0x8f0   : > { %v1112_v10 = vadd.f32 1e-05, %v1110_v9 }
 0x8f2   : > { %2157 = vrsqrt.f32 %v1112_v10 }
 0x8fb   : > { %v2156_v11 = vpop.eup %2155 }
 0x8fc   : > { %v1115_v12 = vmul.f32 %v2156_v11, %v1099_v59 }
 0x8fe   : > { %v1123_v17 = vmul.f32 %v1860_v13, %v1115_v12 }
 0x8ff   : > { %v2158_v14 = vpop.eup %2157 }
 0x900   : > { %v1116_v16 = vmul.f32 %v2158_v14, %v1100_v62  ;;  %v1131_v20 = vadd.f32 %v1861_v18, %v1123_v17 }
 0x902   : > { %v1124_v19 = vmul.f32 %v1860_v13, %v1116_v16 }
 0x904   : > { %v1132_v21 = vadd.f32 %v1861_v18, %v1124_v19 }
 0x906   : > { %v1133_v22 = vpack.c.bf16 %v1132_v21, %v1131_v20 }
 0x908   : > { %2014 = vmatmul.mubr.msk.bf16.vlgmr.msra.gmra.mxu0 %vm579_vm0, %v1133_v22 }
 0x909   : > { %2021 = vmatprep.mubr.msk.bf16.mxu0 %vm2204_vm1, %v2203_v15  ;;  %2018 = vmatpush3.bf16.msra.mxu0 %v2113_v52 }
 0x90a   : > { %2019 = vmatprep.subr.bf16.mxu0 %v2203_v15 }
 0x90d   : > { %2020 = vmatpush3.bf16.msra.mxu0 %v2114_v6  ;;  %v2123_v6 = vld [vmem:[%s2643_s12 + $0x48] sm:$0xff]  }
 0x90e   : > { %2025 = vmatprep.subr.bf16.mxu0 %v2203_v15 }
 0x9c8   : > { %v1196_v24 = vpop.f32.mrf.mxu0 }
 0x9c9   : > { %v2494_v25 = vadd.f32 %v1867_v23, %v1196_v24  ;;  %v1876_v24 = vld [vmem:[%s2638_s7 + $0x1] ss:$0 sm:$0xff] }
 0x9ca   : > { %v2015_v26 = vpop.f32.mrf.mxu0 }
 0x9cb   : > { %1205 = vrot.lane.b32.xlu0 %v2494_v25, %s2205_s29 }
 0x9cc   : > { %v1199_v27 = vpop.f32.mrf.mxu0 }
 0x9cd   : > { %v2498_v28 = vadd.f32 %v1867_v23, %v1199_v27 }
 0x9ce   : > { %v2016_v29 = vpop.f32.mrf.mxu0 }
 0x9cf   : > { %1207 = vrot.lane.b32.xlu1 %v2498_v28, %s2205_s29 }
 0xa3d   : > { %v1206_v30 = vpop.permute.xlu0 %1205 }
 0xa3e   : > { %v1211_v31 = vmul.f32 %v1206_v30, %v2494_v25 }
 0xa40   : > { %1237 = vrot.lane.b32.xlu1 %v1211_v31, %s2206_s0  ;;  %v1213_v32 = vsel %vm701_vm2, %v1211_v31, 0.0 }
 0xa41   : > { %1214 = vadd.xlane.f32.xlu0 %v1213_v32  ;;  %v1208_v33 = vpop.permute.xlu1 %1207 }
 0xa42   : > { %v1212_v34 = vmul.f32 %v1208_v33, %v2498_v28 }
 0xa44   : > { %1239 = vrot.lane.b32.xlu1 %v1212_v34, %s2206_s0  ;;  %v1216_v35 = vsel %vm701_vm2, %v1212_v34, 0.0 }
 0xa68   : > { %1217 = vadd.xlane.f32.xlu1 %v1216_v35 }
 0xab2   : > { %v1238_v36 = vpop.permute.xlu1 %1237 }
 0xab3   : > { %v1243_v37 = vsel %vm701_vm2, %v1238_v36, 0.0 }
 0xab4   : > { %1244 = vadd.xlane.f32.xlu0 %v1243_v37 }
 0xab6   : > { %v1240_v38 = vpop.permute.xlu1 %1239 }
 0xab7   : > { %v1246_v40 = vsel %vm701_vm2, %v1240_v38, 0.0 }
 0xab8   : > { %1247 = vadd.xlane.f32.xlu0 %v1246_v40 }
 0xaca   : > { %v1215_v41 = vpop.xlane.xlu0 %1214 }
 0xacb   : > { %v1219_v42 = vmul.f32 0.25, %v1215_v41 }
 0xacd   : > { %v1221_v43 = vsub.f32 %v1219_v42, %v1219_v42 }
 0xacf   : > { %v1223_v45 = vmul.f32 1.442695, %v1221_v43 }
 0xad1   : > { %2159 = vpow2.f32 %v1223_v45  ;;  %v2115_v45 = vld [vmem:[%s2641_s10 + $0x18] sm:$0xff]  }
 0xade   : > { %v2160_v49 = vpop.eup %2159 }
 0xaf1   : > { %v1218_v46 = vpop.xlane.xlu1 %1217 }
 0xaf2   : > { %v1220_v47 = vmul.f32 0.25, %v1218_v46  ;;  %v2116_v46 = vld [vmem:[%s2641_s10 + $0x10] sm:$0xff]  }
 0xaf4   : > { %v1222_v48 = vsub.f32 %v1220_v47, %v1220_v47 }
 0xaf6   : > { %v1225_v0 = vmul.f32 1.442695, %v1222_v48 }
 0xaf8   : > { %2161 = vpow2.f32 %v1225_v0 }
 0xaf9   : > { %2163 = vrcp.f32 %v2160_v49 }
 0xb05   : > { %v2162_v50 = vpop.eup %2161 }
 0xb06   : > { %2165 = vrcp.f32 %v2162_v50  ;;  %v2164_v53 = vpop.eup %2163 }
 0xb07   : > { %v1230_v1 = vmul.f32 %v2164_v53, %v2160_v49 }
 0xb09   : > { %v1233_v57 = vmul.f32 %v1230_v1, %v2494_v25 }
 0xb13   : > { %v2166_v54 = vpop.eup %2165 }
 0xb14   : > { %v1232_v56 = vmul.f32 %v2166_v54, %v2162_v50  ;;  %v1882_v54 = vld [vmem:[%s2639_s8 + $0x1] ss:$0 sm:$0xff] }
 0xb16   : > { %v1234_v58 = vmul.f32 %v1232_v56, %v2498_v28 }
 0xb18   : > { %v2085_v59 = vpack.i.bf16 %v1234_v58, %v1233_v57 }
 0xb1a   : > { %2086 = vrot.lane.b32.xlu0 %v2085_v59, %s2207_s19  ;;  %v1883_v59 = vld [vmem:[%s2640_s9 + $0x1] ss:$0 sm:$0xff] }
 0xb3d   : > { %v1245_v39 = vpop.xlane.xlu0 %1244 }
 0xb3e   : > { %v1249_v60 = vmul.f32 0.25, %v1245_v39 }
 0xb40   : > { %v1251_v61 = vsub.f32 %v1249_v60, %v1249_v60 }
 0xb41   : > { %v1248_v62 = vpop.xlane.xlu0 %1247 }
 0xb42   : > { %v1253_v63 = vmul.f32 1.442695, %v1251_v61  ;;  %v1250_v2 = vmul.f32 0.25, %v1248_v62 }
 0xb44   : > { %2167 = vpow2.f32 %v1253_v63  ;;  %v1252_v44 = vsub.f32 %v1250_v2, %v1250_v2  ;;  %v2117_v63 = vld [vmem:[%s2643_s12 + $0x78] sm:$0xff]   ;;  %v2118_v2 = vld [vmem:[%s2643_s12 + $0x70] sm:$0xff]  }
 0xb46   : > { %v1255_v3 = vmul.f32 1.442695, %v1252_v44  ;;  %v2119_v44 = vld [vmem:[%s2643_s12 + $0x68] sm:$0xff]  }
 0xb48   : > { %2169 = vpow2.f32 %v1255_v3  ;;  %v2120_v3 = vld [vmem:[%s2643_s12 + $0x60] sm:$0xff]  }
 0xb51   : > { %v2168_v4 = vpop.eup %2167 }
 0xb52   : > { %2171 = vrcp.f32 %v2168_v4 }
 0xb55   : > { %v2170_v5 = vpop.eup %2169 }
 0xb56   : > { %2173 = vrcp.f32 %v2170_v5 }
 0xb5f   : > { %v2172_v7 = vpop.eup %2171 }
 0xb60   : > { %v1260_v8 = vmul.f32 %v2172_v7, %v2168_v4  ;;  %v2121_v4 = vld [vmem:[%s2643_s12 + $0x58] sm:$0xff]   ;;  %v2124_v7 = vld [vmem:[%s2643_s12 + $0x40] sm:$0xff]  }
 0xb62   : > { %v1263_v11 = vmul.f32 %v1260_v8, %v2494_v25  ;;  %v1889_v8 = vld [vmem:[%s2642_s11 + $0x1] ss:$0 sm:$0xff] }
 0xb63   : > { %v2174_v9 = vpop.eup %2173 }
 0xb64   : > { %v1262_v10 = vmul.f32 %v2174_v9, %v2170_v5  ;;  %v2122_v5 = vld [vmem:[%s2643_s12 + $0x50] sm:$0xff]  }
 0xb66   : > { %v1264_v12 = vmul.f32 %v1262_v10, %v2498_v28 }
 0xb68   : > { %v2090_v13 = vpack.i.bf16 %v1264_v12, %v1263_v11 }
 0xb6a   : > { %2091 = vrot.lane.b32.xlu1 %v2090_v13, %s2207_s19  ;;  %s566_s19 = scalar_lea.vmem %s2652_s25, %s2307_s27 }
 0xb8c   : > { %v2087_v14 = vpop.permute.xlu0 %2086 }
 0xb8d   : > { %v2089_v17 = vunpack.i.h.bf16 %v2087_v14  ;;  %v2088_v18 = vunpack.i.l.bf16 %v2087_v14 }
 0xbdc   : > { %v2092_v16 = vpop.permute.xlu1 %2091 }
 0xbdd   : > { %v2094_v19 = vunpack.i.h.bf16 %v2092_v16  ;;  %v2093_v20 = vunpack.i.l.bf16 %v2092_v16 }
 0xbdf   : > { %v1282_v21 = vsel %vm701_vm2, %v2089_v17, %v2094_v19  ;;  %v1281_v22 = vsel %vm701_vm2, %v2088_v18, %v2093_v20 }
 0xbe0   : > { %v1283_v23 = vpack.c.bf16 %v1282_v21, %v1281_v22 }
 0xbe2   : > { %2022 = vmatmul.mubr.msk.bf16.vlgmr.msra.gmra.mxu0 %vm579_vm0, %v1283_v23 }
 0xbe3   : > { %2029 = vmatprep.mubr.msk.bf16.mxu0 %vm2204_vm1, %v2203_v15  ;;  %2026 = vmatpush3.bf16.msra.mxu0 %v2115_v45 }
 0xbe4   : > { %2027 = vmatprep.subr.bf16.mxu0 %v2203_v15 }
 0xbe7   : > { %2028 = vmatpush3.bf16.msra.mxu0 %v2116_v46 }
 0xbe8   : > { %2033 = vmatprep.subr.bf16.mxu0 %v2203_v15 }
 0xca2   : > { %v1346_v25 = vpop.f32.mrf.mxu0 }
 0xca3   : > { %v1347_v26 = vadd.f32 %v1876_v24, %v1346_v25 }
 0xca4   : > { %v2023_v27 = vpop.f32.mrf.mxu0 }
 0xca5   : > { %v2533_v28 = vadd.f32 %v1347_v26, %v2461_v51 }
 0xca6   : > { %v1349_v29 = vpop.f32.mrf.mxu0 }
 0xca7   : > { %v1350_v30 = vadd.f32 %v1876_v24, %v1349_v29  ;;  %v1359_v31 = vsel %vm579_vm0, %v2533_v28, 0.0 }
 0xca8   : > { %1360 = vadd.xlane.f32.xlu1 %v1359_v31  ;;  %v2024_v32 = vpop.f32.mrf.mxu0 }
 0xca9   : > { %v2538_v33 = vadd.f32 %v1350_v30, %v2466_v55 }
 0xcab   : > { %v1362_v34 = vsel %vm579_vm0, %v2538_v33, 0.0 }
 0xcac   : > { %1363 = vadd.xlane.f32.xlu0 %v1362_v34 }
 0xd31   : > { %v1361_v35 = vpop.xlane.xlu1 %1360 }
 0xd32   : > { %v1365_v36 = vmul.f32 0.03125, %v1361_v35 }
 0xd34   : > { %v1367_v37 = vsub.f32 %v2533_v28, %v1365_v36 }
 0xd35   : > { %v1364_v51 = vpop.xlane.xlu0 %1363 }
 0xd36   : > { %v1366_v38 = vmul.f32 0.03125, %v1364_v51  ;;  %v1369_v40 = vmul.f32 %v1367_v37, %v1367_v37 }
 0xd38   : > { %v1368_v41 = vsub.f32 %v2538_v33, %v1366_v38  ;;  %v1371_v42 = vsel %vm579_vm0, %v1369_v40, 0.0 }
 0xd39   : > { %1372 = vadd.xlane.f32.xlu0 %v1371_v42 }
 0xd3a   : > { %v1370_v43 = vmul.f32 %v1368_v41, %v1368_v41 }
 0xd3c   : > { %v1374_v55 = vsel %vm579_vm0, %v1370_v43, 0.0 }
 0xd3d   : > { %1375 = vadd.xlane.f32.xlu1 %v1374_v55 }
 0xdc2   : > { %v1373_v47 = vpop.xlane.xlu0 %1372 }
 0xdc3   : > { %v1377_v48 = vmul.f32 0.03125, %v1373_v47 }
 0xdc5   : > { %v1379_v0 = vadd.f32 1e-05, %v1377_v48 }
 0xdc6   : > { %v1376_v49 = vpop.xlane.xlu1 %1375 }
 0xdc7   : > { %2175 = vrsqrt.f32 %v1379_v0  ;;  %v1378_v50 = vmul.f32 0.03125, %v1376_v49 }
 0xdc9   : > { %v1380_v52 = vadd.f32 1e-05, %v1378_v50 }
 0xdcb   : > { %2177 = vrsqrt.f32 %v1380_v52 }
 0xdd4   : > { %v2176_v53 = vpop.eup %2175 }
 0xdd5   : > { %v1383_v1 = vmul.f32 %v2176_v53, %v1367_v37  ;;  %v1910_v37 = vld [vmem:[%s2644_s13 + $0x1] ss:$0 sm:$0xff] }
 0xdd7   : > { %v1391_v58 = vmul.f32 %v1882_v54, %v1383_v1 }
 0xdd8   : > { %v2178_v56 = vpop.eup %2177 }
 0xdd9   : > { %v1384_v57 = vmul.f32 %v2178_v56, %v1368_v41  ;;  %v1399_v60 = vadd.f32 %v1883_v59, %v1391_v58 }
 0xddb   : > { %v1392_v39 = vmul.f32 %v1882_v54, %v1384_v57  ;;  %v2126_v57 = vld [vmem:[%s2647_s16] sm:$0xff]  }
 0xddd   : > { %v1400_v61 = vadd.f32 %v1883_v59, %v1392_v39 }
 0xddf   : > { %v1401_v62 = vpack.c.bf16 %v1400_v61, %v1399_v60 }
 0xde1   : > { %2030 = vmatmul.mubr.msk.bf16.vlgmr.msra.gmra.mxu0 %vm579_vm0, %v1401_v62 }
 0xde2   : > { %2049 = vmatprep.mubr.msk.bf16.mxu0 %vm2204_vm1, %v2203_v15  ;;  %2034 = vmatpush3.bf16.msra.mxu0 %v2117_v63 }
 0xde3   : > { %2035 = vmatprep.subr.bf16.mxu0 %v2203_v15 }
 0xde6   : > { %2036 = vmatpush3.bf16.msra.mxu0 %v2118_v2 }
 0xde7   : > { %2037 = vmatprep.subr.bf16.mxu0 %v2203_v15 }
 0xdea   : > { %2038 = vmatpush3.bf16.msra.mxu0 %v2119_v44  ;;  %v1919_v44 = vld [vmem:[%s2645_s14] ss:$0 sm:$0xff] }
 0xdeb   : > { %2039 = vmatprep.subr.bf16.mxu0 %v2203_v15 }
 0xdee   : > { %2040 = vmatpush3.bf16.msra.mxu0 %v2120_v3 }
 0xdef   : > { %2041 = vmatprep.subr.bf16.mxu0 %v2203_v15 }
 0xdf2   : > { %2042 = vmatpush3.bf16.msra.mxu0 %v2121_v4 }
 0xdf3   : > { %2043 = vmatprep.subr.bf16.mxu0 %v2203_v15 }
 0xdf6   : > { %2044 = vmatpush3.bf16.msra.mxu0 %v2122_v5 }
 0xdf7   : > { %2045 = vmatprep.subr.bf16.mxu0 %v2203_v15 }
 0xdfa   : > { %2046 = vmatpush3.bf16.msra.mxu0 %v2123_v6 }
 0xdfb   : > { %2047 = vmatprep.subr.bf16.mxu0 %v2203_v15 }
 0xdfe   : > { %2048 = vmatpush3.bf16.msra.mxu0 %v2124_v7 }
 0xea1   : > { %v1464_v9 = vpop.f32.mrf.mxu0 }
 0xea2   : > { %v1465_v10 = vadd.f32 %v1889_v8, %v1464_v9 }
 0xea3   : > { %v2031_v11 = vpop.f32.mrf.mxu0 }
 0xea4   : > { %v1473_v12 = vmul.f32 0.044715, %v1465_v10  ;;  %v1471_v30 = vmul.f32 0.5, %v1465_v10 }
 0xea5   : > { %v1467_v13 = vpop.f32.mrf.mxu0 }
 0xea6   : > { %v1475_v14 = vmul.f32 %v1473_v12, %v1465_v10  ;;  %v1468_v16 = vadd.f32 %v1889_v8, %v1467_v13 }
 0xea7   : > { %v2032_v17 = vpop.f32.mrf.mxu0 }
 0xea8   : > { %v1477_v18 = vmul.f32 %v1475_v14, %v1465_v10  ;;  %v1474_v19 = vmul.f32 0.044715, %v1468_v16  ;;  %v1472_v31 = vmul.f32 0.5, %v1468_v16  ;;  %v1731_v17 = vld [vmem:[%s566_s19] sm:$0xff] }
 0xeaa   : > { %v1479_v20 = vadd.f32 %v1477_v18, %v1465_v10  ;;  %v1476_v21 = vmul.f32 %v1474_v19, %v1468_v16  ;;  %v2208_v10 = vmov 0  }
 0xeab   : > { %2096 = vset.pattern.permute.xlu1 %v2208_v10  ;;  %2095 = vset.pattern.permute.xlu0 %v2208_v10 }
 0xeac   : > { %v1481_v22 = vmul.f32 0.7978846, %v1479_v20  ;;  %v1478_v23 = vmul.f32 %v1476_v21, %v1468_v16 }
 0xeae   : > { %2179 = vtanh.f32 %v1481_v22  ;;  %v1480_v24 = vadd.f32 %v1478_v23, %v1468_v16  ;;  %v1732_v16 = vld [vmem:[%s566_s19 + $0x8] sm:$0xff] }
 0xeb0   : > { %v1482_v25 = vmul.f32 0.7978846, %v1480_v24  ;;  %v1733_v24 = vlaneseq }
 0xeb2   : > { %2181 = vtanh.f32 %v1482_v25  ;;  %v1734_v25 = vand.u32 127, %v1733_v24 }
 0xebb   : > { %v2180_v26 = vpop.eup %2179 }
 0xebc   : > { %v1485_v27 = vadd.f32 1.0, %v2180_v26 }
 0xebe   : > { %v1487_v34 = vmul.f32 %v1485_v27, %v1471_v30 }
 0xebf   : > { %v2182_v29 = vpop.eup %2181 }
 0xec0   : > { %v1486_v32 = vadd.f32 1.0, %v2182_v29 }
 0xec2   : > { %v1488_v35 = vmul.f32 %v1486_v32, %v1472_v31 }
 0xec4   : > { %v1489_v36 = vpack.c.bf16 %v1488_v35, %v1487_v34 }
 0xec6   : > { %2050 = vmatmul.mubr.bf16.vlgmr.msra.gmra.mxu0 %v1489_v36 }
 0xf86   : > { %v1597_v51 = vpop.f32.mrf.mxu0 }
 0xf87   : > { %v1598_v38 = vadd.f32 %v1910_v37, %v1597_v51 }
 0xf88   : > { %v2051_v40 = vpop.f32.mrf.mxu0 }
 0xf89   : > { %v1604_v41 = vadd.f32 %v1598_v38, %v2533_v28 }
 0xf8a   : > { %v1600_v42 = vpop.f32.mrf.mxu0 }
 0xf8b   : > { %v1601_v43 = vadd.f32 %v1910_v37, %v1600_v42  ;;  %v1608_v55 = vsel %vm579_vm0, %v1604_v41, 0.0 }
 0xf8c   : > { %1609 = vadd.xlane.f32.xlu0 %v1608_v55  ;;  %v2052_v45 = vpop.f32.mrf.mxu0 }
 0xf8d   : > { %v1605_v46 = vadd.f32 %v1601_v43, %v2538_v33  ;;  %v2125_v33 = vld [vmem:[%s2647_s16 + $0x8] sm:$0xff]  }
 0xf8e   : > { %2054 = vmatpush3.bf16.msra.mxu1 %v2125_v33 }
 0xf8f   : > { %v1611_v47 = vsel %vm579_vm0, %v1605_v46, 0.0  ;;  %2055 = vmatprep.subr.bf16.mxu1 %v2203_v15  ;;  %v1920_v15 = vld [vmem:[%s2646_s15] ss:$0 sm:$0xff] }
 0xf90   : > { %1612 = vadd.xlane.f32.xlu1 %v1611_v47 }
 0xf92   : > { %2056 = vmatpush3.bf16.msra.mxu1 %v2126_v57 }
0x1015   : > { %v1610_v48 = vpop.xlane.xlu0 %1609 }
0x1016   : > { %v1614_v0 = vmul.f32 0.03125, %v1610_v48 }
0x1018   : > { %v1616_v49 = vsub.f32 %v1604_v41, %v1614_v0 }
0x1019   : > { %v1613_v50 = vpop.xlane.xlu1 %1612 }
0x101a   : > { %v1615_v52 = vmul.f32 0.03125, %v1613_v50  ;;  %v1618_v53 = vmul.f32 %v1616_v49, %v1616_v49 }
0x101c   : > { %v1617_v1 = vsub.f32 %v1605_v46, %v1615_v52  ;;  %v1620_v28 = vsel %vm579_vm0, %v1618_v53, 0.0 }
0x101d   : > { %1621 = vadd.xlane.f32.xlu0 %v1620_v28 }
0x101e   : > { %v1619_v54 = vmul.f32 %v1617_v1, %v1617_v1 }
0x1020   : > { %v1623_v56 = vsel %vm579_vm0, %v1619_v54, 0.0 }
0x1021   : > { %1624 = vadd.xlane.f32.xlu1 %v1623_v56 }
0x10a6   : > { %v1622_v58 = vpop.xlane.xlu0 %1621 }
0x10a7   : > { %v1626_v59 = vmul.f32 0.03125, %v1622_v58 }
0x10a9   : > { %v1628_v39 = vadd.f32 1e-05, %v1626_v59 }
0x10aa   : > { %v1625_v60 = vpop.xlane.xlu1 %1624 }
0x10ab   : > { %2183 = vrsqrt.f32 %v1628_v39  ;;  %v1627_v61 = vmul.f32 0.03125, %v1625_v60 }
0x10ad   : > { %v1629_v62 = vadd.f32 1e-05, %v1627_v61 }
0x10af   : > { %2185 = vrsqrt.f32 %v1629_v62 }
0x10b8   : > { %v2184_v63 = vpop.eup %2183 }
0x10b9   : > { %v1632_v2 = vmul.f32 %v2184_v63, %v1616_v49 }
0x10bb   : > { %v1640_v5 = vmul.f32 %v1919_v44, %v1632_v2 }
0x10bc   : > { %v2186_v3 = vpop.eup %2185 }
0x10bd   : > { %v1633_v4 = vmul.f32 %v2186_v3, %v1617_v1  ;;  %v1648_v7 = vadd.f32 %v1920_v15, %v1640_v5 }
0x10bf   : > { %v1641_v6 = vmul.f32 %v1919_v44, %v1633_v4 }
0x10c1   : > { %v1649_v8 = vadd.f32 %v1920_v15, %v1641_v6 }
0x10c3   : > { %v1650_v9 = vpack.c.bf16 %v1649_v8, %v1648_v7 }
0x10c5   : > { %2058 = vmatmul.mubr.msk.bf16.vlgmr.msra.gmra.mxu1 %vm579_vm0, %v1650_v9 }
0x1185   : > { %v1704_v11 = vpop.f32.mrf.mxu1 }
0x1186   : > { %1711 = vmax.xlane.f32.xlu0 %v1704_v11 }
0x1187   : > { %v2059_v12 = vpop.f32.mrf.mxu1 }
0x1189   : > { %v1707_v13 = vpop.f32.mrf.mxu1 }
0x118a   : > { %1713 = vmax.xlane.f32.xlu1 %v1707_v13 }
0x118b   : > { %v2060_v14 = vpop.f32.mrf.mxu1 }
0x119b   : > { %1739 = vperm.xlu1 %2096, %v1732_v16  }
0x119c   : > { %1736 = vperm.xlu0 %2095, %v1731_v17  }
0x120f   : > { %v1712_v18 = vpop.xlane.xlu0 %1711 }
0x1210   : > { %v1715_v19 = vsub.f32 %v1704_v11, %v1712_v18 }
0x1212   : > { %v1717_v20 = vmul.f32 1.442695, %v1715_v19 }
0x1213   : > { %v1714_v21 = vpop.xlane.xlu1 %1713 }
0x1214   : > { %2187 = vpow2.f32 %v1717_v20  ;;  %v1716_v22 = vsub.f32 %v1707_v13, %v1714_v21 }
0x1216   : > { %v1719_v23 = vmul.f32 1.442695, %v1716_v22 }
0x1217   : > { %v1737_v26 = vpop.permute.xlu0 %1736  ;;  %v1740_v29 = vpop.permute.xlu1 %1739 }
0x1218   : > { %2189 = vpow2.f32 %v1719_v23  ;;  %vm1741_vm3 = vcmp.eq.s32.totalorder %v1734_v25, %v1737_v26  ;;  %vm1742_vm4 = vcmp.eq.s32.totalorder %v1734_v25, %v1740_v29 }
0x1219   : > { %v1743_v31 = vsel %vm1741_vm3, %v1704_v11, 0.0  ;;  %v1744_v32 = vsel %vm1742_vm4, %v1707_v13, 0.0 }
0x1221   : > { %v2188_v27 = vpop.eup %2187 }
0x1222   : > { %1721 = vadd.xlane.f32.xlu1 %v2188_v27 }
0x1225   : > { %v2190_v30 = vpop.eup %2189 }
0x1226   : > { %1745 = vadd.xlane.f32.xlu1 %v1743_v31  ;;  %1723 = vadd.xlane.f32.xlu0 %v2190_v30 }
0x122a   : > { %1747 = vadd.xlane.f32.xlu1 %v1744_v32 }
0x12ab   : > { %v1722_v34 = vpop.xlane.xlu1 %1721 }
0x12ac   : > { %2191 = vlog2.f32 %v1722_v34 }
0x12af   : > { %v1724_v35 = vpop.xlane.xlu0 %1723  ;;  %v1746_v51 = vpop.xlane.xlu1 %1745 }
0x12b0   : > { %2193 = vlog2.f32 %v1724_v35 }
0x12b3   : > { %v1748_v55 = vpop.xlane.xlu1 %1747 }
0x12b9   : > { %v2192_v36 = vpop.eup %2191 }
0x12ba   : > { %v1726_v37 = vmul.f32 0.6931472, %v2192_v36 }
0x12bc   : > { %v1729_v38 = vadd.f32 %v1726_v37, %v1712_v18 }
0x12bd   : > { %v2194_v40 = vpop.eup %2193 }
0x12be   : > { %v1728_v41 = vmul.f32 0.6931472, %v2194_v40  ;;  %v1749_v42 = vsub.f32 %v1746_v51, %v1729_v38 }
0x12c0   : > { %1752 = vst.msk [vmem:[%s572_s30] sm:$0xff] %vm1751_vm5, %v1749_v42  ;;  %v1730_v43 = vadd.f32 %v1728_v41, %v1714_v21 }
0x12c2   : > { %v1750_v45 = vsub.f32 %v1748_v55, %v1730_v43 }
0x12c4   : > { %1753 = vst.msk [vmem:[%s572_s30 + $0x8] sm:$0xff] %vm1751_vm5, %v1750_v45 }
0x12c5 PF: > { %s27_s24 = sadd.s32 1, %s2201_s24  }
0x12c6   : > { %p24_p4 = scmp.ge.s32.totalorder %s27_s24, 5  }
0x12c8   :  { %26 = sbr.rel (!%p24_p4) target bundleno = 3 (0x3), region = 133 }

// kernel: forward.8
= control target key start
LH: loop header
LB: loop body
LE: loop exit
PB: predicated region body
PF: predicated region fallthrough
CT: control target
= control target key end

     0   :  { %v171_v2 = vmov 0   ;;  %v83_v32 = vlaneseq  ;;  %vm133_vm6 = vcmask 7168   ;;  %s301_s0 = inlined_call_operand.vmem [shape: f32[48,128], index: 0, kind: input, shape index: {}]   ;;  %s302_s1 = inlined_call_operand.vmem [shape: s32[48,1], index: 1, kind: input, shape index: {}]   ;;  %s303_s2 = inlined_call_operand.vmem [shape: f32[48,1], index: 2, kind: output, shape index: {}]  }
   0x1   :  { %v190_v0 = vld [vmem:[%s301_s0] sm:$0xff]  ;;  %v195_v1 = vld [vmem:[%s301_s0 + $0x10] sm:$0xff]  ;;  %146 = vset.pattern.permute.xlu1 %v171_v2  ;;  %145 = vset.pattern.permute.xlu0 %v171_v2  ;;  %v202_v3 = vld [vmem:[%s301_s0 + $0x8] sm:$0xff] }
   0x2   :  { %23 = vmax.xlane.f32.xlu0 %v190_v0  ;;  %27 = vmax.xlane.f32.xlu1 %v195_v1  ;;  %v207_v4 = vld [vmem:[%s301_s0 + $0x18] sm:$0xff]  ;;  %v214_v5 = vld [vmem:[%s301_s0 + $0x20] sm:$0xff]  ;;  %v219_v6 = vld [vmem:[%s301_s0 + $0x28] sm:$0xff]  ;;  %v84_v36 = vand.u32 127, %v83_v32 }
   0x3   :  { %v18_v7 = vld [vmem:[%s302_s1 + $0x8] sm:$0xff]  ;;  %v19_v8 = vld [vmem:[%s302_s1 + $0x10] sm:$0xff]  ;;  %v17_v9 = vld [vmem:[%s302_s1] sm:$0xff] }
   0x4   :  { %v20_v10 = vld [vmem:[%s302_s1 + $0x18] sm:$0xff]  ;;  %v21_v11 = vld [vmem:[%s302_s1 + $0x20] sm:$0xff]  ;;  %v22_v12 = vld [vmem:[%s302_s1 + $0x28] sm:$0xff] }
   0x6   :  { %25 = vmax.xlane.f32.xlu0 %v202_v3  ;;  %29 = vmax.xlane.f32.xlu1 %v207_v4 }
   0xa   :  { %31 = vmax.xlane.f32.xlu0 %v214_v5  ;;  %33 = vmax.xlane.f32.xlu1 %v219_v6 }
  0x1b   :  { %89 = vperm.xlu1 %146, %v18_v7  }
  0x1f   :  { %92 = vperm.xlu1 %146, %v19_v8  }
  0x20   :  { %86 = vperm.xlu0 %145, %v17_v9  }
  0x23   :  { %95 = vperm.xlu1 %146, %v20_v10  }
  0x27   :  { %98 = vperm.xlu1 %146, %v21_v11  }
  0x2b   :  { %101 = vperm.xlu1 %146, %v22_v12  }
  0x8b   :  { %v241_v13 = vpop.xlane.xlu0 %23  ;;  %v243_v14 = vpop.xlane.xlu1 %27 }
  0x8c   :  { %v35_v15 = vsub.f32 %v190_v0, %v241_v13  ;;  %v37_v16 = vsub.f32 %v195_v1, %v243_v14 }
  0x8e   :  { %v41_v17 = vmul.f32 1.442695, %v35_v15  ;;  %v45_v18 = vmul.f32 1.442695, %v37_v16 }
  0x8f   :  { %v249_v19 = vpop.xlane.xlu0 %25  ;;  %v251_v20 = vpop.xlane.xlu1 %29 }
  0x90   :  { %147 = vpow2.f32 %v41_v17  ;;  %v36_v21 = vsub.f32 %v202_v3, %v249_v19  ;;  %v38_v22 = vsub.f32 %v207_v4, %v251_v20 }
  0x91   :  { %149 = vpow2.f32 %v45_v18 }
  0x92   :  { %v43_v23 = vmul.f32 1.442695, %v36_v21  ;;  %v47_v24 = vmul.f32 1.442695, %v38_v22 }
  0x93   :  { %v257_v25 = vpop.xlane.xlu0 %31  ;;  %v259_v26 = vpop.xlane.xlu1 %33 }
  0x94   :  { %151 = vpow2.f32 %v43_v23  ;;  %v39_v27 = vsub.f32 %v214_v5, %v257_v25  ;;  %v40_v28 = vsub.f32 %v219_v6, %v259_v26 }
  0x95   :  { %153 = vpow2.f32 %v47_v24 }
  0x96   :  { %v49_v29 = vmul.f32 1.442695, %v39_v27  ;;  %v51_v30 = vmul.f32 1.442695, %v40_v28 }
  0x97   :  { %v90_v31 = vpop.permute.xlu1 %89 }
  0x98   :  { %155 = vpow2.f32 %v49_v29  ;;  %vm104_vm1 = vcmp.eq.s32.totalorder %v84_v36, %v90_v31 }
  0x99   :  { %157 = vpow2.f32 %v51_v30  ;;  %v110_v45 = vsel %vm104_vm1, %v202_v3, 0.0 }
  0x9b   :  { %v93_v34 = vpop.permute.xlu1 %92  ;;  %v87_v38 = vpop.permute.xlu0 %86 }
  0x9c   :  { %vm103_vm0 = vcmp.eq.s32.totalorder %v84_v36, %v87_v38  ;;  %vm105_vm2 = vcmp.eq.s32.totalorder %v84_v36, %v93_v34 }
  0x9d   :  { %v148_v33 = vpop.eup %147  ;;  %v109_v43 = vsel %vm103_vm0, %v190_v0, 0.0  ;;  %v111_v46 = vsel %vm105_vm2, %v195_v1, 0.0 }
  0x9e   :  { %53 = vadd.xlane.f32.xlu1 %v148_v33  ;;  %v150_v35 = vpop.eup %149 }
  0x9f   :  { %v96_v40 = vpop.permute.xlu1 %95 }
  0xa0   :  { %vm106_vm3 = vcmp.eq.s32.totalorder %v84_v36, %v96_v40 }
  0xa1   :  { %v152_v37 = vpop.eup %151  ;;  %v112_v48 = vsel %vm106_vm3, %v207_v4, 0.0 }
  0xa2   :  { %57 = vadd.xlane.f32.xlu1 %v150_v35  ;;  %55 = vadd.xlane.f32.xlu0 %v152_v37  ;;  %v154_v39 = vpop.eup %153 }
  0xa3   :  { %v99_v44 = vpop.permute.xlu1 %98 }
  0xa4   :  { %vm107_vm4 = vcmp.eq.s32.totalorder %v84_v36, %v99_v44 }
  0xa5   :  { %v156_v41 = vpop.eup %155  ;;  %v113_v49 = vsel %vm107_vm4, %v214_v5, 0.0 }
  0xa6   :  { %59 = vadd.xlane.f32.xlu1 %v154_v39  ;;  %61 = vadd.xlane.f32.xlu0 %v156_v41  ;;  %v158_v42 = vpop.eup %157 }
  0xa7   :  { %v102_v47 = vpop.permute.xlu1 %101 }
  0xa8   :  { %vm108_vm5 = vcmp.eq.s32.totalorder %v84_v36, %v102_v47 }
  0xa9   :  { %v114_v50 = vsel %vm108_vm5, %v219_v6, 0.0 }
  0xaa   :  { %63 = vadd.xlane.f32.xlu1 %v158_v42  ;;  %115 = vadd.xlane.f32.xlu0 %v109_v43 }
  0xae   :  { %117 = vadd.xlane.f32.xlu1 %v110_v45  ;;  %119 = vadd.xlane.f32.xlu0 %v111_v46 }
  0xb2   :  { %121 = vadd.xlane.f32.xlu1 %v112_v48  ;;  %123 = vadd.xlane.f32.xlu0 %v113_v49 }
  0xb6   :  { %125 = vadd.xlane.f32.xlu1 %v114_v50 }
 0x127   :  { %v54_v51 = vpop.xlane.xlu1 %53 }
 0x128   :  { %159 = vlog2.f32 %v54_v51 }
 0x12b   :  { %v58_v52 = vpop.xlane.xlu1 %57  ;;  %v56_v53 = vpop.xlane.xlu0 %55 }
 0x12c   :  { %161 = vlog2.f32 %v58_v52 }
 0x12d   :  { %163 = vlog2.f32 %v56_v53 }
 0x12f   :  { %v60_v54 = vpop.xlane.xlu1 %59  ;;  %v62_v55 = vpop.xlane.xlu0 %61 }
 0x130   :  { %165 = vlog2.f32 %v60_v54 }
 0x131   :  { %167 = vlog2.f32 %v62_v55 }
 0x133   :  { %v64_v56 = vpop.xlane.xlu1 %63  ;;  %v116_v59 = vpop.xlane.xlu0 %115 }
 0x134   :  { %169 = vlog2.f32 %v64_v56 }
 0x135   :  { %v160_v57 = vpop.eup %159 }
 0x136   :  { %v66_v58 = vmul.f32 0.6931472, %v160_v57 }
 0x137   :  { %v118_v62 = vpop.xlane.xlu1 %117  ;;  %v120_v4 = vpop.xlane.xlu0 %119 }
 0x138   :  { %v77_v60 = vadd.f32 %v66_v58, %v241_v13 }
 0x139   :  { %v162_v61 = vpop.eup %161 }
 0x13a   :  { %v164_v63 = vpop.eup %163  ;;  %v70_v0 = vmul.f32 0.6931472, %v162_v61  ;;  %v127_v1 = vsub.f32 %v116_v59, %v77_v60 }
 0x13b   :  { %v68_v2 = vmul.f32 0.6931472, %v164_v63  ;;  %v122_v12 = vpop.xlane.xlu1 %121  ;;  %v124_v18 = vpop.xlane.xlu0 %123 }
 0x13c   :  { %134 = vst.msk [vmem:[%s303_s2] sm:$0xff] %vm133_vm6, %v127_v1  ;;  %v79_v3 = vadd.f32 %v70_v0, %v243_v14 }
 0x13d   :  { %v166_v5 = vpop.eup %165  ;;  %v78_v6 = vadd.f32 %v68_v2, %v249_v19 }
 0x13e   :  { %v168_v7 = vpop.eup %167  ;;  %v72_v8 = vmul.f32 0.6931472, %v166_v5  ;;  %v129_v9 = vsub.f32 %v120_v4, %v79_v3 }
 0x13f   :  { %v74_v10 = vmul.f32 0.6931472, %v168_v7  ;;  %v128_v11 = vsub.f32 %v118_v62, %v78_v6 }
 0x140   :  { %136 = vst.msk [vmem:[%s303_s2 + $0x10] sm:$0xff] %vm133_vm6, %v129_v9  ;;  %v80_v13 = vadd.f32 %v72_v8, %v251_v20  ;;  %v126_v20 = vpop.xlane.xlu1 %125 }
 0x141   :  { %v170_v15 = vpop.eup %169  ;;  %135 = vst.msk [vmem:[%s303_s2 + $0x8] sm:$0xff] %vm133_vm6, %v128_v11  ;;  %v81_v14 = vadd.f32 %v74_v10, %v257_v25 }
 0x142   :  { %v76_v16 = vmul.f32 0.6931472, %v170_v15  ;;  %v130_v17 = vsub.f32 %v122_v12, %v80_v13 }
 0x143   :  { %v131_v19 = vsub.f32 %v124_v18, %v81_v14 }
 0x144   :  { %137 = vst.msk [vmem:[%s303_s2 + $0x18] sm:$0xff] %vm133_vm6, %v130_v17  ;;  %v82_v21 = vadd.f32 %v76_v16, %v259_v26 }
 0x145   :  { %138 = vst.msk [vmem:[%s303_s2 + $0x20] sm:$0xff] %vm133_vm6, %v131_v19 }
 0x146   :  { %v132_v22 = vsub.f32 %v126_v20, %v82_v21 }
 0x148   :  { %139 = vst.msk [vmem:[%s303_s2 + $0x28] sm:$0xff] %vm133_vm6, %v132_v22 }

</bundles_post_ra>
